<compile_context>
chip_gen: v6e
topology: v6e:2x2x1
jax: 0.10.0
libtpu: 0.0.40
codegen_flags: <defaults>
</compile_context>

<pallas_src>
import functools

import numpy as np

import jax
import jax.numpy as jnp
from jax import lax
from jax.experimental import pallas as pl
from jax.experimental.pallas import tpu as pltpu

KSIZE = 5
PAD = 1


# ------------------------------ static configs ------------------------------ #

def _stage_configs(channels, in_size=32):
    """Static shape/tiling config for the three conv+pool stages (square inputs)."""
    def cfg(w_in, cin, cout, kp_in):
        oh = w_in + 2 * PAD - KSIZE + 1            # conv output size (stride 1)
        ohp = oh // 2                              # pooled size (floor mode)
        half = ohp * cout                          # valid lanes of one W-parity block
        half_p = ((half + 127) // 128) * 128       # parity block padded to lane multiple
        return dict(W_in=w_in, Cin=cin, Cout=cout,
                    Hp=w_in + 2 * PAD,             # rows incl. top/bottom zero padding
                    K=w_in * cin,                  # valid input lanes
                    Kp=kp_in,                      # stored (lane-dense) input lanes
                    OHe=2 * ohp,                   # conv rows actually needed by the pool
                    OHp=ohp, half=half, half_p=half_p, Ncols=2 * half_p)
    kp1 = ((in_size * channels + 127) // 128) * 128
    c1 = cfg(in_size, channels, 16, kp1)               # 32 -> 30 -> 15
    c2 = cfg(c1["OHp"], c1["Cout"], 32, c1["half_p"])  # 15 -> 13 -> 6 (floor pool)
    c3 = cfg(c2["OHp"], c2["Cout"], 64, c2["half_p"])  # 6  -> 4  -> 2
    return c1, c2, c3


# ------------------------------ fused Pallas kernel ------------------------------ #

def _detector_kernel(x_ref, band1_ref, bias1_ref, band2_ref, bias2_ref,
                     band3_ref, bias3_ref, w1_ref, b1_ref, w2_ref, b2_ref,
                     o_ref, *, cfg1, cfg2, cfg3, TB):
    """TB images: conv1+pool -> conv2+pool -> conv3+pool -> MLP -> sigmoid."""

    def conv_relu_pool(x_bf16, band_ref, bias_ref, cfg):
        OHe, OHp, half_p, Kp = cfg["OHe"], cfg["OHp"], cfg["half_p"], cfg["Kp"]
        # H-only im2col: concatenate the 5 kh row-slabs along lanes so the whole
        # stage is ONE MXU matmul with K = 5*Kp (every piece a 128-multiple).
        lhs = jnp.concatenate(
            [x_bf16[:, kh:kh + OHe, :] for kh in range(KSIZE)], axis=-1)
        lhs = lhs.reshape(TB * OHe, KSIZE * Kp)
        acc = jnp.dot(lhs, band_ref[...], preferred_element_type=jnp.float32)
        acc = jnp.maximum(acc + bias_ref[...], 0.0)             # bias + ReLU (f32)
        # W-pool: even-ow / odd-ow column blocks are aligned 128-lane halves.
        hmax = jnp.maximum(acc[:, :half_p], acc[:, half_p:])    # (TB*OHe, half_p)
        # H-pool: vectorized row-pair max (no per-row stores).
        pooled = hmax.reshape(TB, OHp, 2, half_p).max(axis=2)   # (TB, OHp, half_p)
        return pooled                                           # f32, pad lanes == 0

    x = x_ref[...]                                              # bf16 (TB, Hp1, Kp1)
    p1 = conv_relu_pool(x, band1_ref, bias1_ref, cfg1)          # (TB, 15, 256)
    z1 = jnp.zeros((TB, 1, cfg1["half_p"]), jnp.bfloat16)
    a1 = jnp.concatenate([z1, p1.astype(jnp.bfloat16), z1], axis=1)   # (TB, 17, 256)

    p2 = conv_relu_pool(a1, band2_ref, bias2_ref, cfg2)         # (TB, 6, 256)
    z2 = jnp.zeros((TB, 1, cfg2["half_p"]), jnp.bfloat16)
    a2 = jnp.concatenate([z2, p2.astype(jnp.bfloat16), z2], axis=1)   # (TB, 8, 256)

    p3 = conv_relu_pool(a2, band3_ref, bias3_ref, cfg3)         # (TB, 2, 128)
    # Flatten in fed order (oh-major, then ow, then co) -> one (TB, 256) MLP slab.
    feat = jnp.concatenate([p3[:, 0, :], p3[:, 1, :]], axis=-1).astype(jnp.bfloat16)

    h = jnp.dot(feat, w1_ref[...], preferred_element_type=jnp.float32) + b1_ref[...]
    h = jnp.maximum(h, 0.0).astype(jnp.bfloat16)                # ReLU, (TB, 256)
    logits = (jnp.dot(h, w2_ref[...], preferred_element_type=jnp.float32)
              + b2_ref[...])                                    # (TB, 2) f32
    probs = 1.0 / (1.0 + jnp.exp(-logits))                      # sigmoid
    o_ref[...] = probs.reshape(TB, 1, probs.shape[-1])          # single block store


# ------------------------------- pallas_call wrapper ------------------------------- #

def _detector_call(prepared, x_rows, cfgs, TB):
    cfg1, cfg2, cfg3 = cfgs
    B = x_rows.shape[0]
    assert B % TB == 0, (B, TB)
    n_out = prepared["b2"].shape[1]

    def wspec(arr):  # constant (weight/bias) block: same block every grid step
        return pl.BlockSpec(tuple(arr.shape), lambda i: (0, 0))

    kernel = functools.partial(_detector_kernel, cfg1=cfg1, cfg2=cfg2, cfg3=cfg3, TB=TB)
    out = pl.pallas_call(
        kernel,
        out_shape=jax.ShapeDtypeStruct((B, 1, n_out), jnp.float32),
        grid=(B // TB,),
        in_specs=[
            pl.BlockSpec((TB, cfg1["Hp"], cfg1["Kp"]), lambda i: (i, 0, 0)),
            wspec(prepared["band1"]), wspec(prepared["bias1"]),
            wspec(prepared["band2"]), wspec(prepared["bias2"]),
            wspec(prepared["band3"]), wspec(prepared["bias3"]),
            wspec(prepared["w1"]), wspec(prepared["b1"]),
            wspec(prepared["w2"]), wspec(prepared["b2"]),
        ],
        out_specs=pl.BlockSpec((TB, 1, n_out), lambda i: (i, 0, 0)),
        compiler_params=pltpu.CompilerParams(
            dimension_semantics=("parallel",),     # batch blocks -> both TCs on v7x
            vmem_limit_bytes=32 * 1024 * 1024),    # ~7 MiB used; safe on v5e/v6e/v7x
    )(x_rows, prepared["band1"], prepared["bias1"],
      prepared["band2"], prepared["bias2"],
      prepared["band3"], prepared["bias3"],
      prepared["w1"], prepared["b1"], prepared["w2"], prepared["b2"])
    return out.reshape(B, n_out)


def make_forward(cfgs, TB):
    cfg1 = cfgs[0]

    @jax.jit
    def forward(prepared, x_nchw):
        B, C, H, W = x_nchw.shape
        # NCHW -> rows = H (plus top/bottom conv zero-pad rows), lanes = (w, c)
        # zero-padded to a 128 multiple; W conv padding is folded into the weights.
        x = jnp.transpose(x_nchw, (0, 2, 3, 1)).reshape(B, H, W * C)
        x = jnp.pad(x, ((0, 0), (PAD, PAD), (0, cfg1["Kp"] - W * C)))
        return _detector_call(prepared, x.astype(jnp.bfloat16), cfgs, TB)

    return forward


# --------------------------- host-side weight prep --------------------------- #

def _band_weights(w_oihw, b, cfg):
    """Banded conv weights (KSIZE*Kp, Ncols) for the single-matmul row-slab conv.

    band[kh*Kp + iw*Cin + ci, p*half_p + owp*Cout + co] = W[co, ci, kh, kw] with
    ow = 2*owp + p and iw = ow + kw - PAD (out-of-range iw = zero padding, dropped).
    Bias is tiled per valid column; pad columns keep zero weight+bias so pad lanes
    remain exactly 0 after ReLU."""
    Cin, Cout, W_in, Kp = cfg["Cin"], cfg["Cout"], cfg["W_in"], cfg["Kp"]
    w = np.asarray(w_oihw, np.float32)
    b_np = np.asarray(b, np.float32)
    band = np.zeros((KSIZE, Kp, cfg["Ncols"]), np.float32)
    bias = np.zeros((1, cfg["Ncols"]), np.float32)
    for ow in range(cfg["OHe"]):                  # square stages: OWe == OHe
        p, owp = ow % 2, ow // 2
        c0 = p * cfg["half_p"] + owp * Cout
        bias[0, c0:c0 + Cout] = b_np
        for kh in range(KSIZE):
            for kw in range(KSIZE):
                iw = ow + kw - PAD
                if 0 <= iw < W_in:
                    band[kh, iw * Cin:(iw + 1) * Cin, c0:c0 + Cout] = w[:, :, kh, kw].T
    band = band.reshape(KSIZE * Kp, cfg["Ncols"])  # matches lane-concat of kh slabs
    return jnp.asarray(band, jnp.bfloat16), jnp.asarray(bias, jnp.float32)


def prepare_params(params, cfgs):
    """One-time repacking of PyTorch-layout weights into the kernel layout."""
    cfg1, cfg2, cfg3 = cfgs
    band1, bias1 = _band_weights(params["cl1_w"], params["cl1_b"], cfg1)
    band2, bias2 = _band_weights(params["cl2_w"], params["cl2_b"], cfg2)
    band3, bias3 = _band_weights(params["cl3_w"], params["cl3_b"], cfg3)

    cout, ohp = cfg3["Cout"], cfg3["OHp"]
    assert ohp == 2 and cfg3["half"] == cfg3["half_p"] == 128
    n_feat = cout * ohp * ohp                                   # 256
    w1 = np.asarray(params["ll1_w"], np.float32)                # (256, 256) torch [out,in]
    perm = np.empty(n_feat, np.int64)
    for oh in range(ohp):                                       # fed order oh,ow,co
        for ow in range(ohp):
            for co in range(cout):
                perm[oh * ohp * cout + ow * cout + co] = co * ohp * ohp + oh * ohp + ow
    w1_k = jnp.asarray(w1[:, perm].T, jnp.bfloat16)             # (in fed-order, out)
    b1 = jnp.asarray(np.asarray(params["ll1_b"], np.float32)[None, :], jnp.float32)
    w2 = jnp.asarray(np.asarray(params["ll2_w"], np.float32).T, jnp.bfloat16)
    b2 = jnp.asarray(np.asarray(params["ll2_b"], np.float32)[None, :], jnp.float32)
    return dict(band1=band1, bias1=bias1, band2=band2, bias2=bias2,
                band3=band3, bias3=bias3, w1=w1_k, b1=b1, w2=w2, b2=b2)


# ------------------------------ reference & init ------------------------------ #

def detector_reference(params, x):
    """Plain-JAX (XLA) reference mirroring the PyTorch forward pass."""
    def conv_relu(x, w, b):
        y = lax.conv_general_dilated(x, w, window_strides=(1, 1),
                                     padding=((PAD, PAD), (PAD, PAD)),
                                     dimension_numbers=("NCHW", "OIHW", "NCHW"))
        return jnp.maximum(y + b[None, :, None, None], 0.0)

    def pool(x):
        B, C, H, W = x.shape
        x = x[:, :, : H // 2 * 2, : W // 2 * 2]
        return x.reshape(B, C, H // 2, 2, W // 2, 2).max(axis=(3, 5))

    out = pool(conv_relu(x, params["cl1_w"], params["cl1_b"]))
    out = pool(conv_relu(out, params["cl2_w"], params["cl2_b"]))
    out = pool(conv_relu(out, params["cl3_w"], params["cl3_b"]))
    out = out.reshape(out.shape[0], -1)                         # (C,H,W) flatten
    out = jnp.maximum(out @ params["ll1_w"].T + params["ll1_b"], 0.0)
    out = out @ params["ll2_w"].T + params["ll2_b"]
    return 1.0 / (1.0 + jnp.exp(-out))


def init_params(key, channels):
    """Synthetic PyTorch-layout parameters: conv (O,I,kh,kw), linear (out,in)."""
    def uni(k, shape, fan_in):
        bound = 1.0 / float(fan_in) ** 0.5
        return jax.random.uniform(k, shape, jnp.float32, -bound, bound)

    ks = jax.random.split(key, 10)
    return {
        "cl1_w": uni(ks[0], (16, channels, 5, 5), channels * 25),
        "cl1_b": uni(ks[1], (16,), channels * 25),
        "cl2_w": uni(ks[2], (32, 16, 5, 5), 16 * 25),
        "cl2_b": uni(ks[3], (32,), 16 * 25),
        "cl3_w": uni(ks[4], (64, 32, 5, 5), 32 * 25),
        "cl3_b": uni(ks[5], (64,), 32 * 25),
        "ll1_w": uni(ks[6], (256, 256), 256),
        "ll1_b": uni(ks[7], (256,), 256),
        "ll2_w": uni(ks[8], (2, 256), 256),
        "ll2_b": uni(ks[9], (2,), 256),
    }


# ---------------------------------- main -------------------------------------- #

if __name__ == "__main__":
    key = jax.random.PRNGKey(0)
    pkey, xkey = jax.random.split(key)

    channels, batch, tb = 4, 8, 4                   # grid=(2,) keeps both v7x TCs busy
    params = init_params(pkey, channels)
    # Forward implies 32x32 spatial input (-> 64*2*2 after three conv+pool stages).
    x = jax.random.normal(xkey, (batch, channels, 32, 32), jnp.float32)

    cfgs = _stage_configs(channels)
    prepared = prepare_params(params, cfgs)
    forward = make_forward(cfgs, tb)

    out = forward(prepared, x)
    jax.block_until_ready(out)

    assert out.shape == (batch, 2), out.shape
    assert bool(jnp.all((out >= 0.0) & (out <= 1.0)))           # sigmoid range
    ref = detector_reference(params, x)
    assert bool(jnp.allclose(out, ref, atol=5e-2, rtol=0.0)), (out, ref)
    print("KERNEL_OK")
</pallas_src>

<mosaic_0001>
module attributes {stable_mosaic.version = 11 : i64} {
  func.func @_detector_kernel(%arg0: i32, %arg1: memref<4x34x128xbf16, #tpu.memory_space<vmem>>, %arg2: memref<640x512xbf16, #tpu.memory_space<vmem>>, %arg3: memref<1x512xf32, #tpu.memory_space<vmem>>, %arg4: memref<1280x512xbf16, #tpu.memory_space<vmem>>, %arg5: memref<1x512xf32, #tpu.memory_space<vmem>>, %arg6: memref<1280x256xbf16, #tpu.memory_space<vmem>>, %arg7: memref<1x256xf32, #tpu.memory_space<vmem>>, %arg8: memref<256x256xbf16, #tpu.memory_space<vmem>>, %arg9: memref<1x256xf32, #tpu.memory_space<vmem>>, %arg10: memref<256x2xbf16, #tpu.memory_space<vmem>>, %arg11: memref<1x2xf32, #tpu.memory_space<vmem>>, %arg12: memref<4x1x2xf32, #tpu.memory_space<vmem>>) attributes {dimension_semantics = [#tpu.dimension_semantics<parallel>], iteration_bounds = array<i64: 2>, scalar_prefetch = 0 : i64, scratch_operands = 0 : i64, tpu.core_type = #tpu.core_type<tc>, window_params = [{transform_indices = @transform_0, window_bounds = array<i64: 4, 34, 128>}, {pipeline_mode = #tpu.pipeline_mode<synchronous>, transform_indices = @transform_1, window_bounds = array<i64: 640, 512>}, {pipeline_mode = #tpu.pipeline_mode<synchronous>, transform_indices = @transform_2, window_bounds = array<i64: 1, 512>}, {pipeline_mode = #tpu.pipeline_mode<synchronous>, transform_indices = @transform_3, window_bounds = array<i64: 1280, 512>}, {pipeline_mode = #tpu.pipeline_mode<synchronous>, transform_indices = @transform_4, window_bounds = array<i64: 1, 512>}, {pipeline_mode = #tpu.pipeline_mode<synchronous>, transform_indices = @transform_5, window_bounds = array<i64: 1280, 256>}, {pipeline_mode = #tpu.pipeline_mode<synchronous>, transform_indices = @transform_6, window_bounds = array<i64: 1, 256>}, {pipeline_mode = #tpu.pipeline_mode<synchronous>, transform_indices = @transform_7, window_bounds = array<i64: 256, 256>}, {pipeline_mode = #tpu.pipeline_mode<synchronous>, transform_indices = @transform_8, window_bounds = array<i64: 1, 256>}, {pipeline_mode = #tpu.pipeline_mode<synchronous>, transform_indices = @transform_9, window_bounds = array<i64: 256, 2>}, {pipeline_mode = #tpu.pipeline_mode<synchronous>, transform_indices = @transform_10, window_bounds = array<i64: 1, 2>}, {transform_indices = @transform_11, window_bounds = array<i64: 4, 1, 2>}]} {
    %c0 = arith.constant 0 : index
    %c0_0 = arith.constant 0 : index
    %c0_1 = arith.constant 0 : index
    %0 = vector.load %arg1[%c0, %c0_0, %c0_1] : memref<4x34x128xbf16, #tpu.memory_space<vmem>>, vector<4x34x128xbf16>
    %1 = vector.extract_strided_slice %0 {offsets = [0, 0, 0], sizes = [4, 30, 128], strides = [1, 1, 1]} : vector<4x34x128xbf16> to vector<4x30x128xbf16>
    %2 = vector.extract_strided_slice %0 {offsets = [0, 1, 0], sizes = [4, 30, 128], strides = [1, 1, 1]} : vector<4x34x128xbf16> to vector<4x30x128xbf16>
    %3 = vector.extract_strided_slice %0 {offsets = [0, 2, 0], sizes = [4, 30, 128], strides = [1, 1, 1]} : vector<4x34x128xbf16> to vector<4x30x128xbf16>
    %4 = vector.extract_strided_slice %0 {offsets = [0, 3, 0], sizes = [4, 30, 128], strides = [1, 1, 1]} : vector<4x34x128xbf16> to vector<4x30x128xbf16>
    %5 = vector.extract_strided_slice %0 {offsets = [0, 4, 0], sizes = [4, 30, 128], strides = [1, 1, 1]} : vector<4x34x128xbf16> to vector<4x30x128xbf16>
    %6 = tpu.concatenate %1, %2, %3, %4, %5 in 2 : vector<4x30x128xbf16>, vector<4x30x128xbf16>, vector<4x30x128xbf16>, vector<4x30x128xbf16>, vector<4x30x128xbf16> -> vector<4x30x640xbf16>
    %7 = vector.shape_cast %6 : vector<4x30x640xbf16> to vector<120x640xbf16>
    %c0_2 = arith.constant 0 : index
    %c0_3 = arith.constant 0 : index
    %8 = vector.load %arg2[%c0_2, %c0_3] : memref<640x512xbf16, #tpu.memory_space<vmem>>, vector<640x512xbf16>
    %cst = arith.constant dense<0.000000e+00> : vector<120x512xf32>
    %9 = tpu.matmul %7, %8, %cst {dimension_numbers = #tpu.dot_dimension_numbers<[1], [0], [0], [1], [0, 0, 1, 1], [], []>} : vector<120x640xbf16>, vector<640x512xbf16>, vector<120x512xf32> -> vector<120x512xf32>
    %c0_4 = arith.constant 0 : index
    %c0_5 = arith.constant 0 : index
    %10 = vector.load %arg3[%c0_4, %c0_5] : memref<1x512xf32, #tpu.memory_space<vmem>>, vector<1x512xf32>
    %11 = vector.broadcast %10 : vector<1x512xf32> to vector<120x512xf32>
    %12 = arith.addf %9, %11 : vector<120x512xf32>
    %cst_6 = arith.constant 0.000000e+00 : f32
    %13 = vector.broadcast %cst_6 : f32 to vector<120x512xf32>
    %14 = arith.maximumf %12, %13 : vector<120x512xf32>
    %15 = vector.extract_strided_slice %14 {offsets = [0, 0], sizes = [120, 256], strides = [1, 1]} : vector<120x512xf32> to vector<120x256xf32>
    %16 = vector.extract_strided_slice %14 {offsets = [0, 256], sizes = [120, 256], strides = [1, 1]} : vector<120x512xf32> to vector<120x256xf32>
    %17 = arith.maximumf %15, %16 : vector<120x256xf32>
    %18 = vector.shape_cast %17 : vector<120x256xf32> to vector<4x15x2x256xf32>
    %cst_7 = arith.constant dense<0xFF800000> : vector<4x15x256xf32>
    %19 = vector.multi_reduction <maximumf>, %18, %cst_7 [2] : vector<4x15x2x256xf32> to vector<4x15x256xf32>
    %cst_8 = arith.constant 0.000000e+00 : bf16
    %20 = vector.broadcast %cst_8 : bf16 to vector<4x1x256xbf16>
    %21 = arith.truncf %19 : vector<4x15x256xf32> to vector<4x15x256xbf16>
    %22 = tpu.concatenate %20, %21, %20 in 1 : vector<4x1x256xbf16>, vector<4x15x256xbf16>, vector<4x1x256xbf16> -> vector<4x17x256xbf16>
    %23 = vector.extract_strided_slice %22 {offsets = [0, 0, 0], sizes = [4, 12, 256], strides = [1, 1, 1]} : vector<4x17x256xbf16> to vector<4x12x256xbf16>
    %24 = vector.extract_strided_slice %22 {offsets = [0, 1, 0], sizes = [4, 12, 256], strides = [1, 1, 1]} : vector<4x17x256xbf16> to vector<4x12x256xbf16>
    %25 = vector.extract_strided_slice %22 {offsets = [0, 2, 0], sizes = [4, 12, 256], strides = [1, 1, 1]} : vector<4x17x256xbf16> to vector<4x12x256xbf16>
    %26 = vector.extract_strided_slice %22 {offsets = [0, 3, 0], sizes = [4, 12, 256], strides = [1, 1, 1]} : vector<4x17x256xbf16> to vector<4x12x256xbf16>
    %27 = vector.extract_strided_slice %22 {offsets = [0, 4, 0], sizes = [4, 12, 256], strides = [1, 1, 1]} : vector<4x17x256xbf16> to vector<4x12x256xbf16>
    %28 = tpu.concatenate %23, %24, %25, %26, %27 in 2 : vector<4x12x256xbf16>, vector<4x12x256xbf16>, vector<4x12x256xbf16>, vector<4x12x256xbf16>, vector<4x12x256xbf16> -> vector<4x12x1280xbf16>
    %29 = vector.shape_cast %28 : vector<4x12x1280xbf16> to vector<48x1280xbf16>
    %c0_9 = arith.constant 0 : index
    %c0_10 = arith.constant 0 : index
    %30 = vector.load %arg4[%c0_9, %c0_10] : memref<1280x512xbf16, #tpu.memory_space<vmem>>, vector<1280x512xbf16>
    %cst_11 = arith.constant dense<0.000000e+00> : vector<48x512xf32>
    %31 = tpu.matmul %29, %30, %cst_11 {dimension_numbers = #tpu.dot_dimension_numbers<[1], [0], [0], [1], [0, 0, 1, 1], [], []>} : vector<48x1280xbf16>, vector<1280x512xbf16>, vector<48x512xf32> -> vector<48x512xf32>
    %c0_12 = arith.constant 0 : index
    %c0_13 = arith.constant 0 : index
    %32 = vector.load %arg5[%c0_12, %c0_13] : memref<1x512xf32, #tpu.memory_space<vmem>>, vector<1x512xf32>
    %33 = vector.broadcast %32 : vector<1x512xf32> to vector<48x512xf32>
    %34 = arith.addf %31, %33 : vector<48x512xf32>
    %cst_14 = arith.constant 0.000000e+00 : f32
    %35 = vector.broadcast %cst_14 : f32 to vector<48x512xf32>
    %36 = arith.maximumf %34, %35 : vector<48x512xf32>
    %37 = vector.extract_strided_slice %36 {offsets = [0, 0], sizes = [48, 256], strides = [1, 1]} : vector<48x512xf32> to vector<48x256xf32>
    %38 = vector.extract_strided_slice %36 {offsets = [0, 256], sizes = [48, 256], strides = [1, 1]} : vector<48x512xf32> to vector<48x256xf32>
    %39 = arith.maximumf %37, %38 : vector<48x256xf32>
    %40 = vector.shape_cast %39 : vector<48x256xf32> to vector<4x6x2x256xf32>
    %cst_15 = arith.constant dense<0xFF800000> : vector<4x6x256xf32>
    %41 = vector.multi_reduction <maximumf>, %40, %cst_15 [2] : vector<4x6x2x256xf32> to vector<4x6x256xf32>
    %cst_16 = arith.constant 0.000000e+00 : bf16
    %42 = vector.broadcast %cst_16 : bf16 to vector<4x1x256xbf16>
    %43 = arith.truncf %41 : vector<4x6x256xf32> to vector<4x6x256xbf16>
    %44 = tpu.concatenate %42, %43, %42 in 1 : vector<4x1x256xbf16>, vector<4x6x256xbf16>, vector<4x1x256xbf16> -> vector<4x8x256xbf16>
    %45 = vector.extract_strided_slice %44 {offsets = [0, 0, 0], sizes = [4, 4, 256], strides = [1, 1, 1]} : vector<4x8x256xbf16> to vector<4x4x256xbf16>
    %46 = vector.extract_strided_slice %44 {offsets = [0, 1, 0], sizes = [4, 4, 256], strides = [1, 1, 1]} : vector<4x8x256xbf16> to vector<4x4x256xbf16>
    %47 = vector.extract_strided_slice %44 {offsets = [0, 2, 0], sizes = [4, 4, 256], strides = [1, 1, 1]} : vector<4x8x256xbf16> to vector<4x4x256xbf16>
    %48 = vector.extract_strided_slice %44 {offsets = [0, 3, 0], sizes = [4, 4, 256], strides = [1, 1, 1]} : vector<4x8x256xbf16> to vector<4x4x256xbf16>
    %49 = vector.extract_strided_slice %44 {offsets = [0, 4, 0], sizes = [4, 4, 256], strides = [1, 1, 1]} : vector<4x8x256xbf16> to vector<4x4x256xbf16>
    %50 = tpu.concatenate %45, %46, %47, %48, %49 in 2 : vector<4x4x256xbf16>, vector<4x4x256xbf16>, vector<4x4x256xbf16>, vector<4x4x256xbf16>, vector<4x4x256xbf16> -> vector<4x4x1280xbf16>
    %51 = vector.shape_cast %50 : vector<4x4x1280xbf16> to vector<16x1280xbf16>
    %c0_17 = arith.constant 0 : index
    %c0_18 = arith.constant 0 : index
    %52 = vector.load %arg6[%c0_17, %c0_18] : memref<1280x256xbf16, #tpu.memory_space<vmem>>, vector<1280x256xbf16>
    %cst_19 = arith.constant dense<0.000000e+00> : vector<16x256xf32>
    %53 = tpu.matmul %51, %52, %cst_19 {dimension_numbers = #tpu.dot_dimension_numbers<[1], [0], [0], [1], [0, 0, 1, 1], [], []>} : vector<16x1280xbf16>, vector<1280x256xbf16>, vector<16x256xf32> -> vector<16x256xf32>
    %c0_20 = arith.constant 0 : index
    %c0_21 = arith.constant 0 : index
    %54 = vector.load %arg7[%c0_20, %c0_21] : memref<1x256xf32, #tpu.memory_space<vmem>>, vector<1x256xf32>
    %55 = vector.broadcast %54 : vector<1x256xf32> to vector<16x256xf32>
    %56 = arith.addf %53, %55 : vector<16x256xf32>
    %cst_22 = arith.constant 0.000000e+00 : f32
    %57 = vector.broadcast %cst_22 : f32 to vector<16x256xf32>
    %58 = arith.maximumf %56, %57 : vector<16x256xf32>
    %59 = vector.extract_strided_slice %58 {offsets = [0, 0], sizes = [16, 128], strides = [1, 1]} : vector<16x256xf32> to vector<16x128xf32>
    %60 = vector.extract_strided_slice %58 {offsets = [0, 128], sizes = [16, 128], strides = [1, 1]} : vector<16x256xf32> to vector<16x128xf32>
    %61 = arith.maximumf %59, %60 : vector<16x128xf32>
    %62 = vector.shape_cast %61 : vector<16x128xf32> to vector<4x2x2x128xf32>
    %cst_23 = arith.constant dense<0xFF800000> : vector<4x2x128xf32>
    %63 = vector.multi_reduction <maximumf>, %62, %cst_23 [2] : vector<4x2x2x128xf32> to vector<4x2x128xf32>
    %64 = vector.extract_strided_slice %63 {offsets = [0, 0, 0], sizes = [4, 1, 128], strides = [1, 1, 1]} : vector<4x2x128xf32> to vector<4x1x128xf32>
    %65 = vector.shape_cast %64 : vector<4x1x128xf32> to vector<4x128xf32>
    %66 = vector.extract_strided_slice %63 {offsets = [0, 1, 0], sizes = [4, 1, 128], strides = [1, 1, 1]} : vector<4x2x128xf32> to vector<4x1x128xf32>
    %67 = vector.shape_cast %66 : vector<4x1x128xf32> to vector<4x128xf32>
    %68 = tpu.concatenate %65, %67 in 1 : vector<4x128xf32>, vector<4x128xf32> -> vector<4x256xf32>
    %69 = arith.truncf %68 : vector<4x256xf32> to vector<4x256xbf16>
    %c0_24 = arith.constant 0 : index
    %c0_25 = arith.constant 0 : index
    %70 = vector.load %arg8[%c0_24, %c0_25] : memref<256x256xbf16, #tpu.memory_space<vmem>>, vector<256x256xbf16>
    %cst_26 = arith.constant dense<0.000000e+00> : vector<4x256xf32>
    %71 = tpu.matmul %69, %70, %cst_26 {dimension_numbers = #tpu.dot_dimension_numbers<[1], [0], [0], [1], [0, 0, 1, 1], [], []>} : vector<4x256xbf16>, vector<256x256xbf16>, vector<4x256xf32> -> vector<4x256xf32>
    %c0_27 = arith.constant 0 : index
    %c0_28 = arith.constant 0 : index
    %72 = vector.load %arg9[%c0_27, %c0_28] : memref<1x256xf32, #tpu.memory_space<vmem>>, vector<1x256xf32>
    %73 = vector.broadcast %72 : vector<1x256xf32> to vector<4x256xf32>
    %74 = arith.addf %71, %73 : vector<4x256xf32>
    %cst_29 = arith.constant 0.000000e+00 : f32
    %75 = vector.broadcast %cst_29 : f32 to vector<4x256xf32>
    %76 = arith.maximumf %74, %75 : vector<4x256xf32>
    %77 = arith.truncf %76 : vector<4x256xf32> to vector<4x256xbf16>
    %c0_30 = arith.constant 0 : index
    %c0_31 = arith.constant 0 : index
    %78 = vector.load %arg10[%c0_30, %c0_31] : memref<256x2xbf16, #tpu.memory_space<vmem>>, vector<256x2xbf16>
    %cst_32 = arith.constant dense<0.000000e+00> : vector<4x2xf32>
    %79 = tpu.matmul %77, %78, %cst_32 {dimension_numbers = #tpu.dot_dimension_numbers<[1], [0], [0], [1], [0, 0, 1, 1], [], []>} : vector<4x256xbf16>, vector<256x2xbf16>, vector<4x2xf32> -> vector<4x2xf32>
    %c0_33 = arith.constant 0 : index
    %c0_34 = arith.constant 0 : index
    %80 = vector.load %arg11[%c0_33, %c0_34] : memref<1x2xf32, #tpu.memory_space<vmem>>, vector<1x2xf32>
    %81 = vector.broadcast %80 : vector<1x2xf32> to vector<4x2xf32>
    %82 = arith.addf %79, %81 : vector<4x2xf32>
    %cst_35 = arith.constant 0.000000e+00 : f32
    %83 = vector.broadcast %cst_35 : f32 to vector<4x2xf32>
    %84 = arith.subf %83, %82 : vector<4x2xf32>
    %85 = math.exp %84 : vector<4x2xf32>
    %cst_36 = arith.constant 1.000000e+00 : f32
    %86 = vector.broadcast %cst_36 : f32 to vector<4x2xf32>
    %87 = arith.addf %86, %85 : vector<4x2xf32>
    %cst_37 = arith.constant 1.000000e+00 : f32
    %88 = vector.broadcast %cst_37 : f32 to vector<4x2xf32>
    %89 = arith.divf %88, %87 : vector<4x2xf32>
    %90 = vector.shape_cast %89 : vector<4x2xf32> to vector<4x1x2xf32>
    %c0_38 = arith.constant 0 : index
    %c0_39 = arith.constant 0 : index
    %c0_40 = arith.constant 0 : index
    %91 = vector.load %arg12[%c0_38, %c0_39, %c0_40] : memref<4x1x2xf32, #tpu.memory_space<vmem>>, vector<4x1x2xf32>
    tpu.vector_store %arg12[%c0_38, %c0_39, %c0_40], %90 {strides = array<i32>} : memref<4x1x2xf32, #tpu.memory_space<vmem>>, vector<4x1x2xf32>,
    return
  }
  func.func @transform_0(%arg0: i32) -> (i32, i32, i32) {
    %c0_i32 = arith.constant 0 : i32
    %c0_i32_0 = arith.constant 0 : i32
    %c0_i32_1 = arith.constant 0 : i32
    return %arg0, %c0_i32, %c0_i32_0 : i32, i32, i32
  }
  func.func @transform_1(%arg0: i32) -> (i32, i32) {
    %c0_i32 = arith.constant 0 : i32
    %c0_i32_0 = arith.constant 0 : i32
    %c0_i32_1 = arith.constant 0 : i32
    return %c0_i32, %c0_i32_0 : i32, i32
  }
  func.func @transform_2(%arg0: i32) -> (i32, i32) {
    %c0_i32 = arith.constant 0 : i32
    %c0_i32_0 = arith.constant 0 : i32
    %c0_i32_1 = arith.constant 0 : i32
    return %c0_i32, %c0_i32_0 : i32, i32
  }
  func.func @transform_3(%arg0: i32) -> (i32, i32) {
    %c0_i32 = arith.constant 0 : i32
    %c0_i32_0 = arith.constant 0 : i32
    %c0_i32_1 = arith.constant 0 : i32
    return %c0_i32, %c0_i32_0 : i32, i32
  }
  func.func @transform_4(%arg0: i32) -> (i32, i32) {
    %c0_i32 = arith.constant 0 : i32
    %c0_i32_0 = arith.constant 0 : i32
    %c0_i32_1 = arith.constant 0 : i32
    return %c0_i32, %c0_i32_0 : i32, i32
  }
  func.func @transform_5(%arg0: i32) -> (i32, i32) {
    %c0_i32 = arith.constant 0 : i32
    %c0_i32_0 = arith.constant 0 : i32
    %c0_i32_1 = arith.constant 0 : i32
    return %c0_i32, %c0_i32_0 : i32, i32
  }
  func.func @transform_6(%arg0: i32) -> (i32, i32) {
    %c0_i32 = arith.constant 0 : i32
    %c0_i32_0 = arith.constant 0 : i32
    %c0_i32_1 = arith.constant 0 : i32
    return %c0_i32, %c0_i32_0 : i32, i32
  }
  func.func @transform_7(%arg0: i32) -> (i32, i32) {
    %c0_i32 = arith.constant 0 : i32
    %c0_i32_0 = arith.constant 0 : i32
    %c0_i32_1 = arith.constant 0 : i32
    return %c0_i32, %c0_i32_0 : i32, i32
  }
  func.func @transform_8(%arg0: i32) -> (i32, i32) {
    %c0_i32 = arith.constant 0 : i32
    %c0_i32_0 = arith.constant 0 : i32
    %c0_i32_1 = arith.constant 0 : i32
    return %c0_i32, %c0_i32_0 : i32, i32
  }
  func.func @transform_9(%arg0: i32) -> (i32, i32) {
    %c0_i32 = arith.constant 0 : i32
    %c0_i32_0 = arith.constant 0 : i32
    %c0_i32_1 = arith.constant 0 : i32
    return %c0_i32, %c0_i32_0 : i32, i32
  }
  func.func @transform_10(%arg0: i32) -> (i32, i32) {
    %c0_i32 = arith.constant 0 : i32
    %c0_i32_0 = arith.constant 0 : i32
    %c0_i32_1 = arith.constant 0 : i32
    return %c0_i32, %c0_i32_0 : i32, i32
  }
  func.func @transform_11(%arg0: i32) -> (i32, i32, i32) {
    %c0_i32 = arith.constant 0 : i32
    %c0_i32_0 = arith.constant 0 : i32
    %c0_i32_1 = arith.constant 0 : i32
    return %arg0, %c0_i32, %c0_i32_0 : i32, i32, i32
  }
}

</mosaic_0001>

<bundles_post_ra>
// kernel: forward.1
= control target key start
LH: loop header
LB: loop body
LE: loop exit
PB: predicated region body
PF: predicated region fallthrough
CT: control target
= control target key end

     0   :  { %16 = vsyncpa [#allocation3], 0  ;;  %s19527_s0 = inlined_call_operand.vmem [shape: bf16[8,34,128], index: 0, kind: input, shape index: {}]   ;;  %s19528_s1 = inlined_call_operand.hbm [shape: bf16[640,512], index: 1, kind: input, shape index: {}]   ;;  %s19529_s2 = inlined_call_operand.vmem [shape: f32[1,512], index: 2, kind: input, shape index: {}]   ;;  %s19530_s3 = inlined_call_operand.vmem [shape: bf16[1280,512], index: 3, kind: input, shape index: {}]   ;;  %s19531_s4 = inlined_call_operand.vmem [shape: f32[1,512], index: 4, kind: input, shape index: {}]   ;;  %s19532_s5 = inlined_call_operand.hbm [shape: bf16[1280,256], index: 5, kind: input, shape index: {}]   ;;  %s19533_s6 = inlined_call_operand.vmem [shape: f32[1,256], index: 6, kind: input, shape index: {}]   ;;  %s19534_s7 = inlined_call_operand.vmem [shape: bf16[256,256], index: 7, kind: input, shape index: {}]   ;;  %s19535_s8 = inlined_call_operand.vmem [shape: f32[1,256], index: 8, kind: input, shape index: {}]   ;;  %s19536_s9 = inlined_call_operand.vmem [shape: bf16[256,2], index: 9, kind: input, shape index: {}]   ;;  %s19537_s10 = inlined_call_operand.vmem [shape: f32[1,2], index: 10, kind: input, shape index: {}]   ;;  %s19538_s11 = inlined_call_operand.vmem [shape: f32[8,1,2], index: 11, kind: output, shape index: {}]  }
   0x1   :  { %17 = vsyncpa [#allocation5], 0  ;;  %s15001_s17 = smov 0  }
   0x2 LB: > { %s14932_s18 = smov [#allocation2]   ;;  %s12958_s20 = sadd.s32 4294967295, %s14930_s17   ;;  %s14930_s17 = sphi %s15001_s17, %s23_s17  }
   0x3   : > { %s302_s19 = sshll.u32 %s14932_s18, 4  ;;  %p12960_p0 = scmp.ge.s32.totalorder %s14930_s17, 1  ;;  %s303_s19 = int_to_ptr.vmem [resolvable:$true] %s302_s19 }
   0x4   : > { %p290_p1 = scmp.lt.s32.totalorder %s14930_s17, 3  ;;  %p15015_p3 = scmp.eq.s32.totalorder %s12958_s20, 0 }
   0x5   : > { %s14933_s23 = smov [#allocation4]   ;;  %s14875_s26 = scalar_lea.vmem %s303_s19, 20480 }
   0x6   : > { %p15009_p2 = pnand %p12960_p0, %p290_p1  ;;  %s324_s24 = sshll.u32 %s14933_s23, 4  ;;  %s325_s24 = int_to_ptr.vmem [resolvable:$true] %s324_s24 }
   0x7   : > { %p14876_p7 = scmp.ne.s32.totalorder %s303_s19, %s14875_s26  ;;  %p14883_p10 = scmp.lt.s32.totalorder %s303_s19, %s303_s19 }
   0x8   : > { %p13796_p4 = pneg %p15009_p2  ;;  %p14884_p11 = scmp.lt.s32.totalorder %s14875_s26, %s14875_s26 }
   0xa   : > { %p15023_p5 = pnand %p15015_p3, %p13796_p4  ;;  %p14885_p12 = por %p14884_p11, %p14883_p10 }
   0xc   : > { %p14866_p6 = pneg %p15023_p5 }
   0xe   : > { %p14878_p8 = pnand %p14876_p7, %p14866_p6 }
  0x10   : > { %p14879_p9 = pneg %p14878_p8 }
  0x12   : > { %p14886_p13 = pnand %p14885_p12, %p14879_p9 }
  0x14   : > { %14889 = shalt.err (!%p14886_p13)
}
  0x15   : > { %s14934_s27 = smov 256   ;;  %s14935_s28 = smov 16  }
  0x16   : > { %13799 = dma.hbm_to_vmem [thread:$0]  (!%p15023_p5), %s19528_s1, 20480, %s303_s19, [#allocation3], %s14934_s27, %s14934_s27, %s14935_s28  }
  0x17   : > { %s14901_s12 = scalar_lea.vmem %s325_s24, 20480  ;;  %p14909_p7 = scmp.lt.s32.totalorder %s325_s24, %s325_s24 }
  0x18   : > { %p14902_p0 = scmp.ne.s32.totalorder %s325_s24, %s14901_s12  ;;  %p14910_p8 = scmp.lt.s32.totalorder %s14901_s12, %s14901_s12 }
  0x1a   : > { %p14904_p1 = pnand %p14902_p0, %p14866_p6  ;;  %p14911_p10 = por %p14910_p8, %p14909_p7 }
  0x1c   : > { %p14905_p4 = pneg %p14904_p1 }
  0x1e   : > { %p14912_p9 = pnand %p14911_p10, %p14905_p4 }
  0x20   : > { %14915 = shalt.err (!%p14912_p9)
}
  0x21   : > { %s14936_s13 = smov 128   ;;  %s14937_s14 = smov 8  }
  0x22   : > { %13802 = dma.hbm_to_vmem [thread:$0]  (!%p15023_p5), %s19532_s5, 20480, %s325_s24, [#allocation5], %s14936_s13, %s14936_s13, %s14937_s14  }
  0x23   : > { %365 = sbr.rel (%p15009_p2) target bundleno = 2331 (0x91b), region = 64 }
  0x28   : > { %14921 = dma.done.wait (%p15015_p3), [#allocation3], 20480  }
  0x29   : > { %14923 = vsyncadd (%p15015_p3), [#allocation3], 4294946816 }
  0x2a   : > { %14925 = dma.done.wait (%p15015_p3), [#allocation5], 20480  }
  0x2b   : > { %14927 = vsyncadd (%p15015_p3), [#allocation5], 4294946816  ;;  %v13824_v0 = vld [vmem:[#allocation2 + $0xe4] ss:$16 sps:$4 sm:$0xff]   ;;  %v13828_v2 = vld [vmem:[#allocation2 + $0xe0] ss:$16 sps:$4 sm:$0xff]   ;;  %v646_v48 = vlaneseq }
  0x2c   : > { %v13826_v1 = vld [vmem:[#allocation2 + $0x2e4] ss:$16 sps:$4 sm:$0xff]   ;;  %3469 = vmatprep.subr.bf16.mxu0 %v13824_v0  ;;  %v13829_v3 = vld [vmem:[#allocation2 + $0x2e0] ss:$16 sps:$4 sm:$0xff]   ;;  %s12967_s18 = sshll.u32 %s12958_s20, 2  ;;  %vm543_vm2 = vcmask 1046528  }
  0x2d   : > { %3580 = vmatprep.subr.bf16.mxu1 %v13826_v1  ;;  %v13830_v4 = vld [vmem:[#allocation2 + $0xc4] ss:$16 sps:$4 sm:$0xff]   ;;  %3470 = vmatpush1.bf16.msra.mxu0 %v13828_v2  ;;  %v13834_v6 = vld [vmem:[#allocation2 + $0xc0] ss:$16 sps:$4 sm:$0xff]   ;;  %p410_p2 = scmp.lt.s32.totalorder %s12967_s18, 7  ;;  %v15079_v60 = vshrl.u32 %v646_v48, 7 }
  0x2e   : > { %3581 = vmatpush1.bf16.msra.mxu1 %v13829_v3  ;;  %v13832_v5 = vld [vmem:[#allocation2 + $0x2c4] ss:$16 sps:$4 sm:$0xff]   ;;  %3471 = vmatprep.subr.bf16.mxu0 %v13830_v4  ;;  %v13835_v7 = vld [vmem:[#allocation2 + $0x2c0] ss:$16 sps:$4 sm:$0xff]   ;;  %vm482_vm0 = vsmask.f32 7424 }
  0x2f   : > { %3582 = vmatprep.subr.bf16.mxu1 %v13832_v5  ;;  %v13836_v8 = vld [vmem:[#allocation2 + $0xa4] ss:$16 sps:$4 sm:$0xff]   ;;  %v13840_v10 = vld [vmem:[#allocation2 + $0xa0] ss:$16 sps:$4 sm:$0xff]   ;;  %s19828_s18 = smov (!%p410_p2, %s12967_s18), 7  ;;  %19605 = vst [vmem:[#allocation8_spill] sm:$0xff] %v15079_v60 }
  0x30   : > { %v13838_v9 = vld [vmem:[#allocation2 + $0x2a4] ss:$16 sps:$4 sm:$0xff]   ;;  %v13841_v11 = vld [vmem:[#allocation2 + $0x2a0] ss:$16 sps:$4 sm:$0xff]   ;;  %s13787_s19 = smul.u32 20, %s19828_s18  ;;  %vm617_vm3 = vcmask 1045504   ;;  %s419_s23 = scalar_lea.vmem %s19538_s11, %s19828_s18 }
  0x31   : > { %3472 = vmatpush1.bf16.msra.mxu0 %v13834_v6  ;;  %v13842_v12 = vld [vmem:[#allocation2 + $0x84] ss:$16 sps:$4 sm:$0xff]   ;;  %v13846_v14 = vld [vmem:[#allocation2 + $0x80] ss:$16 sps:$4 sm:$0xff]   ;;  %v14938_v46 = vmov 1966171168  }
  0x32   : > { %3583 = vmatpush1.bf16.msra.mxu1 %v13835_v7  ;;  %3473 = vmatprep.subr.bf16.mxu0 %v13836_v8  ;;  %v13844_v13 = vld [vmem:[#allocation2 + $0x284] ss:$16 sps:$4 sm:$0xff]   ;;  %v13847_v15 = vld [vmem:[#allocation2 + $0x280] ss:$16 sps:$4 sm:$0xff]   ;;  %s15063_s22 = scalar_lea.vmem %s19527_s0, %s13787_s19  ;;  %v644_v47 = vunpack.c.l.s4 %v14938_v46  ;;  %vm568_vm1 = vsmask.f32 6400 }
  0x33   : > { %3584 = vmatprep.subr.bf16.mxu1 %v13838_v9  ;;  %v13848_v16 = vld [vmem:[#allocation2 + $0x64] ss:$16 sps:$4 sm:$0xff]   ;;  %v13852_v18 = vld [vmem:[#allocation2 + $0x60] ss:$16 sps:$4 sm:$0xff]   ;;  %v15070_v53 = vld [vmem:[%s15063_s22 + $0x8] sm:$0xf] }
  0x34   : > { %v13850_v17 = vld [vmem:[#allocation2 + $0x264] ss:$16 sps:$4 sm:$0xff]   ;;  %v13853_v19 = vld [vmem:[#allocation2 + $0x260] ss:$16 sps:$4 sm:$0xff]   ;;  %v425_v54 = vld [vmem:[%s15063_s22 + $0xc] sm:$0xf]  ;;  %v645_v59 = vunpack.c.0.s8 %v644_v47 }
  0x35   : > { %3474 = vmatpush1.bf16.msra.mxu0 %v13840_v10  ;;  %v13854_v20 = vld [vmem:[#allocation2 + $0x44] ss:$16 sps:$4 sm:$0xff]   ;;  %v13858_v22 = vld [vmem:[#allocation2 + $0x40] ss:$16 sps:$4 sm:$0xff]   ;;  %v15077_v57 = vcombine.low %v15070_v53, %v425_v54  ;;  %vm5125_vm4 = vcmask 1041408   ;;  %vm6326_vm5 = vcmask 1042434  }
  0x36   : > { %3585 = vmatpush1.bf16.msra.mxu1 %v13841_v11  ;;  %3475 = vmatprep.subr.bf16.mxu0 %v13842_v12  ;;  %v13856_v21 = vld [vmem:[#allocation2 + $0x244] ss:$16 sps:$4 sm:$0xff]   ;;  %v13859_v23 = vld [vmem:[#allocation2 + $0x240] ss:$16 sps:$4 sm:$0xff]   ;;  %vm6328_vm6 = vcmask 1043459   ;;  %vm6330_vm7 = vcmask 1044484  }
  0x37   : > { %3586 = vmatprep.subr.bf16.mxu1 %v13844_v13  ;;  %v13860_v24 = vld [vmem:[#allocation2 + $0x24] ss:$16 sps:$4 sm:$0xff]   ;;  %v13864_v26 = vld [vmem:[#allocation2 + $0x20] ss:$16 sps:$4 sm:$0xff]   ;;  %v491_v0 = vshll.u32 %v15077_v57, 16  ;;  %v495_v1 = vshrl.u32 %v15077_v57, 16 }
  0x38   : > { %v13862_v25 = vld [vmem:[#allocation2 + $0x224] ss:$16 sps:$4 sm:$0xff]   ;;  %v13865_v27 = vld [vmem:[#allocation2 + $0x220] ss:$16 sps:$4 sm:$0xff]   ;;  %v15087_v4 = vrot.slane %v15077_v57, 1  ;;  %vm6332_vm8 = vcmask 1045509  }
  0x39   : > { %3476 = vmatpush1.bf16.msra.mxu0 %v13846_v14  ;;  %v13866_v28 = vld [vmem:[#allocation2 + $0x4] ss:$16 sps:$4 sm:$0xff]   ;;  %v13870_v30 = vld [vmem:[#allocation2] ss:$16 sps:$4 sm:$0xff]   ;;  %v493_v7 = vrot.slane %v491_v0, 1  ;;  %v572_v11 = vrot.slane %v495_v1, 1 }
  0x3a   : > { %3587 = vmatpush1.bf16.msra.mxu1 %v13847_v15  ;;  %3477 = vmatprep.subr.bf16.mxu0 %v13848_v16  ;;  %v13868_v29 = vld [vmem:[#allocation2 + $0x204] ss:$16 sps:$4 sm:$0xff]   ;;  %v13871_v31 = vld [vmem:[#allocation2 + $0x200] ss:$16 sps:$4 sm:$0xff]   ;;  %v573_v12 = vrot.slane %v491_v0, 2  ;;  %vm6334_vm9 = vcmask 1046534  }
  0x3b   : > { %3588 = vmatprep.subr.bf16.mxu1 %v13850_v17  ;;  %v13872_v32 = vld [vmem:[#allocation2 + $0x1e4] ss:$16 sps:$4 sm:$0xff]   ;;  %v13876_v34 = vld [vmem:[#allocation2 + $0x1e0] ss:$16 sps:$4 sm:$0xff]   ;;  %v15090_v17 = vsub.s32 %v645_v59, %v15079_v60  ;;  %vm6336_vm10 = vcmask 1047559   ;;  %vm6344_vm11 = vcmask 1041409  }
  0x3c   : > { %v13874_v33 = vld [vmem:[#allocation2 + $0x3e4] ss:$16 sps:$4 sm:$0xff]   ;;  %v13877_v35 = vld [vmem:[#allocation2 + $0x3e0] ss:$16 sps:$4 sm:$0xff]   ;;  %vm6453_vm12 = vcmask 1040384   ;;  %vm10728_vm15 = vcmask 1043456  }
  0x3d   : > { %3478 = vmatpush1.bf16.msra.mxu0 %v13852_v18  ;;  %v13878_v36 = vld [vmem:[#allocation2 + $0x1c4] ss:$16 sps:$4 sm:$0xff]   ;;  %v13882_v38 = vld [vmem:[#allocation2 + $0x1c0] ss:$16 sps:$4 sm:$0xff]   ;;  %19606 = vst [vmem:[#allocation9_spill] sm:$0xff] %v15090_v17 }
  0x3e   : > { %3589 = vmatpush1.bf16.msra.mxu1 %v13853_v19  ;;  %3479 = vmatprep.subr.bf16.mxu0 %v13854_v20  ;;  %v13880_v37 = vld [vmem:[#allocation2 + $0x3c4] ss:$16 sps:$4 sm:$0xff]   ;;  %v13883_v39 = vld [vmem:[#allocation2 + $0x3c0] ss:$16 sps:$4 sm:$0xff]   ;;  %v428_v19 = vld [vmem:[%s15063_s22 + $0x18] sm:$0xf] }
  0x3f   : > { %3590 = vmatprep.subr.bf16.mxu1 %v13856_v21  ;;  %v13884_v40 = vld [vmem:[#allocation2 + $0x1a4] ss:$16 sps:$4 sm:$0xff]   ;;  %v13888_v42 = vld [vmem:[#allocation2 + $0x1a0] ss:$16 sps:$4 sm:$0xff]   ;;  %v15097_v20 = vld [vmem:[%s15063_s22 + $0x1c] sm:$0xf]  ;;  %v15099_v21 = vor.u32 %v495_v1, %v493_v7 }
  0x40   : > { %v13886_v41 = vld [vmem:[#allocation2 + $0x3a4] ss:$16 sps:$4 sm:$0xff]   ;;  %v13889_v43 = vld [vmem:[#allocation2 + $0x3a0] ss:$16 sps:$4 sm:$0xff]   ;;  %vm6454_vm13 = vsmask.f32 256 }
  0x41   : > { %3480 = vmatpush1.bf16.msra.mxu0 %v13858_v22  ;;  %v13890_v44 = vld [vmem:[#allocation2 + $0x184] ss:$16 sps:$4 sm:$0xff]   ;;  %v13894_v49 = vld [vmem:[#allocation2 + $0x180] ss:$16 sps:$4 sm:$0xff]   ;;  %vm17514_vm14 = vmand %vm6453_vm12, %vm6454_vm13 }
  0x42   : > { %3591 = vmatpush1.bf16.msra.mxu1 %v13859_v23  ;;  %3481 = vmatprep.subr.bf16.mxu0 %v13860_v24  ;;  %v13892_v45 = vld [vmem:[#allocation2 + $0x384] ss:$16 sps:$4 sm:$0xff]   ;;  %v13895_v50 = vld [vmem:[#allocation2 + $0x380] ss:$16 sps:$4 sm:$0xff]   ;;  %v15103_v24 = vor.u32 %v573_v12, %v572_v11 }
  0x43   : > { %3592 = vmatprep.subr.bf16.mxu1 %v13862_v25  ;;  %v15066_v51 = vld [vmem:[%s15063_s22] sm:$0xf]  ;;  %v423_v52 = vld [vmem:[%s15063_s22 + $0x4] sm:$0xf]  ;;  %v15093_v18 = vld [vmem:[%s15063_s22 + $0x14] sm:$0xf] }
  0x44   : > { %v13896_v55 = vld [vmem:[#allocation2 + $0x164] ss:$16 sps:$4 sm:$0xff]   ;;  %v15074_v56 = vcombine.low %v15066_v51, %v423_v52  ;;  %v13900_v61 = vld [vmem:[#allocation2 + $0x160] ss:$16 sps:$4 sm:$0xff]  }
  0x45   : > { %3482 = vmatpush1.bf16.msra.mxu0 %v13864_v26  ;;  %v13898_v58 = vld [vmem:[#allocation2 + $0x364] ss:$16 sps:$4 sm:$0xff]   ;;  %v13901_v2 = vld [vmem:[#allocation2 + $0x360] ss:$16 sps:$4 sm:$0xff]   ;;  %v15107_v26 = vcombine.low %v15093_v18, %v428_v19 }
  0x46   : > { %3593 = vmatpush1.bf16.msra.mxu1 %v13865_v27  ;;  %3483 = vmatprep.subr.bf16.mxu0 %v13866_v28  ;;  %v484_v62 = vshrl.u32 %v15074_v56, 16  ;;  %v486_v63 = vshll.u32 %v15074_v56, 16  ;;  %v544_v3 = vrot.slane %v15074_v56, 1  ;;  %v13902_v5 = vld [vmem:[#allocation2 + $0x144] ss:$16 sps:$4 sm:$0xff]   ;;  %v19539_v27 = vrot.slane %v15077_v57, 2 }
  0x47   : > { %3594 = vmatprep.subr.bf16.mxu1 %v13868_v29  ;;  %v13904_v10 = vld [vmem:[#allocation2 + $0x344] ss:$16 sps:$4 sm:$0xff]   ;;  %v13906_v13 = vld [vmem:[#allocation2 + $0x140] ss:$16 sps:$4 sm:$0xff]   ;;  %v547_v48 = vrot.slane %v15107_v26, 1 }
  0x48   : > { %v488_v6 = vrot.slane %v486_v63, 1  ;;  %v569_v8 = vrot.slane %v484_v62, 1  ;;  %v570_v9 = vrot.slane %v486_v63, 2  ;;  %v13907_v14 = vld [vmem:[#allocation2 + $0x340] ss:$16 sps:$4 sm:$0xff]   ;;  %v546_v23 = vsel %vm543_vm2, %v544_v3, %v15087_v4 }
  0x49   : > { %3484 = vmatpush1.bf16.msra.mxu0 %v13870_v30  ;;  %v13908_v22 = vld [vmem:[#allocation2 + $0x124] ss:$16 sps:$4 sm:$0xff]   ;;  %v430_v25 = vld [vmem:[%s15063_s22 + $0x20] sm:$0xf] }
  0x4a   : > { %3595 = vmatpush1.bf16.msra.mxu1 %v13871_v31  ;;  %3485 = vmatprep.subr.bf16.mxu0 %v13872_v32  ;;  %v489_v15 = vor.u32 %v488_v6, %v484_v62  ;;  %v571_v16 = vor.u32 %v570_v9, %v569_v8  ;;  %v13910_v28 = vld [vmem:[#allocation2 + $0x324] ss:$16 sps:$4 sm:$0xff]   ;;  %v15112_v30 = vcombine.low %v15097_v20, %v430_v25  ;;  %v13919_v3 = vld [vmem:[#allocation2 + $0x300] ss:$16 sps:$4 sm:$0xff]  }
  0x4b   : > { %3596 = vmatprep.subr.bf16.mxu1 %v13874_v33  ;;  %v12983_v31 = vcombine.low %v15070_v53, %v15099_v21 }
  0x4c   : > { %v494_v29 = vsel %vm482_vm0, %v489_v15, %v493_v7  ;;  %v575_v33 = vsel %vm568_vm1, %v571_v16, %v15103_v24  ;;  %v510_v47 = vshrl.u32 %v15112_v30, 16  ;;  %v13924_v15 = vld [vmem:[#allocation2 + $0x4e4] ss:$16 sps:$4 sm:$0xff]   ;;  %v13927_v16 = vld [vmem:[#allocation2 + $0xec] ss:$16 sps:$4 sm:$0xff]  }
  0x4d   : > { %3486 = vmatpush2.bf16.msra.mxu0 %v13876_v34  ;;  %v12982_v34 = vcombine.low %v15066_v51, %v494_v29 }
  0x4e   : > { %3597 = vmatpush2.bf16.msra.mxu1 %v13877_v35  ;;  %3487 = vmatprep.subr.bf16.mxu0 %v13878_v36  ;;  %v639_v35 = vcombine.high %v15074_v56, %v494_v29  ;;  %v499_v36 = vshrl.u32 %v15107_v26, 16  ;;  %v584_v12 = vrot.slane %v510_v47, 1 }
  0x4f   : > { %3598 = vmatprep.subr.bf16.mxu1 %v13880_v37  ;;  %v15123_v37 = vld [vmem:[%s15063_s22 + $0x10] ss:$0 sps:$4 sm:$0x11]  }
  0x50   : > { %v656_v46 = vrot.slane %v639_v35, %v15090_v17  ;;  %v581_v59 = vrot.slane %v499_v36, 1  ;;  %v621_v29 = vrot.slane %v15123_v37, 2 }
  0x51   : > { %3488 = vmatpush2.bf16.msra.mxu0 %v13882_v38  ;;  %v13912_v38 = vld [vmem:[#allocation2 + $0x120] ss:$16 sps:$4 sm:$0xff]  }
  0x52   : > { %3599 = vmatpush2.bf16.msra.mxu1 %v13883_v39  ;;  %3489 = vmatprep.subr.bf16.mxu0 %v13884_v40  ;;  %v13913_v39 = vld [vmem:[#allocation2 + $0x320] ss:$16 sps:$4 sm:$0xff]   ;;  %v640_v40 = vcombine.low %v546_v23, %v575_v33 }
  0x53   : > { %3600 = vmatprep.subr.bf16.mxu1 %v13886_v41  ;;  %v641_v41 = vcombine.high %v546_v23, %v575_v33  ;;  %v756_v33 = vcombine.high %v15077_v57, %v15099_v21 }
  0x55   : > { %3490 = vmatpush2.bf16.msra.mxu0 %v13888_v42  ;;  %v501_v42 = vshll.u32 %v15107_v26, 16  ;;  %v670_v51 = vrot.slane %v641_v41, %v15090_v17 }
  0x56   : > { %3601 = vmatpush2.bf16.msra.mxu1 %v13889_v43  ;;  %3491 = vmatprep.subr.bf16.mxu0 %v13890_v44  ;;  %v506_v43 = vshll.u32 %v15112_v30, 16  ;;  %v13914_v44 = vld [vmem:[#allocation2 + $0x104] ss:$16 sps:$4 sm:$0xff]  }
  0x57   : > { %3602 = vmatprep.subr.bf16.mxu1 %v13892_v45  ;;  %v649_v45 = vrot.slane %v12982_v34, %v15090_v17  ;;  %v503_v52 = vrot.slane %v501_v42, 1  ;;  %v687_v0 = vcombine.low %v656_v46, %v670_v51  ;;  %v688_v1 = vcombine.high %v656_v46, %v670_v51 }
  0x58   : > { %v15133_v54 = vrot.slane %v506_v43, 1  ;;  %v585_v23 = vrot.slane %v506_v43, 2 }
  0x59   : > { %3492 = vmatpush2.bf16.msra.mxu0 %v13894_v49  ;;  %v13916_v49 = vld [vmem:[#allocation2 + $0x304] ss:$16 sps:$4 sm:$0xff]  }
  0x5a   : > { %3603 = vmatpush2.bf16.msra.mxu1 %v13895_v50  ;;  %3493 = vmatprep.subr.bf16.mxu0 %v13896_v55  ;;  %v663_v50 = vrot.slane %v640_v40, %v15090_v17  ;;  %v15136_v55 = vrot.slane %v15112_v30, 1  ;;  %v15169_v40 = vsel %vm617_vm3, %v19539_v27, %v621_v29 }
  0x5b   : > { %3604 = vmatprep.subr.bf16.mxu1 %v13898_v58  ;;  %v577_v58 = vshll.u32 %v15123_v37, 16 }
  0x5c   : > { %v685_v62 = vcombine.low %v649_v45, %v663_v50  ;;  %v686_v63 = vcombine.high %v649_v45, %v663_v50  ;;  %v15141_v6 = vsel %vm543_vm2, %v547_v48, %v15136_v55 }
  0x5d   : > { %3494 = vmatpush2.bf16.msra.mxu0 %v13900_v61  ;;  %v582_v61 = vrot.slane %v501_v42, 2  ;;  %v579_v7 = vrot.slane %v577_v58, 2  ;;  %v773_v58 = vrot.slane %v756_v33, %v15090_v17 }
  0x5e   : > { %3605 = vmatpush2.bf16.msra.mxu1 %v13901_v2  ;;  %3495 = vmatprep.subr.bf16.mxu0 %v13902_v5  ;;  %v13918_v2 = vld [vmem:[#allocation2 + $0x100] ss:$16 sps:$4 sm:$0xff]   ;;  %v504_v5 = vor.u32 %v503_v52, %v499_v36  ;;  %v697_v9 = vrot.slane %v685_v62, %v15090_v17  ;;  %v711_v11 = vrot.slane %v686_v63, %v15090_v17 }
  0x5f   : > { %3606 = vmatprep.subr.bf16.mxu1 %v13904_v10  ;;  %v583_v8 = vor.u32 %v582_v61, %v581_v59  ;;  %v704_v10 = vrot.slane %v687_v0, %v15090_v17  ;;  %v15161_v36 = vor.u32 %v585_v23, %v584_v12  ;;  %v766_v52 = vrot.slane %v12983_v31, %v15090_v17  ;;  %v13930_v12 = vld [vmem:[#allocation2 + $0xcc] ss:$16 sps:$4 sm:$0xff]   ;;  %v15211_v23 = vld [vmem:[%s15063_s22 + $0x38] ss:$0 sps:$4 sm:$0x11]  }
  0x60   : > { %v15154_v19 = vsel %vm482_vm0, %v504_v5, %v15133_v54  ;;  %v12990_v25 = vcombine.low %v697_v9, %v711_v11 }
  0x61   : > { %3496 = vmatpush2.bf16.msra.mxu0 %v13906_v13  ;;  %v15149_v13 = vld [vmem:[%s15063_s22 + $0x24] ss:$0 sps:$4 sm:$0x11]   ;;  %v15176_v43 = vsel %vm568_vm1, %v583_v8, %v15161_v36  ;;  %v12984_v53 = vcombine.low %v15093_v18, %v15154_v19 }
  0x62   : > { %3607 = vmatpush2.bf16.msra.mxu1 %v13907_v14  ;;  %3497 = vmatprep.subr.bf16.mxu0 %v13908_v22  ;;  %v718_v14 = vrot.slane %v688_v1, %v15090_v17  ;;  %v580_v22 = vsel %vm568_vm1, %v15103_v24, %v579_v7  ;;  %v589_v37 = vshll.u32 %v15149_v13, 16 }
  0x63   : > { %3608 = vmatprep.subr.bf16.mxu1 %v13910_v28  ;;  %v12992_v28 = vcombine.high %v697_v9, %v711_v11  ;;  %v758_v48 = vcombine.high %v15087_v4, %v580_v22  ;;  %v13925_v11 = vld [vmem:[#allocation2 + $0xe8] ss:$16 sps:$4 sm:$0xff]   ;;  %v882_v29 = vrot.slane %v12984_v53, %v15090_v17 }
  0x64   : > { %v12994_v34 = vcombine.low %v704_v10, %v718_v14  ;;  %v12996_v35 = vcombine.high %v704_v10, %v718_v14  ;;  %v13922_v10 = vld [vmem:[#allocation2 + $0x4e0] ss:$16 sps:$4 sm:$0xff]   ;;  %v591_v33 = vrot.slane %v589_v37, 2  ;;  %v15230_v37 = vor.u32 %v510_v47, %v15133_v54  ;;  %v13937_v53 = vld [vmem:[#allocation2 + $0xa8] ss:$16 sps:$4 sm:$0xff]  }
  0x65   : > { %3498 = vmatpush2.bf16.msra.mxu0 %v13912_v38  ;;  %v757_v38 = vcombine.low %v15087_v4, %v580_v22  ;;  %v1780_v24 = vrot.slane %v12992_v28, %v15090_v17  ;;  %v787_v4 = vrot.slane %v758_v48, %v15090_v17  ;;  %v13936_v22 = vld [vmem:[#allocation2 + $0x4c4] ss:$16 sps:$4 sm:$0xff]   ;;  %v873_v28 = vcombine.low %v15141_v6, %v15176_v43 }
  0x66   : > { %3609 = vmatpush2.bf16.msra.mxu1 %v13913_v39  ;;  %3499 = vmatprep.subr.bf16.mxu0 %v13914_v44  ;;  %v1766_v39 = vrot.slane %v12990_v25, %v15090_v17  ;;  %v1794_v41 = vrot.slane %v12994_v34, %v15090_v17  ;;  %v1808_v42 = vrot.slane %v12996_v35, %v15090_v17  ;;  %v623_v44 = vrot.slane %v15107_v26, 2 }
  0x67   : > { %3610 = vmatprep.subr.bf16.mxu1 %v13916_v49  ;;  %v759_v49 = vcombine.high %v15169_v40, %v15169_v40  ;;  %v780_v62 = vrot.slane %v757_v38, %v15090_v17  ;;  %v872_v54 = vcombine.high %v15107_v26, %v15154_v19 }
  0x68   : > { %v1817_v45 = vcombine.high %v1766_v39, %v1780_v24  ;;  %v1816_v46 = vcombine.low %v1766_v39, %v1780_v24  ;;  %v1820_v50 = vcombine.high %v1794_v41, %v1808_v42  ;;  %v1819_v51 = vcombine.low %v1794_v41, %v1808_v42  ;;  %v13928_v24 = vld [vmem:[#allocation2 + $0xc8] ss:$16 sps:$4 sm:$0xff]  }
  0x69   : > { %3500 = vmatpush2.bf16.msra.mxu0 %v13918_v2  ;;  %v15194_v1 = vrot.slane %v759_v49, %v15090_v17  ;;  %v802_v21 = vcombine.low %v766_v52, %v780_v62  ;;  %v803_v31 = vcombine.high %v766_v52, %v780_v62  ;;  %v804_v2 = vcombine.low %v773_v58, %v787_v4 }
  0x6a   : > { %3611 = vmatpush2.bf16.msra.mxu1 %v13919_v3  ;;  %3691 = vmatprep.subr.bf16.mxu0 %v13924_v15  ;;  %v1842_v59 = vrot.slane %v1817_v45, %v15090_v17  ;;  %v1828_v61 = vrot.slane %v1816_v46, %v15090_v17  ;;  %v1863_v63 = vrot.slane %v1820_v50, %v15090_v17  ;;  %v19540_v39 = vrot.slane %v15112_v30, 2  ;;  %v13934_v45 = vld [vmem:[#allocation2 + $0x4c0] ss:$16 sps:$4 sm:$0xff]  }
  0x6b   : > { %3802 = vmatprep.subr.bf16.mxu1 %v13927_v16  ;;  %v1849_v0 = vrot.slane %v1819_v51, %v15090_v17  ;;  %v805_v3 = vcombine.high %v773_v58, %v787_v4  ;;  %v814_v14 = vrot.slane %v802_v21, %v15090_v17  ;;  %v821_v18 = vrot.slane %v804_v2, %v15090_v17  ;;  %v13939_v51 = vld [vmem:[#allocation2 + $0xac] ss:$16 sps:$4 sm:$0xff]  }
  0x6c   : > { %v15198_v5 = vcombine.low %v1842_v59, %v1863_v63  ;;  %v15200_v7 = vcombine.high %v1842_v59, %v1863_v63  ;;  %v828_v15 = vrot.slane %v803_v31, %v15090_v17  ;;  %v15217_v25 = vrot.slane %v15194_v1, %v15090_v17  ;;  %v13942_v2 = vld [vmem:[#allocation2 + $0x8c] ss:$16 sps:$4 sm:$0xff]  }
  0x6d   : > { %v15202_v8 = vcombine.low %v1828_v61, %v1849_v0  ;;  %v15204_v9 = vcombine.high %v1828_v61, %v1849_v0  ;;  %v835_v16 = vrot.slane %v805_v3, %v15090_v17  ;;  %v896_v42 = vrot.slane %v873_v28, %v15090_v17  ;;  %v13946_v61 = vld [vmem:[#allocation2 + $0x4a4] ss:$16 sps:$4 sm:$0xff]  }
  0x6e   : > { %19607 = vst [vmem:[#allocation10_spill] sm:$0xff] %v15200_v7  ;;  %3501 = vmatprep.mubr.bf16.mxu0 %v15198_v5  ;;  %3612 = vmatprep.mubr.bf16.mxu1 %v15200_v7  ;;  %v12998_v34 = vcombine.low %v814_v14, %v828_v15  ;;  %v13000_v35 = vcombine.high %v814_v14, %v828_v15  ;;  %v601_v52 = vshll.u32 %v15211_v23, 16 }
  0x6f   : > { %19608 = vst [vmem:[#allocation11_spill] sm:$0xff] %v15204_v9  ;;  %3502 = vmatmul.mubr.bf16.vlgmr.msra.gmra.mxu0 %v15202_v8  ;;  %3613 = vmatmul.mubr.bf16.vlgmr.msra.gmra.mxu1 %v15204_v9  ;;  %v13002_v38 = vcombine.low %v821_v18, %v835_v16  ;;  %v867_v41 = vcombine.high %v821_v18, %v15217_v25  ;;  %v13944_v18 = vld [vmem:[#allocation2 + $0x4a0] ss:$16 sps:$4 sm:$0xff]  }
  0x70   : > { %3692 = vmatpush1.bf16.msra.mxu0 %v13922_v10  ;;  %3803 = vmatpush1.bf16.msra.mxu1 %v13925_v11  ;;  %v1883_v48 = vrot.slane %v12998_v34, %v15090_v17  ;;  %v1897_v49 = vrot.slane %v13000_v35, %v15090_v17  ;;  %v918_v58 = vcombine.low %v882_v29, %v896_v42  ;;  %v15257_v31 = vrot.slane %v601_v52, 2  ;;  %v13940_v10 = vld [vmem:[#allocation2 + $0x88] ss:$16 sps:$4 sm:$0xff]   ;;  %v13957_v34 = vld [vmem:[#allocation2 + $0x484] ss:$16 sps:$4 sm:$0xff]  }
  0x71   : > { %3804 = vmatprep.subr.bf16.mxu1 %v13930_v12  ;;  %v15236_v50 = vrot.slane %v13002_v38, %v15090_v17  ;;  %3693 = vmatprep.subr.bf16.mxu0 %v13936_v22  ;;  %v15241_v59 = vsel %vm568_vm1, %v15161_v36, %v591_v33  ;;  %v625_v47 = vsel %vm617_vm3, %v623_v44, %v19540_v39  ;;  %v13949_v33 = vld [vmem:[#allocation2 + $0x6c] ss:$16 sps:$4 sm:$0xff]   ;;  %v15295_v52 = vld [vmem:[%s15063_s22 + $0x30] sm:$0xf] }
  0x72   : > { %v1934_v62 = vcombine.high %v1883_v48, %v1897_v49  ;;  %v1933_v4 = vcombine.low %v1883_v48, %v1897_v49  ;;  %v874_v63 = vcombine.high %v15141_v6, %v15176_v43  ;;  %v875_v0 = vcombine.high %v625_v47, %v625_v47 }
  0x73   : > { %v15253_v36 = vrot.slane %v918_v58, %v15090_v17  ;;  %v889_v21 = vrot.slane %v872_v54, %v15090_v17  ;;  %v910_v44 = vrot.slane %v625_v47, %v15090_v17  ;;  %v919_v11 = vcombine.high %v882_v29, %v896_v42  ;;  %v433_v42 = vld [vmem:[%s15063_s22 + $0x2c] sm:$0xf] }
  0x74   : > { %3805 = vmatpush1.bf16.msra.mxu1 %v13928_v24  ;;  %3694 = vmatpush1.bf16.msra.mxu0 %v13934_v45  ;;  %v1959_v26 = vrot.slane %v1934_v62, %v15090_v17  ;;  %v1945_v19 = vrot.slane %v1933_v4, %v15090_v17  ;;  %v903_v6 = vrot.slane %v874_v63, %v15090_v17  ;;  %v435_v62 = vld [vmem:[%s15063_s22 + $0x34] sm:$0xf]  ;;  %v13955_v4 = vld [vmem:[#allocation2 + $0x480] ss:$16 sps:$4 sm:$0xff]  }
  0x75   : > { %3806 = vmatprep.subr.bf16.mxu1 %v13939_v51  ;;  %v917_v43 = vrot.slane %v875_v0, %v15090_v17  ;;  %v13004_v3 = vcombine.low %v867_v41, %v15253_v36  ;;  %v922_v12 = vcombine.high %v910_v44, %v910_v44  ;;  %v15265_v14 = vrot.slane %v910_v44, %v15090_v17  ;;  %v15280_v41 = vld [vmem:[%s15063_s22 + $0x28] sm:$0xf] }
  0x76   : > { %3695 = vmatprep.subr.bf16.mxu0 %v13946_v61  ;;  %v920_v15 = vcombine.low %v889_v21, %v903_v6  ;;  %v921_v16 = vcombine.high %v889_v21, %v903_v6  ;;  %v15272_v29 = vrot.slane %v919_v11, %v15090_v17  ;;  %v12985_v51 = vcombine.low %v15097_v20, %v15230_v37 }
  0x77   : > { %v923_v22 = vcombine.high %v917_v43, %v917_v43  ;;  %v15268_v28 = vrot.slane %v917_v43, %v15090_v17  ;;  %v1925_v35 = vrot.slane %v13004_v3, %v15090_v17  ;;  %v15275_v38 = vrot.slane %v922_v12, %v15090_v17 }
  0x78   : > { %3807 = vmatpush1.bf16.msra.mxu1 %v13937_v53  ;;  %v981_v24 = vcombine.high %v15253_v36, %v15265_v14  ;;  %v15284_v45 = vrot.slane %v920_v15, %v15090_v17  ;;  %v15287_v48 = vrot.slane %v921_v16, %v15090_v17  ;;  %v990_v61 = vcombine.low %v15136_v55, %v15241_v59  ;;  %v13967_v53 = vld [vmem:[#allocation2 + $0x464] ss:$16 sps:$4 sm:$0xff]  }
  0x79   : > { %3808 = vmatprep.subr.bf16.mxu1 %v13942_v2  ;;  %v15290_v49 = vrot.slane %v923_v22, %v15090_v17  ;;  %v1937_v58 = vcombine.high %v15236_v50, %v1925_v35  ;;  %v1936_v47 = vcombine.low %v15236_v50, %v1925_v35  ;;  %v985_v54 = vcombine.high %v15272_v29, %v15275_v38  ;;  %v13947_v22 = vld [vmem:[#allocation2 + $0x68] ss:$16 sps:$4 sm:$0xff]  }
  0x7a   : > { %3696 = vmatpush1.bf16.msra.mxu0 %v13944_v18  ;;  %v983_v63 = vcombine.high %v15284_v45, %v15268_v28  ;;  %v15309_v0 = vrot.slane %v12985_v51, %v15090_v17  ;;  %v13006_v50 = vcombine.low %v15272_v29, %v981_v24  ;;  %v15315_v2 = vrot.slane %v990_v61, %v15090_v17 }
  0x7b   : > { %v987_v20 = vcombine.high %v15287_v48, %v15290_v49  ;;  %3697 = vmatprep.subr.bf16.mxu0 %v13957_v34  ;;  %v1980_v21 = vrot.slane %v1937_v58, %v15090_v17  ;;  %v1966_v44 = vrot.slane %v1936_v47, %v15090_v17  ;;  %v13008_v6 = vcombine.low %v985_v54, %v15284_v45  ;;  %v13965_v34 = vld [vmem:[#allocation2 + $0x460] ss:$16 sps:$4 sm:$0xff]  }
  0x7c   : > { %3809 = vmatpush1.bf16.msra.mxu1 %v13940_v10  ;;  %v13010_v43 = vcombine.low %v15287_v48, %v983_v63  ;;  %v2000_v3 = vrot.slane %v13006_v50, %v15090_v17  ;;  %v15321_v11 = vcombine.low %v15280_v41, %v433_v42  ;;  %v15324_v12 = vcombine.low %v15295_v52, %v435_v62  ;;  %v13952_v42 = vld [vmem:[#allocation2 + $0x4c] ss:$16 sps:$4 sm:$0xff]   ;;  %v13950_v63 = vld [vmem:[#allocation2 + $0x48] ss:$16 sps:$4 sm:$0xff]  }
  0x7d   : > { %3810 = vmatprep.subr.bf16.mxu1 %v13949_v33  ;;  %v15326_v18 = vcombine.low %v1959_v26, %v1980_v21  ;;  %v15328_v15 = vcombine.high %v1959_v26, %v1980_v21  ;;  %v15330_v10 = vcombine.low %v1945_v19, %v1966_v44  ;;  %v15332_v16 = vcombine.high %v1945_v19, %v1966_v44  ;;  %v13978_v26 = vld [vmem:[#allocation2 + $0x444] ss:$16 sps:$4 sm:$0xff]  }
  0x7e   : > { %3698 = vmatpush1.bf16.msra.mxu0 %v13955_v4  ;;  %v1035_v33 = vcombine.low %v15309_v0, %v15315_v2  ;;  %v2014_v35 = vrot.slane %v13008_v6, %v15090_v17  ;;  %v2028_v24 = vrot.slane %v13010_v43, %v15090_v17  ;;  %v514_v51 = vshrl.u32 %v15321_v11, 16 }
  0x7f   : > { %19609 = vst [vmem:[#allocation12_spill] sm:$0xff] %v15328_v15  ;;  %19610 = vst [vmem:[#allocation13_spill] sm:$0xff] %v15330_v10  ;;  %3699 = vmatprep.subr.bf16.mxu0 %v13967_v53  ;;  %3511 = vmatprep.mubr.bf16.mxu0 %v15326_v18  ;;  %v516_v19 = vshll.u32 %v15321_v11, 16  ;;  %v521_v58 = vshll.u32 %v15324_v12, 16  ;;  %v525_v47 = vshrl.u32 %v15324_v12, 16  ;;  %v550_v54 = vrot.slane %v15321_v11, 1 }
  0x80   : > { %19611 = vst [vmem:[#allocation14_spill] sm:$0xff] %v15332_v16  ;;  %3622 = vmatprep.mubr.bf16.mxu1 %v15328_v15  ;;  %3512 = vmatmul.mubr.bf16.gmra.mxu0 %v15330_v10  ;;  %v15348_v61 = vrot.slane %v1035_v33, %v15090_v17  ;;  %v2051_v62 = vcombine.high %v2000_v3, %v2014_v35  ;;  %v15351_v50 = vrot.slane %v15324_v12, 1  ;;  %v593_v44 = vrot.slane %v514_v51, 1 }
  0x81   : > { %3623 = vmatmul.mubr.bf16.gmra.mxu1 %v15332_v16  ;;  %v2050_v4 = vcombine.low %v2000_v3, %v2014_v35  ;;  %v518_v53 = vrot.slane %v516_v19, 1  ;;  %v15353_v21 = vrot.slane %v521_v58, 1  ;;  %v594_v6 = vrot.slane %v516_v19, 2  ;;  %v13960_v35 = vld [vmem:[#allocation2 + $0x2c] ss:$16 sps:$4 sm:$0xff]  }
  0x82   : > { %3811 = vmatpush1.bf16.msra.mxu1 %v13947_v22  ;;  %3700 = vmatpush1.bf16.msra.mxu0 %v13965_v34  ;;  %v13012_v43 = vcombine.low %v987_v20, %v15348_v61  ;;  %v2076_v32 = vrot.slane %v2051_v62, %v15090_v17  ;;  %v15360_v3 = vsel %vm543_vm2, %v550_v54, %v15351_v50  ;;  %v596_v39 = vrot.slane %v525_v47, 1  ;;  %v13976_v19 = vld [vmem:[#allocation2 + $0x440] ss:$16 sps:$4 sm:$0xff]  }
  0x83   : > { %v2062_v33 = vrot.slane %v2050_v4, %v15090_v17  ;;  %3812 = vmatprep.subr.bf16.mxu1 %v13952_v42  ;;  %v519_v27 = vor.u32 %v518_v53, %v514_v51  ;;  %v595_v22 = vor.u32 %v594_v6, %v593_v44  ;;  %v597_v46 = vrot.slane %v521_v58, 2  ;;  %3701 = vmatprep.subr.bf16.mxu0 %v13978_v26  ;;  %v13988_v4 = vld [vmem:[#allocation2 + $0x424] ss:$16 sps:$4 sm:$0xff]   ;;  %v13958_v44 = vld [vmem:[#allocation2 + $0x28] ss:$16 sps:$4 sm:$0xff]  }
  0x84   : > { %v2042_v20 = vrot.slane %v13012_v43, %v15090_v17  ;;  %v19612_v34 = vrot.slane %v15149_v13, 2  ;;  %v19613_v62 = vrot.slane %v15112_v30, 2  ;;  %v989_v54 = vcombine.high %v15112_v30, %v15230_v37  ;;  %v13963_v37 = vld [vmem:[#allocation2 + $0xc] ss:$16 sps:$4 sm:$0xff]  }
  0x85   : > { %v991_v51 = vcombine.high %v15136_v55, %v15241_v59  ;;  %v15376_v58 = vsel %vm482_vm0, %v519_v27, %v15353_v21  ;;  %v598_v26 = vor.u32 %v597_v46, %v596_v39  ;;  %v1036_v27 = vcombine.high %v15309_v0, %v15315_v2  ;;  %v13986_v46 = vld [vmem:[#allocation2 + $0x420] ss:$16 sps:$4 sm:$0xff]  }
  0x86   : > { %v627_v42 = vsel %vm617_vm3, %v19613_v62, %v19612_v34  ;;  %3813 = vmatpush1.bf16.msra.mxu1 %v13950_v63  ;;  %v2054_v6 = vcombine.high %v2028_v24, %v2042_v20  ;;  %v2053_v43 = vcombine.low %v2028_v24, %v2042_v20  ;;  %v1006_v34 = vrot.slane %v989_v54, %v15090_v17 }
  0x87   : > { %v992_v53 = vcombine.high %v627_v42, %v627_v42  ;;  %v1027_v13 = vrot.slane %v627_v42, %v15090_v17  ;;  %v1020_v30 = vrot.slane %v991_v51, %v15090_v17  ;;  %3814 = vmatprep.subr.bf16.mxu1 %v13960_v35  ;;  %v15382_v55 = vsel %vm568_vm1, %v595_v22, %v598_v26 }
  0x88   : > { %3702 = vmatpush1.bf16.msra.mxu0 %v13976_v19  ;;  %v2097_v24 = vrot.slane %v2054_v6, %v15090_v17  ;;  %v2083_v63 = vrot.slane %v2053_v43, %v15090_v17  ;;  %v15392_v35 = vrot.slane %v1036_v27, %v15090_v17  ;;  %v1106_v43 = vcombine.low %v15360_v3, %v15382_v55 }
  0x89   : > { %v15385_v59 = vrot.slane %v992_v53, %v15090_v17  ;;  %v1039_v39 = vcombine.high %v1027_v13, %v1027_v13  ;;  %v1037_v20 = vcombine.low %v1006_v34, %v1020_v30  ;;  %v1038_v62 = vcombine.high %v1006_v34, %v1020_v30  ;;  %3703 = vmatprep.subr.bf16.mxu0 %v13988_v4  ;;  %v13961_v4 = vld [vmem:[#allocation2 + $0x8] ss:$16 sps:$4 sm:$0xff]  }
  0x8a   : > { %v15395_v22 = vrot.slane %v1027_v13, %v15090_v17  ;;  %3815 = vmatpush1.bf16.msra.mxu1 %v13958_v44  ;;  %v15404_v2 = vcombine.low %v2076_v32, %v2097_v24  ;;  %v15406_v19 = vcombine.high %v2076_v32, %v2097_v24  ;;  %v15408_v54 = vcombine.low %v2062_v33, %v2083_v63  ;;  %v13970_v32 = vld [vmem:[#allocation2 + $0x1ec] ss:$16 sps:$4 sm:$0xff]   ;;  %v13995_v24 = vld [vmem:[#allocation2 + $0x400] ss:$16 sps:$4 sm:$0xff]  }
  0x8b   : > { %v15399_v42 = vrot.slane %v15385_v59, %v15090_v17  ;;  %v15402_v0 = vrot.slane %v1039_v39, %v15090_v17  ;;  %v15410_v51 = vcombine.high %v2062_v33, %v2083_v63  ;;  %3816 = vmatprep.subr.bf16.mxu1 %v13963_v37  ;;  %v15413_v53 = vrot.slane %v1037_v20, %v15090_v17  ;;  %v13997_v37 = vld [vmem:[#allocation2 + $0x404] ss:$16 sps:$4 sm:$0xff]  }
  0x8c   : > { %19614 = vst [vmem:[#allocation15_spill] sm:$0xff] %v15404_v2  ;;  %19615 = vst [vmem:[#allocation16_spill] sm:$0xff] %v15406_v19  ;;  %v15416_v13 = vrot.slane %v1038_v62, %v15090_v17  ;;  %v1098_v6 = vcombine.high %v15348_v61, %v15395_v22  ;;  %3704 = vmatpush1.bf16.msra.mxu0 %v13986_v46  ;;  %3521 = vmatprep.mubr.bf16.mxu0 %v15404_v2  ;;  %v631_v46 = vrot.slane %v15211_v23, 2  ;;  %v13968_v62 = vld [vmem:[#allocation2 + $0x1e8] ss:$16 sps:$4 sm:$0xff]  }
  0x8d   : > { %19616 = vst [vmem:[#allocation17_spill] sm:$0xff] %v15408_v54  ;;  %19617 = vst [vmem:[#allocation18_spill] sm:$0xff] %v15410_v51  ;;  %v1102_v44 = vcombine.high %v15392_v35, %v15402_v0  ;;  %3632 = vmatprep.mubr.bf16.mxu1 %v15406_v19  ;;  %v12986_v33 = vcombine.low %v15280_v41, %v15376_v58  ;;  %v15431_v34 = vor.u32 %v525_v47, %v15353_v21 }
  0x8e   : > { %3522 = vmatmul.mubr.bf16.gmra.mxu0 %v15408_v54  ;;  %3633 = vmatmul.mubr.bf16.gmra.mxu1 %v15410_v51  ;;  %v1100_v27 = vcombine.high %v15413_v53, %v15399_v42  ;;  %v13014_v41 = vcombine.low %v15392_v35, %v1098_v6  ;;  %v1129_v21 = vrot.slane %v1106_v43, %v15090_v17  ;;  %v15455_v43 = vld [vmem:[%s15063_s22 + $0x3c] sm:$0xf]  ;;  %v440_v51 = vld [vmem:[%s15063_s22 + $0x48] sm:$0xf] }
  0x8f   : > { %v13016_v39 = vcombine.low %v1102_v44, %v15413_v53  ;;  %v1115_v47 = vrot.slane %v12986_v33, %v15090_v17  ;;  %3817 = vmatpush1.bf16.msra.mxu1 %v13961_v4  ;;  %v15445_v63 = vsel %vm568_vm1, %v598_v26, %v15257_v31  ;;  %v1105_v20 = vcombine.high %v15321_v11, %v15376_v58  ;;  %v13973_v4 = vld [vmem:[#allocation2 + $0x1cc] ss:$16 sps:$4 sm:$0xff]  }
  0x90   : > { %v13018_v6 = vcombine.low %v15416_v13, %v1100_v27  ;;  %v2117_v44 = vrot.slane %v13014_v41, %v15090_v17  ;;  %v1107_v33 = vcombine.high %v15360_v3, %v15382_v55  ;;  %3818 = vmatprep.subr.bf16.mxu1 %v13970_v32  ;;  %v12987_v58 = vcombine.low %v15295_v52, %v15431_v34  ;;  %v13971_v27 = vld [vmem:[#allocation2 + $0x1c8] ss:$16 sps:$4 sm:$0xff]   ;;  %v14006_v41 = vld [vmem:[#allocation2 + $0x2ec] ss:$16 sps:$4 sm:$0xff]   ;;  %v438_v32 = vld [vmem:[%s15063_s22 + $0x40] sm:$0xf] }
  0x91   : > { %v2131_v23 = vrot.slane %v13016_v39, %v15090_v17  ;;  %v1151_v31 = vcombine.low %v1115_v47, %v1129_v21  ;;  %v1152_v26 = vcombine.high %v1115_v47, %v1129_v21  ;;  %v1122_v30 = vrot.slane %v1105_v20, %v15090_v17  ;;  %3705 = vmatprep.subr.bf16.mxu0 %v13997_v37  ;;  %v15469_v37 = vld [vmem:[%s15063_s22 + $0x44] sm:$0xf] }
  0x92   : > { %v2145_v39 = vrot.slane %v13018_v6, %v15090_v17  ;;  %v1136_v55 = vrot.slane %v1107_v33, %v15090_v17  ;;  %3706 = vmatpush1.bf16.msra.mxu0 %v13995_v24  ;;  %v1223_v20 = vcombine.low %v15351_v50, %v15445_v63  ;;  %v1232_v52 = vrot.slane %v12987_v58, %v15090_v17  ;;  %v13981_v24 = vld [vmem:[#allocation2 + $0x1ac] ss:$16 sps:$4 sm:$0xff]  }
  0x93   : > { %v2168_v60 = vcombine.high %v2117_v44, %v2131_v23  ;;  %v2167_v3 = vcombine.low %v2117_v44, %v2131_v23  ;;  %v1163_v47 = vrot.slane %v1151_v31, %v15090_v17  ;;  %v1177_v21 = vrot.slane %v1152_v26, %v15090_v17  ;;  %3819 = vmatpush2.bf16.msra.mxu1 %v13968_v62 }
  0x94   : > { %v1153_v23 = vcombine.low %v1122_v30, %v1136_v55  ;;  %v1154_v33 = vcombine.high %v1122_v30, %v1136_v55  ;;  %3820 = vmatprep.subr.bf16.mxu1 %v13973_v4  ;;  %v1246_v26 = vrot.slane %v1223_v20, %v15090_v17  ;;  %v15476_v16 = vcombine.low %v15455_v43, %v438_v32 }
  0x95   : > { %v2193_v6 = vrot.slane %v2168_v60, %v15090_v17  ;;  %v2179_v44 = vrot.slane %v2167_v3, %v15090_v17  ;;  %v13020_v31 = vcombine.low %v1163_v47, %v1177_v21  ;;  %v13022_v19 = vcombine.high %v1163_v47, %v1177_v21  ;;  %3913 = vmatprep.subr.bf16.mxu0 %v14006_v41  ;;  %v13979_v41 = vld [vmem:[#allocation2 + $0x1a8] ss:$16 sps:$4 sm:$0xff]  }
  0x96   : > { %v1170_v62 = vrot.slane %v1153_v23, %v15090_v17  ;;  %v1184_v58 = vrot.slane %v1154_v33, %v15090_v17  ;;  %v15481_v60 = vcombine.low %v15469_v37, %v440_v51  ;;  %v19618_v3 = vrot.slane %v15324_v12, 2  ;;  %v13984_v33 = vld [vmem:[#allocation2 + $0x18c] ss:$16 sps:$4 sm:$0xff]  }
  0x97   : > { %v2159_v4 = vrot.slane %v13020_v31, %v15090_v17  ;;  %v1268_v55 = vcombine.low %v1232_v52, %v1246_v26  ;;  %v1269_v47 = vcombine.high %v1232_v52, %v1246_v26  ;;  %v2234_v32 = vrot.slane %v13022_v19, %v15090_v17  ;;  %3821 = vmatpush2.bf16.msra.mxu1 %v13971_v27 }
  0x98   : > { %v15486_v30 = vsel %vm617_vm3, %v19618_v3, %v631_v46  ;;  %v13024_v21 = vcombine.low %v1170_v62, %v1184_v58  ;;  %v13026_v20 = vcombine.high %v1170_v62, %v1184_v58  ;;  %v529_v23 = vshrl.u32 %v15476_v16, 16  ;;  %3822 = vmatprep.subr.bf16.mxu1 %v13981_v24  ;;  %v13982_v3 = vld [vmem:[#allocation2 + $0x188] ss:$16 sps:$4 sm:$0xff]  }
  0x99   : > { %v531_v51 = vshll.u32 %v15476_v16, 16  ;;  %v2171_v15 = vcombine.high %v2145_v39, %v2159_v4  ;;  %v2170_v9 = vcombine.low %v2145_v39, %v2159_v4  ;;  %v15493_v46 = vrot.slane %v1268_v55, %v15090_v17 }
  0x9a   : > { %v15496_v31 = vrot.slane %v1269_v47, %v15090_v17  ;;  %v2248_v19 = vrot.slane %v13024_v21, %v15090_v17  ;;  %v2262_v27 = vrot.slane %v13026_v20, %v15090_v17  ;;  %v536_v26 = vshll.u32 %v15481_v60, 16  ;;  %v13991_v20 = vld [vmem:[#allocation2 + $0x16c] ss:$16 sps:$4 sm:$0xff]  }
  0x9b   : > { %v533_v52 = vrot.slane %v531_v51, 1  ;;  %v2214_v62 = vrot.slane %v2171_v15, %v15090_v17  ;;  %v2200_v24 = vrot.slane %v2170_v9, %v15090_v17  ;;  %v19555_v58 = vshrl.u32 %v15481_v60, 16  ;;  %3823 = vmatpush2.bf16.msra.mxu1 %v13979_v41 }
  0x9c   : > { %v13028_v39 = vcombine.low %v15493_v46, %v15496_v31  ;;  %v2285_v4 = vcombine.high %v2234_v32, %v2248_v19  ;;  %v2284_v55 = vcombine.low %v2234_v32, %v2248_v19  ;;  %v15506_v21 = vrot.slane %v536_v26, 1  ;;  %3824 = vmatprep.subr.bf16.mxu1 %v13984_v33 }
  0x9d   : > { %v534_v47 = vor.u32 %v533_v52, %v529_v23  ;;  %v15508_v7 = vcombine.low %v2193_v6, %v2214_v62  ;;  %v15510_v54 = vcombine.high %v2193_v6, %v2214_v62  ;;  %v15512_v15 = vcombine.low %v2179_v44, %v2200_v24  ;;  %v13989_v62 = vld [vmem:[#allocation2 + $0x168] ss:$16 sps:$4 sm:$0xff]  }
  0x9e   : > { %v15514_v9 = vcombine.high %v2179_v44, %v2200_v24  ;;  %v2276_v2 = vrot.slane %v13028_v39, %v15090_v17  ;;  %v2310_v41 = vrot.slane %v2285_v4, %v15090_v17  ;;  %v2296_v32 = vrot.slane %v2284_v55, %v15090_v17 }
  0x9f   : > { %19619 = vst [vmem:[#allocation19_spill] sm:$0xff] %v15508_v7  ;;  %19620 = vst [vmem:[#allocation20_spill] sm:$0xff] %v15510_v54  ;;  %v15521_v19 = vsel %vm482_vm0, %v534_v47, %v15506_v21  ;;  %3531 = vmatprep.mubr.bf16.mxu0 %v15508_v7  ;;  %3642 = vmatprep.mubr.bf16.mxu1 %v15510_v54  ;;  %v553_v6 = vrot.slane %v15476_v16, 1  ;;  %v15527_v44 = vrot.slane %v15481_v60, 1  ;;  %v605_v33 = vrot.slane %v529_v23, 1 }
  0xa0   : > { %19621 = vst [vmem:[#allocation21_spill] sm:$0xff] %v15512_v15  ;;  %19622 = vst [vmem:[#allocation22_spill] sm:$0xff] %v15514_v9  ;;  %v606_v52 = vrot.slane %v531_v51, 2  ;;  %3532 = vmatmul.mubr.bf16.gmra.mxu0 %v15512_v15  ;;  %3643 = vmatmul.mubr.bf16.gmra.mxu1 %v15514_v9  ;;  %v2288_v24 = vcombine.high %v2262_v27, %v2276_v2  ;;  %v2287_v39 = vcombine.low %v2262_v27, %v2276_v2  ;;  %v13985_v47 = vld [vmem:[%s15063_s22 + $0x4c] ss:$0 sps:$4 sm:$0x11]  }
  0xa1   : > { %v608_v4 = vrot.slane %v19555_v58, 1  ;;  %v609_v55 = vrot.slane %v536_v26, 2  ;;  %v15536_v54 = vsel %vm543_vm2, %v553_v6, %v15527_v44  ;;  %v633_v23 = vrot.slane %v15476_v16, 2  ;;  %3825 = vmatpush2.bf16.msra.mxu1 %v13982_v3  ;;  %v13994_v15 = vld [vmem:[#allocation2 + $0x14c] ss:$16 sps:$4 sm:$0xff]  }
  0xa2   : > { %v607_v7 = vor.u32 %v606_v52, %v605_v33  ;;  %v634_v51 = vrot.slane %v15481_v60, 2  ;;  %v2331_v9 = vrot.slane %v2288_v24, %v15090_v17  ;;  %v2317_v2 = vrot.slane %v2287_v39, %v15090_v17  ;;  %3826 = vmatprep.subr.bf16.mxu1 %v13991_v20  ;;  %v13992_v52 = vld [vmem:[#allocation2 + $0x148] ss:$16 sps:$4 sm:$0xff]   ;;  %v14000_v20 = vld [vmem:[#allocation2 + $0x12c] ss:$16 sps:$4 sm:$0xff]  }
  0xa3   : > { %v610_v27 = vor.u32 %v609_v55, %v608_v4  ;;  %v1222_v26 = vcombine.high %v15324_v12, %v15431_v34  ;;  %v1224_v6 = vcombine.high %v15351_v50, %v15445_v63  ;;  %v1225_v33 = vcombine.high %v15486_v30, %v15486_v30 }
  0xa4   : > { %v635_v58 = vsel %vm617_vm3, %v633_v23, %v634_v51  ;;  %v12988_v3 = vcombine.low %v15455_v43, %v15521_v19  ;;  %v15551_v24 = vcombine.low %v2310_v41, %v2331_v9  ;;  %v15553_v39 = vcombine.high %v2310_v41, %v2331_v9 }
  0xa5   : > { %v15555_v4 = vcombine.low %v2296_v32, %v2317_v2  ;;  %v15557_v34 = vcombine.high %v2296_v32, %v2317_v2  ;;  %v611_v55 = vsel %vm568_vm1, %v607_v7, %v610_v27  ;;  %v1239_v50 = vrot.slane %v1222_v26, %v15090_v17  ;;  %3827 = vmatpush2.bf16.msra.mxu1 %v13989_v62 }
  0xa6   : > { %19623 = vst [vmem:[#allocation23_spill] sm:$0xff] %v15551_v24  ;;  %19624 = vst [vmem:[#allocation24_spill] sm:$0xff] %v15553_v39  ;;  %v1253_v63 = vrot.slane %v1224_v6, %v15090_v17  ;;  %v15563_v23 = vrot.slane %v1225_v33, %v15090_v17  ;;  %3541 = vmatprep.mubr.bf16.mxu0 %v15551_v24  ;;  %3652 = vmatprep.mubr.bf16.mxu1 %v15553_v39  ;;  %v613_v32 = vshll.u32 %v13985_v47, 16  ;;  %v13998_v6 = vld [vmem:[#allocation2 + $0x128] ss:$16 sps:$4 sm:$0xff]   ;;  %vm12881_vm2 = vcmask 8192  }
  0xa7   : > { %19625 = vst [vmem:[#allocation25_spill] sm:$0xff] %v15555_v4  ;;  %19626 = vst [vmem:[#allocation26_spill] sm:$0xff] %v15557_v34  ;;  %v1339_v43 = vcombine.low %v15536_v54, %v611_v55  ;;  %v1348_v9 = vrot.slane %v12988_v3, %v15090_v17  ;;  %v1376_v41 = vrot.slane %v635_v58, %v15090_v17  ;;  %3828 = vmatprep.subr.bf16.mxu1 %v13994_v15  ;;  %v14003_v24 = vld [vmem:[#allocation2 + $0x10c] ss:$16 sps:$4 sm:$0xff]   ;;  %vm10729_vm0 = vsmask.f32 3328 }
  0xa8   : > { %19627 = vst [vmem:[#allocation27_spill] sm:$0xff] %v15563_v23  ;;  %v1270_v7 = vcombine.low %v1239_v50, %v1253_v63  ;;  %v1271_v2 = vcombine.high %v1239_v50, %v1253_v63  ;;  %v15572_v26 = vrot.slane %v15563_v23, %v15090_v17  ;;  %v13030_v62 = vcombine.high %v15493_v46, %v15496_v31 }
  0xa9   : > { %3542 = vmatmul.mubr.bf16.gmra.mxu0 %v15555_v4  ;;  %3653 = vmatmul.mubr.bf16.gmra.mxu1 %v15557_v34  ;;  %v1362_v33 = vrot.slane %v1339_v43, %v15090_v17  ;;  %v15580_v3 = vrot.slane %v1376_v41, %v15090_v17  ;;  %v19628_v50 = vshrl.u32 %v15481_v60, 16  ;;  %v615_v39 = vrot.slane %v613_v32, 2 }
  0xaa   : > { %v1287_v46 = vrot.slane %v1270_v7, %v15090_v17  ;;  %v1301_v31 = vrot.slane %v1271_v2, %v15090_v17  ;;  %v2351_v15 = vrot.slane %v13030_v62, %v15090_v17  ;;  %v636_v4 = vrot.slane %v13985_v47, 2  ;;  %3829 = vmatpush2.bf16.msra.mxu1 %v13992_v52  ;;  %v14001_v62 = vld [vmem:[#allocation2 + $0x108] ss:$16 sps:$4 sm:$0xff]  }
  0xab   : > { %v15585_v63 = vor.u32 %v19628_v50, %v15506_v21  ;;  %v1384_v34 = vcombine.low %v1348_v9, %v1362_v33  ;;  %v1385_v43 = vcombine.high %v1348_v9, %v1362_v33  ;;  %v15591_v10 = vsel %vm568_vm1, %v610_v27, %v615_v39  ;;  %3830 = vmatprep.subr.bf16.mxu1 %v14000_v20  ;;  %vm19174_vm1 = vmand %vm10728_vm15, %vm10729_vm0 }
  0xac   : > { %v1338_v23 = vcombine.high %v15476_v16, %v15521_v19  ;;  %v1333_v21 = vcombine.high %v1287_v46, %v15572_v26  ;;  %v13032_v32 = vcombine.low %v1287_v46, %v1301_v31  ;;  %v15597_v7 = vsel %vm617_vm3, %v634_v51, %v636_v4  ;;  %v14009_v16 = vld [vmem:[#allocation2 + $0x4ec] ss:$16 sps:$4 sm:$0xff]  }
  0xad   : > { %v1340_v2 = vcombine.high %v15536_v54, %v611_v55  ;;  %v15601_v47 = vrot.slane %v1384_v34, %v15090_v17  ;;  %v15604_v52 = vrot.slane %v1385_v43, %v15090_v17  ;;  %v1341_v27 = vcombine.high %v635_v58, %v635_v58 }
  0xae   : > { %v1355_v39 = vrot.slane %v1338_v23, %v15090_v17  ;;  %v2365_v19 = vrot.slane %v13032_v32, %v15090_v17  ;;  %v1388_v9 = vcombine.high %v1376_v41, %v1376_v41  ;;  %v12989_v51 = vcombine.low %v15469_v37, %v15585_v63  ;;  %3831 = vmatpush2.bf16.msra.mxu1 %v13998_v6 }
  0xaf   : > { %v1369_v20 = vrot.slane %v1340_v2, %v15090_v17  ;;  %v1447_v54 = vcombine.high %v15601_v47, %v15580_v3  ;;  %v13034_v4 = vcombine.low %v1333_v21, %v15601_v47  ;;  %v1383_v34 = vrot.slane %v1341_v27, %v15090_v17  ;;  %3832 = vmatprep.subr.bf16.mxu1 %v14003_v24 }
  0xb0   : > { %v1456_v58 = vcombine.low %v15527_v44, %v15591_v10  ;;  %v2402_v55 = vcombine.high %v2351_v15, %v2365_v19  ;;  %v2401_v23 = vcombine.low %v2351_v15, %v2365_v19  ;;  %v15632_v32 = vrot.slane %v1388_v9, %v15090_v17 }
  0xb1   : > { %v1386_v33 = vcombine.low %v1355_v39, %v1369_v20  ;;  %v1387_v50 = vcombine.high %v1355_v39, %v1369_v20  ;;  %v13036_v41 = vcombine.low %v15604_v52, %v1447_v54  ;;  %v2379_v37 = vrot.slane %v13034_v4, %v15090_v17 }
  0xb2   : > { %v1389_v6 = vcombine.high %v1383_v34, %v1383_v34  ;;  %v15620_v46 = vrot.slane %v1383_v34, %v15090_v17  ;;  %v2427_v31 = vrot.slane %v2402_v55, %v15090_v17  ;;  %v2413_v43 = vrot.slane %v2401_v23, %v15090_v17  ;;  %3833 = vmatpush2.bf16.msra.mxu1 %v14001_v62 }
  0xb3   : > { %v15625_v21 = vrot.slane %v1386_v33, %v15090_v17  ;;  %v15628_v24 = vrot.slane %v1387_v50, %v15090_v17  ;;  %v2393_v15 = vrot.slane %v13036_v41, %v15090_v17  ;;  %v1465_v27 = vrot.slane %v12989_v51, %v15090_v17  ;;  %4024 = vmatprep.subr.bf16.mxu1 %v14009_v16 }
  0xb4   : > { %v15635_v2 = vrot.slane %v1389_v6, %v15090_v17  ;;  %v1479_v19 = vrot.slane %v1456_v58, %v15090_v17  ;;  %v1493_v20 = vrot.slane %v15597_v7, %v15090_v17  ;;  %v1455_v62 = vcombine.high %v15481_v60, %v15585_v63 }
  0xb5   : > { %v1449_v39 = vcombine.high %v15625_v21, %v15620_v46  ;;  %v2405_v54 = vcombine.high %v2379_v37, %v2393_v15  ;;  %v2404_v9 = vcombine.low %v2379_v37, %v2393_v15  ;;  %v1451_v4 = vcombine.high %v15604_v52, %v15632_v32 }
  0xb6   : > { %v1453_v51 = vcombine.high %v15628_v24, %v15635_v2  ;;  %v1501_v16 = vcombine.low %v1465_v27, %v1479_v19  ;;  %v1502_v34 = vcombine.high %v1465_v27, %v1479_v19  ;;  %v15650_v55 = vrot.slane %v1493_v20, %v15090_v17 }
  0xb7   : > { %v13040_v58 = vcombine.low %v15628_v24, %v1449_v39  ;;  %v2448_v23 = vrot.slane %v2405_v54, %v15090_v17  ;;  %v2434_v33 = vrot.slane %v2404_v9, %v15090_v17  ;;  %v13038_v60 = vcombine.low %v1451_v4, %v15625_v21 }
  0xb8   : > { %v1457_v63 = vcombine.high %v15527_v44, %v15591_v10  ;;  %v15659_v50 = vrot.slane %v1501_v16, %v15090_v17  ;;  %v15662_v41 = vrot.slane %v1502_v34, %v15090_v17  ;;  %v1458_v6 = vcombine.high %v15597_v7, %v15597_v7 }
  0xb9   : > { %v2482_v37 = vrot.slane %v13040_v58, %v15090_v17  ;;  %v15667_v15 = vcombine.low %v2427_v31, %v2448_v23  ;;  %v15669_v27 = vcombine.high %v2427_v31, %v2448_v23  ;;  %v15671_v39 = vcombine.low %v2413_v43, %v2434_v33 }
  0xba   : > { %v15673_v19 = vcombine.high %v2413_v43, %v2434_v33  ;;  %v1564_v10 = vcombine.high %v15659_v50, %v15650_v55  ;;  %v13042_v44 = vcombine.low %v1453_v51, %v15659_v50  ;;  %v2468_v54 = vrot.slane %v13038_v60, %v15090_v17 }
  0xbb   : > { %19629 = vst [vmem:[#allocation28_spill] sm:$0xff] %v15669_v27  ;;  %19630 = vst [vmem:[#allocation29_spill] sm:$0xff] %v15671_v39  ;;  %v1472_v9 = vrot.slane %v1455_v62, %v15090_v17  ;;  %3551 = vmatprep.mubr.bf16.mxu0 %v15667_v15  ;;  %3662 = vmatprep.mubr.bf16.mxu1 %v15669_v27  ;;  %v1486_v7 = vrot.slane %v1457_v63, %v15090_v17  ;;  %v19632_v63 = vrot.slane %v15077_v57, 2 }
  0xbc   : > { %19631 = vst [vmem:[#allocation30_spill] sm:$0xff] %v15673_v19  ;;  %v15684_v31 = vrot.slane %v1458_v6, %v15090_v17  ;;  %v1505_v43 = vcombine.high %v1493_v20, %v1493_v20  ;;  %3552 = vmatmul.mubr.bf16.gmra.mxu0 %v15671_v39  ;;  %3663 = vmatmul.mubr.bf16.gmra.mxu1 %v15673_v19  ;;  %v19633_v6 = vrot.slane %v15074_v56, 2 }
  0xbd   : > { %v13044_v4 = vcombine.low %v15662_v41, %v1564_v10  ;;  %v2496_v51 = vrot.slane %v13042_v44, %v15090_v17  ;;  %v2519_v16 = vcombine.high %v2468_v54, %v2482_v37  ;;  %v2518_v62 = vcombine.low %v2468_v54, %v2482_v37 }
  0xbe   : > { %v1503_v34 = vcombine.low %v1472_v9, %v1486_v7  ;;  %v1504_v58 = vcombine.high %v1472_v9, %v1486_v7  ;;  %v15692_v23 = vrot.slane %v15684_v31, %v15090_v17  ;;  %v15697_v60 = vrot.slane %v1505_v43, %v15090_v17 }
  0xbf   : > { %v2510_v33 = vrot.slane %v13044_v4, %v15090_v17  ;;  %v2544_v20 = vrot.slane %v2519_v16, %v15090_v17  ;;  %v620_v10 = vsel %vm617_vm3, %v19633_v6, %v19632_v63  ;;  %v2530_v37 = vrot.slane %v2518_v62, %v15090_v17 }
  0xc0   : > { %v15706_v44 = vrot.slane %v1503_v34, %v15090_v17  ;;  %v15709_v54 = vrot.slane %v1504_v58, %v15090_v17  ;;  %v642_v9 = vcombine.high %v620_v10, %v620_v10  ;;  %v1568_v43 = vcombine.high %v15662_v41, %v15697_v60 }
  0xc1   : > { %v2522_v7 = vcombine.high %v2496_v51, %v2510_v33  ;;  %v2521_v4 = vcombine.low %v2496_v51, %v2510_v33  ;;  %v677_v57 = vrot.slane %v620_v10, %v15090_v17  ;;  %v794_v62 = vrot.slane %v15169_v40, %v15090_v17 }
  0xc2   : > { %v1566_v56 = vcombine.high %v15706_v44, %v15692_v23  ;;  %v684_v16 = vrot.slane %v642_v9, %v15090_v17  ;;  %v807_v34 = vcombine.high %v15194_v1, %v15194_v1  ;;  %v13046_v33 = vcombine.low %v1568_v43, %v15706_v44 }
  0xc3   : > { %v2565_v58 = vrot.slane %v2522_v7, %v15090_v17  ;;  %v2551_v51 = vrot.slane %v2521_v4, %v15090_v17  ;;  %v689_v63 = vcombine.high %v677_v57, %v677_v57  ;;  %v725_v19 = vrot.slane %v677_v57, %v15090_v17 }
  0xc4   : > { %v13048_v6 = vcombine.low %v15709_v54, %v1566_v56  ;;  %v690_v10 = vcombine.high %v684_v16, %v684_v16  ;;  %v732_v9 = vrot.slane %v684_v16, %v15090_v17  ;;  %v2581_v7 = vrot.slane %v13046_v33, %v15090_v17 }
  0xc5   : > { %v15727_v27 = vcombine.low %v2544_v20, %v2565_v58  ;;  %v15729_v40 = vcombine.high %v2544_v20, %v2565_v58  ;;  %v15731_v39 = vcombine.low %v2530_v37, %v2551_v51  ;;  %v15733_v1 = vcombine.high %v2530_v37, %v2551_v51 }
  0xc6   : > { %v2595_v4 = vrot.slane %v13048_v6, %v15090_v17  ;;  %v739_v43 = vrot.slane %v689_v63, %v15090_v17  ;;  %v746_v56 = vrot.slane %v690_v10, %v15090_v17  ;;  %v806_v57 = vcombine.high %v794_v62, %v794_v62 }
  0xc7   : > { %19634 = vst [vmem:[#allocation31_spill] sm:$0xff] %v15727_v27  ;;  %19635 = vst [vmem:[#allocation32_spill] sm:$0xff] %v15729_v40  ;;  %3561 = vmatprep.mubr.bf16.mxu0 %v15727_v27  ;;  %3672 = vmatprep.mubr.bf16.mxu1 %v15729_v40  ;;  %v842_v20 = vrot.slane %v794_v62, %v15090_v17  ;;  %v863_v16 = vrot.slane %v807_v34, %v15090_v17  ;;  %v628_v33 = vrot.slane %v15321_v11, 2 }
  0xc8   : > { %19636 = vst [vmem:[#allocation33_spill] sm:$0xff] %v15733_v1  ;;  %3562 = vmatmul.mubr.bf16.gmra.mxu0 %v15731_v39  ;;  %3673 = vmatmul.mubr.bf16.gmra.mxu1 %v15733_v1  ;;  %v2604_v37 = vcombine.high %v2581_v7, %v2595_v4  ;;  %v2603_v58 = vcombine.low %v2581_v7, %v2595_v4 }
  0xc9   : > { %v12991_v51 = vcombine.low %v725_v19, %v739_v43  ;;  %v12993_v63 = vcombine.high %v725_v19, %v739_v43  ;;  %v12995_v6 = vcombine.low %v732_v9, %v746_v56  ;;  %v12997_v10 = vcombine.high %v732_v9, %v746_v56 }
  0xca   : > { %v856_v27 = vrot.slane %v806_v57, %v15090_v17  ;;  %v15748_v40 = vrot.slane %v2604_v37, %v15090_v17  ;;  %v15751_v62 = vrot.slane %v2603_v58, %v15090_v17  ;;  %v980_v1 = vcombine.low %v15253_v36, %v15265_v14 }
  0xcb   : > { %v1773_v34 = vrot.slane %v12991_v51, %v15090_v17  ;;  %v1787_v7 = vrot.slane %v12993_v63, %v15090_v17  ;;  %v1801_v11 = vrot.slane %v12995_v6, %v15090_v17  ;;  %v1815_v19 = vrot.slane %v12997_v10, %v15090_v17 }
  0xcc   : > { %v12999_v9 = vcombine.low %v842_v20, %v856_v27  ;;  %3571 = vmatprep.mubr.bf16.mxu0 %v15748_v40  ;;  %v15762_v4 = vcombine.high %v15748_v40, %v15748_v40  ;;  %v15766_v43 = vcombine.high %v15751_v62, %v15751_v62  ;;  %v13001_v56 = vcombine.high %v842_v20, %v856_v27 }
  0xcd   : > { %v13003_v36 = vcombine.low %v15217_v25, %v863_v16  ;;  %v1818_v57 = vcombine.low %v1773_v34, %v1787_v7  ;;  %v1821_v37 = vcombine.low %v1801_v11, %v1815_v19  ;;  %v13005_v58 = vcombine.high %v15217_v25, %v980_v1 }
  0xce   : > { %v1890_v51 = vrot.slane %v12999_v9, %v15090_v17  ;;  %3682 = vmatprep.mubr.bf16.mxu1 %v15762_v4  ;;  %v1904_v63 = vrot.slane %v13001_v56, %v15090_v17  ;;  %v982_v10 = vcombine.low %v15284_v45, %v15268_v28  ;;  %v984_v27 = vcombine.low %v15272_v29, %v15275_v38 }
  0xcf   : > { %v1918_v6 = vrot.slane %v13003_v36, %v15090_v17  ;;  %v1835_v20 = vrot.slane %v1818_v57, %v15090_v17  ;;  %v1856_v16 = vrot.slane %v1821_v37, %v15090_v17  ;;  %v1932_v25 = vrot.slane %v13005_v58, %v15090_v17  ;;  %v14004_v36 = vld [vmem:[#allocation2 + $0x2e8] ss:$16 sps:$4 sm:$0xff]   ;;  %v14012_v58 = vld [vmem:[#allocation2 + $0x2cc] ss:$16 sps:$4 sm:$0xff]  }
  0xd0   : > { %v986_v1 = vcombine.low %v15287_v48, %v15290_v49  ;;  %3572 = vmatmul.mubr.bf16.gmra.mxu0 %v15751_v62  ;;  %3683 = vmatmul.mubr.bf16.gmra.mxu1 %v15766_v43  ;;  %v1097_v34 = vcombine.low %v15348_v61, %v15395_v22  ;;  %v13007_v45 = vcombine.high %v984_v27, %v15265_v14  ;;  %v14939_v7 = vmov 0   ;;  %v14007_v57 = vld [vmem:[#allocation2 + $0x4e8] ss:$16 sps:$4 sm:$0xff]  }
  0xd1   : > { %3723 = vmatprep.mubr.bf16.mxu0 %v14939_v7  ;;  %3834 = vmatprep.mubr.bf16.mxu1 %v15198_v5  ;;  %v1935_v29 = vcombine.low %v1890_v51, %v1904_v63  ;;  %v13009_v11 = vcombine.high %v15275_v38, %v982_v10  ;;  %v15791_v19 = vcombine.low %v1835_v20, %v1856_v16  ;;  %v19637_v37 = vrot.slane %v15324_v12, 2  ;;  %v14018_v10 = vld [vmem:[#allocation2 + $0x4cc] ss:$16 sps:$4 sm:$0xff]  }
  0xd2   : > { %v1938_v48 = vcombine.low %v1918_v6, %v1932_v25  ;;  %v13011_v9 = vcombine.high %v986_v1, %v15268_v28  ;;  %v13013_v56 = vcombine.high %v15290_v49, %v1097_v34  ;;  %v2007_v61 = vrot.slane %v13007_v45, %v15090_v17  ;;  %v14010_v25 = vld [vmem:[#allocation2 + $0x2c8] ss:$16 sps:$4 sm:$0xff]  }
  0xd3   : > { %v2021_v14 = vrot.slane %v13009_v11, %v15090_v17  ;;  %v630_v5 = vsel %vm617_vm3, %v628_v33, %v19637_v37  ;;  %v1040_v38 = vcombine.high %v15385_v59, %v15385_v59  ;;  %v1099_v49 = vcombine.low %v15413_v53, %v15399_v42  ;;  %v14016_v1 = vld [vmem:[#allocation2 + $0x4c8] ss:$16 sps:$4 sm:$0xff]  }
  0xd4   : > { %v2035_v51 = vrot.slane %v13011_v9, %v15090_v17  ;;  %v2049_v28 = vrot.slane %v13013_v56, %v15090_v17  ;;  %v1101_v63 = vcombine.low %v15392_v35, %v15402_v0  ;;  %v1952_v6 = vrot.slane %v1935_v29, %v15090_v17  ;;  %v14015_v29 = vld [vmem:[#allocation2 + $0x2ac] ss:$16 sps:$4 sm:$0xff]  }
  0xd5   : > { %v1096_v12 = vrot.slane %v1040_v38, %v15090_v17  ;;  %v1143_v33 = vrot.slane %v630_v5, %v15090_v17  ;;  %v1973_v59 = vrot.slane %v1938_v48, %v15090_v17  ;;  %v13017_v20 = vcombine.high %v15402_v0, %v1099_v49  ;;  %v14027_v48 = vld [vmem:[#allocation2 + $0x4ac] ss:$16 sps:$4 sm:$0xff]  }
  0xd6   : > { %v13015_v27 = vcombine.high %v1101_v63, %v15395_v22  ;;  %v1108_v16 = vcombine.high %v630_v5, %v630_v5  ;;  %v2052_v53 = vcombine.low %v2007_v61, %v2021_v14  ;;  %v2055_v11 = vcombine.low %v2035_v51, %v2049_v28  ;;  %v14013_v14 = vld [vmem:[#allocation2 + $0x2a8] ss:$16 sps:$4 sm:$0xff]   ;;  %v14036_v63 = vld [vmem:[#allocation2 + $0x48c] ss:$16 sps:$4 sm:$0xff]  }
  0xd7   : > { %v1103_v34 = vcombine.low %v15416_v13, %v1096_v12  ;;  %v1155_v35 = vcombine.high %v1143_v33, %v1143_v33  ;;  %v15816_v45 = vrot.slane %v1143_v33, %v15090_v17  ;;  %v2138_v0 = vrot.slane %v13017_v20, %v15090_v17  ;;  %v14019_v33 = vld [vmem:[#allocation2 + $0x288] ss:$16 sps:$4 sm:$0xff]  }
  0xd8   : > { %3724 = vmatmul.mubr.bf16.vlgmr.msra.gmra.mxu0 %v15791_v19  ;;  %3835 = vmatmul.mubr.bf16.vlgmr.msra.gmra.mxu1 %v15202_v8  ;;  %v2124_v22 = vrot.slane %v13015_v27, %v15090_v17  ;;  %v1150_v56 = vrot.slane %v1108_v16, %v15090_v17  ;;  %v15826_v61 = vcombine.low %v1952_v6, %v1973_v59  ;;  %v19638_v6 = vld [vmem:[#allocation27_spill] sm:$0xff]  ;;  %v19639_v16 = vld [vmem:[#allocation13_spill] sm:$0xff] }
  0xd9   : > { %3914 = vmatpush1.bf16.msra.mxu0 %v14004_v36  ;;  %4025 = vmatpush1.bf16.msra.mxu1 %v14007_v57  ;;  %v1205_v9 = vrot.slane %v1155_v35, %v15090_v17  ;;  %v13019_v13 = vcombine.high %v1103_v34, %v15399_v42  ;;  %v1260_v8 = vrot.slane %v15486_v30, %v15090_v17  ;;  %v14021_v42 = vld [vmem:[#allocation2 + $0x28c] ss:$16 sps:$4 sm:$0xff]   ;;  %v14025_v30 = vld [vmem:[#allocation2 + $0x4a8] ss:$16 sps:$4 sm:$0xff]  }
  0xda   : > { %3915 = vmatprep.subr.bf16.mxu0 %v14012_v58  ;;  %3733 = vmatprep.mubr.bf16.mxu0 %v14939_v7  ;;  %v2069_v36 = vrot.slane %v2052_v53, %v15090_v17  ;;  %v1156_v37 = vcombine.high %v1150_v56, %v1150_v56  ;;  %v2090_v5 = vrot.slane %v2055_v11, %v15090_v17  ;;  %v19640_v11 = vld [vmem:[#allocation15_spill] sm:$0xff] }
  0xdb   : > { %3844 = vmatprep.mubr.bf16.mxu1 %v15326_v18  ;;  %4026 = vmatprep.subr.bf16.mxu1 %v14018_v10  ;;  %v13021_v57 = vcombine.low %v15816_v45, %v1205_v9  ;;  %v2152_v38 = vrot.slane %v13019_v13, %v15090_v17  ;;  %v15835_v58 = vcombine.low %v2124_v22, %v2138_v0 }
  0xdc   : > { %v1272_v51 = vcombine.high %v1260_v8, %v1260_v8  ;;  %v1198_v28 = vrot.slane %v1150_v56, %v15090_v17  ;;  %v1212_v49 = vrot.slane %v1156_v37, %v15090_v17  ;;  %v1273_v10 = vcombine.high %v19638_v6, %v19638_v6  ;;  %v14054_v6 = vld [vmem:[#allocation2 + $0x44c] ss:$16 sps:$4 sm:$0xff]  }
  0xdd   : > { %3916 = vmatpush1.bf16.msra.mxu0 %v14010_v25  ;;  %4027 = vmatpush1.bf16.msra.mxu1 %v14016_v1  ;;  %v2166_v18 = vrot.slane %v13021_v57, %v15090_v17  ;;  %v1446_v12 = vcombine.low %v15601_v47, %v15580_v3  ;;  %v1308_v59 = vrot.slane %v1260_v8, %v15090_v17  ;;  %v14024_v25 = vld [vmem:[#allocation2 + $0x26c] ss:$16 sps:$4 sm:$0xff]  }
  0xde   : > { %3917 = vmatprep.subr.bf16.mxu0 %v14015_v29  ;;  %4028 = vmatprep.subr.bf16.mxu1 %v14027_v48  ;;  %v1322_v27 = vrot.slane %v1272_v51, %v15090_v17  ;;  %v13023_v20 = vcombine.high %v15816_v45, %v1205_v9  ;;  %v1329_v53 = vrot.slane %v1273_v10, %v15090_v17  ;;  %v14034_v45 = vld [vmem:[#allocation2 + $0x488] ss:$16 sps:$4 sm:$0xff]  }
  0xdf   : > { %v2172_v1 = vcombine.low %v2152_v38, %v2166_v18  ;;  %v1450_v34 = vcombine.low %v15604_v52, %v15632_v32  ;;  %v15853_v47 = vcombine.low %v2069_v36, %v2090_v5  ;;  %v2186_v35 = vrot.slane %v15835_v58, %v15090_v17  ;;  %v14022_v9 = vld [vmem:[#allocation2 + $0x268] ss:$16 sps:$4 sm:$0xff]   ;;  %v14045_v38 = vld [vmem:[#allocation2 + $0x46c] ss:$16 sps:$4 sm:$0xff]  }
  0xe0   : > { %3734 = vmatmul.mubr.bf16.gmra.mxu0 %v15826_v61  ;;  %3845 = vmatmul.mubr.bf16.gmra.mxu1 %v19639_v16  ;;  %v13025_v29 = vcombine.low %v1198_v28, %v1212_v49  ;;  %v13027_v48 = vcombine.high %v1198_v28, %v1212_v49  ;;  %v13031_v22 = vcombine.high %v1308_v59, %v1322_v27  ;;  %v14028_v49 = vld [vmem:[#allocation2 + $0x248] ss:$16 sps:$4 sm:$0xff]  }
  0xe1   : > { %3918 = vmatpush1.bf16.msra.mxu0 %v14013_v14  ;;  %3743 = vmatprep.mubr.bf16.mxu0 %v14939_v7  ;;  %v13033_v0 = vcombine.low %v15572_v26, %v1329_v53  ;;  %v13029_v52 = vcombine.low %v1308_v59, %v1322_v27  ;;  %v15860_v13 = vrot.slane %v13023_v20, %v15090_v17  ;;  %v14030_v14 = vld [vmem:[#allocation2 + $0x24c] ss:$16 sps:$4 sm:$0xff]  }
  0xe2   : > { %3919 = vmatprep.subr.bf16.mxu0 %v14021_v42  ;;  %3854 = vmatprep.mubr.bf16.mxu1 %v19640_v11  ;;  %v13035_v56 = vcombine.high %v15572_v26, %v1446_v12  ;;  %v13037_v8 = vcombine.high %v1450_v34, %v15580_v3  ;;  %v2207_v36 = vrot.slane %v2172_v1, %v15090_v17  ;;  %v14033_v59 = vld [vmem:[#allocation2 + $0x22c] ss:$16 sps:$4 sm:$0xff]  }
  0xe3   : > { %4029 = vmatpush1.bf16.msra.mxu1 %v14025_v30  ;;  %v2358_v57 = vrot.slane %v13031_v22, %v15090_v17  ;;  %v2372_v37 = vrot.slane %v13033_v0, %v15090_v17  ;;  %v1448_v42 = vcombine.low %v15625_v21, %v15620_v46  ;;  %v2255_v5 = vrot.slane %v13025_v29, %v15090_v17  ;;  %v14043_v30 = vld [vmem:[#allocation2 + $0x468] ss:$16 sps:$4 sm:$0xff]   ;;  %v14039_v29 = vld [vmem:[#allocation2 + $0x20c] ss:$16 sps:$4 sm:$0xff]  }
  0xe4   : > { %4030 = vmatprep.subr.bf16.mxu1 %v14036_v63  ;;  %v2386_v58 = vrot.slane %v13035_v56, %v15090_v17  ;;  %v2400_v26 = vrot.slane %v13037_v8, %v15090_v17  ;;  %v1452_v3 = vcombine.low %v15628_v24, %v15635_v2  ;;  %v2269_v51 = vrot.slane %v13027_v48, %v15090_v17  ;;  %v19642_v20 = vld [vmem:[#allocation19_spill] sm:$0xff] }
  0xe5   : > { %3920 = vmatpush1.bf16.msra.mxu0 %v14019_v33  ;;  %v2403_v18 = vcombine.low %v2358_v57, %v2372_v37  ;;  %v1563_v28 = vcombine.low %v15659_v50, %v15650_v55  ;;  %v1567_v21 = vcombine.low %v15662_v41, %v15697_v60  ;;  %v13039_v10 = vcombine.high %v15632_v32, %v1448_v42  ;;  %v19641_v33 = vld [vmem:[#allocation17_spill] sm:$0xff] }
  0xe6   : > { %3921 = vmatprep.subr.bf16.mxu0 %v14024_v25  ;;  %v2406_v63 = vcombine.low %v2386_v58, %v2400_v26  ;;  %v13041_v12 = vcombine.high %v1452_v3, %v15620_v46  ;;  %v1506_v24 = vcombine.high %v15684_v31, %v15684_v31  ;;  %v2283_v50 = vrot.slane %v13029_v52, %v15090_v17  ;;  %v14063_v8 = vld [vmem:[#allocation2 + $0x42c] ss:$16 sps:$4 sm:$0xff]   ;;  %v14040_v26 = vld [vmem:[#allocation2 + $0x3e8] ss:$16 sps:$4 sm:$0xff]  }
  0xe7   : > { %4031 = vmatpush1.bf16.msra.mxu1 %v14034_v45  ;;  %v2420_v41 = vrot.slane %v2403_v18, %v15090_v17  ;;  %v13043_v27 = vcombine.high %v15635_v2, %v1563_v28  ;;  %v13045_v46 = vcombine.high %v1567_v21, %v15650_v55  ;;  %v2475_v31 = vrot.slane %v13039_v10, %v15090_v17  ;;  %v14031_v2 = vld [vmem:[#allocation2 + $0x228] ss:$16 sps:$4 sm:$0xff]  }
  0xe8   : > { %3744 = vmatmul.mubr.bf16.gmra.mxu0 %v15853_v47  ;;  %3855 = vmatmul.mubr.bf16.gmra.mxu1 %v19641_v33  ;;  %v2441_v32 = vrot.slane %v2406_v63, %v15090_v17  ;;  %v2489_v16 = vrot.slane %v13041_v12, %v15090_v17  ;;  %v1562_v1 = vrot.slane %v1506_v24, %v15090_v17  ;;  %v14070_v18 = vld [vmem:[#allocation2 + $0x408] ss:$16 sps:$4 sm:$0xff]   ;;  %v14060_v24 = vld [vmem:[#allocation2 + $0x36c] ss:$16 sps:$4 sm:$0xff]  }
  0xe9   : > { %3922 = vmatpush1.bf16.msra.mxu0 %v14022_v9  ;;  %3753 = vmatprep.mubr.bf16.mxu0 %v14939_v7  ;;  %v2503_v25 = vrot.slane %v13043_v27, %v15090_v17  ;;  %v15896_v53 = vcombine.low %v2186_v35, %v2207_v36  ;;  %v2517_v45 = vrot.slane %v13045_v46, %v15090_v17  ;;  %v14052_v35 = vld [vmem:[#allocation2 + $0x448] ss:$16 sps:$4 sm:$0xff]   ;;  %v14075_v46 = vld [vmem:[#allocation2 + $0x30c] ss:$16 sps:$4 sm:$0xff]  }
  0xea   : > { %3923 = vmatprep.subr.bf16.mxu0 %v14030_v14  ;;  %3864 = vmatprep.mubr.bf16.mxu1 %v19642_v20  ;;  %v15898_v34 = vcombine.low %v2420_v41, %v2441_v32  ;;  %v1565_v55 = vcombine.low %v15706_v44, %v15692_v23  ;;  %v2286_v11 = vcombine.low %v15860_v13, %v2255_v5  ;;  %v14037_v14 = vld [vmem:[#allocation2 + $0x208] ss:$16 sps:$4 sm:$0xff]   ;;  %v14069_v41 = vld [vmem:[#allocation2 + $0x32c] ss:$16 sps:$4 sm:$0xff]   ;;  %v19650_v20 = vld [vmem:[#allocation12_spill] sm:$0xff] }
  0xeb   : > { %4032 = vmatprep.subr.bf16.mxu1 %v14045_v38  ;;  %v2289_v48 = vcombine.low %v2269_v51, %v2283_v50  ;;  %v2520_v22 = vcombine.low %v2475_v31, %v2489_v16  ;;  %v1569_v0 = vcombine.low %v15709_v54, %v1562_v1  ;;  %v2523_v9 = vcombine.low %v2503_v25, %v2517_v45  ;;  %v19643_v54 = vld [vmem:[#allocation21_spill] sm:$0xff]  ;;  %v19644_v38 = vld [vmem:[#allocation23_spill] sm:$0xff]  ;;  %v19651_v16 = vld [vmem:[#allocation14_spill] sm:$0xff] }
  0xec   : > { %4033 = vmatpush1.bf16.msra.mxu1 %v14043_v30  ;;  %v13047_v52 = vcombine.high %v15697_v60, %v1565_v55  ;;  %v2303_v57 = vrot.slane %v2286_v11, %v15090_v17  ;;  %v14042_v60 = vld [vmem:[#allocation2 + $0x3ec] ss:$16 sps:$4 sm:$0xff]   ;;  %v14061_v5 = vld [vmem:[#allocation2 + $0x428] ss:$16 sps:$4 sm:$0xff]   ;;  %v19653_v25 = vld [vmem:[#allocation18_spill] sm:$0xff] }
  0xed   : > { %3924 = vmatpush1.bf16.msra.mxu0 %v14028_v49  ;;  %4034 = vmatprep.subr.bf16.mxu1 %v14054_v6  ;;  %v2537_v56 = vrot.slane %v2520_v22, %v15090_v17  ;;  %v13049_v44 = vcombine.high %v1569_v0, %v15692_v23  ;;  %v2558_v13 = vrot.slane %v2523_v9, %v15090_v17  ;;  %v14048_v51 = vld [vmem:[#allocation2 + $0x3cc] ss:$16 sps:$4 sm:$0xff]   ;;  %v14046_v28 = vld [vmem:[#allocation2 + $0x3c8] ss:$16 sps:$4 sm:$0xff]   ;;  %v19654_v1 = vld [vmem:[#allocation20_spill] sm:$0xff] }
  0xee   : > { %3925 = vmatprep.subr.bf16.mxu0 %v14033_v59  ;;  %v2588_v36 = vrot.slane %v13047_v52, %v15090_v17  ;;  %v2324_v37 = vrot.slane %v2289_v48, %v15090_v17  ;;  %v14072_v30 = vld [vmem:[#allocation2 + $0x40c] ss:$16 sps:$4 sm:$0xff]   ;;  %v14049_v63 = vld [vmem:[#allocation2 + $0x3a8] ss:$16 sps:$4 sm:$0xff]   ;;  %v19659_v11 = vld [vmem:[#allocation24_spill] sm:$0xff] }
  0xef   : > { %v2602_v42 = vrot.slane %v13049_v44, %v15090_v17  ;;  %v15916_v23 = vcombine.low %v2537_v56, %v2558_v13  ;;  %v19645_v21 = vld [vmem:[#allocation25_spill] sm:$0xff]  ;;  %v19647_v33 = vld [vmem:[#allocation31_spill] sm:$0xff]  ;;  %v19660_v13 = vld [vmem:[#allocation26_spill] sm:$0xff] }
  0xf0   : > { %3754 = vmatmul.mubr.bf16.gmra.mxu0 %v15896_v53  ;;  %3865 = vmatmul.mubr.bf16.gmra.mxu1 %v19643_v54  ;;  %v15919_v3 = vcombine.low %v2303_v57, %v2324_v37  ;;  %v14051_v49 = vld [vmem:[#allocation2 + $0x3ac] ss:$16 sps:$4 sm:$0xff]   ;;  %v14055_v10 = vld [vmem:[#allocation2 + $0x388] ss:$16 sps:$4 sm:$0xff]   ;;  %v19661_v54 = vld [vmem:[#allocation28_spill] sm:$0xff] }
  0xf1   : > { %3926 = vmatpush1.bf16.msra.mxu0 %v14031_v2  ;;  %3763 = vmatprep.mubr.bf16.mxu0 %v14939_v7  ;;  %v2605_v58 = vcombine.low %v2588_v36, %v2602_v42  ;;  %v14057_v6 = vld [vmem:[#allocation2 + $0x38c] ss:$16 sps:$4 sm:$0xff]   ;;  %v14058_v59 = vld [vmem:[#allocation2 + $0x368] ss:$16 sps:$4 sm:$0xff]   ;;  %v19655_v2 = vld [vmem:[#allocation8_spill] sm:$0xff] }
  0xf2   : > { %3927 = vmatprep.subr.bf16.mxu0 %v14039_v29  ;;  %3874 = vmatprep.mubr.bf16.mxu1 %v19644_v38  ;;  %v19646_v12 = vld [vmem:[#allocation29_spill] sm:$0xff]  ;;  %v15958_v45 = vsub.s32 0, %v19655_v2  ;;  %v19663_v42 = vld [vmem:[#allocation32_spill] sm:$0xff] }
  0xf3   : > { %4035 = vmatpush1.bf16.msra.mxu1 %v14052_v35  ;;  %v14064_v50 = vld [vmem:[#allocation2 + $0x348] ss:$16 sps:$4 sm:$0xff]   ;;  %v15934_v32 = vrot.slane %v2605_v58, %v15090_v17 }
  0xf4   : > { %4036 = vmatprep.subr.bf16.mxu1 %v14063_v8  ;;  %v14067_v27 = vld [vmem:[#allocation2 + $0x328] ss:$16 sps:$4 sm:$0xff]   ;;  %19656 = vst [vmem:[#allocation27_spill] sm:$0xff] %v15958_v45 }
  0xf5   : > { %3928 = vmatpush1.bf16.msra.mxu0 %v14037_v14  ;;  %v14073_v31 = vld [vmem:[#allocation2 + $0x308] ss:$16 sps:$4 sm:$0xff]  }
  0xf6   : > { %3929 = vmatprep.subr.bf16.mxu0 %v14042_v60  ;;  %v19662_v60 = vld [vmem:[#allocation30_spill] sm:$0xff] }
  0xf7   : > { %4037 = vmatpush1.bf16.msra.mxu1 %v14061_v5 }
  0xf8   : > { %3764 = vmatmul.mubr.bf16.gmra.mxu0 %v15919_v3  ;;  %3875 = vmatmul.mubr.bf16.gmra.mxu1 %v19645_v21 }
  0xf9   : > { %3930 = vmatpush2.bf16.msra.mxu0 %v14040_v26  ;;  %3773 = vmatprep.mubr.bf16.mxu0 %v14939_v7 }
  0xfa   : > { %3931 = vmatprep.subr.bf16.mxu0 %v14048_v51  ;;  %3884 = vmatprep.mubr.bf16.mxu1 %v15667_v15  ;;  %v14066_v15 = vld [vmem:[#allocation2 + $0x34c] ss:$16 sps:$4 sm:$0xff]  }
  0xfb   : > { %4038 = vmatprep.subr.bf16.mxu1 %v14072_v30 }
  0xfc   : > { %4039 = vmatpush1.bf16.msra.mxu1 %v14070_v18 }
  0xfd   : > { %3932 = vmatpush2.bf16.msra.mxu0 %v14046_v28  ;;  %v19664_v28 = vld [vmem:[#allocation33_spill] sm:$0xff] }
  0xfe   : > { %3933 = vmatprep.subr.bf16.mxu0 %v14051_v49 }
 0x100   : > { %3774 = vmatmul.mubr.bf16.gmra.mxu0 %v15898_v34  ;;  %3885 = vmatmul.mubr.bf16.gmra.mxu1 %v19646_v12 }
 0x101   : > { %3934 = vmatpush2.bf16.msra.mxu0 %v14049_v63  ;;  %3783 = vmatprep.mubr.bf16.mxu0 %v14939_v7 }
 0x102   : > { %3935 = vmatprep.subr.bf16.mxu0 %v14057_v6  ;;  %3894 = vmatprep.mubr.bf16.mxu1 %v19647_v33 }
 0x105   : > { %3936 = vmatpush2.bf16.msra.mxu0 %v14055_v10 }
 0x106   : > { %3937 = vmatprep.subr.bf16.mxu0 %v14060_v24 }
 0x108   : > { %3784 = vmatmul.mubr.bf16.gmra.mxu0 %v15916_v23  ;;  %3895 = vmatmul.mubr.bf16.gmra.mxu1 %v15731_v39  ;;  %v19648_v39 = vld [vmem:[#allocation10_spill] sm:$0xff] }
 0x109   : > { %3938 = vmatpush2.bf16.msra.mxu0 %v14058_v59  ;;  %3793 = vmatprep.mubr.bf16.mxu0 %v14939_v7 }
 0x10a   : > { %3939 = vmatprep.subr.bf16.mxu0 %v14066_v15  ;;  %3904 = vmatprep.mubr.bf16.mxu1 %v15748_v40  ;;  %v19649_v40 = vld [vmem:[#allocation11_spill] sm:$0xff] }
 0x10d   : > { %3940 = vmatpush2.bf16.msra.mxu0 %v14064_v50 }
 0x10e   : > { %3941 = vmatprep.subr.bf16.mxu0 %v14069_v41 }
 0x110   : > { %3794 = vmatmul.mubr.bf16.gmra.mxu0 %v15934_v32  ;;  %3905 = vmatmul.mubr.bf16.gmra.mxu1 %v15751_v62  ;;  %v19652_v62 = vld [vmem:[#allocation16_spill] sm:$0xff] }
 0x111   : > { %3942 = vmatpush2.bf16.msra.mxu0 %v14067_v27  ;;  %3945 = vmatprep.mubr.bf16.mxu0 %v19648_v39 }
 0x112   : > { %3943 = vmatprep.subr.bf16.mxu0 %v14075_v46  ;;  %4056 = vmatprep.mubr.bf16.mxu1 %v14939_v7 }
 0x115   : > { %3944 = vmatpush2.bf16.msra.mxu0 %v14073_v31 }
 0x118   : > { %3946 = vmatmul.mubr.bf16.vlgmr.msra.gmra.mxu0 %v19649_v40  ;;  %4057 = vmatmul.mubr.bf16.vlgmr.msra.gmra.mxu1 %v15791_v19  ;;  %v15955_v19 = vld [vmem:[%s19529_s2] sm:$0xf] }
 0x119   : > { %3955 = vmatprep.mubr.bf16.mxu0 %v19650_v20  ;;  %4066 = vmatprep.mubr.bf16.mxu1 %v14939_v7  ;;  %v15965_v55 = vrot.slane %v15955_v19, %v15958_v45 }
 0x120   : > { %3956 = vmatmul.mubr.bf16.gmra.mxu0 %v19651_v16  ;;  %4067 = vmatmul.mubr.bf16.gmra.mxu1 %v15826_v61  ;;  %v15961_v61 = vsub.s32 1, %v19655_v2 }
 0x121   : > { %3965 = vmatprep.mubr.bf16.mxu0 %v19652_v62  ;;  %4076 = vmatprep.mubr.bf16.mxu1 %v14939_v7 }
 0x122   : > { %19657 = vst [vmem:[#allocation13_spill] sm:$0xff] %v15961_v61  ;;  %v15971_v29 = vrot.slane %v15955_v19, %v15961_v61 }
 0x128   : > { %3966 = vmatmul.mubr.bf16.gmra.mxu0 %v19653_v25  ;;  %4077 = vmatmul.mubr.bf16.gmra.mxu1 %v15853_v47  ;;  %v19658_v47 = vld [vmem:[#allocation22_spill] sm:$0xff] }
 0x129   : > { %3975 = vmatprep.mubr.bf16.mxu0 %v19654_v1  ;;  %4086 = vmatprep.mubr.bf16.mxu1 %v14939_v7 }
 0x12f   : > { %v3503_v48 = vpop.f32.mrf.mxu0  ;;  %v3614_v22 = vpop.f32.mrf.mxu1 }
 0x130   : > { %3976 = vmatmul.mubr.bf16.gmra.mxu0 %v19658_v47  ;;  %4087 = vmatmul.mubr.bf16.gmra.mxu1 %v15896_v53  ;;  %v3504_v0 = vadd.f32 %v3503_v48, %v15965_v55 }
 0x131   : > { %3985 = vmatprep.mubr.bf16.mxu0 %v19659_v11  ;;  %4096 = vmatprep.mubr.bf16.mxu1 %v14939_v7  ;;  %v3505_v35 = vpop.f32.mrf.mxu0  ;;  %v3616_v9 = vpop.f32.mrf.mxu1 }
 0x132   : > { %v15976_v52 = vadd.f32 %v3614_v22, %v3504_v0  ;;  %v3506_v56 = vadd.f32 %v3505_v35, %v15971_v29 }
 0x133   : > { %v3507_v8 = vpop.f32.mrf.mxu0  ;;  %v3618_v14 = vpop.f32.mrf.mxu1 }
 0x134   : > { %v15979_v53 = vadd.f32 %v3616_v9, %v3506_v56  ;;  %v3508_v44 = vadd.f32 %v3507_v8, %v15965_v55 }
 0x135   : > { %v15988_v57 = vpop.f32.mrf.mxu0  ;;  %v15990_v37 = vpop.f32.mrf.mxu1 }
 0x136   : > { %v15984_v36 = vadd.f32 %v3618_v14, %v3508_v44 }
 0x138   : > { %3986 = vmatmul.mubr.bf16.gmra.mxu0 %v19660_v13  ;;  %4097 = vmatmul.mubr.bf16.gmra.mxu1 %v15919_v3 }
 0x139   : > { %3995 = vmatprep.mubr.bf16.mxu0 %v19661_v54  ;;  %4106 = vmatprep.mubr.bf16.mxu1 %v14939_v7 }
 0x140   : > { %3996 = vmatmul.mubr.bf16.gmra.mxu0 %v19662_v60  ;;  %4107 = vmatmul.mubr.bf16.gmra.mxu1 %v15898_v34  ;;  %v3513_v5 = vpop.f32.mrf.mxu0 }
 0x141   : > { %4005 = vmatprep.mubr.bf16.mxu0 %v19663_v42  ;;  %4116 = vmatprep.mubr.bf16.mxu1 %v14939_v7  ;;  %v3624_v38 = vpop.f32.mrf.mxu1  ;;  %v3514_v58 = vadd.f32 %v3513_v5, %v15965_v55 }
 0x142   : > { %v3515_v26 = vpop.f32.mrf.mxu0 }
 0x143   : > { %v3626_v3 = vpop.f32.mrf.mxu1  ;;  %v15997_v51 = vadd.f32 %v3624_v38, %v3514_v58  ;;  %v3516_v30 = vadd.f32 %v3515_v26, %v15971_v29 }
 0x144   : > { %v3517_v18 = vpop.f32.mrf.mxu0 }
 0x145   : > { %v16002_v34 = vadd.f32 %v3626_v3, %v3516_v30  ;;  %v3518_v21 = vadd.f32 %v3517_v18, %v15965_v55  ;;  %v3628_v49 = vpop.f32.mrf.mxu1 }
 0x146   : > { %v16009_v6 = vpop.f32.mrf.mxu0 }
 0x147   : > { %v16007_v63 = vadd.f32 %v3628_v49, %v3518_v21  ;;  %v16011_v10 = vpop.f32.mrf.mxu1 }
 0x148   : > { %4006 = vmatmul.mubr.bf16.gmra.mxu0 %v19664_v28  ;;  %4117 = vmatmul.mubr.bf16.gmra.mxu1 %v15916_v23 }
 0x149   : > { %4015 = vmatprep.mubr.bf16.mxu0 %v15762_v4  ;;  %4126 = vmatprep.mubr.bf16.mxu1 %v14939_v7 }
 0x14e   : > { %v3523_v23 = vpop.f32.mrf.mxu0  ;;  %v3634_v12 = vpop.f32.mrf.mxu1 }
 0x14f   : > { %v3524_v24 = vadd.f32 %v3523_v23, %v15965_v55 }
 0x150   : > { %4016 = vmatmul.mubr.bf16.gmra.mxu0 %v15766_v43  ;;  %4127 = vmatmul.mubr.bf16.gmra.mxu1 %v15934_v32  ;;  %v3525_v33 = vpop.f32.mrf.mxu0  ;;  %v3636_v59 = vpop.f32.mrf.mxu1 }
 0x151   : > { %v16016_v15 = vadd.f32 %v3634_v12, %v3524_v24  ;;  %v3526_v4 = vadd.f32 %v3525_v33, %v15971_v29 }
 0x152   : > { %v3527_v7 = vpop.f32.mrf.mxu0  ;;  %v3638_v27 = vpop.f32.mrf.mxu1 }
 0x153   : > { %v16019_v50 = vadd.f32 %v3636_v59, %v3526_v4  ;;  %v3528_v41 = vadd.f32 %v3527_v7, %v15965_v55 }
 0x154   : > { %v16024_v43 = vpop.f32.mrf.mxu0  ;;  %v16026_v32 = vpop.f32.mrf.mxu1 }
 0x155   : > { %v16022_v46 = vadd.f32 %v3638_v27, %v3528_v41 }
 0x160   : > { %v3533_v31 = vpop.f32.mrf.mxu0  ;;  %v3644_v39 = vpop.f32.mrf.mxu1 }
 0x161   : > { %v3534_v40 = vadd.f32 %v3533_v31, %v15965_v55 }
 0x162   : > { %v3535_v20 = vpop.f32.mrf.mxu0  ;;  %v3646_v16 = vpop.f32.mrf.mxu1 }
 0x163   : > { %v16029_v62 = vadd.f32 %v3644_v39, %v3534_v40  ;;  %v3536_v25 = vadd.f32 %v3535_v20, %v15971_v29 }
 0x164   : > { %v3537_v1 = vpop.f32.mrf.mxu0  ;;  %v3648_v47 = vpop.f32.mrf.mxu1 }
 0x165   : > { %v16032_v11 = vadd.f32 %v3646_v16, %v3536_v25  ;;  %v3538_v48 = vadd.f32 %v3537_v1, %v15965_v55 }
 0x166   : > { %v16035_v22 = vpop.f32.mrf.mxu0  ;;  %v16037_v0 = vpop.f32.mrf.mxu1 }
 0x167   : > { %v16039_v35 = vadd.f32 %v3648_v47, %v3538_v48 }
 0x169   : > { %v3543_v9 = vpop.f32.mrf.mxu0  ;;  %v3654_v56 = vpop.f32.mrf.mxu1 }
 0x16a   : > { %v3544_v8 = vadd.f32 %v3543_v9, %v15965_v55 }
 0x16b   : > { %v3545_v44 = vpop.f32.mrf.mxu0  ;;  %v3656_v14 = vpop.f32.mrf.mxu1 }
 0x16c   : > { %v16042_v13 = vadd.f32 %v3654_v56, %v3544_v8  ;;  %v3546_v54 = vadd.f32 %v3545_v44, %v15971_v29 }
 0x16d   : > { %v3547_v60 = vpop.f32.mrf.mxu0  ;;  %v3658_v38 = vpop.f32.mrf.mxu1 }
 0x16e   : > { %v16045_v42 = vadd.f32 %v3656_v14, %v3546_v54  ;;  %v3548_v5 = vadd.f32 %v3547_v60, %v15965_v55 }
 0x16f   : > { %v16050_v26 = vpop.f32.mrf.mxu0  ;;  %v16052_v3 = vpop.f32.mrf.mxu1 }
 0x170   : > { %v16048_v58 = vadd.f32 %v3658_v38, %v3548_v5 }
 0x17c   : > { %v3553_v30 = vpop.f32.mrf.mxu0  ;;  %v3664_v18 = vpop.f32.mrf.mxu1 }
 0x17d   : > { %v3554_v28 = vadd.f32 %v3553_v30, %v15965_v55 }
 0x17e   : > { %v3555_v21 = vpop.f32.mrf.mxu0  ;;  %v3666_v49 = vpop.f32.mrf.mxu1 }
 0x17f   : > { %v16055_v23 = vadd.f32 %v3664_v18, %v3554_v28  ;;  %v3556_v12 = vadd.f32 %v3555_v21, %v15971_v29 }
 0x180   : > { %v3557_v24 = vpop.f32.mrf.mxu0  ;;  %v3668_v33 = vpop.f32.mrf.mxu1 }
 0x181   : > { %v16058_v59 = vadd.f32 %v3666_v49, %v3556_v12  ;;  %v3558_v4 = vadd.f32 %v3557_v24, %v15965_v55 }
 0x182   : > { %v16063_v41 = vpop.f32.mrf.mxu0  ;;  %v16065_v27 = vpop.f32.mrf.mxu1 }
 0x183   : > { %v16061_v7 = vadd.f32 %v3668_v33, %v3558_v4 }
 0x188   : > { %v3563_v31 = vpop.f32.mrf.mxu0  ;;  %v3674_v39 = vpop.f32.mrf.mxu1 }
 0x189   : > { %v3564_v40 = vadd.f32 %v3563_v31, %v15965_v55 }
 0x18a   : > { %v3565_v20 = vpop.f32.mrf.mxu0  ;;  %v3676_v16 = vpop.f32.mrf.mxu1 }
 0x18b   : > { %v16068_v25 = vadd.f32 %v3674_v39, %v3564_v40  ;;  %v3566_v1 = vadd.f32 %v3565_v20, %v15971_v29 }
 0x18c   : > { %v3567_v47 = vpop.f32.mrf.mxu0  ;;  %v3678_v48 = vpop.f32.mrf.mxu1 }
 0x18d   : > { %v16071_v9 = vadd.f32 %v3676_v16, %v3566_v1  ;;  %v3568_v56 = vadd.f32 %v3567_v47, %v15965_v55 }
 0x18e   : > { %v16074_v8 = vpop.f32.mrf.mxu0  ;;  %v16076_v44 = vpop.f32.mrf.mxu1 }
 0x18f   : > { %v16078_v14 = vadd.f32 %v3678_v48, %v3568_v56 }
 0x190   : > { %v3573_v54 = vpop.f32.mrf.mxu0  ;;  %v3684_v60 = vpop.f32.mrf.mxu1 }
 0x191   : > { %v3574_v5 = vadd.f32 %v3573_v54, %v15965_v55 }
 0x192   : > { %v3575_v38 = vpop.f32.mrf.mxu0  ;;  %v3686_v30 = vpop.f32.mrf.mxu1 }
 0x193   : > { %v16081_v18 = vadd.f32 %v3684_v60, %v3574_v5  ;;  %v3576_v28 = vadd.f32 %v3575_v38, %v15971_v29 }
 0x194   : > { %v3577_v21 = vpop.f32.mrf.mxu0  ;;  %v3688_v49 = vpop.f32.mrf.mxu1 }
 0x195   : > { %v16084_v12 = vadd.f32 %v3686_v30, %v3576_v28 }
 0x196   : > { %v3578_v24 = vpop.f32.mrf.mxu0  ;;  %v3689_v33 = vpop.f32.mrf.mxu1 }
 0x197   : > { %v14076_v24 = vld [vmem:[%s19530_s3 + $0xe0] ss:$16 sps:$4 sm:$0xff]  }
 0x198   : > { %v3725_v4 = vpop.f32.mrf.mxu0  ;;  %v16086_v31 = vpop.f32.mrf.mxu1 }
 0x199   : > { %v16089_v39 = vadd.f32 %v3725_v4, %v15976_v52 }
 0x19a   : > { %v3727_v40 = vpop.f32.mrf.mxu0  ;;  %v16091_v55 = vpop.f32.mrf.mxu1 }
 0x19b   : > { %v16094_v20 = vadd.f32 %v3727_v40, %v15979_v53 }
 0x19c   : > { %v3729_v16 = vpop.f32.mrf.mxu0  ;;  %v16096_v1 = vpop.f32.mrf.mxu1 }
 0x19d   : > { %v16099_v47 = vadd.f32 %v3729_v16, %v15984_v36 }
 0x19e   : > { %v16101_v48 = vpop.f32.mrf.mxu0  ;;  %v16103_v56 = vpop.f32.mrf.mxu1 }
 0x1a0   : > { %v3735_v54 = vpop.f32.mrf.mxu0  ;;  %v16105_v60 = vpop.f32.mrf.mxu1 }
 0x1a1   : > { %v16108_v52 = vadd.f32 %v3735_v54, %v15997_v51  ;;  %v14078_v51 = vld [vmem:[%s19530_s3 + $0xe4] ss:$16 sps:$4 sm:$0xff]  }
 0x1a2   : > { %v3737_v5 = vpop.f32.mrf.mxu0  ;;  %v16110_v38 = vpop.f32.mrf.mxu1  ;;  %9158 = vmatprep.subr.bf16.mxu0 %v14078_v51 }
 0x1a3   : > { %v16113_v53 = vadd.f32 %v3737_v5, %v16002_v34  ;;  %9159 = vmatpush1.bf16.msra.mxu0 %v14076_v24 }
 0x1a4   : > { %v3739_v30 = vpop.f32.mrf.mxu0  ;;  %v16115_v28 = vpop.f32.mrf.mxu1 }
 0x1a5   : > { %v16118_v36 = vadd.f32 %v3739_v30, %v16007_v63 }
 0x1a6   : > { %v16120_v21 = vpop.f32.mrf.mxu0  ;;  %v16122_v49 = vpop.f32.mrf.mxu1 }
 0x1a8   : > { %v3745_v34 = vpop.f32.mrf.mxu0  ;;  %v16130_v33 = vpop.f32.mrf.mxu1 }
 0x1a9   : > { %v16133_v4 = vadd.f32 %v3745_v34, %v16016_v15 }
 0x1aa   : > { %v3747_v63 = vpop.f32.mrf.mxu0  ;;  %v16135_v40 = vpop.f32.mrf.mxu1 }
 0x1ab   : > { %v16138_v16 = vadd.f32 %v3747_v63, %v16019_v50 }
 0x1ac   : > { %v3749_v54 = vpop.f32.mrf.mxu0  ;;  %v16140_v5 = vpop.f32.mrf.mxu1 }
 0x1ad   : > { %19665 = vst [vmem:[#allocation15_spill] sm:$0xff] %v16140_v5  ;;  %v16143_v30 = vadd.f32 %v3749_v54, %v16022_v46 }
 0x1ae   : > { %v16145_v17 = vpop.f32.mrf.mxu0  ;;  %v16147_v61 = vpop.f32.mrf.mxu1 }
 0x1af   : > { %19666 = vst [vmem:[#allocation17_spill] sm:$0xff] %v16143_v30  ;;  %19667 = vst [vmem:[#allocation19_spill] sm:$0xff] %v16147_v61 }
 0x1b0   : > { %v3755_v51 = vpop.f32.mrf.mxu0  ;;  %v16149_v15 = vpop.f32.mrf.mxu1 }
 0x1b1   : > { %19668 = vst [vmem:[#allocation21_spill] sm:$0xff] %v16149_v15  ;;  %v16152_v24 = vadd.f32 %v3755_v51, %v16029_v62 }
 0x1b2   : > { %v3757_v34 = vpop.f32.mrf.mxu0  ;;  %v16154_v45 = vpop.f32.mrf.mxu1 }
 0x1b3   : > { %19669 = vst [vmem:[#allocation23_spill] sm:$0xff] %v16152_v24  ;;  %19670 = vst [vmem:[#allocation25_spill] sm:$0xff] %v16154_v45  ;;  %v16157_v50 = vadd.f32 %v3757_v34, %v16032_v11 }
 0x1b4   : > { %v3759_v63 = vpop.f32.mrf.mxu0  ;;  %v16159_v5 = vpop.f32.mrf.mxu1 }
 0x1b5   : > { %19671 = vst [vmem:[#allocation29_spill] sm:$0xff] %v16157_v50  ;;  %19672 = vst [vmem:[#allocation31_spill] sm:$0xff] %v16159_v5  ;;  %v16162_v46 = vadd.f32 %v3759_v63, %v16039_v35 }
 0x1b6   : > { %v16164_v54 = vpop.f32.mrf.mxu0  ;;  %v16166_v61 = vpop.f32.mrf.mxu1 }
 0x1b7   : > { %19673 = vst [vmem:[#allocation10_spill] sm:$0xff] %v16162_v46  ;;  %19674 = vst [vmem:[#allocation11_spill] sm:$0xff] %v16166_v61 }
 0x1b8   : > { %v3765_v15 = vpop.f32.mrf.mxu0  ;;  %v16168_v30 = vpop.f32.mrf.mxu1 }
 0x1b9   : > { %19675 = vst [vmem:[#allocation12_spill] sm:$0xff] %v16168_v30  ;;  %v16171_v62 = vadd.f32 %v3765_v15, %v16042_v13 }
 0x1ba   : > { %v3767_v51 = vpop.f32.mrf.mxu0  ;;  %v16173_v45 = vpop.f32.mrf.mxu1 }
 0x1bb   : > { %19676 = vst [vmem:[#allocation14_spill] sm:$0xff] %v16171_v62  ;;  %19677 = vst [vmem:[#allocation16_spill] sm:$0xff] %v16173_v45  ;;  %v16176_v11 = vadd.f32 %v3767_v51, %v16045_v42  ;;  %v14081_v42 = vld [vmem:[%s19530_s3 + $0xc4] ss:$16 sps:$4 sm:$0xff]   ;;  %v14079_v51 = vld [vmem:[%s19530_s3 + $0xc0] ss:$16 sps:$4 sm:$0xff]  }
 0x1bc   : > { %v3769_v34 = vpop.f32.mrf.mxu0  ;;  %v16178_v5 = vpop.f32.mrf.mxu1  ;;  %9160 = vmatprep.subr.bf16.mxu0 %v14081_v42 }
 0x1bd   : > { %19678 = vst [vmem:[#allocation18_spill] sm:$0xff] %v16176_v11  ;;  %v16181_v35 = vadd.f32 %v3769_v34, %v16048_v58  ;;  %9161 = vmatpush1.bf16.msra.mxu0 %v14079_v51  ;;  %v3530_v51 = vadd.f32 %v16024_v43, %v15971_v29  ;;  %v3570_v43 = vadd.f32 %v16074_v8, %v15971_v29 }
 0x1be   : > { %v16183_v63 = vpop.f32.mrf.mxu0  ;;  %v16185_v61 = vpop.f32.mrf.mxu1 }
 0x1bf   : > { %19679 = vst [vmem:[#allocation20_spill] sm:$0xff] %v16181_v35  ;;  %19680 = vst [vmem:[#allocation22_spill] sm:$0xff] %v16185_v61 }
 0x1c0   : > { %v3775_v30 = vpop.f32.mrf.mxu0  ;;  %v16187_v46 = vpop.f32.mrf.mxu1 }
 0x1c1   : > { %19681 = vst [vmem:[#allocation24_spill] sm:$0xff] %v16187_v46  ;;  %v16190_v13 = vadd.f32 %v3775_v30, %v16055_v23  ;;  %v19579_v30 = vsub.s32 2, %v19655_v2 }
 0x1c2   : > { %v3777_v15 = vpop.f32.mrf.mxu0  ;;  %v16192_v45 = vpop.f32.mrf.mxu1 }
 0x1c3   : > { %19682 = vst [vmem:[#allocation26_spill] sm:$0xff] %v16190_v13  ;;  %19683 = vst [vmem:[#allocation28_spill] sm:$0xff] %v16192_v45  ;;  %v16198_v58 = vadd.f32 %v3777_v15, %v16058_v59  ;;  %v14940_v59 = vmov 1983009808  }
 0x1c4   : > { %v3779_v34 = vpop.f32.mrf.mxu0  ;;  %v16203_v61 = vpop.f32.mrf.mxu1  ;;  %v4258_v15 = vunpack.c.l.s4 %v14940_v59 }
 0x1c5   : > { %19684 = vst [vmem:[#allocation30_spill] sm:$0xff] %v16198_v58  ;;  %19685 = vst [vmem:[#allocation32_spill] sm:$0xff] %v16203_v61  ;;  %v16206_v23 = vadd.f32 %v3779_v34, %v16061_v7  ;;  %v3510_v58 = vadd.f32 %v15988_v57, %v15971_v29  ;;  %v3520_v7 = vadd.f32 %v16009_v6, %v15971_v29 }
 0x1c6   : > { %v16209_v45 = vpop.f32.mrf.mxu0  ;;  %v16211_v46 = vpop.f32.mrf.mxu1  ;;  %v3540_v34 = vadd.f32 %v16035_v22, %v15971_v29  ;;  %v16230_v57 = vrot.slane %v15955_v19, %v19579_v30  ;;  %v3550_v6 = vadd.f32 %v16050_v26, %v15971_v29  ;;  %v19691_v30 = vsub.s32 3, %v19655_v2  ;;  %v19712_v11 = vld [vmem:[#allocation22_spill] sm:$0xff] }
 0x1c7   : > { %19686 = vst [vmem:[#allocation33_spill] sm:$0xff] %v16206_v23  ;;  %v3631_v26 = vadd.f32 %v16011_v10, %v3520_v7 }
 0x1c8   : > { %v3785_v35 = vpop.f32.mrf.mxu0  ;;  %v16216_v61 = vpop.f32.mrf.mxu1 }
 0x1c9   : > { %19687 = vst [vmem:[#allocation34_spill] sm:$0xff] %v16216_v61  ;;  %v16221_v42 = vadd.f32 %v3785_v35, %v16068_v25  ;;  %v4259_v61 = vunpack.c.0.s8 %v4258_v15  ;;  %v3560_v25 = vadd.f32 %v16063_v41, %v15971_v29  ;;  %v3621_v35 = vadd.f32 %v15990_v37, %v3510_v58 }
 0x1ca   : > { %v3787_v59 = vpop.f32.mrf.mxu0  ;;  %v16232_v13 = vpop.f32.mrf.mxu1  ;;  %v3641_v29 = vadd.f32 %v16026_v32, %v3530_v51  ;;  %v3837_v32 = vadd.f32 %v16086_v31, %v16230_v57 }
 0x1cb   : > { %19688 = vst [vmem:[#allocation35_spill] sm:$0xff] %v16221_v42  ;;  %19689 = vst [vmem:[#allocation36_spill] sm:$0xff] %v16232_v13  ;;  %v16241_v22 = vadd.f32 %v3787_v59, %v16071_v9  ;;  %v16247_v42 = vrot.slane %v15955_v19, %v19691_v30  ;;  %v3651_v9 = vadd.f32 %v16037_v0, %v3540_v34 }
 0x1cc   : > { %v3789_v15 = vpop.f32.mrf.mxu0  ;;  %v16249_v13 = vpop.f32.mrf.mxu1  ;;  %v16258_v8 = vadd.f32 %v16101_v48, %v3621_v35  ;;  %v16265_v19 = vsub.s32 %v4259_v61, %v19655_v2  ;;  %v3661_v30 = vadd.f32 %v16052_v3, %v3550_v6  ;;  %v3671_v10 = vadd.f32 %v16065_v27, %v3560_v25  ;;  %v14082_v48 = vld [vmem:[%s19530_s3 + $0x2e0] ss:$16 sps:$4 sm:$0xff]  }
 0x1cd   : > { %19690 = vst [vmem:[#allocation37_spill] sm:$0xff] %v16241_v22  ;;  %v16253_v41 = vadd.f32 %v3789_v15, %v16078_v14  ;;  %v16270_v14 = vadd.f32 %v16076_v44, %v3570_v43  ;;  %v16278_v7 = vadd.f32 %v16091_v55, %v16247_v42  ;;  %v16281_v61 = vadd.f32 %v16120_v21, %v3631_v26  ;;  %v19700_v21 = vld [vmem:[#allocation21_spill] sm:$0xff] }
 0x1ce   : > { %v16260_v37 = vpop.f32.mrf.mxu0  ;;  %v16262_v58 = vpop.f32.mrf.mxu1  ;;  %19693 = vst [vmem:[#allocation39_spill] sm:$0xff] %v16265_v19  ;;  %v16288_v44 = vadd.f32 %v16096_v1, %v16230_v57  ;;  %v16292_v31 = vadd.f32 %v16103_v56, %v16247_v42  ;;  %v16301_v59 = vadd.f32 %v16105_v60, %v16230_v57  ;;  %v16304_v6 = vadd.f32 %v16145_v17, %v3641_v29  ;;  %v19697_v17 = vld [vmem:[#allocation17_spill] sm:$0xff]  ;;  %v19698_v60 = vld [vmem:[#allocation15_spill] sm:$0xff] }
 0x1cf   : > { %19692 = vst [vmem:[#allocation38_spill] sm:$0xff] %v16253_v41  ;;  %v16315_v43 = vadd.f32 %v16115_v28, %v16230_v57  ;;  %v16324_v15 = vadd.f32 %v16122_v49, %v16247_v42  ;;  %v16328_v26 = vadd.f32 %v16130_v33, %v16230_v57  ;;  %v16342_v56 = vadd.f32 %v19698_v60, %v16230_v57  ;;  %v19701_v49 = vld [vmem:[#allocation25_spill] sm:$0xff]  ;;  %v14084_v33 = vld [vmem:[%s19530_s3 + $0x2e4] ss:$16 sps:$4 sm:$0xff]  }
 0x1d0   : > { %v3795_v3 = vpop.f32.mrf.mxu0  ;;  %v16283_v51 = vpop.f32.mrf.mxu1  ;;  %v16357_v60 = vadd.f32 %v19701_v49, %v16247_v42  ;;  %9221 = vmatprep.subr.bf16.mxu1 %v14084_v33  ;;  %v16393_v0 = vadd.f32 %v16178_v5, %v16230_v57  ;;  %v16396_v55 = vadd.f32 %v16209_v45, %v3671_v10 }
 0x1d1   : > { %v16295_v34 = vadd.f32 %v3795_v3, %v16081_v18  ;;  %v16311_v18 = vadd.f32 %v16110_v38, %v16247_v42  ;;  %9222 = vmatpush1.bf16.msra.mxu1 %v14082_v48  ;;  %v19714_v48 = vld [vmem:[#allocation24_spill] sm:$0xff] }
 0x1d2   : > { %v3797_v1 = vpop.f32.mrf.mxu0  ;;  %v16306_v25 = vpop.f32.mrf.mxu1  ;;  %19710 = vst [vmem:[#allocation21_spill] sm:$0xff] %v16396_v55  ;;  %v16443_v55 = vadd.f32 %v16260_v37, %v16270_v14  ;;  %v16456_v37 = vadd.f32 %v16262_v58, %v16247_v42 }
 0x1d3   : > { %19694 = vst [vmem:[#allocation40_spill] sm:$0xff] %v16295_v34  ;;  %v16318_v35 = vadd.f32 %v3797_v1, %v16084_v12  ;;  %v16334_v12 = vadd.f32 %v16135_v40, %v16247_v42  ;;  %v16337_v1 = vadd.f32 %v16164_v54, %v3651_v9  ;;  %v16352_v54 = vadd.f32 %v19700_v21, %v16230_v57  ;;  %v19704_v40 = vld [vmem:[#allocation11_spill] sm:$0xff] }
 0x1d4   : > { %v3799_v38 = vpop.f32.mrf.mxu0  ;;  %v3910_v29 = vpop.f32.mrf.mxu1  ;;  %v16369_v21 = vadd.f32 %v19704_v40, %v16247_v42  ;;  %v16372_v9 = vadd.f32 %v16183_v63, %v3661_v30  ;;  %v14087_v63 = vld [vmem:[%s19530_s3 + $0xa4] ss:$16 sps:$4 sm:$0xff]   ;;  %19724 = vst [vmem:[#allocation11_spill] sm:$0xff] %v16443_v55 }
 0x1d5   : > { %19695 = vst [vmem:[#allocation41_spill] sm:$0xff] %v16318_v35  ;;  %19696 = vst [vmem:[#allocation42_spill] sm:$0xff] %v16337_v1  ;;  %v19699_v38 = vld [vmem:[#allocation19_spill] sm:$0xff]  ;;  %v19707_v40 = vld [vmem:[#allocation16_spill] sm:$0xff]  ;;  %9162 = vmatprep.subr.bf16.mxu0 %v14087_v63 }
 0x1d6   : > { %v16347_v29 = vadd.f32 %v19699_v38, %v16247_v42  ;;  %v3800_v3 = vpop.f32.mrf.mxu0  ;;  %v3911_v28 = vpop.f32.mrf.mxu1  ;;  %19705 = vst [vmem:[#allocation17_spill] sm:$0xff] %v16372_v9  ;;  %v16389_v50 = vadd.f32 %v19707_v40, %v16247_v42  ;;  %19709 = vst [vmem:[#allocation19_spill] sm:$0xff] %v16393_v0  ;;  %v16404_v40 = vadd.f32 %v19712_v11, %v16247_v42  ;;  %v19717_v1 = vld [vmem:[#allocation32_spill] sm:$0xff] }
 0x1d7   : > { %v19703_v28 = vld [vmem:[#allocation31_spill] sm:$0xff]  ;;  %v16411_v0 = vadd.f32 %v19714_v48, %v16230_v57  ;;  %v16422_v45 = vadd.f32 %v19717_v1, %v16230_v57  ;;  %v19720_v1 = vld [vmem:[#allocation34_spill] sm:$0xff]  ;;  %v19722_v48 = vld [vmem:[#allocation36_spill] sm:$0xff]  ;;  %19727 = vst [vmem:[#allocation16_spill] sm:$0xff] %v16456_v37 }
 0x1d8   : > { %v16365_v3 = vadd.f32 %v19703_v28, %v16230_v57  ;;  %v3947_v27 = vpop.f32.mrf.mxu0  ;;  %v4058_v49 = vpop.f32.mrf.mxu1  ;;  %v19706_v28 = vld [vmem:[#allocation12_spill] sm:$0xff]  ;;  %19708 = vst [vmem:[#allocation15_spill] sm:$0xff] %v16389_v50  ;;  %v16435_v23 = vadd.f32 %v19720_v1, %v16230_v57 }
 0x1d9   : > { %v16381_v2 = vadd.f32 %v19706_v28, %v16230_v57  ;;  %v3948_v38 = vadd.f32 %v3947_v27, %v3837_v32  ;;  %v14085_v27 = vld [vmem:[%s19530_s3 + $0xa0] ss:$16 sps:$4 sm:$0xff]  }
 0x1da   : > { %v3949_v28 = vpop.f32.mrf.mxu0  ;;  %v4060_v32 = vpop.f32.mrf.mxu1  ;;  %v19715_v50 = vld [vmem:[#allocation28_spill] sm:$0xff]  ;;  %9163 = vmatpush1.bf16.msra.mxu0 %v14085_v27  ;;  %19721 = vst [vmem:[#allocation25_spill] sm:$0xff] %v16435_v23 }
 0x1db   : > { %v4059_v62 = vadd.f32 %v4058_v49, %v3948_v38  ;;  %v3950_v5 = vadd.f32 %v3949_v28, %v16278_v7  ;;  %v16415_v24 = vadd.f32 %v19715_v50, %v16247_v42  ;;  %v16427_v50 = vadd.f32 %v16211_v46, %v16247_v42 }
 0x1dc   : > { %v3951_v30 = vpop.f32.mrf.mxu0  ;;  %v4062_v33 = vpop.f32.mrf.mxu1  ;;  %v19718_v38 = vmax.f32 %v16089_v39, 0.0  ;;  %v16439_v46 = vadd.f32 %v19722_v48, %v16247_v42  ;;  %v16452_v48 = vadd.f32 %v16249_v13, %v16230_v57 }
 0x1dd   : > { %v4137_v49 = vmax.f32 %v4059_v62, 0.0  ;;  %v4061_v7 = vadd.f32 %v4060_v32, %v3950_v5  ;;  %v3952_v63 = vadd.f32 %v3951_v30, %v16288_v44 }
 0x1de   : > { %v3953_v10 = vpop.f32.mrf.mxu0  ;;  %v4064_v27 = vpop.f32.mrf.mxu1  ;;  %19723 = vst [vmem:[#allocation31_spill] sm:$0xff] %v16439_v46  ;;  %19726 = vst [vmem:[#allocation12_spill] sm:$0xff] %v16452_v48 }
 0x1df   : > { %v4195_v62 = vmax.f32 %v19718_v38, %v4137_v49  ;;  %v4138_v32 = vmax.f32 %v4061_v7, 0.0  ;;  %v4063_v44 = vadd.f32 %v4062_v33, %v3952_v63  ;;  %v3954_v30 = vadd.f32 %v3953_v10, %v16292_v31 }
 0x1e0   : > { %v3957_v39 = vpop.f32.mrf.mxu0  ;;  %v19725_v38 = vmax.f32 %v16094_v20, 0.0  ;;  %v4068_v7 = vpop.f32.mrf.mxu1 }
 0x1e1   : > { %v4141_v49 = vmax.f32 %v4063_v44, 0.0  ;;  %v4065_v31 = vadd.f32 %v4064_v27, %v3954_v30  ;;  %v3958_v10 = vadd.f32 %v3957_v39, %v16301_v59  ;;  %v19728_v27 = vmax.f32 %v16099_v47, 0.0 }
 0x1e2   : > { %v4196_v33 = vmax.f32 %v19725_v38, %v4138_v32  ;;  %v3959_v14 = vpop.f32.mrf.mxu0  ;;  %v16463_v39 = vadd.f32 %v16283_v51, %v16230_v57  ;;  %v4070_v47 = vpop.f32.mrf.mxu1  ;;  %v16476_v57 = vadd.f32 %v16306_v25, %v16247_v42 }
 0x1e3   : > { %v4197_v44 = vmax.f32 %v19728_v27, %v4141_v49  ;;  %v4142_v59 = vmax.f32 %v4065_v31, 0.0  ;;  %v4069_v38 = vadd.f32 %v4068_v7, %v3958_v10  ;;  %v3960_v13 = vadd.f32 %v3959_v14, %v16311_v18 }
 0x1e4   : > { %v4255_v20 = vcombine.low %v4195_v62, %v4196_v33  ;;  %v4256_v32 = vcombine.high %v4195_v62, %v4196_v33  ;;  %19729 = vst [vmem:[#allocation22_spill] sm:$0xff] %v16463_v39  ;;  %v3961_v1 = vpop.f32.mrf.mxu0  ;;  %v19730_v62 = vmax.f32 %v16258_v8, 0.0  ;;  %19731 = vst [vmem:[#allocation24_spill] sm:$0xff] %v16476_v57 }
 0x1e5   : > { %v16471_v49 = vadd.f32 %v3961_v1, %v16315_v43  ;;  %v4145_v51 = vmax.f32 %v4069_v38, 0.0  ;;  %v16478_v18 = vadd.f32 %v4070_v47, %v3960_v13  ;;  %v19732_v43 = vmax.f32 %v16108_v52, 0.0 }
 0x1e6   : > { %v4263_v58 = vrot.slane %v4255_v20, %v16265_v19  ;;  %v4270_v63 = vrot.slane %v4256_v32, %v16265_v19  ;;  %v4198_v33 = vmax.f32 %v19730_v62, %v4142_v59 }
 0x1e7   : > { %v16484_v1 = vmax.f32 %v19732_v43, %v4145_v51 }
 0x1e8   : > { %v4271_v10 = vcombine.high %v4263_v58, %v4263_v58  ;;  %v4272_v7 = vcombine.high %v4270_v63, %v4270_v63  ;;  %v4531_v14 = vrot.slane %v4263_v58, %v16265_v19  ;;  %v4547_v8 = vrot.slane %v4270_v63, %v16265_v19 }
 0x1e9   : > { %v4273_v20 = vcombine.low %v4197_v44, %v4198_v33  ;;  %v4274_v32 = vcombine.high %v4197_v44, %v4198_v33 }
 0x1ea   : > { %v4532_v59 = vcombine.high %v4531_v14, %v4531_v14  ;;  %v4539_v42 = vrot.slane %v4271_v10, %v16265_v19  ;;  %v4548_v25 = vcombine.high %v4547_v8, %v4547_v8  ;;  %v4555_v38 = vrot.slane %v4272_v7, %v16265_v19 }
 0x1eb   : > { %v5126_v13 = vsel %vm5125_vm4, %v4531_v14, -inf  ;;  %v5154_v58 = vsel %vm5125_vm4, %v4547_v8, -inf  ;;  %v16492_v63 = vrot.slane %v4273_v20, %v16265_v19  ;;  %v16495_v44 = vrot.slane %v4274_v32, %v16265_v19 }
 0x1ec   : > { %v4540_v52 = vcombine.high %v4539_v42, %v4539_v42  ;;  %v4556_v62 = vcombine.high %v4555_v38, %v4555_v38  ;;  %v5127_v33 = vrot.slane %v5126_v13, 4  ;;  %v5133_v47 = vsel %vm5125_vm4, %v4532_v59, -inf }
 0x1ed   : > { %v5134_v51 = vrot.slane %v5133_v47, 4  ;;  %v5140_v10 = vsel %vm5125_vm4, %v4539_v42, -inf  ;;  %v5155_v43 = vrot.slane %v5154_v58, 4  ;;  %v5161_v7 = vsel %vm5125_vm4, %v4548_v25, -inf  ;;  %v14090_v25 = vld [vmem:[%s19530_s3 + $0x2c4] ss:$16 sps:$4 sm:$0xff]  }
 0x1ee   : > { %v5128_v14 = vmax.f32 %v5126_v13, %v5127_v33  ;;  %v5141_v31 = vrot.slane %v5140_v10, 4  ;;  %v5147_v8 = vsel %vm5125_vm4, %v4540_v52, -inf  ;;  %v5162_v20 = vrot.slane %v5161_v7, 4  ;;  %9223 = vmatprep.subr.bf16.mxu1 %v14090_v25 }
 0x1ef   : > { %v5135_v30 = vmax.f32 %v5133_v47, %v5134_v51  ;;  %v5148_v28 = vrot.slane %v5147_v8, 4  ;;  %v5156_v32 = vmax.f32 %v5154_v58, %v5155_v43  ;;  %v5168_v27 = vsel %vm5125_vm4, %v4555_v38, -inf  ;;  %v14088_v38 = vld [vmem:[%s19530_s3 + $0x2c0] ss:$16 sps:$4 sm:$0xff]  }
 0x1f0   : > { %v5129_v34 = vrot.slane %v5128_v14, 2  ;;  %v5142_v55 = vmax.f32 %v5140_v10, %v5141_v31  ;;  %v5163_v57 = vmax.f32 %v5161_v7, %v5162_v20  ;;  %v5169_v59 = vrot.slane %v5168_v27, 4  ;;  %9224 = vmatpush1.bf16.msra.mxu1 %v14088_v38 }
 0x1f1   : > { %v5136_v39 = vrot.slane %v5135_v30, 2  ;;  %v5149_v41 = vmax.f32 %v5147_v8, %v5148_v28  ;;  %v5157_v42 = vrot.slane %v5156_v32, 2  ;;  %v5175_v22 = vsel %vm5125_vm4, %v4556_v62, -inf  ;;  %v14093_v28 = vld [vmem:[%s19530_s3 + $0x84] ss:$16 sps:$4 sm:$0xff]  }
 0x1f2   : > { %v5130_v13 = vmax.f32 %v5128_v14, %v5129_v34  ;;  %v5143_v52 = vrot.slane %v5142_v55, 2  ;;  %v5164_v33 = vrot.slane %v5163_v57, 2  ;;  %v5170_v47 = vmax.f32 %v5168_v27, %v5169_v59  ;;  %v14091_v27 = vld [vmem:[%s19530_s3 + $0x80] ss:$16 sps:$4 sm:$0xff]   ;;  %9164 = vmatprep.subr.bf16.mxu0 %v14093_v28 }
 0x1f3   : > { %v5137_v31 = vmax.f32 %v5135_v30, %v5136_v39  ;;  %v5150_v58 = vrot.slane %v5149_v41, 2  ;;  %v5158_v51 = vmax.f32 %v5156_v32, %v5157_v42  ;;  %v5176_v10 = vrot.slane %v5175_v22, 4  ;;  %9165 = vmatpush1.bf16.msra.mxu0 %v14091_v27 }
 0x1f4   : > { %v5131_v62 = vrot.slane %v5130_v13, 1  ;;  %v5144_v43 = vmax.f32 %v5142_v55, %v5143_v52  ;;  %v5165_v34 = vmax.f32 %v5163_v57, %v5164_v33  ;;  %v5171_v7 = vrot.slane %v5170_v47, 2 }
 0x1f5   : > { %v5138_v30 = vrot.slane %v5137_v31, 1  ;;  %v5151_v39 = vmax.f32 %v5149_v41, %v5150_v58  ;;  %v5159_v14 = vrot.slane %v5158_v51, 1  ;;  %v5177_v8 = vmax.f32 %v5175_v22, %v5176_v10 }
 0x1f6   : > { %v5132_v20 = vmax.f32 %v5130_v13, %v5131_v62  ;;  %v5145_v32 = vrot.slane %v5144_v43, 1  ;;  %v5166_v59 = vrot.slane %v5165_v34, 1  ;;  %v5172_v42 = vmax.f32 %v5170_v47, %v5171_v7 }
 0x1f7   : > { %v5139_v55 = vmax.f32 %v5137_v31, %v5138_v30  ;;  %v5152_v57 = vrot.slane %v5151_v39, 1  ;;  %v5160_v25 = vmax.f32 %v5158_v51, %v5159_v14  ;;  %v5178_v52 = vrot.slane %v5177_v8, 2 }
 0x1f8   : > { %v5146_v33 = vmax.f32 %v5144_v43, %v5145_v32  ;;  %v5167_v38 = vmax.f32 %v5165_v34, %v5166_v59  ;;  %v5173_v37 = vrot.slane %v5172_v42, 1  ;;  %v5966_v5 = vpack.c.bf16 %v5132_v20, %v5132_v20 }
 0x1f9   : > { %v5153_v48 = vmax.f32 %v5151_v39, %v5152_v57  ;;  %v5179_v46 = vmax.f32 %v5177_v8, %v5178_v52  ;;  %v5967_v41 = vpack.c.bf16 %v5139_v55, %v5139_v55  ;;  %v5970_v58 = vpack.c.bf16 %v5160_v25, %v5160_v25 }
 0x1fa   : > { %v5174_v22 = vmax.f32 %v5172_v42, %v5173_v37  ;;  %v5968_v10 = vpack.c.bf16 %v5146_v33, %v5146_v33  ;;  %v5971_v28 = vpack.c.bf16 %v5167_v38, %v5167_v38  ;;  %v6206_v13 = vunpack.c.l.b16 %v5966_v5 }
 0x1fb   : > { %v5180_v62 = vrot.slane %v5179_v46, 1  ;;  %v5969_v11 = vpack.c.bf16 %v5153_v48, %v5153_v48  ;;  %v6207_v47 = vunpack.c.l.b16 %v5967_v41  ;;  %v6210_v7 = vunpack.c.l.b16 %v5970_v58 }
 0x1fc   : > { %v5972_v31 = vpack.c.bf16 %v5174_v22, %v5174_v22  ;;  %v6208_v27 = vunpack.c.l.b16 %v5968_v10  ;;  %v6211_v51 = vunpack.c.l.b16 %v5971_v28  ;;  %v4289_v43 = vcombine.high %v16492_v63, %v16492_v63 }
 0x1fd   : > { %v5181_v34 = vmax.f32 %v5179_v46, %v5180_v62  ;;  %v6209_v30 = vunpack.c.l.b16 %v5969_v11  ;;  %v4290_v39 = vcombine.high %v16495_v44, %v16495_v44  ;;  %v4563_v37 = vrot.slane %v16492_v63, %v16265_v19 }
 0x1fe   : > { %v6212_v14 = vunpack.c.l.b16 %v5972_v31  ;;  %v6327_v5 = vsel %vm6326_vm5, %v6208_v27, %v6206_v13  ;;  %v4571_v48 = vrot.slane %v4289_v43, %v16265_v19  ;;  %v4579_v8 = vrot.slane %v16495_v44, %v16265_v19 }
 0x1ff   : > { %v5973_v20 = vpack.c.bf16 %v5181_v34, %v5181_v34  ;;  %v6329_v32 = vsel %vm6328_vm6, %v6210_v7, %v6327_v5  ;;  %v6338_v46 = vsel %vm6326_vm5, %v6209_v30, %v6207_v47  ;;  %v4564_v11 = vcombine.high %v4563_v37, %v4563_v37 }
 0x200   : > { %v16528_v59 = vsel %vm6330_vm7, %v6212_v14, %v6329_v32  ;;  %v6339_v42 = vsel %vm6328_vm6, %v6211_v51, %v6338_v46  ;;  %v4572_v63 = vcombine.high %v4571_v48, %v4571_v48  ;;  %v4580_v55 = vcombine.high %v4579_v8, %v4579_v8 }
 0x201   : > { %v6213_v57 = vunpack.c.l.b16 %v5973_v20  ;;  %v4587_v25 = vrot.slane %v4290_v39, %v16265_v19  ;;  %v5182_v52 = vsel %vm5125_vm4, %v4563_v37, -inf  ;;  %v5189_v44 = vsel %vm5125_vm4, %v4564_v11, -inf }
 0x202   : > { %v5183_v33 = vrot.slane %v5182_v52, 4  ;;  %v5190_v38 = vrot.slane %v5189_v44, 4  ;;  %v5196_v41 = vsel %vm5125_vm4, %v4571_v48, -inf  ;;  %v5203_v58 = vsel %vm5125_vm4, %v4572_v63, -inf  ;;  %v14096_v63 = vld [vmem:[%s19530_s3 + $0x2a4] ss:$16 sps:$4 sm:$0xff]  }
 0x203   : > { %v16537_v22 = vsel %vm6330_vm7, %v6213_v57, %v6339_v42  ;;  %v4588_v10 = vcombine.high %v4587_v25, %v4587_v25  ;;  %v5197_v28 = vrot.slane %v5196_v41, 4  ;;  %v5204_v13 = vrot.slane %v5203_v58, 4  ;;  %9225 = vmatprep.subr.bf16.mxu1 %v14096_v63 }
 0x204   : > { %v5184_v62 = vmax.f32 %v5182_v52, %v5183_v33  ;;  %v5191_v47 = vmax.f32 %v5189_v44, %v5190_v38  ;;  %v5210_v7 = vsel %vm5125_vm4, %v4579_v8, -inf  ;;  %v5217_v31 = vsel %vm5125_vm4, %v4580_v55, -inf  ;;  %v4072_v44 = vpop.f32.mrf.mxu1  ;;  %v3963_v33 = vpop.f32.mrf.mxu0  ;;  %v14094_v38 = vld [vmem:[%s19530_s3 + $0x2a0] ss:$16 sps:$4 sm:$0xff]  }
 0x205   : > { %v5198_v27 = vmax.f32 %v5196_v41, %v5197_v28  ;;  %v5205_v51 = vmax.f32 %v5203_v58, %v5204_v13  ;;  %v5211_v43 = vrot.slane %v5210_v7, 4  ;;  %v5218_v34 = vrot.slane %v5217_v31, 4  ;;  %v14099_v13 = vld [vmem:[%s19530_s3 + $0x64] ss:$16 sps:$4 sm:$0xff]   ;;  %9226 = vmatpush1.bf16.msra.mxu1 %v14094_v38 }
 0x206   : > { %v5185_v30 = vrot.slane %v5184_v62, 2  ;;  %v5192_v39 = vrot.slane %v5191_v47, 2  ;;  %v5224_v37 = vsel %vm5125_vm4, %v4587_v25, -inf  ;;  %v5231_v14 = vsel %vm5125_vm4, %v4588_v10, -inf  ;;  %9166 = vmatprep.subr.bf16.mxu0 %v14099_v13 }
 0x207   : > { %v5199_v5 = vrot.slane %v5198_v27, 2  ;;  %v5206_v48 = vrot.slane %v5205_v51, 2  ;;  %v5212_v20 = vmax.f32 %v5210_v7, %v5211_v43  ;;  %v5219_v32 = vmax.f32 %v5217_v31, %v5218_v34 }
 0x208   : > { %v5186_v46 = vmax.f32 %v5184_v62, %v5185_v30  ;;  %v5193_v11 = vmax.f32 %v5191_v47, %v5192_v39  ;;  %v5225_v8 = vrot.slane %v5224_v37, 4  ;;  %v5232_v42 = vrot.slane %v5231_v14, 4 }
 0x209   : > { %v5200_v55 = vmax.f32 %v5198_v27, %v5199_v5  ;;  %v5207_v57 = vmax.f32 %v5205_v51, %v5206_v48  ;;  %v5213_v52 = vrot.slane %v5212_v20, 2  ;;  %v5220_v25 = vrot.slane %v5219_v32, 2  ;;  %v14097_v27 = vld [vmem:[%s19530_s3 + $0x60] ss:$16 sps:$4 sm:$0xff]   ;;  %v4074_v48 = vpop.f32.mrf.mxu1 }
 0x20a   : > { %v5187_v41 = vrot.slane %v5186_v46, 1  ;;  %v5194_v58 = vrot.slane %v5193_v11, 1  ;;  %v5226_v10 = vmax.f32 %v5224_v37, %v5225_v8  ;;  %v5233_v28 = vmax.f32 %v5231_v14, %v5232_v42  ;;  %v3967_v8 = vpop.f32.mrf.mxu0  ;;  %9167 = vmatpush1.bf16.msra.mxu0 %v14097_v27 }
 0x20b   : > { %v5201_v62 = vrot.slane %v5200_v55, 1  ;;  %v5208_v47 = vrot.slane %v5207_v57, 1  ;;  %v5214_v7 = vmax.f32 %v5212_v20, %v5213_v52  ;;  %v5221_v31 = vmax.f32 %v5219_v32, %v5220_v25 }
 0x20c   : > { %v5188_v51 = vmax.f32 %v5186_v46, %v5187_v41  ;;  %v5195_v43 = vmax.f32 %v5193_v11, %v5194_v58  ;;  %v5227_v34 = vrot.slane %v5226_v10, 2  ;;  %v5234_v30 = vrot.slane %v5233_v28, 2  ;;  %v3969_v23 = vpop.f32.mrf.mxu0 }
 0x20d   : > { %v5202_v39 = vmax.f32 %v5200_v55, %v5201_v62  ;;  %v5209_v37 = vmax.f32 %v5207_v57, %v5208_v47  ;;  %v5215_v14 = vrot.slane %v5214_v7, 1  ;;  %v5222_v5 = vrot.slane %v5221_v31, 1  ;;  %v4078_v47 = vpop.f32.mrf.mxu1 }
 0x20e   : > { %v5228_v42 = vmax.f32 %v5226_v10, %v5227_v34  ;;  %v5235_v20 = vmax.f32 %v5233_v28, %v5234_v30  ;;  %v5974_v32 = vpack.c.bf16 %v5188_v51, %v5188_v51  ;;  %v5975_v63 = vpack.c.bf16 %v5195_v43, %v5195_v43 }
 0x20f   : > { %v5216_v52 = vmax.f32 %v5214_v7, %v5215_v14  ;;  %v5223_v25 = vmax.f32 %v5221_v31, %v5222_v5  ;;  %v5976_v38 = vpack.c.bf16 %v5202_v39, %v5202_v39  ;;  %v5977_v9 = vpack.c.bf16 %v5209_v37, %v5209_v37 }
 0x210   : > { %v5229_v46 = vrot.slane %v5228_v42, 1  ;;  %v5236_v11 = vrot.slane %v5235_v20, 1  ;;  %v6214_v41 = vunpack.c.l.b16 %v5974_v32  ;;  %v6215_v58 = vunpack.c.l.b16 %v5975_v63  ;;  %v4080_v32 = vpop.f32.mrf.mxu1 }
 0x211   : > { %v5978_v57 = vpack.c.bf16 %v5216_v52, %v5216_v52  ;;  %v5979_v13 = vpack.c.bf16 %v5223_v25, %v5223_v25  ;;  %v6216_v62 = vunpack.c.l.b16 %v5976_v38  ;;  %v16562_v31 = vunpack.c.l.b16 %v5977_v9 }
 0x212   : > { %v5230_v27 = vmax.f32 %v5228_v42, %v5229_v46  ;;  %v5237_v10 = vmax.f32 %v5235_v20, %v5236_v11  ;;  %v6333_v28 = vsel %vm6332_vm8, %v6214_v41, %v16528_v59  ;;  %v16560_v7 = vsel %vm6332_vm8, %v6215_v58, %v16537_v22 }
 0x213   : > { %v6218_v51 = vunpack.c.l.b16 %v5978_v57  ;;  %v6335_v43 = vsel %vm6334_vm9, %v6216_v62, %v6333_v28  ;;  %v19733_v34 = vmax.f32 %v16478_v18, 0.0  ;;  %v19734_v30 = vmax.f32 %v16113_v53, 0.0  ;;  %v3971_v18 = vpop.f32.mrf.mxu0  ;;  %v4082_v57 = vpop.f32.mrf.mxu1 }
 0x214   : > { %v5980_v37 = vpack.c.bf16 %v5230_v27, %v5230_v27  ;;  %v5981_v14 = vpack.c.bf16 %v5237_v10, %v5237_v10  ;;  %v4073_v5 = vadd.f32 %v4072_v44, %v16471_v49  ;;  %v3964_v59 = vadd.f32 %v3963_v33, %v16324_v15 }
 0x215   : > { %v4200_v39 = vmax.f32 %v19734_v30, %v19733_v34  ;;  %v16572_v42 = vsel %vm6336_vm10, %v6218_v51, %v6335_v43  ;;  %v3968_v20 = vadd.f32 %v3967_v8, %v16328_v26  ;;  %v16577_v63 = vunpack.c.l.b16 %v5979_v13 }
 0x216   : > { %19735 = vst [vmem:[#allocation28_spill] sm:$0xff] %v16572_v42  ;;  %v16579_v53 = vunpack.c.l.b16 %v5980_v37  ;;  %v4149_v52 = vmax.f32 %v4073_v5, 0.0  ;;  %v4075_v25 = vadd.f32 %v4074_v48, %v3964_v59  ;;  %v3970_v33 = vadd.f32 %v3969_v23, %v16334_v12 }
 0x217   : > { %v4291_v9 = vcombine.low %v16484_v1, %v4200_v39  ;;  %v4292_v22 = vcombine.high %v16484_v1, %v4200_v39  ;;  %v16583_v44 = vadd.f32 %v4078_v47, %v3968_v20  ;;  %v16586_v38 = vunpack.c.l.b16 %v5981_v14 }
 0x218   : > { %v19736_v26 = vmax.f32 %v16118_v36, 0.0  ;;  %v4150_v8 = vmax.f32 %v4075_v25, 0.0  ;;  %v3972_v46 = vadd.f32 %v3971_v18, %v16342_v56  ;;  %v19737_v13 = vmax.f32 %v16281_v61, 0.0 }
 0x219   : > { %v4299_v49 = vrot.slane %v4291_v9, %v16265_v19  ;;  %v4306_v15 = vrot.slane %v4292_v22, %v16265_v19  ;;  %v4153_v23 = vmax.f32 %v16583_v44, 0.0  ;;  %v16600_v12 = vadd.f32 %v4080_v32, %v3970_v33 }
 0x21a   : > { %v16590_v1 = vmax.f32 %v19736_v26, %v4149_v52  ;;  %v16597_v62 = vmax.f32 %v19737_v13, %v4150_v8  ;;  %v16602_v36 = vadd.f32 %v4082_v57, %v3972_v46  ;;  %v14102_v57 = vld [vmem:[%s19530_s3 + $0x284] ss:$16 sps:$4 sm:$0xff]  }
 0x21b   : > { %v4307_v11 = vcombine.high %v4299_v49, %v4299_v49  ;;  %v4308_v41 = vcombine.high %v4306_v15, %v4306_v15  ;;  %v4595_v48 = vrot.slane %v4299_v49, %v16265_v19  ;;  %v4611_v58 = vrot.slane %v4306_v15, %v16265_v19  ;;  %9227 = vmatprep.subr.bf16.mxu1 %v14102_v57 }
 0x21c   : > { %v4309_v61 = vcombine.low %v16590_v1, %v16597_v62  ;;  %v4310_v43 = vcombine.high %v16590_v1, %v16597_v62 }
 0x21d   : > { %v4596_v47 = vcombine.high %v4595_v48, %v4595_v48  ;;  %v4603_v56 = vrot.slane %v4307_v11, %v16265_v19  ;;  %v4612_v27 = vcombine.high %v4611_v58, %v4611_v58  ;;  %v4619_v10 = vrot.slane %v4308_v41, %v16265_v19 }
 0x21e   : > { %v5238_v28 = vsel %vm5125_vm4, %v4595_v48, -inf  ;;  %v5266_v51 = vsel %vm5125_vm4, %v4611_v58, -inf }
 0x21f   : > { %v4604_v34 = vcombine.high %v4603_v56, %v4603_v56  ;;  %v4620_v30 = vcombine.high %v4619_v10, %v4619_v10  ;;  %v5239_v39 = vrot.slane %v5238_v28, 4  ;;  %v5245_v37 = vsel %vm5125_vm4, %v4596_v47, -inf }
 0x220   : > { %v5246_v14 = vrot.slane %v5245_v37, 4  ;;  %v5252_v5 = vsel %vm5125_vm4, %v4603_v56, -inf  ;;  %v5267_v59 = vrot.slane %v5266_v51, 4  ;;  %v5273_v9 = vsel %vm5125_vm4, %v4612_v27, -inf }
 0x221   : > { %v5240_v22 = vmax.f32 %v5238_v28, %v5239_v39  ;;  %v5253_v20 = vrot.slane %v5252_v5, 4  ;;  %v5259_v32 = vsel %vm5125_vm4, %v4604_v34, -inf  ;;  %v5274_v18 = vrot.slane %v5273_v9, 4 }
 0x222   : > { %v5247_v52 = vmax.f32 %v5245_v37, %v5246_v14  ;;  %v5260_v25 = vrot.slane %v5259_v32, 4  ;;  %v5268_v49 = vmax.f32 %v5266_v51, %v5267_v59  ;;  %v5280_v15 = vsel %vm5125_vm4, %v4619_v10, -inf  ;;  %v14100_v10 = vld [vmem:[%s19530_s3 + $0x280] ss:$16 sps:$4 sm:$0xff]  }
 0x223   : > { %v5241_v33 = vrot.slane %v5240_v22, 2  ;;  %v5254_v26 = vmax.f32 %v5252_v5, %v5253_v20  ;;  %v5275_v8 = vmax.f32 %v5273_v9, %v5274_v18  ;;  %v5281_v46 = vrot.slane %v5280_v15, 4  ;;  %9228 = vmatpush1.bf16.msra.mxu1 %v14100_v10 }
 0x224   : > { %v5248_v11 = vrot.slane %v5247_v52, 2  ;;  %v5261_v41 = vmax.f32 %v5259_v32, %v5260_v25  ;;  %v5269_v48 = vrot.slane %v5268_v49, 2  ;;  %v5287_v58 = vsel %vm5125_vm4, %v4620_v30, -inf }
 0x225   : > { %v5242_v13 = vmax.f32 %v5240_v22, %v5241_v33  ;;  %v5255_v47 = vrot.slane %v5254_v26, 2  ;;  %v5276_v56 = vrot.slane %v5275_v8, 2  ;;  %v5282_v27 = vmax.f32 %v5280_v15, %v5281_v46 }
 0x226   : > { %v5249_v28 = vmax.f32 %v5247_v52, %v5248_v11  ;;  %v5262_v51 = vrot.slane %v5261_v41, 2  ;;  %v5270_v34 = vmax.f32 %v5268_v49, %v5269_v48  ;;  %v5288_v39 = vrot.slane %v5287_v58, 4 }
 0x227   : > { %v5243_v37 = vrot.slane %v5242_v13, 1  ;;  %v5256_v30 = vmax.f32 %v5254_v26, %v5255_v47  ;;  %v5277_v14 = vmax.f32 %v5275_v8, %v5276_v56  ;;  %v5283_v5 = vrot.slane %v5282_v27, 2  ;;  %v14105_v26 = vld [vmem:[%s19530_s3 + $0x44] ss:$16 sps:$4 sm:$0xff]  }
 0x228   : > { %v5250_v59 = vrot.slane %v5249_v28, 1  ;;  %v5263_v9 = vmax.f32 %v5261_v41, %v5262_v51  ;;  %v5271_v22 = vrot.slane %v5270_v34, 1  ;;  %v5289_v20 = vmax.f32 %v5287_v58, %v5288_v39  ;;  %9168 = vmatprep.subr.bf16.mxu0 %v14105_v26  ;;  %v14108_v51 = vld [vmem:[%s19530_s3 + $0x264] ss:$16 sps:$4 sm:$0xff]  }
 0x229   : > { %v5244_v32 = vmax.f32 %v5242_v13, %v5243_v37  ;;  %v5257_v18 = vrot.slane %v5256_v30, 1  ;;  %v5278_v25 = vrot.slane %v5277_v14, 1  ;;  %v5284_v15 = vmax.f32 %v5282_v27, %v5283_v5  ;;  %v14103_v13 = vld [vmem:[%s19530_s3 + $0x40] ss:$16 sps:$4 sm:$0xff]   ;;  %9229 = vmatprep.subr.bf16.mxu1 %v14108_v51 }
 0x22a   : > { %v5251_v33 = vmax.f32 %v5249_v28, %v5250_v59  ;;  %v5264_v46 = vrot.slane %v5263_v9, 1  ;;  %v5272_v52 = vmax.f32 %v5270_v34, %v5271_v22  ;;  %v5290_v11 = vrot.slane %v5289_v20, 2  ;;  %9169 = vmatpush1.bf16.msra.mxu0 %v14103_v13 }
 0x22b   : > { %v5258_v49 = vmax.f32 %v5256_v30, %v5257_v18  ;;  %v5279_v48 = vmax.f32 %v5277_v14, %v5278_v25  ;;  %v5285_v57 = vrot.slane %v5284_v15, 1  ;;  %v5982_v55 = vpack.c.bf16 %v5244_v32, %v5244_v32  ;;  %v14106_v14 = vld [vmem:[%s19530_s3 + $0x260] ss:$16 sps:$4 sm:$0xff]  }
 0x22c   : > { %v5265_v8 = vmax.f32 %v5263_v9, %v5264_v46  ;;  %v5291_v41 = vmax.f32 %v5289_v20, %v5290_v11  ;;  %v5983_v47 = vpack.c.bf16 %v5251_v33, %v5251_v33  ;;  %v5986_v58 = vpack.c.bf16 %v5272_v52, %v5272_v52  ;;  %9230 = vmatpush1.bf16.msra.mxu1 %v14106_v14 }
 0x22d   : > { %v5286_v56 = vmax.f32 %v5284_v15, %v5285_v57  ;;  %v5984_v27 = vpack.c.bf16 %v5258_v49, %v5258_v49  ;;  %v5987_v10 = vpack.c.bf16 %v5279_v48, %v5279_v48  ;;  %v6222_v28 = vunpack.c.l.b16 %v5982_v55 }
 0x22e   : > { %v5292_v34 = vrot.slane %v5291_v41, 1  ;;  %v5985_v39 = vpack.c.bf16 %v5265_v8, %v5265_v8  ;;  %v6223_v37 = vunpack.c.l.b16 %v5983_v47  ;;  %v6226_v30 = vunpack.c.l.b16 %v5986_v58 }
 0x22f   : > { %v5988_v5 = vpack.c.bf16 %v5286_v56, %v5286_v56  ;;  %v6224_v59 = vunpack.c.l.b16 %v5984_v27  ;;  %v6227_v9 = vunpack.c.l.b16 %v5987_v10  ;;  %v6345_v55 = vsel %vm6344_vm11, %v6222_v28, %v16579_v53  ;;  %v16671_v27 = vpop.f32.mrf.mxu0 }
 0x230   : > { %v5293_v22 = vmax.f32 %v5291_v41, %v5292_v34  ;;  %v6225_v20 = vunpack.c.l.b16 %v5985_v39  ;;  %v6352_v32 = vsel %vm6344_vm11, %v6223_v37, %v16586_v38  ;;  %v4317_v18 = vrot.slane %v4309_v61, %v16265_v19 }
 0x231   : > { %v6228_v25 = vunpack.c.l.b16 %v5988_v5  ;;  %v6346_v15 = vsel %vm6326_vm5, %v6224_v59, %v6345_v55  ;;  %v4324_v53 = vrot.slane %v4310_v43, %v16265_v19  ;;  %v19738_v33 = vmax.f32 %v16133_v4, 0.0 }
 0x232   : > { %v5989_v38 = vpack.c.bf16 %v5293_v22, %v5293_v22  ;;  %v6347_v52 = vsel %vm6328_vm6, %v6226_v30, %v6346_v15  ;;  %v6353_v61 = vsel %vm6326_vm5, %v6225_v20, %v6352_v32  ;;  %v4325_v11 = vcombine.high %v4317_v18, %v4317_v18 }
 0x233   : > { %v16653_v46 = vmax.f32 %v19738_v33, %v4153_v23  ;;  %v16658_v49 = vsel %vm6330_vm7, %v6228_v25, %v6347_v52  ;;  %v6354_v48 = vsel %vm6328_vm6, %v6227_v9, %v6353_v61  ;;  %v4326_v57 = vcombine.high %v4324_v53, %v4324_v53  ;;  %v16679_v25 = vpop.f32.mrf.mxu0 }
 0x234   : > { %v4627_v1 = vrot.slane %v4317_v18, %v16265_v19  ;;  %v6229_v62 = vunpack.c.l.b16 %v5989_v38  ;;  %v4635_v44 = vrot.slane %v4325_v11, %v16265_v19  ;;  %v4643_v4 = vrot.slane %v4324_v53, %v16265_v19 }
 0x235   : > { %v4154_v23 = vmax.f32 %v16600_v12, 0.0  ;;  %v4651_v26 = vrot.slane %v4326_v57, %v16265_v19  ;;  %v4157_v41 = vmax.f32 %v16602_v36, 0.0  ;;  %v16682_v57 = vpop.f32.mrf.mxu1 }
 0x236   : > { %v4628_v43 = vcombine.high %v4627_v1, %v4627_v1  ;;  %v5294_v8 = vsel %vm5125_vm4, %v4627_v1, -inf  ;;  %v16669_v47 = vsel %vm6330_vm7, %v6229_v62, %v6354_v48  ;;  %v4636_v58 = vcombine.high %v4635_v44, %v4635_v44 }
 0x237   : > { %v4644_v13 = vcombine.high %v4643_v4, %v4643_v4  ;;  %v5295_v56 = vrot.slane %v5294_v8, 4  ;;  %v4652_v10 = vcombine.high %v4651_v26, %v4651_v26  ;;  %v5308_v51 = vsel %vm5125_vm4, %v4635_v44, -inf }
 0x238   : > { %v5301_v28 = vsel %vm5125_vm4, %v4628_v43, -inf  ;;  %v5322_v34 = vsel %vm5125_vm4, %v4643_v4, -inf  ;;  %v5309_v30 = vrot.slane %v5308_v51, 4  ;;  %v5315_v14 = vsel %vm5125_vm4, %v4636_v58, -inf }
 0x239   : > { %v5296_v39 = vmax.f32 %v5294_v8, %v5295_v56  ;;  %v5302_v37 = vrot.slane %v5301_v28, 4  ;;  %v5316_v5 = vrot.slane %v5315_v14, 4  ;;  %v5323_v59 = vrot.slane %v5322_v34, 4 }
 0x23a   : > { %v5329_v9 = vsel %vm5125_vm4, %v4644_v13, -inf  ;;  %v5336_v55 = vsel %vm5125_vm4, %v4651_v26, -inf  ;;  %v5310_v32 = vmax.f32 %v5308_v51, %v5309_v30  ;;  %v5343_v38 = vsel %vm5125_vm4, %v4652_v10, -inf  ;;  %v16684_v13 = vpop.f32.mrf.mxu0 }
 0x23b   : > { %v5297_v22 = vrot.slane %v5296_v39, 2  ;;  %v5303_v20 = vmax.f32 %v5301_v28, %v5302_v37  ;;  %v5330_v18 = vrot.slane %v5329_v9, 4  ;;  %v5317_v15 = vmax.f32 %v5315_v14, %v5316_v5  ;;  %v4088_v14 = vpop.f32.mrf.mxu1 }
 0x23c   : > { %v5324_v53 = vmax.f32 %v5322_v34, %v5323_v59  ;;  %v5337_v33 = vrot.slane %v5336_v55, 4  ;;  %v5311_v11 = vrot.slane %v5310_v32, 2  ;;  %v5344_v4 = vrot.slane %v5343_v38, 4 }
 0x23d   : > { %v5298_v52 = vmax.f32 %v5296_v39, %v5297_v22  ;;  %v5304_v61 = vrot.slane %v5303_v20, 2  ;;  %v5331_v48 = vmax.f32 %v5329_v9, %v5330_v18  ;;  %v5318_v1 = vrot.slane %v5317_v15, 2 }
 0x23e   : > { %v5325_v62 = vrot.slane %v5324_v53, 2  ;;  %v5338_v44 = vmax.f32 %v5336_v55, %v5337_v33  ;;  %v5312_v8 = vmax.f32 %v5310_v32, %v5311_v11  ;;  %v5345_v10 = vmax.f32 %v5343_v38, %v5344_v4  ;;  %v3981_v33 = vpop.f32.mrf.mxu0  ;;  %v14109_v11 = vld [vmem:[%s19530_s3 + $0x20] ss:$16 sps:$4 sm:$0xff]   ;;  %v4090_v4 = vpop.f32.mrf.mxu1 }
 0x23f   : > { %v5299_v43 = vrot.slane %v5298_v52, 1  ;;  %v5305_v26 = vmax.f32 %v5303_v20, %v5304_v61  ;;  %v5332_v58 = vrot.slane %v5331_v48, 2  ;;  %v5319_v56 = vmax.f32 %v5317_v15, %v5318_v1  ;;  %v14111_v15 = vld [vmem:[%s19530_s3 + $0x24] ss:$16 sps:$4 sm:$0xff]  }
 0x240   : > { %v5326_v28 = vmax.f32 %v5324_v53, %v5325_v62  ;;  %v5339_v51 = vrot.slane %v5338_v44, 2  ;;  %v5313_v37 = vrot.slane %v5312_v8, 1  ;;  %v5346_v55 = vrot.slane %v5345_v10, 2  ;;  %9170 = vmatprep.subr.bf16.mxu0 %v14111_v15 }
 0x241   : > { %v5300_v34 = vmax.f32 %v5298_v52, %v5299_v43  ;;  %v5306_v39 = vrot.slane %v5305_v26, 1  ;;  %v5333_v30 = vmax.f32 %v5331_v48, %v5332_v58  ;;  %v5320_v5 = vrot.slane %v5319_v56, 1  ;;  %v14114_v43 = vld [vmem:[%s19530_s3 + $0x244] ss:$16 sps:$4 sm:$0xff]   ;;  %9171 = vmatpush1.bf16.msra.mxu0 %v14109_v11 }
 0x242   : > { %v5327_v59 = vrot.slane %v5326_v28, 1  ;;  %v5340_v9 = vmax.f32 %v5338_v44, %v5339_v51  ;;  %v5314_v18 = vmax.f32 %v5312_v8, %v5313_v37  ;;  %v5347_v61 = vmax.f32 %v5345_v10, %v5346_v55  ;;  %v3983_v37 = vpop.f32.mrf.mxu0  ;;  %9231 = vmatprep.subr.bf16.mxu1 %v14114_v43 }
 0x243   : > { %v5307_v22 = vmax.f32 %v5305_v26, %v5306_v39  ;;  %v5334_v20 = vrot.slane %v5333_v30, 1  ;;  %v5990_v32 = vpack.c.bf16 %v5300_v34, %v5300_v34  ;;  %v5321_v53 = vmax.f32 %v5319_v56, %v5320_v5 }
 0x244   : > { %v5328_v38 = vmax.f32 %v5326_v28, %v5327_v59  ;;  %v5341_v52 = vrot.slane %v5340_v9, 1  ;;  %v5992_v62 = vpack.c.bf16 %v5314_v18, %v5314_v18  ;;  %v5348_v8 = vrot.slane %v5347_v61, 1  ;;  %v14112_v28 = vld [vmem:[%s19530_s3 + $0x240] ss:$16 sps:$4 sm:$0xff]  }
 0x245   : > { %v16692_v48 = vmax.f32 %v5333_v30, %v5334_v20  ;;  %v5991_v1 = vpack.c.bf16 %v5307_v22, %v5307_v22  ;;  %v6230_v44 = vunpack.c.l.b16 %v5990_v32  ;;  %v5993_v58 = vpack.c.bf16 %v5321_v53, %v5321_v53  ;;  %9232 = vmatpush1.bf16.msra.mxu1 %v14112_v28 }
 0x246   : > { %v5342_v26 = vmax.f32 %v5340_v9, %v5341_v52  ;;  %v5994_v56 = vpack.c.bf16 %v5328_v38, %v5328_v38  ;;  %v6232_v10 = vunpack.c.l.b16 %v5992_v62  ;;  %v3974_v39 = vadd.f32 %v16671_v27, %v16347_v29  ;;  %v4092_v27 = vpop.f32.mrf.mxu1  ;;  %v3987_v52 = vpop.f32.mrf.mxu0 }
 0x247   : > { %v6231_v51 = vunpack.c.l.b16 %v5991_v1  ;;  %v6349_v34 = vsel %vm6332_vm8, %v6230_v44, %v16658_v49  ;;  %v5349_v30 = vmax.f32 %v5347_v61, %v5348_v8  ;;  %v5995_v5 = vpack.c.bf16 %v16692_v48, %v16692_v48 }
 0x248   : > { %v5996_v59 = vpack.c.bf16 %v5342_v26, %v5342_v26  ;;  %v6234_v9 = vunpack.c.l.b16 %v5994_v56  ;;  %v16706_v55 = vunpack.c.l.b16 %v5993_v58  ;;  %v6350_v22 = vsel %vm6334_vm9, %v6232_v10, %v6349_v34 }
 0x249   : > { %v16711_v18 = vsel %vm6332_vm8, %v6231_v51, %v16669_v47  ;;  %v19741_v29 = vmax.f32 %v16138_v16, 0.0  ;;  %v5997_v20 = vpack.c.bf16 %v5349_v30, %v5349_v30  ;;  %v19743_v53 = vmax.f32 %v19697_v17, 0.0 }
 0x24a   : > { %19739 = vst [vmem:[#allocation32_spill] sm:$0xff] %v16706_v55  ;;  %19740 = vst [vmem:[#allocation34_spill] sm:$0xff] %v16711_v18  ;;  %v16717_v32 = vunpack.c.l.b16 %v5996_v59  ;;  %v16720_v15 = vsel %vm6336_vm10, %v6234_v9, %v6350_v22  ;;  %v4085_v16 = vadd.f32 %v16682_v57, %v3974_v39  ;;  %v3980_v11 = vadd.f32 %v16684_v13, %v16357_v60  ;;  %v4094_v57 = vpop.f32.mrf.mxu1 }
 0x24b   : > { %v4204_v49 = vmax.f32 %v19741_v29, %v4154_v23  ;;  %19742 = vst [vmem:[#allocation36_spill] sm:$0xff] %v16720_v15  ;;  %v16726_v38 = vmax.f32 %v19743_v53, %v4157_v41  ;;  %v3978_v23 = vadd.f32 %v16679_v25, %v16352_v54  ;;  %v16733_v61 = vunpack.c.l.b16 %v5997_v20 }
 0x24c   : > { %v3982_v36 = vadd.f32 %v3981_v33, %v16365_v3  ;;  %v3984_v17 = vadd.f32 %v3983_v37, %v16369_v21  ;;  %v16743_v44 = vadd.f32 %v4090_v4, %v3980_v11  ;;  %v16750_v60 = vadd.f32 %v3987_v52, %v16381_v2 }
 0x24d   : > { %v4327_v47 = vcombine.low %v16653_v46, %v4204_v49  ;;  %v4328_v12 = vcombine.high %v16653_v46, %v4204_v49  ;;  %v4158_v46 = vmax.f32 %v4085_v16, 0.0  ;;  %v16741_v62 = vadd.f32 %v4088_v14, %v3978_v23 }
 0x24e   : > { %v16745_v54 = vadd.f32 %v4092_v27, %v3982_v36  ;;  %v16747_v25 = vadd.f32 %v4094_v57, %v3984_v17  ;;  %v19744_v43 = vmax.f32 %v16304_v6, 0.0  ;;  %v4162_v26 = vmax.f32 %v16743_v44, 0.0 }
 0x24f   : > { %v4335_v41 = vrot.slane %v4327_v47, %v16265_v19  ;;  %v4342_v1 = vrot.slane %v4328_v12, %v16265_v19  ;;  %v4161_v4 = vmax.f32 %v16741_v62, 0.0 }
 0x250   : > { %v16756_v14 = vmax.f32 %v19744_v43, %v4158_v46  ;;  %v4165_v8 = vmax.f32 %v16745_v54, 0.0 }
 0x251   : > { %v4343_v3 = vcombine.high %v4335_v41, %v4335_v41  ;;  %v4344_v13 = vcombine.high %v4342_v1, %v4342_v1  ;;  %v4659_v21 = vrot.slane %v4335_v41, %v16265_v19  ;;  %v4675_v33 = vrot.slane %v4342_v1, %v16265_v19 }
 0x252   : > { %v4345_v6 = vcombine.low %v16726_v38, %v16756_v14  ;;  %v4346_v34 = vcombine.high %v16726_v38, %v16756_v14 }
 0x253   : > { %v4660_v58 = vcombine.high %v4659_v21, %v4659_v21  ;;  %v4667_v2 = vrot.slane %v4343_v3, %v16265_v19  ;;  %v4676_v56 = vcombine.high %v4675_v33, %v4675_v33  ;;  %v4683_v28 = vrot.slane %v4344_v13, %v16265_v19 }
 0x254   : > { %v5350_v51 = vsel %vm5125_vm4, %v4659_v21, -inf  ;;  %v5378_v10 = vsel %vm5125_vm4, %v4675_v33, -inf }
 0x255   : > { %v4668_v39 = vcombine.high %v4667_v2, %v4667_v2  ;;  %v4684_v37 = vcombine.high %v4683_v28, %v4683_v28  ;;  %v5351_v30 = vrot.slane %v5350_v51, 4  ;;  %v5357_v59 = vsel %vm5125_vm4, %v4660_v58, -inf }
 0x256   : > { %v5358_v9 = vrot.slane %v5357_v59, 4  ;;  %v5364_v22 = vsel %vm5125_vm4, %v4667_v2, -inf  ;;  %v5379_v29 = vrot.slane %v5378_v10, 4  ;;  %v5385_v49 = vsel %vm5125_vm4, %v4676_v56, -inf }
 0x257   : > { %v5352_v27 = vmax.f32 %v5350_v51, %v5351_v30  ;;  %v5365_v20 = vrot.slane %v5364_v22, 4  ;;  %v5371_v53 = vsel %vm5125_vm4, %v4668_v39, -inf  ;;  %v5386_v47 = vrot.slane %v5385_v49, 4 }
 0x258   : > { %v5359_v12 = vmax.f32 %v5357_v59, %v5358_v9  ;;  %v5372_v16 = vrot.slane %v5371_v53, 4  ;;  %v5380_v23 = vmax.f32 %v5378_v10, %v5379_v29  ;;  %v5392_v52 = vsel %vm5125_vm4, %v4683_v28, -inf  ;;  %v14117_v28 = vld [vmem:[%s19530_s3 + $0x4] ss:$16 sps:$4 sm:$0xff]  }
 0x259   : > { %v5353_v11 = vrot.slane %v5352_v27, 2  ;;  %v5366_v36 = vmax.f32 %v5364_v22, %v5365_v20  ;;  %v5387_v17 = vmax.f32 %v5385_v49, %v5386_v47  ;;  %v5393_v41 = vrot.slane %v5392_v52, 4  ;;  %9172 = vmatprep.subr.bf16.mxu0 %v14117_v28 }
 0x25a   : > { %v5360_v1 = vrot.slane %v5359_v12, 2  ;;  %v5373_v46 = vmax.f32 %v5371_v53, %v5372_v16  ;;  %v5381_v57 = vrot.slane %v5380_v23, 2  ;;  %v5399_v3 = vsel %vm5125_vm4, %v4684_v37, -inf  ;;  %v14115_v37 = vld [vmem:[%s19530_s3] ss:$16 sps:$4 sm:$0xff]  }
 0x25b   : > { %v5354_v13 = vmax.f32 %v5352_v27, %v5353_v11  ;;  %v5367_v21 = vrot.slane %v5366_v36, 2  ;;  %v5388_v33 = vrot.slane %v5387_v17, 2  ;;  %v5394_v43 = vmax.f32 %v5392_v52, %v5393_v41  ;;  %v14120_v27 = vld [vmem:[%s19530_s3 + $0x224] ss:$16 sps:$4 sm:$0xff]   ;;  %9173 = vmatpush1.bf16.msra.mxu0 %v14115_v37  ;;  %v14118_v16 = vld [vmem:[%s19530_s3 + $0x220] ss:$16 sps:$4 sm:$0xff]  }
 0x25c   : > { %v5361_v58 = vmax.f32 %v5359_v12, %v5360_v1  ;;  %v5374_v2 = vrot.slane %v5373_v46, 2  ;;  %v5382_v56 = vmax.f32 %v5380_v23, %v5381_v57  ;;  %v5400_v51 = vrot.slane %v5399_v3, 4  ;;  %9233 = vmatprep.subr.bf16.mxu1 %v14120_v27 }
 0x25d   : > { %v5355_v10 = vrot.slane %v5354_v13, 1  ;;  %v5368_v39 = vmax.f32 %v5366_v36, %v5367_v21  ;;  %v5389_v30 = vmax.f32 %v5387_v17, %v5388_v33  ;;  %v5395_v59 = vrot.slane %v5394_v43, 2  ;;  %9234 = vmatpush1.bf16.msra.mxu1 %v14118_v16 }
 0x25e   : > { %v5362_v9 = vrot.slane %v5361_v58, 1  ;;  %v5375_v22 = vmax.f32 %v5373_v46, %v5374_v2  ;;  %v5383_v29 = vrot.slane %v5382_v56, 1  ;;  %v5401_v49 = vmax.f32 %v5399_v3, %v5400_v51 }
 0x25f   : > { %v5356_v20 = vmax.f32 %v5354_v13, %v5355_v10  ;;  %v5369_v53 = vrot.slane %v5368_v39, 1  ;;  %v5390_v47 = vrot.slane %v5389_v30, 1  ;;  %v5396_v12 = vmax.f32 %v5394_v43, %v5395_v59 }
 0x260   : > { %v5363_v23 = vmax.f32 %v5361_v58, %v5362_v9  ;;  %v5376_v52 = vrot.slane %v5375_v22, 1  ;;  %v5384_v11 = vmax.f32 %v5382_v56, %v5383_v29  ;;  %v5402_v36 = vrot.slane %v5401_v49, 2 }
 0x261   : > { %v5370_v17 = vmax.f32 %v5368_v39, %v5369_v53  ;;  %v5391_v41 = vmax.f32 %v5389_v30, %v5390_v47  ;;  %v5397_v1 = vrot.slane %v5396_v12, 1  ;;  %v5998_v46 = vpack.c.bf16 %v5356_v20, %v5356_v20 }
 0x262   : > { %v5377_v57 = vmax.f32 %v5375_v22, %v5376_v52  ;;  %v5403_v3 = vmax.f32 %v5401_v49, %v5402_v36  ;;  %v5999_v13 = vpack.c.bf16 %v5363_v23, %v5363_v23  ;;  %v6002_v21 = vpack.c.bf16 %v5384_v11, %v5384_v11 }
 0x263   : > { %v5398_v33 = vmax.f32 %v5396_v12, %v5397_v1  ;;  %v6000_v43 = vpack.c.bf16 %v5370_v17, %v5370_v17  ;;  %v6003_v2 = vpack.c.bf16 %v5391_v41, %v5391_v41  ;;  %v6238_v51 = vunpack.c.l.b16 %v5998_v46 }
 0x264   : > { %v5404_v28 = vrot.slane %v5403_v3, 1  ;;  %v6001_v10 = vpack.c.bf16 %v5377_v57, %v5377_v57  ;;  %v6239_v58 = vunpack.c.l.b16 %v5999_v13  ;;  %v6242_v59 = vunpack.c.l.b16 %v6002_v21 }
 0x265   : > { %v6004_v56 = vpack.c.bf16 %v5398_v33, %v5398_v33  ;;  %v6240_v37 = vunpack.c.l.b16 %v6000_v43  ;;  %v6243_v9 = vunpack.c.l.b16 %v6003_v2  ;;  %v6359_v39 = vsel %vm6326_vm5, %v6238_v51, %v16717_v32  ;;  %v19745_v32 = vld [vmem:[#allocation23_spill] sm:$0xff] }
 0x266   : > { %v5405_v30 = vmax.f32 %v5403_v3, %v5404_v28  ;;  %v6241_v29 = vunpack.c.l.b16 %v6001_v10  ;;  %v6365_v22 = vsel %vm6326_vm5, %v6239_v58, %v16733_v61  ;;  %v4353_v49 = vrot.slane %v4345_v6, %v16265_v19  ;;  %v19749_v3 = vld [vmem:[#allocation10_spill] sm:$0xff] }
 0x267   : > { %v6244_v27 = vunpack.c.l.b16 %v6004_v56  ;;  %v6360_v20 = vsel %vm6328_vm6, %v6240_v37, %v6359_v39  ;;  %v4360_v53 = vrot.slane %v4346_v34, %v16265_v19  ;;  %v19746_v47 = vmax.f32 %v19745_v32, 0.0  ;;  %v19747_v34 = vld [vmem:[#allocation29_spill] sm:$0xff] }
 0x268   : > { %v6005_v61 = vpack.c.bf16 %v5405_v30, %v5405_v30  ;;  %v6361_v16 = vsel %vm6330_vm7, %v6242_v59, %v6360_v20  ;;  %v6366_v23 = vsel %vm6328_vm6, %v6241_v29, %v6365_v22  ;;  %v4361_v6 = vcombine.high %v4353_v49, %v4353_v49 }
 0x269   : > { %v16804_v12 = vmax.f32 %v19746_v47, %v4161_v4  ;;  %v16809_v52 = vsel %vm6332_vm8, %v6244_v27, %v6361_v16  ;;  %v6367_v11 = vsel %vm6330_vm7, %v6243_v9, %v6366_v23  ;;  %v4362_v36 = vcombine.high %v4360_v53, %v4360_v53 }
 0x26a   : > { %v4691_v38 = vrot.slane %v4353_v49, %v16265_v19  ;;  %v6245_v14 = vunpack.c.l.b16 %v6005_v61  ;;  %v4699_v62 = vrot.slane %v4361_v6, %v16265_v19  ;;  %v4707_v4 = vrot.slane %v4360_v53, %v16265_v19 }
 0x26b   : > { %v19748_v17 = vmax.f32 %v19747_v34, 0.0  ;;  %v4715_v46 = vrot.slane %v4362_v36, %v16265_v19  ;;  %v19750_v13 = vmax.f32 %v19749_v3, 0.0 }
 0x26c   : > { %v4692_v1 = vcombine.high %v4691_v38, %v4691_v38  ;;  %v5406_v57 = vsel %vm5125_vm4, %v4691_v38, -inf  ;;  %v16830_v33 = vsel %vm6332_vm8, %v6245_v14, %v6367_v11  ;;  %v4700_v43 = vcombine.high %v4699_v62, %v4699_v62 }
 0x26d   : > { %v16819_v41 = vmax.f32 %v19748_v17, %v4162_v26  ;;  %v16827_v21 = vmax.f32 %v19750_v13, %v4165_v8  ;;  %v4708_v44 = vcombine.high %v4707_v4, %v4707_v4  ;;  %v5407_v2 = vrot.slane %v5406_v57, 4  ;;  %v14123_v17 = vld [vmem:[%s19530_s3 + $0x1e4] ss:$16 sps:$4 sm:$0xff]   ;;  %v14121_v13 = vld [vmem:[%s19530_s3 + $0x1e0] ss:$16 sps:$4 sm:$0xff]  }
 0x26e   : > { %v4716_v51 = vcombine.high %v4715_v46, %v4715_v46  ;;  %v5413_v26 = vsel %vm5125_vm4, %v4692_v1, -inf  ;;  %v5420_v28 = vsel %vm5125_vm4, %v4699_v62, -inf  ;;  %v5434_v10 = vsel %vm5125_vm4, %v4707_v4, -inf  ;;  %9174 = vmatprep.subr.bf16.mxu0 %v14123_v17 }
 0x26f   : > { %v5408_v58 = vmax.f32 %v5406_v57, %v5407_v2  ;;  %v5414_v59 = vrot.slane %v5413_v26, 4  ;;  %v5421_v54 = vrot.slane %v5420_v28, 4  ;;  %v5427_v56 = vsel %vm5125_vm4, %v4700_v43, -inf  ;;  %9175 = vmatpush2.bf16.msra.mxu0 %v14121_v13 }
 0x270   : > { %v5428_v8 = vrot.slane %v5427_v56, 4  ;;  %v5435_v37 = vrot.slane %v5434_v10, 4  ;;  %v5441_v9 = vsel %vm5125_vm4, %v4708_v44, -inf  ;;  %v5448_v39 = vsel %vm5125_vm4, %v4715_v46, -inf }
 0x271   : > { %v5409_v30 = vrot.slane %v5408_v58, 2  ;;  %v5415_v29 = vmax.f32 %v5413_v26, %v5414_v59  ;;  %v5422_v22 = vmax.f32 %v5420_v28, %v5421_v54  ;;  %v5442_v49 = vrot.slane %v5441_v9, 4 }
 0x272   : > { %v5429_v27 = vmax.f32 %v5427_v56, %v5428_v8  ;;  %v5436_v20 = vmax.f32 %v5434_v10, %v5435_v37  ;;  %v5449_v53 = vrot.slane %v5448_v39, 4  ;;  %v5455_v32 = vsel %vm5125_vm4, %v4716_v51, -inf }
 0x273   : > { %v5410_v47 = vmax.f32 %v5408_v58, %v5409_v30  ;;  %v5416_v61 = vrot.slane %v5415_v29, 2  ;;  %v5423_v16 = vrot.slane %v5422_v22, 2  ;;  %v5443_v23 = vmax.f32 %v5441_v9, %v5442_v49 }
 0x274   : > { %v5430_v6 = vrot.slane %v5429_v27, 2  ;;  %v5437_v11 = vrot.slane %v5436_v20, 2  ;;  %v5450_v36 = vmax.f32 %v5448_v39, %v5449_v53  ;;  %v5456_v38 = vrot.slane %v5455_v32, 4 }
 0x275   : > { %v5411_v14 = vrot.slane %v5410_v47, 1  ;;  %v5417_v62 = vmax.f32 %v5415_v29, %v5416_v61  ;;  %v5424_v4 = vmax.f32 %v5422_v22, %v5423_v16  ;;  %v5444_v34 = vrot.slane %v5443_v23, 2  ;;  %v3989_v29 = vpop.f32.mrf.mxu0  ;;  %v14126_v22 = vld [vmem:[%s19530_s3 + $0x204] ss:$16 sps:$4 sm:$0xff]  }
 0x276   : > { %v5431_v1 = vmax.f32 %v5429_v27, %v5430_v6  ;;  %v5438_v46 = vmax.f32 %v5436_v20, %v5437_v11  ;;  %v5451_v57 = vrot.slane %v5450_v36, 2  ;;  %v5457_v3 = vmax.f32 %v5455_v32, %v5456_v38  ;;  %v4098_v32 = vpop.f32.mrf.mxu1  ;;  %9235 = vmatprep.subr.bf16.mxu1 %v14126_v22 }
 0x277   : > { %v5412_v43 = vmax.f32 %v5410_v47, %v5411_v14  ;;  %v5418_v44 = vrot.slane %v5417_v62, 1  ;;  %v5425_v2 = vrot.slane %v5424_v4, 1  ;;  %v5445_v51 = vmax.f32 %v5443_v23, %v5444_v34  ;;  %v14124_v47 = vld [vmem:[%s19530_s3 + $0x200] ss:$16 sps:$4 sm:$0xff]   ;;  %v3991_v48 = vpop.f32.mrf.mxu0 }
 0x278   : > { %v5432_v26 = vrot.slane %v5431_v1, 1  ;;  %v5439_v28 = vrot.slane %v5438_v46, 1  ;;  %v5452_v10 = vmax.f32 %v5450_v36, %v5451_v57  ;;  %v5458_v58 = vrot.slane %v5457_v3, 2  ;;  %9236 = vmatpush1.bf16.msra.mxu1 %v14124_v47 }
 0x279   : > { %v5419_v59 = vmax.f32 %v5417_v62, %v5418_v44  ;;  %v5426_v54 = vmax.f32 %v5424_v4, %v5425_v2  ;;  %v5446_v56 = vrot.slane %v5445_v51, 1  ;;  %v6006_v8 = vpack.c.bf16 %v5412_v43, %v5412_v43 }
 0x27a   : > { %v16845_v37 = vmax.f32 %v5431_v1, %v5432_v26  ;;  %v5440_v9 = vmax.f32 %v5438_v46, %v5439_v28  ;;  %v5453_v39 = vrot.slane %v5452_v10, 1  ;;  %v5459_v30 = vmax.f32 %v5457_v3, %v5458_v58 }
 0x27b   : > { %v5447_v49 = vmax.f32 %v5445_v51, %v5446_v56  ;;  %v6007_v27 = vpack.c.bf16 %v5419_v59, %v5419_v59  ;;  %v6008_v20 = vpack.c.bf16 %v5426_v54, %v5426_v54  ;;  %v6246_v53 = vunpack.c.l.b16 %v6006_v8  ;;  %v19754_v51 = vld [vmem:[#allocation15_spill] sm:$0xff]  ;;  %v19756_v56 = vld [vmem:[#allocation42_spill] sm:$0xff] }
 0x27c   : > { %v16856_v61 = vunpack.c.l.b16 %v5995_v5  ;;  %v5454_v16 = vmax.f32 %v5452_v10, %v5453_v39  ;;  %v5460_v23 = vrot.slane %v5459_v30, 1  ;;  %v6010_v6 = vpack.c.bf16 %v5440_v9, %v5440_v9  ;;  %v16894_v39 = vpop.f32.mrf.mxu0 }
 0x27d   : > { %v6011_v11 = vpack.c.bf16 %v5447_v49, %v5447_v49  ;;  %v6247_v36 = vunpack.c.l.b16 %v6007_v27  ;;  %v6248_v38 = vunpack.c.l.b16 %v6008_v20  ;;  %v6363_v14 = vsel %vm6334_vm9, %v6246_v53, %v16809_v52  ;;  %v4100_v52 = vpop.f32.mrf.mxu1 }
 0x27e   : > { %19751 = vst [vmem:[#allocation23_spill] sm:$0xff] %v16856_v61  ;;  %v5461_v62 = vmax.f32 %v5459_v30, %v5460_v23  ;;  %v6012_v34 = vpack.c.bf16 %v5454_v16, %v5454_v16  ;;  %v6250_v17 = vunpack.c.l.b16 %v6010_v6  ;;  %v4363_v57 = vcombine.low %v16804_v12, %v16819_v41 }
 0x27f   : > { %v6251_v5 = vunpack.c.l.b16 %v6011_v11  ;;  %v16863_v1 = vsel %vm6336_vm10, %v6248_v38, %v6363_v14  ;;  %v16867_v46 = vsel %vm6334_vm9, %v6247_v36, %v16830_v33  ;;  %v4364_v43 = vcombine.high %v16804_v12, %v16819_v41  ;;  %v19755_v33 = vld [vmem:[#allocation19_spill] sm:$0xff]  ;;  %v16896_v30 = vpop.f32.mrf.mxu1 }
 0x280   : > { %19752 = vst [vmem:[#allocation29_spill] sm:$0xff] %v16863_v1  ;;  %19753 = vst [vmem:[#allocation10_spill] sm:$0xff] %v16867_v46  ;;  %v6013_v3 = vpack.c.bf16 %v5461_v62, %v5461_v62  ;;  %v6252_v13 = vunpack.c.l.b16 %v6012_v34  ;;  %v4166_v44 = vmax.f32 %v16747_v25, 0.0  ;;  %v4371_v2 = vrot.slane %v4363_v57, %v16265_v19  ;;  %v16912_v34 = vpop.f32.mrf.mxu0 }
 0x281   : > { %v3990_v26 = vadd.f32 %v3989_v29, %v19754_v51  ;;  %v16877_v28 = vadd.f32 %v4098_v32, %v16750_v60  ;;  %v16880_v10 = vadd.f32 %v3991_v48, %v19755_v33  ;;  %v4378_v54 = vrot.slane %v4364_v43, %v16265_v19 }
 0x282   : > { %v6253_v58 = vunpack.c.l.b16 %v6013_v3  ;;  %v16883_v59 = vsel %vm6344_vm11, %v6252_v13, %v6250_v17  ;;  %v19757_v12 = vmax.f32 %v19756_v56, 0.0  ;;  %v4379_v25 = vcombine.high %v4371_v2, %v4371_v2  ;;  %v16914_v17 = vpop.f32.mrf.mxu1 }
 0x283   : > { %v4723_v8 = vrot.slane %v4371_v2, %v16265_v19  ;;  %v16892_v60 = vadd.f32 %v4100_v52, %v3990_v26  ;;  %v4380_v22 = vcombine.high %v4378_v54, %v4378_v54  ;;  %v4739_v49 = vrot.slane %v4378_v54, %v16265_v19 }
 0x284   : > { %v16888_v41 = vmax.f32 %v19757_v12, %v4166_v44  ;;  %v16899_v29 = vsel %vm6344_vm11, %v6253_v58, %v6251_v5  ;;  %v4731_v53 = vrot.slane %v4379_v25, %v16265_v19  ;;  %v16920_v25 = vpop.f32.mrf.mxu0 }
 0x285   : > { %v4724_v20 = vcombine.high %v4723_v8, %v4723_v8  ;;  %v5462_v32 = vsel %vm5125_vm4, %v4723_v8, -inf  ;;  %v4740_v16 = vcombine.high %v4739_v49, %v4739_v49  ;;  %v4747_v23 = vrot.slane %v4380_v22, %v16265_v19  ;;  %v16922_v8 = vpop.f32.mrf.mxu1 }
 0x286   : > { %v4381_v27 = vcombine.low %v16827_v21, %v16888_v41  ;;  %v5463_v6 = vrot.slane %v5462_v32, 4  ;;  %v5490_v11 = vsel %vm5125_vm4, %v4739_v49, -inf  ;;  %v4732_v36 = vcombine.high %v4731_v53, %v4731_v53  ;;  %v16924_v9 = vpop.f32.mrf.mxu0 }
 0x287   : > { %v5469_v38 = vsel %vm5125_vm4, %v4724_v20, -inf  ;;  %v5476_v14 = vsel %vm5125_vm4, %v4731_v53, -inf  ;;  %v5491_v62 = vrot.slane %v5490_v11, 4  ;;  %v4748_v48 = vcombine.high %v4747_v23, %v4747_v23  ;;  %v16926_v4 = vpop.f32.mrf.mxu1 }
 0x288   : > { %v5464_v5 = vmax.f32 %v5462_v32, %v5463_v6  ;;  %v5470_v57 = vrot.slane %v5469_v38, 4  ;;  %v5477_v52 = vrot.slane %v5476_v14, 4  ;;  %v5483_v3 = vsel %vm5125_vm4, %v4732_v36, -inf }
 0x289   : > { %v5492_v13 = vmax.f32 %v5490_v11, %v5491_v62  ;;  %v5497_v43 = vsel %vm5125_vm4, %v4740_v16, -inf  ;;  %v5504_v44 = vsel %vm5125_vm4, %v4747_v23, -inf  ;;  %v5484_v33 = vrot.slane %v5483_v3, 4 }
 0x28a   : > { %v5465_v2 = vrot.slane %v5464_v5, 2  ;;  %v5471_v51 = vmax.f32 %v5469_v38, %v5470_v57  ;;  %v5478_v26 = vmax.f32 %v5476_v14, %v5477_v52  ;;  %v5498_v54 = vrot.slane %v5497_v43, 4 }
 0x28b   : > { %v5493_v58 = vrot.slane %v5492_v13, 2  ;;  %v5505_v56 = vrot.slane %v5504_v44, 4  ;;  %v5511_v12 = vsel %vm5125_vm4, %v4748_v48, -inf  ;;  %v5485_v53 = vmax.f32 %v5483_v3, %v5484_v33 }
 0x28c   : > { %v5466_v22 = vmax.f32 %v5464_v5, %v5465_v2  ;;  %v5472_v49 = vrot.slane %v5471_v51, 2  ;;  %v5479_v20 = vrot.slane %v5478_v26, 2  ;;  %v5499_v16 = vmax.f32 %v5497_v43, %v5498_v54  ;;  %v14129_v5 = vld [vmem:[%s19530_s3 + $0x1c4] ss:$16 sps:$4 sm:$0xff]   ;;  %v14127_v2 = vld [vmem:[%s19530_s3 + $0x1c0] ss:$16 sps:$4 sm:$0xff]  }
 0x28d   : > { %v5494_v32 = vmax.f32 %v5492_v13, %v5493_v58  ;;  %v5506_v23 = vmax.f32 %v5504_v44, %v5505_v56  ;;  %v5512_v6 = vrot.slane %v5511_v12, 4  ;;  %v5486_v14 = vrot.slane %v5485_v53, 2  ;;  %9176 = vmatprep.subr.bf16.mxu0 %v14129_v5  ;;  %v14132_v54 = vld [vmem:[%s19530_s3 + $0x3e4] ss:$16 sps:$4 sm:$0xff]  }
 0x28e   : > { %v5467_v11 = vrot.slane %v5466_v22, 1  ;;  %v5473_v36 = vmax.f32 %v5471_v51, %v5472_v49  ;;  %v5480_v38 = vmax.f32 %v5478_v26, %v5479_v20  ;;  %v5500_v57 = vrot.slane %v5499_v16, 2  ;;  %9177 = vmatpush2.bf16.msra.mxu0 %v14127_v2  ;;  %v14130_v20 = vld [vmem:[%s19530_s3 + $0x3e0] ss:$16 sps:$4 sm:$0xff]   ;;  %9237 = vmatprep.subr.bf16.mxu1 %v14132_v54 }
 0x28f   : > { %v5495_v62 = vrot.slane %v5494_v32, 1  ;;  %v5507_v52 = vrot.slane %v5506_v23, 2  ;;  %v5513_v48 = vmax.f32 %v5511_v12, %v5512_v6  ;;  %v5487_v44 = vmax.f32 %v5485_v53, %v5486_v14  ;;  %9238 = vmatpush2.bf16.msra.mxu1 %v14130_v20 }
 0x290   : > { %v5468_v3 = vmax.f32 %v5466_v22, %v5467_v11  ;;  %v5474_v13 = vrot.slane %v5473_v36, 1  ;;  %v5481_v43 = vrot.slane %v5480_v38, 1  ;;  %v5501_v26 = vmax.f32 %v5499_v16, %v5500_v57  ;;  %v16942_v11 = vpop.f32.mrf.mxu1 }
 0x291   : > { %v5496_v51 = vmax.f32 %v5494_v32, %v5495_v62  ;;  %v5508_v33 = vmax.f32 %v5506_v23, %v5507_v52  ;;  %v5514_v58 = vrot.slane %v5513_v48, 2  ;;  %v5488_v49 = vrot.slane %v5487_v44, 1  ;;  %v16940_v23 = vpop.f32.mrf.mxu0 }
 0x292   : > { %v5475_v56 = vmax.f32 %v5473_v36, %v5474_v13  ;;  %v5482_v12 = vmax.f32 %v5480_v38, %v5481_v43  ;;  %v6014_v22 = vpack.c.bf16 %v5468_v3, %v5468_v3  ;;  %v5502_v53 = vrot.slane %v5501_v26, 1 }
 0x293   : > { %v5509_v6 = vrot.slane %v5508_v33, 1  ;;  %v5515_v32 = vmax.f32 %v5513_v48, %v5514_v58  ;;  %v6018_v16 = vpack.c.bf16 %v5496_v51, %v5496_v51  ;;  %v5489_v14 = vmax.f32 %v5487_v44, %v5488_v49  ;;  %v16950_v54 = vpop.f32.mrf.mxu0 }
 0x294   : > { %v6015_v62 = vpack.c.bf16 %v5475_v56, %v5475_v56  ;;  %v6016_v36 = vpack.c.bf16 %v5482_v12, %v5482_v12  ;;  %v6254_v38 = vunpack.c.l.b16 %v6014_v22  ;;  %v5503_v57 = vmax.f32 %v5501_v26, %v5502_v53  ;;  %v16952_v26 = vpop.f32.mrf.mxu1 }
 0x295   : > { %v5510_v52 = vmax.f32 %v5508_v33, %v5509_v6  ;;  %v5516_v5 = vrot.slane %v5515_v32, 1  ;;  %v6258_v3 = vunpack.c.l.b16 %v6018_v16  ;;  %v6017_v13 = vpack.c.bf16 %v5489_v14, %v5489_v14 }
 0x296   : > { %v6255_v43 = vunpack.c.l.b16 %v6015_v62  ;;  %v6256_v2 = vunpack.c.l.b16 %v6016_v36  ;;  %v6372_v48 = vsel %vm6326_vm5, %v6254_v38, %v16883_v59  ;;  %v6019_v58 = vpack.c.bf16 %v5503_v57, %v5503_v57  ;;  %v16971_v38 = vpop.f32.mrf.mxu1 }
 0x297   : > { %v5517_v51 = vmax.f32 %v5515_v32, %v5516_v5  ;;  %v6020_v47 = vpack.c.bf16 %v5510_v52, %v5510_v52  ;;  %v4389_v44 = vrot.slane %v4381_v27, %v16265_v19  ;;  %v6257_v33 = vunpack.c.l.b16 %v6017_v13 }
 0x298   : > { %v6373_v56 = vsel %vm6328_vm6, %v6256_v2, %v6372_v48  ;;  %v6379_v12 = vsel %vm6326_vm5, %v6255_v43, %v16899_v29  ;;  %v19758_v59 = vcombine.high %v16827_v21, %v16888_v41  ;;  %v6259_v20 = vunpack.c.l.b16 %v6019_v58  ;;  %v16969_v41 = vpop.f32.mrf.mxu0 }
 0x299   : > { %v6021_v22 = vpack.c.bf16 %v5517_v51, %v5517_v51  ;;  %v6260_v53 = vunpack.c.l.b16 %v6020_v47  ;;  %v6374_v27 = vsel %vm6330_vm7, %v6258_v3, %v6373_v56  ;;  %v6380_v6 = vsel %vm6328_vm6, %v6257_v33, %v6379_v12 }
 0x29a   : > { %v4396_v49 = vrot.slane %v19758_v59, %v16265_v19  ;;  %v4397_v32 = vcombine.high %v4389_v44, %v4389_v44  ;;  %v4755_v14 = vrot.slane %v4389_v44, %v16265_v19  ;;  %v6381_v29 = vsel %vm6330_vm7, %v6259_v20, %v6380_v6 }
 0x29b   : > { %v6261_v62 = vunpack.c.l.b16 %v6021_v22  ;;  %v16965_v36 = vsel %vm6332_vm8, %v6260_v53, %v6374_v27  ;;  %v16984_v22 = vpop.f32.mrf.mxu1 }
 0x29c   : > { %v4398_v16 = vcombine.high %v4396_v49, %v4396_v49  ;;  %v4771_v21 = vrot.slane %v4396_v49, %v16265_v19  ;;  %v4756_v47 = vcombine.high %v4755_v14, %v4755_v14  ;;  %v4763_v57 = vrot.slane %v4397_v32, %v16265_v19  ;;  %v16982_v49 = vpop.f32.mrf.mxu0 }
 0x29d   : > { %v5518_v5 = vsel %vm5125_vm4, %v4755_v14, -inf  ;;  %v16977_v3 = vsel %vm6332_vm8, %v6261_v62, %v6381_v29 }
 0x29e   : > { %v4779_v52 = vrot.slane %v4398_v16, %v16265_v19  ;;  %v4772_v13 = vcombine.high %v4771_v21, %v4771_v21  ;;  %v5519_v43 = vrot.slane %v5518_v5, 4  ;;  %v5546_v2 = vsel %vm5125_vm4, %v4771_v21, -inf  ;;  %v16990_v42 = vpop.f32.mrf.mxu0 }
 0x29f   : > { %v4764_v48 = vcombine.high %v4763_v57, %v4763_v57  ;;  %v5525_v58 = vsel %vm5125_vm4, %v4756_v47, -inf  ;;  %v5532_v44 = vsel %vm5125_vm4, %v4763_v57, -inf  ;;  %v5547_v59 = vrot.slane %v5546_v2, 4 }
 0x2a0   : > { %v4780_v51 = vcombine.high %v4779_v52, %v4779_v52  ;;  %v5520_v33 = vmax.f32 %v5518_v5, %v5519_v43  ;;  %v5526_v56 = vrot.slane %v5525_v58, 4  ;;  %v5533_v12 = vrot.slane %v5532_v44, 4 }
 0x2a1   : > { %v5539_v20 = vsel %vm5125_vm4, %v4764_v48, -inf  ;;  %v5553_v53 = vsel %vm5125_vm4, %v4772_v13, -inf  ;;  %v5560_v27 = vsel %vm5125_vm4, %v4779_v52, -inf  ;;  %v5548_v29 = vmax.f32 %v5546_v2, %v5547_v59  ;;  %v16992_v48 = vpop.f32.mrf.mxu1 }
 0x2a2   : > { %v5567_v6 = vsel %vm5125_vm4, %v4780_v51, -inf  ;;  %v5521_v32 = vrot.slane %v5520_v33, 2  ;;  %v5527_v16 = vmax.f32 %v5525_v58, %v5526_v56  ;;  %v5534_v14 = vmax.f32 %v5532_v44, %v5533_v12 }
 0x2a3   : > { %v5540_v62 = vrot.slane %v5539_v20, 4  ;;  %v5554_v21 = vrot.slane %v5553_v53, 4  ;;  %v5561_v47 = vrot.slane %v5560_v27, 4  ;;  %v5568_v57 = vrot.slane %v5567_v6, 4  ;;  %v16996_v18 = vpop.f32.mrf.mxu1 }
 0x2a4   : > { %v5522_v5 = vmax.f32 %v5520_v33, %v5521_v32  ;;  %v5528_v43 = vrot.slane %v5527_v16, 2  ;;  %v5535_v1 = vrot.slane %v5534_v14, 2  ;;  %v5549_v13 = vrot.slane %v5548_v29, 2 }
 0x2a5   : > { %v5541_v15 = vmax.f32 %v5539_v20, %v5540_v62  ;;  %v5555_v52 = vmax.f32 %v5553_v53, %v5554_v21  ;;  %v5562_v46 = vmax.f32 %v5560_v27, %v5561_v47  ;;  %v5569_v51 = vmax.f32 %v5567_v6, %v5568_v57  ;;  %v16994_v62 = vpop.f32.mrf.mxu0  ;;  %v14135_v53 = vld [vmem:[%s19530_s3 + $0x1a4] ss:$16 sps:$4 sm:$0xff]  }
 0x2a6   : > { %v5523_v61 = vrot.slane %v5522_v5, 1  ;;  %v5529_v58 = vmax.f32 %v5527_v16, %v5528_v43  ;;  %v5536_v44 = vmax.f32 %v5534_v14, %v5535_v1  ;;  %v5550_v2 = vmax.f32 %v5548_v29, %v5549_v13  ;;  %v14133_v14 = vld [vmem:[%s19530_s3 + $0x1a0] ss:$16 sps:$4 sm:$0xff]   ;;  %9178 = vmatprep.subr.bf16.mxu0 %v14135_v53  ;;  %v14138_v47 = vld [vmem:[%s19530_s3 + $0x3c4] ss:$16 sps:$4 sm:$0xff]  }
 0x2a7   : > { %v5542_v56 = vrot.slane %v5541_v15, 2  ;;  %v5556_v12 = vrot.slane %v5555_v52, 2  ;;  %v5563_v59 = vrot.slane %v5562_v46, 2  ;;  %v5570_v35 = vrot.slane %v5569_v51, 2  ;;  %9179 = vmatpush2.bf16.msra.mxu0 %v14133_v14  ;;  %9239 = vmatprep.subr.bf16.mxu1 %v14138_v47 }
 0x2a8   : > { %v5524_v33 = vmax.f32 %v5522_v5, %v5523_v61  ;;  %v5530_v32 = vrot.slane %v5529_v58, 1  ;;  %v5537_v55 = vrot.slane %v5536_v44, 1  ;;  %v5551_v27 = vrot.slane %v5550_v2, 1 }
 0x2a9   : > { %v5543_v20 = vmax.f32 %v5541_v15, %v5542_v56  ;;  %v5557_v6 = vmax.f32 %v5555_v52, %v5556_v12  ;;  %v5564_v1 = vmax.f32 %v5562_v46, %v5563_v59  ;;  %v5571_v16 = vmax.f32 %v5569_v51, %v5570_v35  ;;  %v14136_v35 = vld [vmem:[%s19530_s3 + $0x3c0] ss:$16 sps:$4 sm:$0xff]  }
 0x2aa   : > { %v5531_v61 = vmax.f32 %v5529_v58, %v5530_v32  ;;  %v5538_v29 = vmax.f32 %v5536_v44, %v5537_v55  ;;  %v6022_v15 = vpack.c.bf16 %v5524_v33, %v5524_v33  ;;  %v5552_v57 = vmax.f32 %v5550_v2, %v5551_v27  ;;  %v17010_v58 = vpop.f32.mrf.mxu0  ;;  %v17012_v44 = vpop.f32.mrf.mxu1  ;;  %9240 = vmatpush2.bf16.msra.mxu1 %v14136_v35 }
 0x2ab   : > { %v5544_v21 = vrot.slane %v5543_v20, 1  ;;  %v5558_v5 = vrot.slane %v5557_v6, 1  ;;  %v5565_v43 = vrot.slane %v5564_v1, 1  ;;  %v5572_v13 = vrot.slane %v5571_v16, 1 }
 0x2ac   : > { %v6023_v52 = vpack.c.bf16 %v5531_v61, %v5531_v61  ;;  %v6024_v51 = vpack.c.bf16 %v5538_v29, %v5538_v29  ;;  %v6262_v55 = vunpack.c.l.b16 %v6022_v15  ;;  %v6026_v59 = vpack.c.bf16 %v5552_v57, %v5552_v57  ;;  %v4021_v14 = vpop.f32.mrf.mxu0  ;;  %v19761_v57 = vld [vmem:[#allocation14_spill] sm:$0xff] }
 0x2ad   : > { %v5545_v46 = vmax.f32 %v5543_v20, %v5544_v21  ;;  %v5559_v56 = vmax.f32 %v5557_v6, %v5558_v5  ;;  %v5566_v12 = vmax.f32 %v5564_v1, %v5565_v43  ;;  %v5573_v2 = vmax.f32 %v5571_v16, %v5572_v13  ;;  %v17016_v20 = vpop.f32.mrf.mxu1 }
 0x2ae   : > { %v6263_v32 = vunpack.c.l.b16 %v6023_v52  ;;  %v6264_v53 = vunpack.c.l.b16 %v6024_v51  ;;  %v6376_v27 = vsel %vm6334_vm9, %v6262_v55, %v16965_v36  ;;  %v19759_v61 = vpack.c.bf16 %v16845_v37, %v16845_v37  ;;  %v4022_v13 = vpop.f32.mrf.mxu0 }
 0x2af   : > { %v6025_v33 = vpack.c.bf16 %v5545_v46, %v5545_v46  ;;  %v6027_v21 = vpack.c.bf16 %v5559_v56, %v5559_v56  ;;  %v6028_v6 = vpack.c.bf16 %v5566_v12, %v5566_v12  ;;  %v6029_v1 = vpack.c.bf16 %v5573_v2, %v5573_v2  ;;  %v4132_v37 = vpop.f32.mrf.mxu1  ;;  %v19772_v13 = vld [vmem:[#allocation30_spill] sm:$0xff] }
 0x2b0   : > { %v17021_v29 = vunpack.c.l.b16 %v19759_v61  ;;  %v6266_v16 = vunpack.c.l.b16 %v6026_v59  ;;  %v17024_v15 = vsel %vm6336_vm10, %v6264_v53, %v6376_v27  ;;  %v17028_v47 = vsel %vm6334_vm9, %v6263_v32, %v16977_v3  ;;  %v19765_v27 = vld [vmem:[#allocation20_spill] sm:$0xff] }
 0x2b1   : > { %v19760_v36 = vmax.f32 %v16877_v28, 0.0  ;;  %v19762_v5 = vmax.f32 %v19761_v57, 0.0  ;;  %v17034_v35 = vunpack.c.l.b16 %v6025_v33  ;;  %v6268_v46 = vunpack.c.l.b16 %v6028_v6  ;;  %v4133_v12 = vpop.f32.mrf.mxu1  ;;  %v19763_v33 = vld [vmem:[#allocation18_spill] sm:$0xff]  ;;  %v19767_v6 = vld [vmem:[#allocation25_spill] sm:$0xff] }
 0x2b2   : > { %v6269_v52 = vunpack.c.l.b16 %v6029_v1  ;;  %v4170_v51 = vmax.f32 %v16892_v60, 0.0  ;;  %v3994_v55 = vadd.f32 %v16894_v39, %v16404_v40  ;;  %v4103_v3 = vadd.f32 %v16896_v30, %v16880_v10  ;;  %v19770_v57 = vld [vmem:[#allocation26_spill] sm:$0xff] }
 0x2b3   : > { %v4211_v43 = vmax.f32 %v19762_v5, %v19760_v36  ;;  %v3998_v28 = vadd.f32 %v16912_v34, %v16411_v0  ;;  %v4000_v56 = vadd.f32 %v16920_v25, %v16415_v24  ;;  %v6267_v2 = vunpack.c.l.b16 %v6027_v21 }
 0x2b4   : > { %v17046_v59 = vsel %vm6326_vm5, %v6268_v46, %v6266_v16  ;;  %v19764_v32 = vmax.f32 %v19763_v33, 0.0  ;;  %v4002_v40 = vadd.f32 %v16924_v9, %v16422_v45  ;;  %v4173_v39 = vmax.f32 %v4103_v3, 0.0 }
 0x2b5   : > { %v4105_v10 = vadd.f32 %v16914_v17, %v3994_v55  ;;  %v4109_v30 = vadd.f32 %v16922_v8, %v3998_v28  ;;  %v4111_v0 = vadd.f32 %v16926_v4, %v4000_v56  ;;  %v17056_v24 = vsel %vm6326_vm5, %v6269_v52, %v6267_v2 }
 0x2b6   : > { %v4212_v60 = vmax.f32 %v19764_v32, %v4170_v51  ;;  %v17059_v53 = vadd.f32 %v16942_v11, %v4002_v40  ;;  %v19766_v14 = vmax.f32 %v19765_v27, 0.0  ;;  %v17067_v4 = vadd.f32 %v16940_v23, %v16427_v50  ;;  %v19768_v11 = vld [vmem:[#allocation17_spill] sm:$0xff] }
 0x2b7   : > { %v4174_v21 = vmax.f32 %v4105_v10, 0.0  ;;  %v4177_v45 = vmax.f32 %v4109_v30, 0.0  ;;  %v4178_v9 = vmax.f32 %v4111_v0, 0.0  ;;  %v17071_v1 = vadd.f32 %v16950_v54, %v19767_v6 }
 0x2b8   : > { %v4399_v34 = vcombine.low %v4211_v43, %v4212_v60  ;;  %v4400_v25 = vcombine.high %v4211_v43, %v4212_v60  ;;  %v4213_v61 = vmax.f32 %v19766_v14, %v4173_v39  ;;  %v19769_v16 = vmax.f32 %v19768_v11, 0.0 }
 0x2b9   : > { %v19771_v5 = vmax.f32 %v19770_v57, 0.0  ;;  %v19773_v37 = vmax.f32 %v19772_v13, 0.0  ;;  %v4181_v52 = vmax.f32 %v17059_v53, 0.0 }
 0x2ba   : > { %v4407_v17 = vrot.slane %v4399_v34, %v16265_v19  ;;  %v4414_v8 = vrot.slane %v4400_v25, %v16265_v19  ;;  %v4214_v36 = vmax.f32 %v19769_v16, %v4174_v21 }
 0x2bb   : > { %v17077_v43 = vmax.f32 %v19771_v5, %v4177_v45  ;;  %v17081_v46 = vmax.f32 %v19773_v37, %v4178_v9 }
 0x2bc   : > { %v4415_v51 = vcombine.high %v4407_v17, %v4407_v17  ;;  %v4416_v50 = vcombine.high %v4414_v8, %v4414_v8  ;;  %v4787_v23 = vrot.slane %v4407_v17, %v16265_v19  ;;  %v4803_v54 = vrot.slane %v4414_v8, %v16265_v19 }
 0x2bd   : > { %v4417_v55 = vcombine.low %v4213_v61, %v4214_v36  ;;  %v4418_v3 = vcombine.high %v4213_v61, %v4214_v36  ;;  %v4435_v28 = vcombine.low %v17077_v43, %v17081_v46  ;;  %v4436_v56 = vcombine.high %v17077_v43, %v17081_v46 }
 0x2be   : > { %v4788_v12 = vcombine.high %v4787_v23, %v4787_v23  ;;  %v4795_v2 = vrot.slane %v4415_v51, %v16265_v19  ;;  %v4804_v33 = vcombine.high %v4803_v54, %v4803_v54  ;;  %v4811_v32 = vrot.slane %v4416_v50, %v16265_v19 }
 0x2bf   : > { %v5574_v60 = vsel %vm5125_vm4, %v4787_v23, -inf  ;;  %v5602_v40 = vsel %vm5125_vm4, %v4803_v54, -inf  ;;  %v17095_v39 = vrot.slane %v4417_v55, %v16265_v19  ;;  %v17098_v10 = vrot.slane %v4418_v3, %v16265_v19  ;;  %v14141_v55 = vld [vmem:[%s19530_s3 + $0x184] ss:$16 sps:$4 sm:$0xff]  }
 0x2c0   : > { %v4796_v30 = vcombine.high %v4795_v2, %v4795_v2  ;;  %v4812_v0 = vcombine.high %v4811_v32, %v4811_v32  ;;  %v5575_v34 = vrot.slane %v5574_v60, 4  ;;  %v5581_v25 = vsel %vm5125_vm4, %v4788_v12, -inf  ;;  %9180 = vmatprep.subr.bf16.mxu0 %v14141_v55 }
 0x2c1   : > { %v5582_v27 = vrot.slane %v5581_v25, 4  ;;  %v5588_v14 = vsel %vm5125_vm4, %v4795_v2, -inf  ;;  %v5603_v61 = vrot.slane %v5602_v40, 4  ;;  %v5609_v21 = vsel %vm5125_vm4, %v4804_v33, -inf }
 0x2c2   : > { %v5576_v45 = vmax.f32 %v5574_v60, %v5575_v34  ;;  %v5589_v9 = vrot.slane %v5588_v14, 4  ;;  %v5595_v17 = vsel %vm5125_vm4, %v4796_v30, -inf  ;;  %v5610_v8 = vrot.slane %v5609_v21, 4 }
 0x2c3   : > { %v5583_v6 = vmax.f32 %v5581_v25, %v5582_v27  ;;  %v5596_v11 = vrot.slane %v5595_v17, 4  ;;  %v5604_v16 = vmax.f32 %v5602_v40, %v5603_v61  ;;  %v5616_v36 = vsel %vm5125_vm4, %v4811_v32, -inf  ;;  %v14139_v32 = vld [vmem:[%s19530_s3 + $0x180] ss:$16 sps:$4 sm:$0xff]  }
 0x2c4   : > { %v5577_v57 = vrot.slane %v5576_v45, 2  ;;  %v5590_v5 = vmax.f32 %v5588_v14, %v5589_v9  ;;  %v5611_v13 = vmax.f32 %v5609_v21, %v5610_v8  ;;  %v5617_v37 = vrot.slane %v5616_v36, 4  ;;  %9181 = vmatpush2.bf16.msra.mxu0 %v14139_v32  ;;  %v14142_v21 = vld [vmem:[%s19530_s3 + $0x3a0] ss:$16 sps:$4 sm:$0xff]  }
 0x2c5   : > { %v5584_v51 = vrot.slane %v5583_v6, 2  ;;  %v5597_v50 = vmax.f32 %v5595_v17, %v5596_v11  ;;  %v5605_v23 = vrot.slane %v5604_v16, 2  ;;  %v5623_v54 = vsel %vm5125_vm4, %v4812_v0, -inf  ;;  %v14144_v0 = vld [vmem:[%s19530_s3 + $0x3a4] ss:$16 sps:$4 sm:$0xff]  }
 0x2c6   : > { %v5578_v3 = vmax.f32 %v5576_v45, %v5577_v57  ;;  %v5591_v12 = vrot.slane %v5590_v5, 2  ;;  %v5612_v2 = vrot.slane %v5611_v13, 2  ;;  %v5618_v33 = vmax.f32 %v5616_v36, %v5617_v37  ;;  %9241 = vmatprep.subr.bf16.mxu1 %v14144_v0 }
 0x2c7   : > { %v5585_v60 = vmax.f32 %v5583_v6, %v5584_v51  ;;  %v5598_v40 = vrot.slane %v5597_v50, 2  ;;  %v5606_v30 = vmax.f32 %v5604_v16, %v5605_v23  ;;  %v5624_v34 = vrot.slane %v5623_v54, 4  ;;  %v14147_v6 = vld [vmem:[%s19530_s3 + $0x164] ss:$16 sps:$4 sm:$0xff]   ;;  %9242 = vmatpush2.bf16.msra.mxu1 %v14142_v21 }
 0x2c8   : > { %v5579_v25 = vrot.slane %v5578_v3, 1  ;;  %v5592_v27 = vmax.f32 %v5590_v5, %v5591_v12  ;;  %v5613_v14 = vmax.f32 %v5611_v13, %v5612_v2  ;;  %v5619_v61 = vrot.slane %v5618_v33, 2  ;;  %v14145_v5 = vld [vmem:[%s19530_s3 + $0x160] ss:$16 sps:$4 sm:$0xff]   ;;  %9182 = vmatprep.subr.bf16.mxu0 %v14147_v6  ;;  %v14150_v23 = vld [vmem:[%s19530_s3 + $0x384] ss:$16 sps:$4 sm:$0xff]  }
 0x2c9   : > { %v5586_v45 = vrot.slane %v5585_v60, 1  ;;  %v5599_v9 = vmax.f32 %v5597_v50, %v5598_v40  ;;  %v5607_v17 = vrot.slane %v5606_v30, 1  ;;  %v5625_v8 = vmax.f32 %v5623_v54, %v5624_v34  ;;  %9183 = vmatpush2.bf16.msra.mxu0 %v14145_v5  ;;  %v14148_v2 = vld [vmem:[%s19530_s3 + $0x380] ss:$16 sps:$4 sm:$0xff]   ;;  %9243 = vmatprep.subr.bf16.mxu1 %v14150_v23 }
 0x2ca   : > { %v5580_v11 = vmax.f32 %v5578_v3, %v5579_v25  ;;  %v5593_v16 = vrot.slane %v5592_v27, 1  ;;  %v5614_v36 = vrot.slane %v5613_v14, 1  ;;  %v5620_v57 = vmax.f32 %v5618_v33, %v5619_v61 }
 0x2cb   : > { %v5587_v13 = vmax.f32 %v5585_v60, %v5586_v45  ;;  %v5600_v37 = vrot.slane %v5599_v9, 1  ;;  %v5608_v51 = vmax.f32 %v5606_v30, %v5607_v17  ;;  %v5626_v50 = vrot.slane %v5625_v8, 2  ;;  %v14153_v30 = vld [vmem:[%s19530_s3 + $0x144] ss:$16 sps:$4 sm:$0xff]   ;;  %9244 = vmatpush2.bf16.msra.mxu1 %v14148_v2 }
 0x2cc   : > { %v5594_v54 = vmax.f32 %v5592_v27, %v5593_v16  ;;  %v5615_v55 = vmax.f32 %v5613_v14, %v5614_v36  ;;  %v5621_v3 = vrot.slane %v5620_v57, 1  ;;  %v6030_v12 = vpack.c.bf16 %v5580_v11, %v5580_v11  ;;  %v14151_v14 = vld [vmem:[%s19530_s3 + $0x140] ss:$16 sps:$4 sm:$0xff]   ;;  %9184 = vmatprep.subr.bf16.mxu0 %v14153_v30  ;;  %v14156_v17 = vld [vmem:[%s19530_s3 + $0x364] ss:$16 sps:$4 sm:$0xff]  }
 0x2cd   : > { %v5601_v33 = vmax.f32 %v5599_v9, %v5600_v37  ;;  %v5627_v32 = vmax.f32 %v5625_v8, %v5626_v50  ;;  %v6031_v60 = vpack.c.bf16 %v5587_v13, %v5587_v13  ;;  %v6034_v40 = vpack.c.bf16 %v5608_v51, %v5608_v51  ;;  %9185 = vmatpush2.bf16.msra.mxu0 %v14151_v14  ;;  %v14154_v36 = vld [vmem:[%s19530_s3 + $0x360] ss:$16 sps:$4 sm:$0xff]   ;;  %v14159_v51 = vld [vmem:[%s19530_s3 + $0x124] ss:$16 sps:$4 sm:$0xff]  }
 0x2ce   : > { %v5622_v34 = vmax.f32 %v5620_v57, %v5621_v3  ;;  %v6032_v0 = vpack.c.bf16 %v5594_v54, %v5594_v54  ;;  %v6035_v25 = vpack.c.bf16 %v5615_v55, %v5615_v55  ;;  %v6270_v27 = vunpack.c.l.b16 %v6030_v12  ;;  %9245 = vmatprep.subr.bf16.mxu1 %v14156_v17  ;;  %9186 = vmatprep.subr.bf16.mxu0 %v14159_v51 }
 0x2cf   : > { %v5628_v61 = vrot.slane %v5627_v32, 1  ;;  %v6033_v21 = vpack.c.bf16 %v5601_v33, %v5601_v33  ;;  %v6271_v45 = vunpack.c.l.b16 %v6031_v60  ;;  %v6274_v9 = vunpack.c.l.b16 %v6034_v40  ;;  %9246 = vmatpush2.bf16.msra.mxu1 %v14154_v36 }
 0x2d0   : > { %v6036_v8 = vpack.c.bf16 %v5622_v34, %v5622_v34  ;;  %v6272_v6 = vunpack.c.l.b16 %v6032_v0  ;;  %v6275_v11 = vunpack.c.l.b16 %v6035_v25  ;;  %v6386_v16 = vsel %vm6328_vm6, %v6270_v27, %v17046_v59  ;;  %v14165_v25 = vld [vmem:[%s19530_s3 + $0x104] ss:$16 sps:$4 sm:$0xff]  }
 0x2d1   : > { %v17144_v57 = vmax.f32 %v5627_v32, %v5628_v61  ;;  %v6273_v5 = vunpack.c.l.b16 %v6033_v21  ;;  %v6392_v13 = vsel %vm6328_vm6, %v6271_v45, %v17056_v24  ;;  %v4433_v37 = vcombine.high %v17095_v39, %v17095_v39  ;;  %v14157_v24 = vld [vmem:[%s19530_s3 + $0x120] ss:$16 sps:$4 sm:$0xff]  }
 0x2d2   : > { %v6276_v59 = vunpack.c.l.b16 %v6036_v8  ;;  %v6387_v50 = vsel %vm6330_vm7, %v6272_v6, %v6386_v16  ;;  %v4434_v23 = vcombine.high %v17098_v10, %v17098_v10  ;;  %v4819_v54 = vrot.slane %v17095_v39, %v16265_v19  ;;  %v14162_v39 = vld [vmem:[%s19530_s3 + $0x344] ss:$16 sps:$4 sm:$0xff]   ;;  %9187 = vmatpush2.bf16.msra.mxu0 %v14157_v24  ;;  %v14163_v21 = vld [vmem:[%s19530_s3 + $0x100] ss:$16 sps:$4 sm:$0xff]  }
 0x2d3   : > { %v6388_v55 = vsel %vm6332_vm8, %v6274_v9, %v6387_v50  ;;  %v6393_v3 = vsel %vm6330_vm7, %v6273_v5, %v6392_v13  ;;  %v4827_v12 = vrot.slane %v4433_v37, %v16265_v19  ;;  %v17166_v2 = vadd.f32 %v16952_v26, %v17067_v4  ;;  %v14160_v26 = vld [vmem:[%s19530_s3 + $0x340] ss:$16 sps:$4 sm:$0xff]   ;;  %9247 = vmatprep.subr.bf16.mxu1 %v14162_v39  ;;  %v14168_v6 = vld [vmem:[%s19530_s3 + $0x324] ss:$16 sps:$4 sm:$0xff]  }
 0x2d4   : > { %v17172_v33 = vsel %vm6334_vm9, %v6276_v59, %v6388_v55  ;;  %v17175_v32 = vsel %vm6332_vm8, %v6275_v11, %v6393_v3  ;;  %v4820_v60 = vcombine.high %v4819_v54, %v4819_v54  ;;  %v4835_v40 = vrot.slane %v17098_v10, %v16265_v19  ;;  %9248 = vmatpush2.bf16.msra.mxu1 %v14160_v26  ;;  %v14166_v13 = vld [vmem:[%s19530_s3 + $0x320] ss:$16 sps:$4 sm:$0xff]  }
 0x2d5   : > { %v6037_v4 = vpack.c.bf16 %v17144_v57, %v17144_v57  ;;  %v4828_v30 = vcombine.high %v4827_v12, %v4827_v12  ;;  %v4843_v34 = vrot.slane %v4434_v23, %v16265_v19  ;;  %v5630_v0 = vsel %vm5125_vm4, %v4819_v54, -inf  ;;  %9188 = vmatprep.subr.bf16.mxu0 %v14165_v25  ;;  %9249 = vmatprep.subr.bf16.mxu1 %v14168_v6 }
 0x2d6   : > { %v4836_v27 = vcombine.high %v4835_v40, %v4835_v40  ;;  %v5631_v10 = vrot.slane %v5630_v0, 4  ;;  %v5637_v14 = vsel %vm5125_vm4, %v4820_v60, -inf  ;;  %v5644_v61 = vsel %vm5125_vm4, %v4827_v12, -inf  ;;  %9189 = vmatpush2.bf16.msra.mxu0 %v14163_v21 }
 0x2d7   : > { %v4844_v45 = vcombine.high %v4843_v34, %v4843_v34  ;;  %v5638_v9 = vrot.slane %v5637_v14, 4  ;;  %v5645_v17 = vrot.slane %v5644_v61, 4  ;;  %v5651_v8 = vsel %vm5125_vm4, %v4828_v30, -inf }
 0x2d8   : > { %v5632_v11 = vmax.f32 %v5630_v0, %v5631_v10  ;;  %v5652_v16 = vrot.slane %v5651_v8, 4  ;;  %v5658_v36 = vsel %vm5125_vm4, %v4835_v40, -inf  ;;  %v5665_v5 = vsel %vm5125_vm4, %v4836_v27, -inf  ;;  %9250 = vmatpush2.bf16.msra.mxu1 %v14166_v13 }
 0x2d9   : > { %v5639_v37 = vmax.f32 %v5637_v14, %v5638_v9  ;;  %v5646_v51 = vmax.f32 %v5644_v61, %v5645_v17  ;;  %v5659_v59 = vrot.slane %v5658_v36, 4  ;;  %v5666_v50 = vrot.slane %v5665_v5, 4 }
 0x2da   : > { %v5633_v23 = vrot.slane %v5632_v11, 2  ;;  %v5653_v54 = vmax.f32 %v5651_v8, %v5652_v16  ;;  %v5672_v24 = vsel %vm5125_vm4, %v4843_v34, -inf  ;;  %v5679_v55 = vsel %vm5125_vm4, %v4844_v45, -inf }
 0x2db   : > { %v5640_v3 = vrot.slane %v5639_v37, 2  ;;  %v5647_v12 = vrot.slane %v5646_v51, 2  ;;  %v5660_v39 = vmax.f32 %v5658_v36, %v5659_v59  ;;  %v5667_v60 = vmax.f32 %v5665_v5, %v5666_v50 }
 0x2dc   : > { %v5634_v40 = vmax.f32 %v5632_v11, %v5633_v23  ;;  %v5654_v26 = vrot.slane %v5653_v54, 2  ;;  %v5673_v30 = vrot.slane %v5672_v24, 4  ;;  %v5680_v0 = vrot.slane %v5679_v55, 4 }
 0x2dd   : > { %v5641_v25 = vmax.f32 %v5639_v37, %v5640_v3  ;;  %v5648_v27 = vmax.f32 %v5646_v51, %v5647_v12  ;;  %v5661_v10 = vrot.slane %v5660_v39, 2  ;;  %v5668_v14 = vrot.slane %v5667_v60, 2 }
 0x2de   : > { %v5635_v61 = vrot.slane %v5634_v40, 1  ;;  %v5655_v21 = vmax.f32 %v5653_v54, %v5654_v26  ;;  %v5674_v9 = vmax.f32 %v5672_v24, %v5673_v30  ;;  %v5681_v17 = vmax.f32 %v5679_v55, %v5680_v0 }
 0x2df   : > { %v5642_v34 = vrot.slane %v5641_v25, 1  ;;  %v5649_v8 = vrot.slane %v5648_v27, 1  ;;  %v5662_v45 = vmax.f32 %v5660_v39, %v5661_v10  ;;  %v5669_v6 = vmax.f32 %v5667_v60, %v5668_v14 }
 0x2e0   : > { %v5636_v16 = vmax.f32 %v5634_v40, %v5635_v61  ;;  %v5656_v13 = vrot.slane %v5655_v21, 1  ;;  %v5675_v36 = vrot.slane %v5674_v9, 2  ;;  %v5682_v5 = vrot.slane %v5681_v17, 2 }
 0x2e1   : > { %v17205_v11 = vmax.f32 %v5641_v25, %v5642_v34  ;;  %v5650_v59 = vmax.f32 %v5648_v27, %v5649_v8  ;;  %v5663_v50 = vrot.slane %v5662_v45, 1  ;;  %v5670_v37 = vrot.slane %v5669_v6, 1 }
 0x2e2   : > { %v5657_v51 = vmax.f32 %v5655_v21, %v5656_v13  ;;  %v5676_v23 = vmax.f32 %v5674_v9, %v5675_v36  ;;  %v5683_v3 = vmax.f32 %v5681_v17, %v5682_v5  ;;  %v6038_v12 = vpack.c.bf16 %v5636_v16, %v5636_v16 }
 0x2e3   : > { %v17210_v54 = vunpack.c.l.b16 %v6037_v4  ;;  %v5664_v24 = vmax.f32 %v5662_v45, %v5663_v50  ;;  %v5671_v55 = vmax.f32 %v5669_v6, %v5670_v37  ;;  %v6040_v39 = vpack.c.bf16 %v5650_v59, %v5650_v59  ;;  %v19774_v6 = vld [vmem:[#allocation33_spill] sm:$0xff] }
 0x2e4   : > { %v5677_v60 = vrot.slane %v5676_v23, 1  ;;  %v5684_v40 = vrot.slane %v5683_v3, 1  ;;  %v6041_v26 = vpack.c.bf16 %v5657_v51, %v5657_v51  ;;  %v6278_v30 = vunpack.c.l.b16 %v6038_v12 }
 0x2e5   : > { %v6039_v0 = vpack.c.bf16 %v17205_v11, %v17205_v11  ;;  %v6042_v25 = vpack.c.bf16 %v5664_v24, %v5664_v24  ;;  %v6043_v27 = vpack.c.bf16 %v5671_v55, %v5671_v55  ;;  %v6280_v10 = vunpack.c.l.b16 %v6040_v39 }
 0x2e6   : > { %v5678_v14 = vmax.f32 %v5676_v23, %v5677_v60  ;;  %v5685_v61 = vmax.f32 %v5683_v3, %v5684_v40  ;;  %v6281_v21 = vunpack.c.l.b16 %v6041_v26  ;;  %v17216_v57 = vsel %vm6336_vm10, %v6278_v30, %v17172_v33 }
 0x2e7   : > { %v6282_v4 = vunpack.c.l.b16 %v6042_v25  ;;  %v6283_v9 = vunpack.c.l.b16 %v6043_v27  ;;  %v4443_v17 = vrot.slane %v4435_v28, %v16265_v19  ;;  %v4450_v34 = vrot.slane %v4436_v56, %v16265_v19 }
 0x2e8   : > { %v6044_v8 = vpack.c.bf16 %v5678_v14, %v5678_v14  ;;  %v6045_v45 = vpack.c.bf16 %v5685_v61, %v5685_v61  ;;  %v19775_v16 = vmax.f32 %v19774_v6, 0.0  ;;  %v4182_v13 = vmax.f32 %v17166_v2, 0.0  ;;  %v19778_v2 = vld [vmem:[#allocation31_spill] sm:$0xff] }
 0x2e9   : > { %v6397_v36 = vsel %vm6344_vm11, %v6282_v4, %v6280_v10  ;;  %v6404_v5 = vsel %vm6344_vm11, %v6283_v9, %v6281_v21  ;;  %v4451_v28 = vcombine.high %v4443_v17, %v4443_v17  ;;  %v4452_v59 = vcombine.high %v4450_v34, %v4450_v34 }
 0x2ea   : > { %v17230_v33 = vmax.f32 %v19775_v16, %v4181_v52  ;;  %v6284_v50 = vunpack.c.l.b16 %v6044_v8  ;;  %v6285_v37 = vunpack.c.l.b16 %v6045_v45  ;;  %v4851_v43 = vrot.slane %v4443_v17, %v16265_v19  ;;  %v19776_v52 = vld [vmem:[#allocation21_spill] sm:$0xff] }
 0x2eb   : > { %v4867_v46 = vrot.slane %v4450_v34, %v16265_v19  ;;  %v4859_v53 = vrot.slane %v4451_v28, %v16265_v19  ;;  %v4875_v56 = vrot.slane %v4452_v59, %v16265_v19  ;;  %v19777_v51 = vmax.f32 %v19776_v52, 0.0 }
 0x2ec   : > { %v17245_v3 = vadd.f32 %v16969_v41, %v19778_v2  ;;  %v17248_v12 = vsel %vm6326_vm5, %v6284_v50, %v6397_v36  ;;  %v17251_v24 = vsel %vm6326_vm5, %v6285_v37, %v6404_v5  ;;  %v4852_v55 = vcombine.high %v4851_v43, %v4851_v43  ;;  %v14171_v50 = vld [vmem:[%s19530_s3 + $0x4e4] ss:$16 sps:$4 sm:$0xff]  }
 0x2ed   : > { %v17241_v23 = vmax.f32 %v19777_v51, %v4182_v13  ;;  %v4868_v39 = vcombine.high %v4867_v46, %v4867_v46  ;;  %v4860_v60 = vcombine.high %v4859_v53, %v4859_v53  ;;  %v4876_v40 = vcombine.high %v4875_v56, %v4875_v56  ;;  %9284 = vmatprep.subr.bf16.mxu0 %v14171_v50 }
 0x2ee   : > { %v5686_v26 = vsel %vm5125_vm4, %v4851_v43, -inf  ;;  %v5700_v30 = vsel %vm5125_vm4, %v4859_v53, -inf  ;;  %v5693_v27 = vsel %vm5125_vm4, %v4852_v55, -inf  ;;  %v5714_v41 = vsel %vm5125_vm4, %v4867_v46, -inf }
 0x2ef   : > { %v5687_v25 = vrot.slane %v5686_v26, 4  ;;  %v5701_v10 = vrot.slane %v5700_v30, 4  ;;  %v5694_v14 = vrot.slane %v5693_v27, 4  ;;  %v5707_v61 = vsel %vm5125_vm4, %v4860_v60, -inf }
 0x2f0   : > { %v5715_v21 = vrot.slane %v5714_v41, 4  ;;  %v5721_v4 = vsel %vm5125_vm4, %v4868_v39, -inf  ;;  %v5708_v34 = vrot.slane %v5707_v61, 4  ;;  %v5728_v16 = vsel %vm5125_vm4, %v4875_v56, -inf  ;;  %v14172_v56 = vld [vmem:[%s19530_s3 + $0x300] ss:$16 sps:$4 sm:$0xff]  }
 0x2f1   : > { %v5688_v9 = vmax.f32 %v5686_v26, %v5687_v25  ;;  %v5702_v17 = vmax.f32 %v5700_v30, %v5701_v10  ;;  %v5722_v8 = vrot.slane %v5721_v4, 4  ;;  %v5695_v45 = vmax.f32 %v5693_v27, %v5694_v14  ;;  %v14174_v39 = vld [vmem:[%s19530_s3 + $0x304] ss:$16 sps:$4 sm:$0xff]  }
 0x2f2   : > { %v5716_v6 = vmax.f32 %v5714_v41, %v5715_v21  ;;  %v5735_v13 = vsel %vm5125_vm4, %v4876_v40, -inf  ;;  %v5709_v28 = vmax.f32 %v5707_v61, %v5708_v34  ;;  %v5729_v46 = vrot.slane %v5728_v16, 4  ;;  %9251 = vmatprep.subr.bf16.mxu1 %v14174_v39 }
 0x2f3   : > { %v5689_v36 = vrot.slane %v5688_v9, 2  ;;  %v5703_v5 = vrot.slane %v5702_v17, 2  ;;  %v5723_v59 = vmax.f32 %v5721_v4, %v5722_v8  ;;  %v5696_v37 = vrot.slane %v5695_v45, 2  ;;  %9252 = vmatpush2.bf16.msra.mxu1 %v14172_v56 }
 0x2f4   : > { %v5717_v43 = vrot.slane %v5716_v6, 2  ;;  %v5736_v53 = vrot.slane %v5735_v13, 4  ;;  %v5710_v2 = vrot.slane %v5709_v28, 2  ;;  %v5730_v26 = vmax.f32 %v5728_v16, %v5729_v46 }
 0x2f5   : > { %v5690_v52 = vmax.f32 %v5688_v9, %v5689_v36  ;;  %v5704_v51 = vmax.f32 %v5702_v17, %v5703_v5  ;;  %v5724_v55 = vrot.slane %v5723_v59, 2  ;;  %v5697_v60 = vmax.f32 %v5695_v45, %v5696_v37 }
 0x2f6   : > { %v5718_v40 = vmax.f32 %v5716_v6, %v5717_v43  ;;  %v5737_v30 = vmax.f32 %v5735_v13, %v5736_v53  ;;  %v5711_v10 = vmax.f32 %v5709_v28, %v5710_v2  ;;  %v5731_v21 = vrot.slane %v5730_v26, 2  ;;  %v14180_v53 = vld [vmem:[%s19530_s3 + $0x6e4] ss:$16 sps:$4 sm:$0xff]  }
 0x2f7   : > { %v5691_v25 = vrot.slane %v5690_v52, 1  ;;  %v5705_v27 = vrot.slane %v5704_v51, 1  ;;  %v5725_v41 = vmax.f32 %v5723_v59, %v5724_v55  ;;  %v5698_v14 = vrot.slane %v5697_v60, 1  ;;  %9347 = vmatprep.subr.bf16.mxu1 %v14180_v53  ;;  %v19782_v53 = vld [vmem:[#allocation16_spill] sm:$0xff] }
 0x2f8   : > { %v5719_v61 = vrot.slane %v5718_v40, 1  ;;  %v5738_v4 = vrot.slane %v5737_v30, 2  ;;  %v5712_v34 = vrot.slane %v5711_v10, 1  ;;  %v5732_v45 = vmax.f32 %v5730_v26, %v5731_v21 }
 0x2f9   : > { %v5692_v9 = vmax.f32 %v5690_v52, %v5691_v25  ;;  %v5706_v17 = vmax.f32 %v5704_v51, %v5705_v27  ;;  %v5726_v8 = vrot.slane %v5725_v41, 1  ;;  %v5699_v36 = vmax.f32 %v5697_v60, %v5698_v14 }
 0x2fa   : > { %v5720_v5 = vmax.f32 %v5718_v40, %v5719_v61  ;;  %v5739_v6 = vmax.f32 %v5737_v30, %v5738_v4  ;;  %v5713_v16 = vmax.f32 %v5711_v10, %v5712_v34  ;;  %v5733_v28 = vrot.slane %v5732_v45, 1 }
 0x2fb   : > { %v5727_v13 = vmax.f32 %v5725_v41, %v5726_v8  ;;  %v6046_v50 = vpack.c.bf16 %v5692_v9, %v5692_v9  ;;  %v6048_v37 = vpack.c.bf16 %v5706_v17, %v5706_v17  ;;  %v6047_v43 = vpack.c.bf16 %v5699_v36, %v5699_v36 }
 0x2fc   : > { %v5740_v59 = vrot.slane %v5739_v6, 1  ;;  %v6050_v46 = vpack.c.bf16 %v5720_v5, %v5720_v5  ;;  %v6049_v52 = vpack.c.bf16 %v5713_v16, %v5713_v16  ;;  %v5734_v56 = vmax.f32 %v5732_v45, %v5733_v28  ;;  %v19780_v28 = vld [vmem:[#allocation35_spill] sm:$0xff] }
 0x2fd   : > { %v6051_v51 = vpack.c.bf16 %v5727_v13, %v5727_v13  ;;  %v6286_v2 = vunpack.c.l.b16 %v6046_v50  ;;  %v6288_v55 = vunpack.c.l.b16 %v6048_v37  ;;  %v6287_v60 = vunpack.c.l.b16 %v6047_v43 }
 0x2fe   : > { %v5741_v39 = vmax.f32 %v5739_v6, %v5740_v59  ;;  %v6290_v40 = vunpack.c.l.b16 %v6050_v46  ;;  %v6289_v26 = vunpack.c.l.b16 %v6049_v52  ;;  %v4453_v27 = vcombine.low %v17230_v33, %v17241_v23 }
 0x2ff   : > { %v6291_v30 = vunpack.c.l.b16 %v6051_v51  ;;  %v6399_v25 = vsel %vm6328_vm6, %v6286_v2, %v17248_v12  ;;  %v6052_v10 = vpack.c.bf16 %v5734_v56, %v5734_v56  ;;  %v6406_v61 = vsel %vm6328_vm6, %v6287_v60, %v17251_v24 }
 0x300   : > { %v6053_v41 = vpack.c.bf16 %v5741_v39, %v5741_v39  ;;  %v6400_v14 = vsel %vm6330_vm7, %v6288_v55, %v6399_v25  ;;  %v6407_v4 = vsel %vm6330_vm7, %v6289_v26, %v6406_v61  ;;  %v4454_v9 = vcombine.high %v17230_v33, %v17241_v23  ;;  %v19783_v39 = vld [vmem:[#allocation37_spill] sm:$0xff] }
 0x301   : > { %v6401_v21 = vsel %vm6332_vm8, %v6290_v40, %v6400_v14  ;;  %v4461_v17 = vrot.slane %v4453_v27, %v16265_v19  ;;  %v17288_v12 = vunpack.c.l.b16 %v6039_v0  ;;  %v6292_v34 = vunpack.c.l.b16 %v6052_v10  ;;  %v19779_v0 = vld [vmem:[#allocation12_spill] sm:$0xff] }
 0x302   : > { %v17291_v8 = vsel %vm6332_vm8, %v6291_v30, %v6407_v4  ;;  %v4119_v24 = vadd.f32 %v16971_v38, %v17071_v1  ;;  %v17295_v36 = vunpack.c.l.b16 %v6053_v41  ;;  %v4468_v5 = vrot.slane %v4454_v9, %v16265_v19 }
 0x303   : > { %v4469_v45 = vcombine.high %v4461_v17, %v4461_v17  ;;  %v4883_v33 = vrot.slane %v4461_v17, %v16265_v19  ;;  %v17300_v23 = vsel %vm6334_vm9, %v6292_v34, %v6401_v21  ;;  %v17304_v6 = vadd.f32 %v16982_v49, %v19779_v0 }
 0x304   : > { %v4185_v11 = vmax.f32 %v4119_v24, 0.0  ;;  %v4121_v16 = vadd.f32 %v16984_v22, %v17245_v3  ;;  %v4470_v13 = vcombine.high %v4468_v5, %v4468_v5  ;;  %v4899_v50 = vrot.slane %v4468_v5, %v16265_v19 }
 0x305   : > { %v4884_v38 = vcombine.high %v4883_v33, %v4883_v33  ;;  %v4891_v1 = vrot.slane %v4469_v45, %v16265_v19  ;;  %v5742_v37 = vsel %vm5125_vm4, %v4883_v33, -inf  ;;  %v19781_v59 = vmax.f32 %v19780_v28, 0.0 }
 0x306   : > { %v4186_v46 = vmax.f32 %v4121_v16, 0.0  ;;  %v17317_v49 = vadd.f32 %v16990_v42, %v19782_v53  ;;  %v4900_v51 = vcombine.high %v4899_v50, %v4899_v50  ;;  %v4907_v22 = vrot.slane %v4470_v13, %v16265_v19 }
 0x307   : > { %v17313_v43 = vmax.f32 %v19781_v59, %v4185_v11  ;;  %v4892_v52 = vcombine.high %v4891_v1, %v4891_v1  ;;  %v5743_v3 = vrot.slane %v5742_v37, 4  ;;  %v5749_v2 = vsel %vm5125_vm4, %v4884_v38, -inf }
 0x308   : > { %v5756_v55 = vsel %vm5125_vm4, %v4891_v1, -inf  ;;  %v5770_v56 = vsel %vm5125_vm4, %v4899_v50, -inf  ;;  %v19784_v60 = vmax.f32 %v19783_v39, 0.0  ;;  %v4908_v26 = vcombine.high %v4907_v22, %v4907_v22 }
 0x309   : > { %v5744_v30 = vmax.f32 %v5742_v37, %v5743_v3  ;;  %v5750_v25 = vrot.slane %v5749_v2, 4  ;;  %v5757_v42 = vrot.slane %v5756_v55, 4  ;;  %v5763_v27 = vsel %vm5125_vm4, %v4892_v52, -inf }
 0x30a   : > { %v17325_v40 = vmax.f32 %v19784_v60, %v4186_v46  ;;  %v5771_v10 = vrot.slane %v5770_v56, 4  ;;  %v5777_v41 = vsel %vm5125_vm4, %v4900_v51, -inf  ;;  %v5784_v14 = vsel %vm5125_vm4, %v4907_v22, -inf }
 0x30b   : > { %v5745_v61 = vrot.slane %v5744_v30, 2  ;;  %v5751_v21 = vmax.f32 %v5749_v2, %v5750_v25  ;;  %v5758_v4 = vmax.f32 %v5756_v55, %v5757_v42  ;;  %v5764_v9 = vrot.slane %v5763_v27, 4 }
 0x30c   : > { %v5772_v17 = vmax.f32 %v5770_v56, %v5771_v10  ;;  %v5778_v34 = vrot.slane %v5777_v41, 4  ;;  %v5785_v24 = vrot.slane %v5784_v14, 4  ;;  %v5791_v5 = vsel %vm5125_vm4, %v4908_v26, -inf }
 0x30d   : > { %v5746_v45 = vmax.f32 %v5744_v30, %v5745_v61  ;;  %v5752_v33 = vrot.slane %v5751_v21, 2  ;;  %v5759_v11 = vrot.slane %v5758_v4, 2  ;;  %v5765_v0 = vmax.f32 %v5763_v27, %v5764_v9 }
 0x30e   : > { %v5773_v16 = vrot.slane %v5772_v17, 2  ;;  %v5779_v13 = vmax.f32 %v5777_v41, %v5778_v34  ;;  %v5786_v38 = vmax.f32 %v5784_v14, %v5785_v24  ;;  %v5792_v1 = vrot.slane %v5791_v5, 4 }
 0x30f   : > { %v5747_v50 = vrot.slane %v5746_v45, 1  ;;  %v5753_v37 = vmax.f32 %v5751_v21, %v5752_v33  ;;  %v5760_v28 = vmax.f32 %v5758_v4, %v5759_v11  ;;  %v5766_v59 = vrot.slane %v5765_v0, 2 }
 0x310   : > { %v5774_v46 = vmax.f32 %v5772_v17, %v5773_v16  ;;  %v5780_v53 = vrot.slane %v5779_v13, 2  ;;  %v5787_v52 = vrot.slane %v5786_v38, 2  ;;  %v5793_v51 = vmax.f32 %v5791_v5, %v5792_v1 }
 0x311   : > { %v5748_v22 = vmax.f32 %v5746_v45, %v5747_v50  ;;  %v5754_v3 = vrot.slane %v5753_v37, 1  ;;  %v5761_v2 = vrot.slane %v5760_v28, 1  ;;  %v5767_v55 = vmax.f32 %v5765_v0, %v5766_v59 }
 0x312   : > { %v5775_v56 = vrot.slane %v5774_v46, 1  ;;  %v5781_v39 = vmax.f32 %v5779_v13, %v5780_v53  ;;  %v5788_v60 = vmax.f32 %v5786_v38, %v5787_v52  ;;  %v5794_v26 = vrot.slane %v5793_v51, 2 }
 0x313   : > { %v17331_v30 = vmax.f32 %v5753_v37, %v5754_v3  ;;  %v5762_v25 = vmax.f32 %v5760_v28, %v5761_v2  ;;  %v5768_v42 = vrot.slane %v5767_v55, 1  ;;  %v6054_v27 = vpack.c.bf16 %v5748_v22, %v5748_v22  ;;  %v19785_v22 = vld [vmem:[#allocation38_spill] sm:$0xff] }
 0x314   : > { %v5776_v10 = vmax.f32 %v5774_v46, %v5775_v56  ;;  %v5782_v41 = vrot.slane %v5781_v39, 1  ;;  %v5789_v14 = vrot.slane %v5788_v60, 1  ;;  %v5795_v61 = vmax.f32 %v5793_v51, %v5794_v26 }
 0x315   : > { %v5769_v21 = vmax.f32 %v5767_v55, %v5768_v42  ;;  %v6056_v4 = vpack.c.bf16 %v5762_v25, %v5762_v25  ;;  %v6294_v9 = vunpack.c.l.b16 %v6054_v27  ;;  %v4123_v17 = vadd.f32 %v16992_v48, %v17304_v6  ;;  %v19787_v55 = vld [vmem:[#allocation22_spill] sm:$0xff] }
 0x316   : > { %v5783_v34 = vmax.f32 %v5781_v39, %v5782_v41  ;;  %v5790_v24 = vmax.f32 %v5788_v60, %v5789_v14  ;;  %v5796_v5 = vrot.slane %v5795_v61, 1  ;;  %v6058_v45 = vpack.c.bf16 %v5776_v10, %v5776_v10 }
 0x317   : > { %v6055_v33 = vpack.c.bf16 %v17331_v30, %v17331_v30  ;;  %v6057_v11 = vpack.c.bf16 %v5769_v21, %v5769_v21  ;;  %v6296_v0 = vunpack.c.l.b16 %v6056_v4  ;;  %v17339_v16 = vsel %vm6336_vm10, %v6294_v9, %v17300_v23 }
 0x318   : > { %v5797_v13 = vmax.f32 %v5795_v61, %v5796_v5  ;;  %v6059_v38 = vpack.c.bf16 %v5783_v34, %v5783_v34  ;;  %v6060_v1 = vpack.c.bf16 %v5790_v24, %v5790_v24  ;;  %v6298_v50 = vunpack.c.l.b16 %v6058_v45  ;;  %v19789_v34 = vld [vmem:[#allocation11_spill] sm:$0xff] }
 0x319   : > { %v6297_v37 = vunpack.c.l.b16 %v6057_v11  ;;  %v4471_v48 = vcombine.low %v17313_v43, %v17325_v40  ;;  %v4472_v6 = vcombine.high %v17313_v43, %v17325_v40  ;;  %v4189_v28 = vmax.f32 %v4123_v17, 0.0 }
 0x31a   : > { %v6061_v59 = vpack.c.bf16 %v5797_v13, %v5797_v13  ;;  %v6299_v46 = vunpack.c.l.b16 %v6059_v38  ;;  %v6300_v53 = vunpack.c.l.b16 %v6060_v1  ;;  %v6411_v52 = vsel %vm6326_vm5, %v6298_v50, %v6296_v0 }
 0x31b   : > { %v4479_v23 = vrot.slane %v4471_v48, %v16265_v19  ;;  %v4486_v51 = vrot.slane %v4472_v6, %v16265_v19  ;;  %v19786_v3 = vmax.f32 %v19785_v22, 0.0  ;;  %v4018_v56 = vadd.f32 %v16994_v62, %v19787_v55  ;;  %v19788_v62 = vld [vmem:[#allocation24_spill] sm:$0xff] }
 0x31c   : > { %v6301_v39 = vunpack.c.l.b16 %v6061_v59  ;;  %v17355_v43 = vsel %vm6328_vm6, %v6300_v53, %v6411_v52  ;;  %v6417_v40 = vsel %vm6326_vm5, %v6299_v46, %v6297_v37  ;;  %v4125_v60 = vadd.f32 %v16996_v18, %v17317_v49 }
 0x31d   : > { %v17350_v2 = vmax.f32 %v19786_v3, %v4189_v28  ;;  %v4487_v26 = vcombine.high %v4479_v23, %v4479_v23  ;;  %v4488_v25 = vcombine.high %v4486_v51, %v4486_v51  ;;  %v4915_v42 = vrot.slane %v4479_v23, %v16265_v19 }
 0x31e   : > { %v4931_v27 = vrot.slane %v4486_v51, %v16265_v19  ;;  %v17363_v10 = vsel %vm6328_vm6, %v6301_v39, %v6417_v40  ;;  %v4190_v41 = vmax.f32 %v4125_v60, 0.0  ;;  %v17367_v14 = vadd.f32 %v17010_v58, %v19788_v62 }
 0x31f   : > { %v17370_v61 = vadd.f32 %v17012_v44, %v4018_v56  ;;  %v4916_v21 = vcombine.high %v4915_v42, %v4915_v42  ;;  %v4923_v18 = vrot.slane %v4487_v26, %v16265_v19  ;;  %v4939_v4 = vrot.slane %v4488_v25, %v16265_v19 }
 0x320   : > { %v4932_v49 = vcombine.high %v4931_v27, %v4931_v27  ;;  %v5798_v9 = vsel %vm5125_vm4, %v4915_v42, -inf  ;;  %v5826_v17 = vsel %vm5125_vm4, %v4931_v27, -inf  ;;  %v19790_v24 = vmax.f32 %v19789_v34, 0.0 }
 0x321   : > { %v4193_v58 = vmax.f32 %v17370_v61, 0.0  ;;  %v4924_v45 = vcombine.high %v4923_v18, %v4923_v18  ;;  %v4940_v11 = vcombine.high %v4939_v4, %v4939_v4  ;;  %v5799_v44 = vrot.slane %v5798_v9, 4 }
 0x322   : > { %v17378_v5 = vmax.f32 %v19790_v24, %v4190_v41  ;;  %v5805_v0 = vsel %vm5125_vm4, %v4916_v21, -inf  ;;  %v5812_v38 = vsel %vm5125_vm4, %v4923_v18, -inf  ;;  %v5827_v1 = vrot.slane %v5826_v17, 4 }
 0x323   : > { %v5806_v13 = vrot.slane %v5805_v0, 4  ;;  %v5833_v50 = vsel %vm5125_vm4, %v4932_v49, -inf  ;;  %v5800_v37 = vmax.f32 %v5798_v9, %v5799_v44  ;;  %v5813_v48 = vrot.slane %v5812_v38, 4 }
 0x324   : > { %v5819_v6 = vsel %vm5125_vm4, %v4924_v45, -inf  ;;  %v5834_v28 = vrot.slane %v5833_v50, 4  ;;  %v5828_v53 = vmax.f32 %v5826_v17, %v5827_v1  ;;  %v5840_v52 = vsel %vm5125_vm4, %v4939_v4, -inf }
 0x325   : > { %v5807_v59 = vmax.f32 %v5805_v0, %v5806_v13  ;;  %v5820_v46 = vrot.slane %v5819_v6, 4  ;;  %v5801_v23 = vrot.slane %v5800_v37, 2  ;;  %v5814_v51 = vmax.f32 %v5812_v38, %v5813_v48 }
 0x326   : > { %v5835_v22 = vmax.f32 %v5833_v50, %v5834_v28  ;;  %v5841_v3 = vrot.slane %v5840_v52, 4  ;;  %v5829_v39 = vrot.slane %v5828_v53, 2  ;;  %v5847_v40 = vsel %vm5125_vm4, %v4940_v11, -inf }
 0x327   : > { %v5808_v55 = vrot.slane %v5807_v59, 2  ;;  %v5821_v56 = vmax.f32 %v5819_v6, %v5820_v46  ;;  %v5802_v60 = vmax.f32 %v5800_v37, %v5801_v23  ;;  %v5815_v26 = vrot.slane %v5814_v51, 2 }
 0x328   : > { %v5836_v25 = vrot.slane %v5835_v22, 2  ;;  %v5842_v42 = vmax.f32 %v5840_v52, %v5841_v3  ;;  %v5830_v62 = vmax.f32 %v5828_v53, %v5829_v39  ;;  %v5848_v21 = vrot.slane %v5847_v40, 4 }
 0x329   : > { %v5809_v27 = vmax.f32 %v5807_v59, %v5808_v55  ;;  %v5822_v41 = vrot.slane %v5821_v56, 2  ;;  %v5803_v18 = vrot.slane %v5802_v60, 1  ;;  %v5816_v49 = vmax.f32 %v5814_v51, %v5815_v26 }
 0x32a   : > { %v5837_v4 = vmax.f32 %v5835_v22, %v5836_v25  ;;  %v5843_v9 = vrot.slane %v5842_v42, 2  ;;  %v5831_v24 = vrot.slane %v5830_v62, 1  ;;  %v5849_v45 = vmax.f32 %v5847_v40, %v5848_v21 }
 0x32b   : > { %v5810_v17 = vrot.slane %v5809_v27, 1  ;;  %v5823_v34 = vmax.f32 %v5821_v56, %v5822_v41  ;;  %v5804_v44 = vmax.f32 %v5802_v60, %v5803_v18  ;;  %v5817_v0 = vrot.slane %v5816_v49, 1 }
 0x32c   : > { %v5838_v13 = vrot.slane %v5837_v4, 1  ;;  %v5844_v11 = vmax.f32 %v5842_v42, %v5843_v9  ;;  %v5832_v50 = vmax.f32 %v5830_v62, %v5831_v24  ;;  %v5850_v37 = vrot.slane %v5849_v45, 2 }
 0x32d   : > { %v5811_v38 = vmax.f32 %v5809_v27, %v5810_v17  ;;  %v5824_v1 = vrot.slane %v5823_v34, 1  ;;  %v5818_v48 = vmax.f32 %v5816_v49, %v5817_v0  ;;  %v6062_v59 = vpack.c.bf16 %v5804_v44, %v5804_v44  ;;  %v19791_v17 = vld [vmem:[#allocation40_spill] sm:$0xff] }
 0x32e   : > { %v5839_v6 = vmax.f32 %v5837_v4, %v5838_v13  ;;  %v5845_v28 = vrot.slane %v5844_v11, 1  ;;  %v5851_v53 = vmax.f32 %v5849_v45, %v5850_v37  ;;  %v6066_v23 = vpack.c.bf16 %v5832_v50, %v5832_v50 }
 0x32f   : > { %v5825_v46 = vmax.f32 %v5823_v34, %v5824_v1  ;;  %v6063_v52 = vpack.c.bf16 %v5811_v38, %v5811_v38  ;;  %v6064_v22 = vpack.c.bf16 %v5818_v48, %v5818_v48  ;;  %v6302_v55 = vunpack.c.l.b16 %v6062_v59  ;;  %v19793_v48 = vld [vmem:[#allocation34_spill] sm:$0xff] }
 0x330   : > { %v5846_v51 = vmax.f32 %v5844_v11, %v5845_v28  ;;  %v6067_v3 = vpack.c.bf16 %v5839_v6, %v5839_v6  ;;  %v5852_v56 = vrot.slane %v5851_v53, 1  ;;  %v6306_v60 = vunpack.c.l.b16 %v6066_v23  ;;  %v19794_v6 = vld [vmem:[#allocation32_spill] sm:$0xff] }
 0x331   : > { %v6065_v39 = vpack.c.bf16 %v5825_v46, %v5825_v46  ;;  %v6303_v40 = vunpack.c.l.b16 %v6063_v52  ;;  %v6304_v25 = vunpack.c.l.b16 %v6064_v22  ;;  %v6413_v27 = vsel %vm6330_vm7, %v6302_v55, %v17355_v43 }
 0x332   : > { %v6068_v26 = vpack.c.bf16 %v5846_v51, %v5846_v51  ;;  %v6307_v42 = vunpack.c.l.b16 %v6067_v3  ;;  %v17389_v41 = vmax.f32 %v5851_v53, %v5852_v56  ;;  %v4489_v18 = vcombine.low %v17350_v2, %v17378_v5 }
 0x333   : > { %v6305_v62 = vunpack.c.l.b16 %v6065_v39  ;;  %v6419_v21 = vsel %vm6330_vm7, %v6303_v40, %v17363_v10  ;;  %v6414_v4 = vsel %vm6332_vm8, %v6304_v25, %v6413_v27  ;;  %v4490_v9 = vcombine.high %v17350_v2, %v17378_v5 }
 0x334   : > { %v6308_v49 = vunpack.c.l.b16 %v6068_v26  ;;  %v19792_v34 = vmax.f32 %v19791_v17, 0.0  ;;  %v17407_v24 = vunpack.c.l.b16 %v6055_v33  ;;  %v6415_v10 = vsel %vm6334_vm9, %v6306_v60, %v6414_v4 }
 0x335   : > { %v6420_v45 = vsel %vm6332_vm8, %v6305_v62, %v6419_v21  ;;  %v4497_v44 = vrot.slane %v4489_v18, %v16265_v19  ;;  %v4504_v61 = vrot.slane %v4490_v9, %v16265_v19  ;;  %v17421_v5 = vadd.f32 %v17016_v20, %v17367_v14 }
 0x336   : > { %v17402_v43 = vmax.f32 %v19792_v34, %v4193_v58  ;;  %v17413_v0 = vsel %vm6336_vm10, %v6308_v49, %v6415_v10  ;;  %v17416_v2 = vsel %vm6334_vm9, %v6307_v42, %v6420_v45  ;;  %v6069_v30 = vpack.c.bf16 %v17389_v41, %v17389_v41 }
 0x337   : > { %v4505_v33 = vcombine.high %v4497_v44, %v4497_v44  ;;  %v4947_v58 = vrot.slane %v4497_v44, %v16265_v19  ;;  %v6342_v13 = vsel %vm6334_vm9, %v16562_v31, %v16560_v7  ;;  %v4506_v11 = vcombine.high %v4504_v61, %v4504_v61 }
 0x338   : > { %v4963_v38 = vrot.slane %v4504_v61, %v16265_v19  ;;  %v4194_v1 = vmax.f32 %v17421_v5, 0.0  ;;  %v17433_v50 = vsel %vm6336_vm10, %v16577_v63, %v6342_v13  ;;  %v17440_v28 = vsel %vm6334_vm9, %v19794_v6, %v19793_v48 }
 0x339   : > { %v4948_v20 = vcombine.high %v4947_v58, %v4947_v58  ;;  %v4955_v14 = vrot.slane %v4505_v33, %v16265_v19  ;;  %v5854_v37 = vsel %vm5125_vm4, %v4947_v58, -inf  ;;  %v4971_v31 = vrot.slane %v4506_v11, %v16265_v19 }
 0x33a   : > { %v4964_v7 = vcombine.high %v4963_v38, %v4963_v38  ;;  %v5855_v59 = vrot.slane %v5854_v37, 4  ;;  %v5882_v46 = vsel %vm5125_vm4, %v4963_v38, -inf }
 0x33b   : > { %v4956_v53 = vcombine.high %v4955_v14, %v4955_v14  ;;  %v5861_v63 = vsel %vm5125_vm4, %v4948_v20, -inf  ;;  %v5868_v52 = vsel %vm5125_vm4, %v4955_v14, -inf  ;;  %v5883_v23 = vrot.slane %v5882_v46, 4 }
 0x33c   : > { %v4972_v51 = vcombine.high %v4971_v31, %v4971_v31  ;;  %v5856_v22 = vmax.f32 %v5854_v37, %v5855_v59  ;;  %v5862_v3 = vrot.slane %v5861_v63, 4  ;;  %v5869_v55 = vrot.slane %v5868_v52, 4 }
 0x33d   : > { %v5875_v56 = vsel %vm5125_vm4, %v4956_v53, -inf  ;;  %v5884_v39 = vmax.f32 %v5882_v46, %v5883_v23  ;;  %v5889_v40 = vsel %vm5125_vm4, %v4964_v7, -inf  ;;  %v5896_v60 = vsel %vm5125_vm4, %v4971_v31, -inf }
 0x33e   : > { %v5857_v26 = vrot.slane %v5856_v22, 2  ;;  %v5863_v25 = vmax.f32 %v5861_v63, %v5862_v3  ;;  %v5870_v42 = vmax.f32 %v5868_v52, %v5869_v55  ;;  %v5876_v27 = vrot.slane %v5875_v56, 4 }
 0x33f   : > { %v5885_v62 = vrot.slane %v5884_v39, 2  ;;  %v5890_v21 = vrot.slane %v5889_v40, 4  ;;  %v5897_v18 = vrot.slane %v5896_v60, 4  ;;  %v5903_v49 = vsel %vm5125_vm4, %v4972_v51, -inf }
 0x340   : > { %v5858_v4 = vmax.f32 %v5856_v22, %v5857_v26  ;;  %v5864_v9 = vrot.slane %v5863_v25, 2  ;;  %v5871_v17 = vrot.slane %v5870_v42, 2  ;;  %v5877_v34 = vmax.f32 %v5875_v56, %v5876_v27 }
 0x341   : > { %v5886_v10 = vmax.f32 %v5884_v39, %v5885_v62  ;;  %v5891_v45 = vmax.f32 %v5889_v40, %v5890_v21  ;;  %v5898_v44 = vmax.f32 %v5896_v60, %v5897_v18  ;;  %v5904_v61 = vrot.slane %v5903_v49, 4 }
 0x342   : > { %v5859_v33 = vrot.slane %v5858_v4, 1  ;;  %v5865_v58 = vmax.f32 %v5863_v25, %v5864_v9  ;;  %v5872_v13 = vmax.f32 %v5870_v42, %v5871_v17  ;;  %v5878_v11 = vrot.slane %v5877_v34, 2  ;;  %v19795_v9 = vld [vmem:[#allocation41_spill] sm:$0xff] }
 0x343   : > { %v5887_v38 = vrot.slane %v5886_v10, 1  ;;  %v5892_v20 = vrot.slane %v5891_v45, 2  ;;  %v5899_v14 = vrot.slane %v5898_v44, 2  ;;  %v5905_v37 = vmax.f32 %v5903_v49, %v5904_v61  ;;  %v19797_v61 = vld [vmem:[#allocation23_spill] sm:$0xff] }
 0x344   : > { %v5860_v48 = vmax.f32 %v5858_v4, %v5859_v33  ;;  %v5866_v6 = vrot.slane %v5865_v58, 1  ;;  %v5873_v7 = vrot.slane %v5872_v13, 1  ;;  %v5879_v31 = vmax.f32 %v5877_v34, %v5878_v11 }
 0x345   : > { %v5888_v59 = vmax.f32 %v5886_v10, %v5887_v38  ;;  %v5893_v46 = vmax.f32 %v5891_v45, %v5892_v20  ;;  %v5900_v53 = vmax.f32 %v5898_v44, %v5899_v14  ;;  %v5906_v63 = vrot.slane %v5905_v37, 2 }
 0x346   : > { %v5867_v52 = vmax.f32 %v5865_v58, %v5866_v6  ;;  %v5874_v23 = vmax.f32 %v5872_v13, %v5873_v7  ;;  %v5880_v51 = vrot.slane %v5879_v31, 1  ;;  %v6070_v22 = vpack.c.bf16 %v5860_v48, %v5860_v48 }
 0x347   : > { %v5894_v3 = vrot.slane %v5893_v46, 1  ;;  %v5901_v55 = vrot.slane %v5900_v53, 1  ;;  %v5907_v56 = vmax.f32 %v5905_v37, %v5906_v63  ;;  %v6074_v39 = vpack.c.bf16 %v5888_v59, %v5888_v59 }
 0x348   : > { %v5881_v40 = vmax.f32 %v5879_v31, %v5880_v51  ;;  %v6071_v60 = vpack.c.bf16 %v5867_v52, %v5867_v52  ;;  %v6072_v26 = vpack.c.bf16 %v5874_v23, %v5874_v23  ;;  %v6310_v25 = vunpack.c.l.b16 %v6070_v22  ;;  %v19799_v51 = vld [vmem:[#allocation28_spill] sm:$0xff] }
 0x349   : > { %v5895_v42 = vmax.f32 %v5893_v46, %v5894_v3  ;;  %v5902_v27 = vmax.f32 %v5900_v53, %v5901_v55  ;;  %v5908_v62 = vrot.slane %v5907_v56, 1  ;;  %v6314_v21 = vunpack.c.l.b16 %v6074_v39  ;;  %v19800_v22 = vld [vmem:[#allocation36_spill] sm:$0xff] }
 0x34a   : > { %v6073_v18 = vpack.c.bf16 %v5881_v40, %v5881_v40  ;;  %v6311_v49 = vunpack.c.l.b16 %v6071_v60  ;;  %v6312_v4 = vunpack.c.l.b16 %v6072_v26  ;;  %v19796_v17 = vmax.f32 %v19795_v9, 0.0 }
 0x34b   : > { %v5909_v10 = vmax.f32 %v5907_v56, %v5908_v62  ;;  %v6075_v45 = vpack.c.bf16 %v5895_v42, %v5895_v42  ;;  %v6076_v44 = vpack.c.bf16 %v5902_v27, %v5902_v27  ;;  %v17457_v33 = vsel %vm6336_vm10, %v19797_v61, %v17440_v28  ;;  %v19798_v28 = vld [vmem:[#allocation10_spill] sm:$0xff]  ;;  %v19801_v56 = vld [vmem:[#allocation29_spill] sm:$0xff] }
 0x34c   : > { %v4224_v34 = vmax.f32 %v19796_v17, %v4194_v1  ;;  %v6313_v58 = vunpack.c.l.b16 %v6073_v18  ;;  %v6423_v13 = vsel %vm6344_vm11, %v6312_v4, %v6310_v25  ;;  %v17469_v7 = vsel %vm6336_vm10, %v17021_v29, %v19798_v28 }
 0x34d   : > { %v6077_v20 = vpack.c.bf16 %v5909_v10, %v5909_v10  ;;  %v6315_v5 = vunpack.c.l.b16 %v6075_v45  ;;  %v6316_v14 = vunpack.c.l.b16 %v6076_v44  ;;  %v6424_v1 = vsel %vm6326_vm5, %v6314_v21, %v6423_v13 }
 0x34e   : > { %v4507_v11 = vcombine.low %v17402_v43, %v4224_v34  ;;  %v4508_v38 = vcombine.high %v17402_v43, %v4224_v34  ;;  %v6430_v37 = vsel %vm6344_vm11, %v6313_v58, %v6311_v49  ;;  %v17478_v46 = vsel %vm6336_vm10, %v17034_v35, %v17028_v47 }
 0x34f   : > { %v6317_v31 = vunpack.c.l.b16 %v6077_v20  ;;  %v17472_v59 = vsel %vm6328_vm6, %v6316_v14, %v6424_v1  ;;  %v6431_v43 = vsel %vm6326_vm5, %v6315_v5, %v6430_v37  ;;  %v6437_v3 = vpack.c.b16 %v19800_v22, %v19799_v51 }
 0x350   : > { %v4515_v48 = vrot.slane %v4507_v11, %v16265_v19  ;;  %v4522_v6 = vrot.slane %v4508_v38, %v16265_v19  ;;  %v6438_v55 = vpack.c.b16 %v17457_v33, %v17433_v50  ;;  %v6439_v39 = vpack.c.b16 %v17024_v15, %v19801_v56 }
 0x351   : > { %v17483_v29 = vsel %vm6328_vm6, %v6317_v31, %v6431_v43  ;;  %v17496_v26 = vunpack.c.l.b16 %v6069_v30  ;;  %v6440_v27 = vpack.c.b16 %v17478_v46, %v17469_v7 }
 0x352   : > { %v4523_v53 = vcombine.high %v4515_v48, %v4515_v48  ;;  %v4524_v63 = vcombine.high %v4522_v6, %v4522_v6  ;;  %v4979_v52 = vrot.slane %v4515_v48, %v16265_v19  ;;  %v4995_v23 = vrot.slane %v4522_v6, %v16265_v19 }
 0x353   : > { %v17558_v51 = vsel %vm17514_vm14, 0, %v6440_v27 }
 0x354   : > { %v4980_v47 = vcombine.high %v4979_v52, %v4979_v52  ;;  %v4987_v35 = vrot.slane %v4523_v53, %v16265_v19  ;;  %v4996_v40 = vcombine.high %v4995_v23, %v4995_v23  ;;  %v5003_v60 = vrot.slane %v4524_v63, %v16265_v19 }
 0x355   : > { %v5910_v25 = vsel %vm5125_vm4, %v4979_v52, -inf  ;;  %v5938_v42 = vsel %vm5125_vm4, %v4995_v23, -inf }
 0x356   : > { %v4988_v62 = vcombine.high %v4987_v35, %v4987_v35  ;;  %v5004_v21 = vcombine.high %v5003_v60, %v5003_v60  ;;  %v5911_v18 = vrot.slane %v5910_v25, 4  ;;  %v5917_v49 = vsel %vm5125_vm4, %v4980_v47, -inf }
 0x357   : > { %v5918_v4 = vrot.slane %v5917_v49, 4  ;;  %v5924_v9 = vsel %vm5125_vm4, %v4987_v35, -inf  ;;  %v5939_v17 = vrot.slane %v5938_v42, 4  ;;  %v5945_v41 = vsel %vm5125_vm4, %v4996_v40, -inf }
 0x358   : > { %v5912_v30 = vmax.f32 %v5910_v25, %v5911_v18  ;;  %v5925_v34 = vrot.slane %v5924_v9, 4  ;;  %v5931_v10 = vsel %vm5125_vm4, %v4988_v62, -inf  ;;  %v5946_v45 = vrot.slane %v5945_v41, 4 }
 0x359   : > { %v5919_v44 = vmax.f32 %v5917_v49, %v5918_v4  ;;  %v5932_v61 = vrot.slane %v5931_v10, 4  ;;  %v5940_v58 = vmax.f32 %v5938_v42, %v5939_v17  ;;  %v5952_v13 = vsel %vm5125_vm4, %v5003_v60, -inf }
 0x35a   : > { %v5913_v11 = vrot.slane %v5912_v30, 2  ;;  %v5926_v38 = vmax.f32 %v5924_v9, %v5925_v34  ;;  %v5947_v20 = vmax.f32 %v5945_v41, %v5946_v45  ;;  %v5953_v5 = vrot.slane %v5952_v13, 4 }
 0x35b   : > { %v5920_v14 = vrot.slane %v5919_v44, 2  ;;  %v5933_v1 = vmax.f32 %v5931_v10, %v5932_v61  ;;  %v5941_v37 = vrot.slane %v5940_v58, 2  ;;  %v5959_v48 = vsel %vm5125_vm4, %v5004_v21, -inf }
 0x35c   : > { %v5914_v6 = vmax.f32 %v5912_v30, %v5913_v11  ;;  %v5927_v28 = vrot.slane %v5926_v38, 2  ;;  %v5948_v31 = vrot.slane %v5947_v20, 2  ;;  %v5954_v43 = vmax.f32 %v5952_v13, %v5953_v5 }
 0x35d   : > { %v5921_v53 = vmax.f32 %v5919_v44, %v5920_v14  ;;  %v5934_v63 = vrot.slane %v5933_v1, 2  ;;  %v5942_v52 = vmax.f32 %v5940_v58, %v5941_v37  ;;  %v5960_v23 = vrot.slane %v5959_v48, 4 }
 0x35e   : > { %v5915_v47 = vrot.slane %v5914_v6, 1  ;;  %v5928_v35 = vmax.f32 %v5926_v38, %v5927_v28  ;;  %v5949_v40 = vmax.f32 %v5947_v20, %v5948_v31  ;;  %v5955_v60 = vrot.slane %v5954_v43, 2 }
 0x35f   : > { %v5922_v25 = vrot.slane %v5921_v53, 1  ;;  %v5935_v42 = vmax.f32 %v5933_v1, %v5934_v63  ;;  %v5943_v62 = vrot.slane %v5942_v52, 1  ;;  %v5961_v18 = vmax.f32 %v5959_v48, %v5960_v23 }
 0x360   : > { %v5916_v49 = vmax.f32 %v5914_v6, %v5915_v47  ;;  %v5929_v4 = vrot.slane %v5928_v35, 1  ;;  %v5950_v21 = vrot.slane %v5949_v40, 1  ;;  %v5956_v9 = vmax.f32 %v5954_v43, %v5955_v60 }
 0x361   : > { %v5923_v17 = vmax.f32 %v5921_v53, %v5922_v25  ;;  %v5936_v41 = vrot.slane %v5935_v42, 1  ;;  %v5944_v30 = vmax.f32 %v5942_v52, %v5943_v62  ;;  %v5962_v34 = vrot.slane %v5961_v18, 2 }
 0x362   : > { %v5930_v10 = vmax.f32 %v5928_v35, %v5929_v4  ;;  %v5951_v45 = vmax.f32 %v5949_v40, %v5950_v21  ;;  %v5957_v44 = vrot.slane %v5956_v9, 1  ;;  %v6078_v61 = vpack.c.bf16 %v5916_v49, %v5916_v49 }
 0x363   : > { %v5937_v58 = vmax.f32 %v5935_v42, %v5936_v41  ;;  %v5963_v13 = vmax.f32 %v5961_v18, %v5962_v34  ;;  %v6079_v11 = vpack.c.bf16 %v5923_v17, %v5923_v17  ;;  %v6082_v38 = vpack.c.bf16 %v5944_v30, %v5944_v30 }
 0x364   : > { %v5958_v20 = vmax.f32 %v5956_v9, %v5957_v44  ;;  %v6080_v5 = vpack.c.bf16 %v5930_v10, %v5930_v10  ;;  %v6083_v14 = vpack.c.bf16 %v5951_v45, %v5951_v45  ;;  %v6318_v1 = vunpack.c.l.b16 %v6078_v61 }
 0x365   : > { %v5964_v37 = vrot.slane %v5963_v13, 1  ;;  %v6081_v48 = vpack.c.bf16 %v5937_v58, %v5937_v58  ;;  %v6319_v6 = vunpack.c.l.b16 %v6079_v11  ;;  %v6322_v28 = vunpack.c.l.b16 %v6082_v38 }
 0x366   : > { %v6084_v31 = vpack.c.bf16 %v5958_v20, %v5958_v20  ;;  %v6320_v43 = vunpack.c.l.b16 %v6080_v5  ;;  %v6323_v53 = vunpack.c.l.b16 %v6083_v14  ;;  %v6426_v63 = vsel %vm6330_vm7, %v6318_v1, %v17472_v59 }
 0x367   : > { %v5965_v52 = vmax.f32 %v5963_v13, %v5964_v37  ;;  %v6321_v23 = vunpack.c.l.b16 %v6081_v48  ;;  %v6433_v47 = vsel %vm6330_vm7, %v6319_v6, %v17483_v29  ;;  %v19802_v60 = vmov 0  ;;  %v14169_v6 = vld [vmem:[%s19530_s3 + $0x4e0] ss:$16 sps:$4 sm:$0xff]  }
 0x368   : > { %v6324_v35 = vunpack.c.l.b16 %v6084_v31  ;;  %v6427_v40 = vsel %vm6332_vm8, %v6320_v43, %v6426_v63  ;;  %v19803_v60 = vsel %vm17514_vm14, 4294967295, %v19802_v60  ;;  %v6395_v25 = vsel %vm6334_vm9, %v17210_v54, %v17175_v32 }
 0x369   : > { %19804 = vst [vmem:[#allocation15_spill] sm:$0xff] %v19803_v60  ;;  %v6409_v59 = vsel %vm6334_vm9, %v17295_v36, %v17291_v8  ;;  %v6085_v42 = vpack.c.bf16 %v5965_v52, %v5965_v52  ;;  %v6428_v29 = vsel %vm6334_vm9, %v6322_v28, %v6427_v40  ;;  %v6434_v62 = vsel %vm6332_vm8, %v6321_v23, %v6433_v47  ;;  %v14177_v28 = vld [vmem:[%s19530_s3 + $0x4c4] ss:$16 sps:$4 sm:$0xff]  }
 0x36a   : > { %v17531_v18 = vsel %vm17514_vm14, 0, %v6437_v3  ;;  %v17534_v49 = vsel %vm6336_vm10, %v6324_v35, %v6428_v29  ;;  %v17537_v32 = vsel %vm6334_vm9, %v6323_v53, %v6434_v62  ;;  %v17544_v54 = vsel %vm17514_vm14, 0, %v6438_v55  ;;  %v14175_v29 = vld [vmem:[%s19530_s3 + $0x4c0] ss:$16 sps:$4 sm:$0xff]  }
 0x36b   : > { %v17551_v8 = vsel %vm17514_vm14, 0, %v6439_v39  ;;  %v6325_v36 = vunpack.c.l.b16 %v6085_v42  ;;  %v6568_v50 = vcombine.low %v17531_v18, %v17544_v54  ;;  %v6569_v33 = vcombine.high %v17531_v18, %v17544_v54 }
 0x36c   : > { %v6655_v15 = vcombine.low %v17551_v8, %v17558_v51  ;;  %v6465_v22 = vshrl.u32 %v17531_v18, 16  ;;  %v6467_v3 = vshll.u32 %v17531_v18, 16  ;;  %v6472_v55 = vshrl.u32 %v17544_v54, 16 }
 0x36d   : > { %v6578_v7 = vrot.slane %v6568_v50, %v16265_v19  ;;  %v6585_v46 = vrot.slane %v6569_v33, %v16265_v19  ;;  %v6474_v56 = vshll.u32 %v17544_v54, 16  ;;  %v6479_v39 = vshrl.u32 %v17551_v8, 16 }
 0x36e   : > { %v6665_v27 = vrot.slane %v6655_v15, %v16265_v19  ;;  %v6469_v4 = vrot.slane %v6467_v3, 1  ;;  %v6481_v21 = vshll.u32 %v17551_v8, 16  ;;  %v6486_v9 = vshrl.u32 %v17558_v51, 16 }
 0x36f   : > { %v7268_v17 = vrot.slane %v6578_v7, %v16265_v19  ;;  %v6476_v41 = vrot.slane %v6474_v56, 1  ;;  %v6488_v30 = vshll.u32 %v17558_v51, 16  ;;  %v6396_v34 = vsel %vm6336_vm10, %v17288_v12, %v6395_v25 }
 0x370   : > { %v13210_v10 = vcombine.low %v6585_v46, %v6665_v27  ;;  %v6470_v45 = vor.u32 %v6469_v4, %v6465_v22  ;;  %v6483_v44 = vrot.slane %v6481_v21, 1  ;;  %v6410_v61 = vsel %vm6336_vm10, %v17407_v24, %v6409_v59  ;;  %v14183_v46 = vld [vmem:[%s19530_s3 + $0x4a4] ss:$16 sps:$4 sm:$0xff]  }
 0x371   : > { %v6477_v58 = vor.u32 %v6476_v41, %v6472_v55  ;;  %v6490_v13 = vrot.slane %v6488_v30, 1  ;;  %v6441_v11 = vpack.c.b16 %v17339_v16, %v17216_v57  ;;  %v6442_v12 = vpack.c.b16 %v6410_v61, %v6396_v34 }
 0x372   : > { %v7282_v38 = vrot.slane %v13210_v10, %v16265_v19  ;;  %v6484_v20 = vor.u32 %v6483_v44, %v6479_v39  ;;  %v6656_v5 = vcombine.high %v17551_v8, %v17558_v51  ;;  %v6422_v24 = vsel %vm6336_vm10, %v17496_v26, %v17416_v2  ;;  %v14181_v44 = vld [vmem:[%s19530_s3 + $0x4a0] ss:$16 sps:$4 sm:$0xff]  }
 0x373   : > { %v6491_v14 = vor.u32 %v6490_v13, %v6486_v9  ;;  %v6570_v1 = vcombine.low %v6470_v45, %v6477_v58  ;;  %v6571_v37 = vcombine.high %v6470_v45, %v6477_v58  ;;  %v17608_v57 = vsel %vm17514_vm14, 0, %v6441_v11 }
 0x374   : > { %v17610_v16 = vcombine.low %v7268_v17, %v7282_v38  ;;  %v17612_v48 = vcombine.high %v7268_v17, %v7282_v38  ;;  %v17619_v2 = vsel %vm17514_vm14, 0, %v6442_v12  ;;  %v6672_v26 = vrot.slane %v6656_v5, %v16265_v19  ;;  %v14189_v5 = vld [vmem:[%s19530_s3 + $0x484] ss:$16 sps:$4 sm:$0xff]  }
 0x375   : > { %v6592_v31 = vrot.slane %v6570_v1, %v16265_v19  ;;  %v6599_v43 = vrot.slane %v6571_v37, %v16265_v19  ;;  %v6657_v53 = vcombine.low %v6484_v20, %v6491_v14  ;;  %v6742_v63 = vcombine.low %v17608_v57, %v17619_v2  ;;  %v14186_v1 = vld [vmem:[%s19530_s3 + $0x6c4] ss:$16 sps:$4 sm:$0xff]  }
 0x376   : > { %9190 = vmatprep.mubr.bf16.mxu0 %v17612_v48  ;;  %v6493_v52 = vshrl.u32 %v17608_v57, 16  ;;  %v6495_v23 = vshll.u32 %v17608_v57, 16  ;;  %v6500_v47 = vshrl.u32 %v17619_v2, 16  ;;  %v6502_v35 = vshll.u32 %v17619_v2, 16 }
 0x377   : > { %9191 = vmatmul.mubr.bf16.vlgmr.msra.gmra.mxu0 %v17610_v16  ;;  %v6679_v40 = vrot.slane %v6657_v53, %v16265_v19  ;;  %v7275_v25 = vrot.slane %v6592_v31, %v16265_v19  ;;  %v6752_v59 = vrot.slane %v6742_v63, %v16265_v19  ;;  %v6658_v42 = vcombine.high %v6484_v20, %v6491_v14  ;;  %v14178_v20 = vld [vmem:[%s19530_s3 + $0x6e0] ss:$16 sps:$4 sm:$0xff]  }
 0x378   : > { %9285 = vmatpush1.bf16.msra.mxu0 %v14169_v6  ;;  %v6497_v62 = vrot.slane %v6495_v23, 1  ;;  %v6504_v50 = vrot.slane %v6502_v35, 1  ;;  %v6436_v33 = vsel %vm6336_vm10, %v6325_v36, %v17537_v32  ;;  %v6443_v15 = vpack.c.b16 %v17534_v49, %v17413_v0 }
 0x379   : > { %9286 = vmatprep.subr.bf16.mxu0 %v14177_v28  ;;  %v13211_v7 = vcombine.low %v6599_v43, %v6679_v40  ;;  %v6688_v4 = vcombine.high %v6665_v27, %v6679_v40  ;;  %v7372_v17 = vrot.slane %v6752_v59, %v16265_v19  ;;  %v6686_v41 = vrot.slane %v6658_v42, %v16265_v19 }
 0x37a   : > { %v6498_v34 = vor.u32 %v6497_v62, %v6493_v52  ;;  %v6505_v32 = vor.u32 %v6504_v50, %v6500_v47  ;;  %v6444_v36 = vpack.c.b16 %v6436_v33, %v6422_v24  ;;  %v17660_v0 = vsel %vm17514_vm14, 0, %v6443_v15  ;;  %v14184_v62 = vld [vmem:[%s19530_s3 + $0x6c0] ss:$16 sps:$4 sm:$0xff]   ;;  %v14195_v50 = vld [vmem:[%s19530_s3 + $0x464] ss:$16 sps:$4 sm:$0xff]  }
 0x37b   : > { %v7289_v49 = vrot.slane %v13211_v7, %v16265_v19  ;;  %v13214_v10 = vcombine.low %v6688_v4, %v6672_v26  ;;  %v6689_v45 = vcombine.low %v6672_v26, %v6686_v41  ;;  %v6507_v27 = vshrl.u32 %v17660_v0, 16  ;;  %v14192_v4 = vld [vmem:[%s19530_s3 + $0x6a4] ss:$16 sps:$4 sm:$0xff]  }
 0x37c   : > { %9287 = vmatpush1.bf16.msra.mxu0 %v14175_v29  ;;  %v6744_v61 = vcombine.low %v6498_v34, %v6505_v32  ;;  %v17669_v58 = vsel %vm17514_vm14, 0, %v6444_v36  ;;  %v6509_v13 = vshll.u32 %v17660_v0, 16  ;;  %v6743_v11 = vcombine.high %v17608_v57, %v17619_v2 }
 0x37d   : > { %v17674_v12 = vcombine.low %v7275_v25, %v7289_v49  ;;  %v17676_v38 = vcombine.high %v7275_v25, %v7289_v49  ;;  %9288 = vmatprep.subr.bf16.mxu0 %v14183_v46  ;;  %v7358_v24 = vrot.slane %v13214_v10, %v16265_v19  ;;  %v13215_v14 = vcombine.high %v6679_v40, %v6689_v45  ;;  %v14187_v40 = vld [vmem:[%s19530_s3 + $0x480] ss:$16 sps:$4 sm:$0xff]  }
 0x37e   : > { %v6766_v37 = vrot.slane %v6744_v61, %v16265_v19  ;;  %v6511_v6 = vrot.slane %v6509_v13, 1  ;;  %v6514_v26 = vshrl.u32 %v17669_v58, 16  ;;  %v6516_v28 = vshll.u32 %v17669_v58, 16 }
 0x37f   : > { %9253 = vmatprep.mubr.bf16.mxu1 %v17676_v38  ;;  %v17694_v31 = vcombine.high %v7358_v24, %v7372_v17  ;;  %v17696_v43 = vcombine.low %v7358_v24, %v7372_v17  ;;  %v7365_v53 = vrot.slane %v13215_v14, %v16265_v19  ;;  %v6759_v63 = vrot.slane %v6743_v11, %v16265_v19  ;;  %v14190_v24 = vld [vmem:[%s19530_s3 + $0x6a0] ss:$16 sps:$4 sm:$0xff]   ;;  %v14201_v14 = vld [vmem:[%s19530_s3 + $0x444] ss:$16 sps:$4 sm:$0xff]  }
 0x380   : > { %9254 = vmatmul.mubr.bf16.vlgmr.msra.gmra.mxu1 %v17674_v12  ;;  %9289 = vmatpush1.bf16.msra.mxu0 %v14181_v44  ;;  %v7379_v25 = vrot.slane %v6766_v37, %v16265_v19  ;;  %v6512_v59 = vor.u32 %v6511_v6, %v6507_v27  ;;  %v6518_v42 = vrot.slane %v6516_v28, 1  ;;  %v6829_v29 = vcombine.low %v17660_v0, %v17669_v58  ;;  %v14193_v44 = vld [vmem:[%s19530_s3 + $0x460] ss:$16 sps:$4 sm:$0xff]  }
 0x381   : > { %9348 = vmatpush1.bf16.msra.mxu1 %v14178_v20  ;;  %9290 = vmatprep.subr.bf16.mxu0 %v14189_v5  ;;  %v6830_v33 = vcombine.high %v17660_v0, %v17669_v58  ;;  %v6745_v15 = vcombine.high %v6498_v34, %v6505_v32  ;;  %v6528_v7 = vrot.slane %v17531_v18, 1  ;;  %v6529_v46 = vrot.slane %v17544_v54, 1 }
 0x382   : > { %9349 = vmatprep.subr.bf16.mxu1 %v14186_v1  ;;  %9200 = vmatprep.mubr.bf16.mxu0 %v17694_v31  ;;  %v17725_v17 = vcombine.high %v7365_v53, %v7379_v25  ;;  %v17727_v41 = vcombine.low %v7365_v53, %v7379_v25  ;;  %v6519_v36 = vor.u32 %v6518_v42, %v6514_v26  ;;  %v6530_v34 = vrot.slane %v17551_v8, 1  ;;  %v14198_v53 = vld [vmem:[%s19530_s3 + $0x684] ss:$16 sps:$4 sm:$0xff]  }
 0x383   : > { %9201 = vmatmul.mubr.bf16.gmra.mxu0 %v17696_v43  ;;  %v6839_v32 = vrot.slane %v6829_v29, %v16265_v19  ;;  %v6846_v49 = vrot.slane %v6830_v33, %v16265_v19  ;;  %v6773_v10 = vrot.slane %v6745_v15, %v16265_v19  ;;  %v6531_v45 = vrot.slane %v17558_v51, 1 }
 0x384   : > { %9291 = vmatpush1.bf16.msra.mxu0 %v14187_v40  ;;  %9263 = vmatprep.mubr.bf16.mxu1 %v17725_v17  ;;  %v6831_v61 = vcombine.low %v6512_v59, %v6519_v36  ;;  %v6832_v11 = vcombine.high %v6512_v59, %v6519_v36  ;;  %v6603_v20 = vcombine.low %v6528_v7, %v6529_v46  ;;  %v6536_v5 = vrot.slane %v6465_v22, 1 }
 0x385   : > { %9350 = vmatpush1.bf16.msra.mxu1 %v14184_v62  ;;  %9292 = vmatprep.subr.bf16.mxu0 %v14195_v50  ;;  %v13218_v1 = vcombine.low %v6759_v63, %v6839_v32  ;;  %v6604_v37 = vcombine.high %v6528_v7, %v6529_v46  ;;  %v6690_v6 = vcombine.low %v6530_v34, %v6531_v45  ;;  %v6537_v22 = vrot.slane %v6467_v3, 2  ;;  %v14199_v50 = vld [vmem:[%s19530_s3 + $0x440] ss:$16 sps:$4 sm:$0xff]  }
 0x386   : > { %9351 = vmatprep.subr.bf16.mxu1 %v14192_v4  ;;  %v6853_v40 = vrot.slane %v6831_v61, %v16265_v19  ;;  %v6860_v25 = vrot.slane %v6832_v11, %v16265_v19  ;;  %v6613_v63 = vrot.slane %v6603_v20, %v16265_v19  ;;  %v6539_v59 = vrot.slane %v6472_v55, 1  ;;  %v14196_v46 = vld [vmem:[%s19530_s3 + $0x680] ss:$16 sps:$4 sm:$0xff]   ;;  %v14207_v4 = vld [vmem:[%s19530_s3 + $0x424] ss:$16 sps:$4 sm:$0xff]  }
 0x387   : > { %v7448_v42 = vrot.slane %v13218_v1, %v16265_v19  ;;  %v6620_v29 = vrot.slane %v6604_v37, %v16265_v19  ;;  %v17766_v3 = vrot.slane %v6690_v6, %v16265_v19  ;;  %v6538_v62 = vor.u32 %v6537_v22, %v6536_v5 }
 0x388   : > { %9293 = vmatpush1.bf16.msra.mxu0 %v14193_v44  ;;  %9264 = vmatmul.mubr.bf16.gmra.mxu1 %v17727_v41  ;;  %v6862_v33 = vcombine.high %v6839_v32, %v6853_v40  ;;  %v6863_v15 = vcombine.low %v6846_v49, %v6860_v25  ;;  %v13219_v7 = vcombine.low %v6773_v10, %v6853_v40  ;;  %v6540_v55 = vrot.slane %v6474_v56, 2  ;;  %v14204_v10 = vld [vmem:[%s19530_s3 + $0x664] ss:$16 sps:$4 sm:$0xff]  }
 0x389   : > { %9352 = vmatpush1.bf16.msra.mxu1 %v14190_v24  ;;  %9294 = vmatprep.subr.bf16.mxu0 %v14201_v14  ;;  %v13212_v36 = vcombine.low %v6620_v29, %v17766_v3  ;;  %v7304_v44 = vrot.slane %v6613_v63, %v16265_v19  ;;  %v6542_v32 = vrot.slane %v6479_v39, 1  ;;  %v6543_v56 = vrot.slane %v6481_v21, 2  ;;  %v14205_v21 = vld [vmem:[%s19530_s3 + $0x420] ss:$16 sps:$4 sm:$0xff]  }
 0x38a   : > { %9353 = vmatprep.subr.bf16.mxu1 %v14198_v53  ;;  %v13220_v61 = vcombine.low %v6862_v33, %v6846_v49  ;;  %v13221_v11 = vcombine.high %v6853_v40, %v6863_v15  ;;  %v7455_v20 = vrot.slane %v13219_v7, %v16265_v19  ;;  %v6541_v5 = vor.u32 %v6540_v55, %v6539_v59  ;;  %v14202_v53 = vld [vmem:[%s19530_s3 + $0x660] ss:$16 sps:$4 sm:$0xff]   ;;  %v14210_v59 = vld [vmem:[%s19530_s3 + $0x644] ss:$16 sps:$4 sm:$0xff]  }
 0x38b   : > { %v7318_v24 = vrot.slane %v13212_v36, %v16265_v19  ;;  %v6544_v14 = vor.u32 %v6543_v56, %v6542_v32  ;;  %v6545_v1 = vrot.slane %v6486_v9, 1  ;;  %v6546_v39 = vrot.slane %v6488_v30, 2  ;;  %v14213_v9 = vld [vmem:[%s19530_s3 + $0x404] ss:$16 sps:$4 sm:$0xff]   ;;  %v14208_v56 = vld [vmem:[%s19530_s3 + $0x640] ss:$16 sps:$4 sm:$0xff]  }
 0x38c   : > { %9295 = vmatpush1.bf16.msra.mxu0 %v14199_v50  ;;  %v7462_v49 = vrot.slane %v13220_v61, %v16265_v19  ;;  %v7469_v37 = vrot.slane %v13221_v11, %v16265_v19  ;;  %v6605_v6 = vcombine.low %v6538_v62, %v6541_v5  ;;  %v6606_v22 = vcombine.high %v6538_v62, %v6541_v5 }
 0x38d   : > { %9354 = vmatpush1.bf16.msra.mxu1 %v14196_v46  ;;  %9296 = vmatprep.subr.bf16.mxu0 %v14207_v4  ;;  %v17806_v30 = vcombine.low %v7304_v44, %v7318_v24  ;;  %v17808_v40 = vcombine.high %v7304_v44, %v7318_v24  ;;  %v6547_v25 = vor.u32 %v6546_v39, %v6545_v1  ;;  %v6532_v63 = vrot.slane %v17608_v57, 1  ;;  %v14211_v4 = vld [vmem:[%s19530_s3 + $0x400] ss:$16 sps:$4 sm:$0xff]  }
 0x38e   : > { %9355 = vmatprep.subr.bf16.mxu1 %v14204_v10  ;;  %v17814_v29 = vcombine.high %v7448_v42, %v7462_v49  ;;  %v17816_v62 = vcombine.high %v7455_v20, %v7469_v37  ;;  %v17818_v50 = vcombine.low %v7448_v42, %v7462_v49  ;;  %v17820_v33 = vcombine.low %v7455_v20, %v7469_v37  ;;  %v14219_v10 = vld [vmem:[%s19530_s3 + $0x5e4] ss:$16 sps:$4 sm:$0xff]  }
 0x38f   : > { %v6627_v15 = vrot.slane %v6605_v6, %v16265_v19  ;;  %v6634_v7 = vrot.slane %v6606_v22, %v16265_v19  ;;  %v6692_v55 = vcombine.low %v6544_v14, %v6547_v25  ;;  %v6533_v46 = vrot.slane %v17619_v2, 1  ;;  %v14214_v6 = vld [vmem:[%s19530_s3 + $0x620] ss:$16 sps:$4 sm:$0xff]   ;;  %v14225_v22 = vld [vmem:[%s19530_s3 + $0x5c4] ss:$16 sps:$4 sm:$0xff]  }
 0x390   : > { %9297 = vmatpush1.bf16.msra.mxu0 %v14205_v21  ;;  %9210 = vmatprep.mubr.bf16.mxu0 %v17814_v29  ;;  %v6691_v42 = vcombine.high %v6530_v34, %v6531_v45  ;;  %v6548_v36 = vrot.slane %v6493_v52, 1  ;;  %v6549_v44 = vrot.slane %v6495_v23, 2  ;;  %v6551_v32 = vrot.slane %v6500_v47, 1  ;;  %v14216_v45 = vld [vmem:[%s19530_s3 + $0x624] ss:$16 sps:$4 sm:$0xff]  }
 0x391   : > { %9356 = vmatpush1.bf16.msra.mxu1 %v14202_v53  ;;  %9298 = vmatprep.subr.bf16.mxu0 %v14213_v9  ;;  %v6714_v34 = vrot.slane %v6692_v55, %v16265_v19  ;;  %v7311_v52 = vrot.slane %v6627_v15, %v16265_v19  ;;  %v6777_v23 = vcombine.low %v6532_v63, %v6533_v46  ;;  %v6552_v47 = vrot.slane %v6502_v35, 2  ;;  %v14217_v21 = vld [vmem:[%s19530_s3 + $0x5e0] ss:$16 sps:$4 sm:$0xff]  }
 0x392   : > { %9357 = vmatprep.subr.bf16.mxu1 %v14210_v59  ;;  %9273 = vmatprep.mubr.bf16.mxu1 %v17816_v62  ;;  %v6707_v61 = vrot.slane %v6691_v42, %v16265_v19  ;;  %v17856_v11 = vor.u32 %v6549_v44, %v6548_v36  ;;  %v6693_v20 = vcombine.high %v6544_v14, %v6547_v25  ;;  %v6534_v5 = vrot.slane %v17660_v0, 1  ;;  %v14223_v44 = vld [vmem:[%s19530_s3 + $0x5c0] ss:$16 sps:$4 sm:$0xff]  }
 0x393   : > { %9211 = vmatmul.mubr.bf16.gmra.mxu0 %v17818_v50  ;;  %9274 = vmatmul.mubr.bf16.gmra.mxu1 %v17820_v33  ;;  %v13213_v24 = vcombine.low %v6634_v7, %v6714_v34  ;;  %v6723_v35 = vcombine.high %v17766_v3, %v6714_v34  ;;  %v6787_v1 = vrot.slane %v6777_v23, %v16265_v19  ;;  %v6535_v39 = vrot.slane %v17669_v58, 1 }
 0x394   : > { %9299 = vmatpush1.bf16.msra.mxu0 %v14211_v4  ;;  %9316 = vmatprep.mubr.bf16.mxu0 %v17808_v40  ;;  %v6553_v14 = vor.u32 %v6552_v47, %v6551_v32  ;;  %v6721_v49 = vrot.slane %v6693_v20, %v16265_v19  ;;  %v6554_v37 = vrot.slane %v6507_v27, 1  ;;  %v6555_v3 = vrot.slane %v6509_v13, 2  ;;  %v14222_v13 = vld [vmem:[%s19530_s3 + $0x604] ss:$16 sps:$4 sm:$0xff]  }
 0x395   : > { %9358 = vmatpush1.bf16.msra.mxu1 %v14208_v56  ;;  %9300 = vmatprep.subr.bf16.mxu0 %v14219_v10  ;;  %v7325_v53 = vrot.slane %v13213_v24, %v16265_v19  ;;  %v13216_v9 = vcombine.low %v6723_v35, %v6707_v61  ;;  %v7408_v25 = vrot.slane %v6787_v1, %v16265_v19  ;;  %v6557_v27 = vrot.slane %v6514_v26, 1 }
 0x396   : > { %9359 = vmatprep.subr.bf16.mxu1 %v14216_v45  ;;  %v6724_v59 = vcombine.low %v6707_v61, %v6721_v49  ;;  %v6779_v15 = vcombine.low %v17856_v11, %v6553_v14  ;;  %v6556_v7 = vor.u32 %v6555_v3, %v6554_v37  ;;  %v6558_v55 = vrot.slane %v6516_v28, 2  ;;  %v14220_v28 = vld [vmem:[%s19530_s3 + $0x600] ss:$16 sps:$4 sm:$0xff]   ;;  %v14228_v45 = vld [vmem:[%s19530_s3 + $0x7e4] ss:$16 sps:$4 sm:$0xff]  }
 0x397   : > { %v17889_v4 = vcombine.low %v7311_v52, %v7325_v53  ;;  %v17891_v42 = vcombine.high %v7311_v52, %v7325_v53  ;;  %v7394_v36 = vrot.slane %v13216_v9, %v16265_v19  ;;  %v6778_v26 = vcombine.high %v6532_v63, %v6533_v46  ;;  %v14231_v63 = vld [vmem:[%s19530_s3 + $0x5a4] ss:$16 sps:$4 sm:$0xff]   ;;  %v14229_v37 = vld [vmem:[%s19530_s3 + $0x5a0] ss:$16 sps:$4 sm:$0xff]  }
 0x398   : > { %9301 = vmatpush2.bf16.msra.mxu0 %v14217_v21  ;;  %v6801_v32 = vrot.slane %v6779_v15, %v16265_v19  ;;  %v13217_v56 = vcombine.high %v6714_v34, %v6724_v59  ;;  %v6559_v10 = vor.u32 %v6558_v55, %v6557_v27  ;;  %v6864_v23 = vcombine.low %v6534_v5, %v6535_v39 }
 0x399   : > { %9360 = vmatpush1.bf16.msra.mxu1 %v14214_v6  ;;  %9302 = vmatprep.subr.bf16.mxu0 %v14225_v22  ;;  %v17906_v46 = vcombine.high %v7394_v36, %v7408_v25  ;;  %v17908_v52 = vcombine.low %v7394_v36, %v7408_v25  ;;  %v6794_v47 = vrot.slane %v6778_v26, %v16265_v19  ;;  %v6560_v34 = vrot.slane %v17531_v18, 2 }
 0x39a   : > { %9361 = vmatprep.subr.bf16.mxu1 %v14222_v13  ;;  %9379 = vmatprep.mubr.bf16.mxu1 %v17891_v42  ;;  %v7401_v61 = vrot.slane %v13217_v56, %v16265_v19  ;;  %v7415_v20 = vrot.slane %v6801_v32, %v16265_v19  ;;  %v6865_v24 = vcombine.high %v6534_v5, %v6535_v39  ;;  %v6561_v35 = vrot.slane %v17544_v54, 2  ;;  %v14226_v54 = vld [vmem:[%s19530_s3 + $0x7e0] ss:$16 sps:$4 sm:$0xff]  }
 0x39b   : > { %v6866_v1 = vcombine.low %v6556_v7, %v6559_v10  ;;  %v6874_v21 = vrot.slane %v6864_v23, %v16265_v19  ;;  %v6780_v49 = vcombine.high %v17856_v11, %v6553_v14  ;;  %v6867_v18 = vcombine.high %v6556_v7, %v6559_v10  ;;  %v14237_v11 = vld [vmem:[%s19530_s3 + $0x584] ss:$16 sps:$4 sm:$0xff]  }
 0x39c   : > { %9303 = vmatpush2.bf16.msra.mxu0 %v14223_v44  ;;  %v17924_v3 = vcombine.high %v7401_v61, %v7415_v20  ;;  %v6881_v6 = vrot.slane %v6865_v24, %v16265_v19  ;;  %v17927_v22 = vcombine.low %v7401_v61, %v7415_v20  ;;  %v6562_v5 = vrot.slane %v17551_v8, 2  ;;  %v14234_v8 = vld [vmem:[%s19530_s3 + $0x7c4] ss:$16 sps:$4 sm:$0xff]  }
 0x39d   : > { %9362 = vmatpush1.bf16.msra.mxu1 %v14220_v28  ;;  %9304 = vmatprep.subr.bf16.mxu0 %v14231_v63  ;;  %v6888_v39 = vrot.slane %v6866_v1, %v16265_v19  ;;  %v13222_v14 = vcombine.low %v6794_v47, %v6874_v21  ;;  %v6808_v53 = vrot.slane %v6780_v49, %v16265_v19  ;;  %v6563_v9 = vrot.slane %v17558_v51, 2  ;;  %v14235_v51 = vld [vmem:[%s19530_s3 + $0x580] ss:$16 sps:$4 sm:$0xff]   ;;  %v14243_v10 = vld [vmem:[%s19530_s3 + $0x564] ss:$16 sps:$4 sm:$0xff]  }
 0x39e   : > { %9363 = vmatprep.subr.bf16.mxu1 %v14228_v45  ;;  %v6895_v25 = vrot.slane %v6867_v18, %v16265_v19  ;;  %v6638_v27 = vcombine.low %v6560_v34, %v6561_v35  ;;  %v6639_v13 = vcombine.high %v6560_v34, %v6561_v35  ;;  %v6564_v59 = vrot.slane %v17608_v57, 2  ;;  %v14232_v57 = vld [vmem:[%s19530_s3 + $0x7c0] ss:$16 sps:$4 sm:$0xff]  }
 0x39f   : > { %v6897_v15 = vcombine.high %v6874_v21, %v6888_v39  ;;  %v7484_v7 = vrot.slane %v13222_v14, %v16265_v19  ;;  %v13223_v55 = vcombine.low %v6808_v53, %v6888_v39  ;;  %v6725_v36 = vcombine.low %v6562_v5, %v6563_v9  ;;  %v14241_v21 = vld [vmem:[%s19530_s3 + $0x560] ss:$16 sps:$4 sm:$0xff]   ;;  %v14246_v53 = vld [vmem:[%s19530_s3 + $0x784] ss:$16 sps:$4 sm:$0xff]  }
 0x3a0   : > { %9305 = vmatpush2.bf16.msra.mxu0 %v14229_v37  ;;  %v6898_v26 = vcombine.low %v6881_v6, %v6895_v25  ;;  %v6646_v44 = vrot.slane %v6638_v27, %v16265_v19  ;;  %v6653_v32 = vrot.slane %v6639_v13, %v16265_v19  ;;  %v6565_v56 = vrot.slane %v17619_v2, 2  ;;  %v14240_v2 = vld [vmem:[%s19530_s3 + $0x7a4] ss:$16 sps:$4 sm:$0xff]  }
 0x3a1   : > { %9364 = vmatpush2.bf16.msra.mxu1 %v14226_v54  ;;  %9306 = vmatprep.subr.bf16.mxu0 %v14237_v11  ;;  %v13224_v23 = vcombine.low %v6897_v15, %v6881_v6  ;;  %v7491_v28 = vrot.slane %v13223_v55, %v16265_v19  ;;  %v6733_v63 = vrot.slane %v6725_v36, %v16265_v19  ;;  %v6567_v1 = vrot.slane %v17669_v58, 2  ;;  %v14249_v58 = vld [vmem:[%s19530_s3 + $0x544] ss:$16 sps:$4 sm:$0xff]  }
 0x3a2   : > { %9365 = vmatprep.subr.bf16.mxu1 %v14234_v8  ;;  %v13225_v47 = vcombine.high %v6888_v39, %v6898_v26  ;;  %v6654_v34 = vcombine.high %v6646_v44, %v6646_v44  ;;  %v6726_v45 = vcombine.high %v6562_v5, %v6563_v9  ;;  %v6812_v61 = vcombine.low %v6564_v59, %v6565_v56  ;;  %v14238_v5 = vld [vmem:[%s19530_s3 + $0x7a0] ss:$16 sps:$4 sm:$0xff]  }
 0x3a3   : > { %v7498_v20 = vrot.slane %v13224_v23, %v16265_v19  ;;  %v7331_v24 = vcombine.low %v6653_v32, %v6733_v63  ;;  %v6741_v35 = vcombine.high %v6733_v63, %v6733_v63  ;;  %v6566_v14 = vrot.slane %v17660_v0, 2  ;;  %v14247_v0 = vld [vmem:[%s19530_s3 + $0x540] ss:$16 sps:$4 sm:$0xff]  }
 0x3a4   : > { %9307 = vmatpush2.bf16.msra.mxu0 %v14235_v51  ;;  %v7505_v49 = vrot.slane %v13225_v47, %v16265_v19  ;;  %v7330_v18 = vcombine.low %v6646_v44, %v6654_v34  ;;  %v6740_v37 = vrot.slane %v6726_v45, %v16265_v19  ;;  %v6820_v6 = vrot.slane %v6812_v61, %v16265_v19  ;;  %v14244_v44 = vld [vmem:[%s19530_s3 + $0x780] ss:$16 sps:$4 sm:$0xff]  }
 0x3a5   : > { %9366 = vmatpush2.bf16.msra.mxu1 %v14232_v57  ;;  %9308 = vmatprep.subr.bf16.mxu0 %v14243_v10  ;;  %v17976_v54 = vcombine.high %v7484_v7, %v7498_v20  ;;  %v17978_v11 = vcombine.low %v7484_v7, %v7498_v20  ;;  %v7345_v39 = vrot.slane %v7331_v24, %v16265_v19  ;;  %v14252_v57 = vld [vmem:[%s19530_s3 + $0x764] ss:$16 sps:$4 sm:$0xff]   ;;  %v14253_v47 = vld [vmem:[%s19530_s3 + $0x520] ss:$16 sps:$4 sm:$0xff]  }
 0x3a6   : > { %9367 = vmatprep.subr.bf16.mxu1 %v14240_v2  ;;  %v17985_v9 = vcombine.high %v7491_v28, %v7505_v49  ;;  %v7338_v8 = vrot.slane %v7330_v18, %v16265_v19  ;;  %v17988_v25 = vcombine.low %v7491_v28, %v7505_v49  ;;  %v6828_v27 = vcombine.high %v6820_v6, %v6820_v6  ;;  %v14250_v61 = vld [vmem:[%s19530_s3 + $0x760] ss:$16 sps:$4 sm:$0xff]   ;;  %v14261_v20 = vld [vmem:[%s19530_s3 + $0x504] ss:$16 sps:$4 sm:$0xff]  }
 0x3a7   : > { %v7420_v13 = vcombine.low %v6741_v35, %v6740_v37  ;;  %v6813_v15 = vcombine.high %v6564_v59, %v6565_v56  ;;  %v6899_v7 = vcombine.low %v6566_v14, %v6567_v1  ;;  %v6900_v55 = vcombine.high %v6566_v14, %v6567_v1  ;;  %v14255_v59 = vld [vmem:[%s19530_s3 + $0x524] ss:$16 sps:$4 sm:$0xff]   ;;  %v14259_v49 = vld [vmem:[%s19530_s3 + $0x500] ss:$16 sps:$4 sm:$0xff]  }
 0x3a8   : > { %9309 = vmatpush2.bf16.msra.mxu0 %v14241_v21  ;;  %v17993_v36 = vcombine.low %v7338_v8, %v7345_v39  ;;  %v17995_v51 = vcombine.high %v7338_v8, %v7345_v39  ;;  %v7421_v26 = vcombine.low %v6820_v6, %v6828_v27  ;;  %v14258_v35 = vld [vmem:[%s19530_s3 + $0x744] ss:$16 sps:$4 sm:$0xff]   ;;  %v14256_v18 = vld [vmem:[%s19530_s3 + $0x740] ss:$16 sps:$4 sm:$0xff]  }
 0x3a9   : > { %9368 = vmatpush2.bf16.msra.mxu1 %v14238_v5  ;;  %9310 = vmatprep.subr.bf16.mxu0 %v14249_v58  ;;  %v6827_v32 = vrot.slane %v6813_v15, %v16265_v19  ;;  %v6907_v56 = vrot.slane %v6899_v7, %v16265_v19  ;;  %v7428_v10 = vrot.slane %v7420_v13, %v16265_v19  ;;  %v14267_v37 = vld [vmem:[%s19530_s3 + $0x8e4] ss:$16 sps:$4 sm:$0xff]   ;;  %v14265_v39 = vld [vmem:[%s19530_s3 + $0x8e0] ss:$16 sps:$4 sm:$0xff]   ;;  %v14276_v7 = vld [vmem:[%s19530_s3 + $0xec] ss:$16 sps:$4 sm:$0xff]  }
 0x3aa   : > { %9369 = vmatprep.subr.bf16.mxu1 %v14246_v53  ;;  %v7435_v23 = vrot.slane %v7421_v26, %v16265_v19  ;;  %v6914_v28 = vrot.slane %v6900_v55, %v16265_v19  ;;  %v14264_v58 = vld [vmem:[%s19530_s3 + $0x724] ss:$16 sps:$4 sm:$0xff]   ;;  %v14262_v14 = vld [vmem:[%s19530_s3 + $0x720] ss:$16 sps:$4 sm:$0xff]   ;;  %v14274_v55 = vld [vmem:[%s19530_s3 + $0xe8] ss:$16 sps:$4 sm:$0xff]  }
 0x3ab   : > { %v6915_v63 = vcombine.high %v6907_v56, %v6907_v56  ;;  %v7510_v2 = vcombine.low %v6827_v32, %v6907_v56  ;;  %v14273_v53 = vld [vmem:[%s19530_s3 + $0x8c4] ss:$16 sps:$4 sm:$0xff]   ;;  %v14271_v27 = vld [vmem:[%s19530_s3 + $0x8c0] ss:$16 sps:$4 sm:$0xff]   ;;  %v14282_v26 = vld [vmem:[%s19530_s3 + $0xcc] ss:$16 sps:$4 sm:$0xff]  }
 0x3ac   : > { %9311 = vmatpush2.bf16.msra.mxu0 %v14247_v0  ;;  %v18014_v34 = vcombine.high %v7428_v10, %v7435_v23  ;;  %v18016_v45 = vcombine.low %v7428_v10, %v7435_v23  ;;  %v14270_v8 = vld [vmem:[%s19530_s3 + $0x704] ss:$16 sps:$4 sm:$0xff]   ;;  %v14268_v13 = vld [vmem:[%s19530_s3 + $0x700] ss:$16 sps:$4 sm:$0xff]   ;;  %v14288_v56 = vld [vmem:[%s19530_s3 + $0xac] ss:$16 sps:$4 sm:$0xff]  }
 0x3ad   : > { %9370 = vmatpush2.bf16.msra.mxu1 %v14244_v44  ;;  %9312 = vmatprep.subr.bf16.mxu0 %v14255_v59  ;;  %v7511_v24 = vcombine.low %v6915_v63, %v6914_v28  ;;  %v7518_v1 = vrot.slane %v7510_v2, %v16265_v19  ;;  %v14279_v15 = vld [vmem:[%s19530_s3 + $0x8a4] ss:$16 sps:$4 sm:$0xff]   ;;  %v14277_v0 = vld [vmem:[%s19530_s3 + $0x8a0] ss:$16 sps:$4 sm:$0xff]   ;;  %v14280_v59 = vld [vmem:[%s19530_s3 + $0xc8] ss:$16 sps:$4 sm:$0xff]  }
 0x3ae   : > { %9371 = vmatprep.subr.bf16.mxu1 %v14252_v57  ;;  %v14285_v44 = vld [vmem:[%s19530_s3 + $0x884] ss:$16 sps:$4 sm:$0xff]   ;;  %v14283_v32 = vld [vmem:[%s19530_s3 + $0x880] ss:$16 sps:$4 sm:$0xff]   ;;  %v14286_v10 = vld [vmem:[%s19530_s3 + $0xa8] ss:$16 sps:$4 sm:$0xff]  }
 0x3af   : > { %v7525_v21 = vrot.slane %v7511_v24, %v16265_v19  ;;  %v14291_v57 = vld [vmem:[%s19530_s3 + $0x864] ss:$16 sps:$4 sm:$0xff]   ;;  %v14289_v23 = vld [vmem:[%s19530_s3 + $0x860] ss:$16 sps:$4 sm:$0xff]   ;;  %v14294_v28 = vld [vmem:[%s19530_s3 + $0x8c] ss:$16 sps:$4 sm:$0xff]  }
 0x3b0   : > { %9313 = vmatpush2.bf16.msra.mxu0 %v14253_v47  ;;  %v14297_v63 = vld [vmem:[%s19530_s3 + $0x844] ss:$16 sps:$4 sm:$0xff]   ;;  %v14292_v2 = vld [vmem:[%s19530_s3 + $0x88] ss:$16 sps:$4 sm:$0xff]   ;;  %v14295_v47 = vld [vmem:[%s19530_s3 + $0x840] ss:$16 sps:$4 sm:$0xff]  }
 0x3b1   : > { %9372 = vmatpush2.bf16.msra.mxu1 %v14250_v61  ;;  %9314 = vmatprep.subr.bf16.mxu0 %v14261_v20  ;;  %v18038_v6 = vcombine.high %v7518_v1, %v7525_v21  ;;  %v18040_v5 = vcombine.low %v7518_v1, %v7525_v21  ;;  %v14300_v61 = vld [vmem:[%s19530_s3 + $0x6c] ss:$16 sps:$4 sm:$0xff]   ;;  %v14303_v20 = vld [vmem:[%s19530_s3 + $0x824] ss:$16 sps:$4 sm:$0xff]   ;;  %v14298_v24 = vld [vmem:[%s19530_s3 + $0x68] ss:$16 sps:$4 sm:$0xff]  }
 0x3b2   : > { %9373 = vmatprep.subr.bf16.mxu1 %v14258_v35  ;;  %v14301_v35 = vld [vmem:[%s19530_s3 + $0x820] ss:$16 sps:$4 sm:$0xff]   ;;  %v14306_v1 = vld [vmem:[%s19530_s3 + $0x4c] ss:$16 sps:$4 sm:$0xff]   ;;  %v14309_v21 = vld [vmem:[%s19530_s3 + $0x804] ss:$16 sps:$4 sm:$0xff]  }
 0x3b4   : > { %9315 = vmatpush2.bf16.msra.mxu0 %v14259_v49  ;;  %v14304_v49 = vld [vmem:[%s19530_s3 + $0x48] ss:$16 sps:$4 sm:$0xff]  }
 0x3b5   : > { %9374 = vmatpush2.bf16.msra.mxu1 %v14256_v18  ;;  %9410 = vmatprep.subr.bf16.mxu0 %v14267_v37  ;;  %v14307_v18 = vld [vmem:[%s19530_s3 + $0x800] ss:$16 sps:$4 sm:$0xff]   ;;  %v14312_v37 = vld [vmem:[%s19530_s3 + $0x2c] ss:$16 sps:$4 sm:$0xff]  }
 0x3b6   : > { %9375 = vmatprep.subr.bf16.mxu1 %v14264_v58  ;;  %v14315_v58 = vld [vmem:[%s19530_s3 + $0x9e4] ss:$16 sps:$4 sm:$0xff]  }
 0x3b7   : > { %9317 = vmatmul.mubr.bf16.vlgmr.msra.gmra.mxu0 %v17806_v30 }
 0x3b8   : > { %9326 = vmatprep.mubr.bf16.mxu0 %v17906_v46  ;;  %9411 = vmatpush1.bf16.msra.mxu0 %v14265_v39  ;;  %v14313_v39 = vld [vmem:[%s19530_s3 + $0x9e0] ss:$16 sps:$4 sm:$0xff]  }
 0x3b9   : > { %9376 = vmatpush2.bf16.msra.mxu1 %v14262_v14  ;;  %9412 = vmatprep.subr.bf16.mxu0 %v14273_v53  ;;  %v14318_v14 = vld [vmem:[%s19530_s3 + $0xc] ss:$16 sps:$4 sm:$0xff]   ;;  %v14321_v53 = vld [vmem:[%s19530_s3 + $0x9c4] ss:$16 sps:$4 sm:$0xff]  }
 0x3ba   : > { %9377 = vmatprep.subr.bf16.mxu1 %v14270_v8  ;;  %v14316_v8 = vld [vmem:[%s19530_s3 + $0x8] ss:$16 sps:$4 sm:$0xff]  }
 0x3bc   : > { %9413 = vmatpush1.bf16.msra.mxu0 %v14271_v27  ;;  %v14319_v27 = vld [vmem:[%s19530_s3 + $0x9c0] ss:$16 sps:$4 sm:$0xff]  }
 0x3bd   : > { %9378 = vmatpush2.bf16.msra.mxu1 %v14268_v13  ;;  %9414 = vmatprep.subr.bf16.mxu0 %v14279_v15  ;;  %v14324_v13 = vld [vmem:[%s19530_s3 + $0x1ec] ss:$16 sps:$4 sm:$0xff]   ;;  %v14327_v15 = vld [vmem:[%s19530_s3 + $0x9a4] ss:$16 sps:$4 sm:$0xff]  }
 0x3be   : > { %9473 = vmatprep.subr.bf16.mxu1 %v14276_v7  ;;  %v14322_v7 = vld [vmem:[%s19530_s3 + $0x1e8] ss:$16 sps:$4 sm:$0xff]  }
 0x3bf   : > { %9327 = vmatmul.mubr.bf16.gmra.mxu0 %v17908_v52 }
 0x3c0   : > { %9380 = vmatmul.mubr.bf16.vlgmr.msra.gmra.mxu1 %v17889_v4  ;;  %9336 = vmatprep.mubr.bf16.mxu0 %v17976_v54 }
 0x3c1   : > { %9389 = vmatprep.mubr.bf16.mxu1 %v17924_v3  ;;  %9474 = vmatpush1.bf16.msra.mxu1 %v14274_v55  ;;  %v14325_v55 = vld [vmem:[%s19530_s3 + $0x9a0] ss:$16 sps:$4 sm:$0xff]  }
 0x3c2   : > { %9415 = vmatpush1.bf16.msra.mxu0 %v14277_v0  ;;  %9475 = vmatprep.subr.bf16.mxu1 %v14282_v26  ;;  %v14330_v0 = vld [vmem:[%s19530_s3 + $0x1cc] ss:$16 sps:$4 sm:$0xff]   ;;  %v14333_v26 = vld [vmem:[%s19530_s3 + $0x984] ss:$16 sps:$4 sm:$0xff]  }
 0x3c3   : > { %9416 = vmatprep.subr.bf16.mxu0 %v14285_v44  ;;  %v14328_v44 = vld [vmem:[%s19530_s3 + $0x1c8] ss:$16 sps:$4 sm:$0xff]  }
 0x3c5   : > { %9476 = vmatpush1.bf16.msra.mxu1 %v14280_v59  ;;  %v14331_v59 = vld [vmem:[%s19530_s3 + $0x980] ss:$16 sps:$4 sm:$0xff]  }
 0x3c6   : > { %9417 = vmatpush1.bf16.msra.mxu0 %v14283_v32  ;;  %9477 = vmatprep.subr.bf16.mxu1 %v14288_v56  ;;  %v14336_v32 = vld [vmem:[%s19530_s3 + $0x1ac] ss:$16 sps:$4 sm:$0xff]   ;;  %v14339_v56 = vld [vmem:[%s19530_s3 + $0x964] ss:$16 sps:$4 sm:$0xff]  }
 0x3c7   : > { %9337 = vmatmul.mubr.bf16.gmra.mxu0 %v17978_v11  ;;  %9418 = vmatprep.subr.bf16.mxu0 %v14291_v57  ;;  %v14334_v57 = vld [vmem:[%s19530_s3 + $0x1a8] ss:$16 sps:$4 sm:$0xff]  }
 0x3c8   : > { %9390 = vmatmul.mubr.bf16.gmra.mxu1 %v17927_v22  ;;  %9442 = vmatprep.mubr.bf16.mxu0 %v17995_v51 }
 0x3c9   : > { %9399 = vmatprep.mubr.bf16.mxu1 %v17985_v9  ;;  %9478 = vmatpush1.bf16.msra.mxu1 %v14286_v10  ;;  %v14337_v10 = vld [vmem:[%s19530_s3 + $0x960] ss:$16 sps:$4 sm:$0xff]  }
 0x3ca   : > { %9419 = vmatpush1.bf16.msra.mxu0 %v14289_v23  ;;  %9479 = vmatprep.subr.bf16.mxu1 %v14294_v28  ;;  %v14342_v23 = vld [vmem:[%s19530_s3 + $0x18c] ss:$16 sps:$4 sm:$0xff]   ;;  %v14345_v28 = vld [vmem:[%s19530_s3 + $0x944] ss:$16 sps:$4 sm:$0xff]  }
 0x3cb   : > { %9420 = vmatprep.subr.bf16.mxu0 %v14297_v63  ;;  %v14340_v63 = vld [vmem:[%s19530_s3 + $0x188] ss:$16 sps:$4 sm:$0xff]  }
 0x3cd   : > { %9480 = vmatpush1.bf16.msra.mxu1 %v14292_v2  ;;  %v14343_v2 = vld [vmem:[%s19530_s3 + $0x940] ss:$16 sps:$4 sm:$0xff]  }
 0x3ce   : > { %9421 = vmatpush1.bf16.msra.mxu0 %v14295_v47  ;;  %9481 = vmatprep.subr.bf16.mxu1 %v14300_v61  ;;  %v14348_v47 = vld [vmem:[%s19530_s3 + $0x16c] ss:$16 sps:$4 sm:$0xff]   ;;  %v14351_v61 = vld [vmem:[%s19530_s3 + $0x924] ss:$16 sps:$4 sm:$0xff]  }
 0x3cf   : > { %9422 = vmatprep.subr.bf16.mxu0 %v14303_v20  ;;  %v14346_v20 = vld [vmem:[%s19530_s3 + $0x168] ss:$16 sps:$4 sm:$0xff]  }
 0x3d0   : > { %9400 = vmatmul.mubr.bf16.gmra.mxu1 %v17988_v25 }
 0x3d1   : > { %9482 = vmatpush1.bf16.msra.mxu1 %v14298_v24  ;;  %9505 = vmatprep.mubr.bf16.mxu1 %v17612_v48  ;;  %v14310_v48 = vld [vmem:[%s19530_s3 + $0x28] ss:$16 sps:$4 sm:$0xff]   ;;  %v14349_v24 = vld [vmem:[%s19530_s3 + $0x920] ss:$16 sps:$4 sm:$0xff]  }
 0x3d2   : > { %9423 = vmatpush1.bf16.msra.mxu0 %v14301_v35  ;;  %9483 = vmatprep.subr.bf16.mxu1 %v14306_v1  ;;  %v14354_v35 = vld [vmem:[%s19530_s3 + $0x14c] ss:$16 sps:$4 sm:$0xff]   ;;  %v14357_v1 = vld [vmem:[%s19530_s3 + $0x904] ss:$16 sps:$4 sm:$0xff]  }
 0x3d3   : > { %9424 = vmatprep.subr.bf16.mxu0 %v14309_v21  ;;  %v14352_v21 = vld [vmem:[%s19530_s3 + $0x148] ss:$16 sps:$4 sm:$0xff]  }
 0x3d5   : > { %9484 = vmatpush1.bf16.msra.mxu1 %v14304_v49  ;;  %v14355_v49 = vld [vmem:[%s19530_s3 + $0x900] ss:$16 sps:$4 sm:$0xff]  }
 0x3d6   : > { %9425 = vmatpush1.bf16.msra.mxu0 %v14307_v18  ;;  %9485 = vmatprep.subr.bf16.mxu1 %v14312_v37  ;;  %v14360_v18 = vld [vmem:[%s19530_s3 + $0x12c] ss:$16 sps:$4 sm:$0xff]  }
 0x3d7   : > { %9426 = vmatprep.subr.bf16.mxu0 %v14315_v58  ;;  %v14363_v37 = vld [vmem:[%s19530_s3 + $0x2ec] ss:$16 sps:$4 sm:$0xff]   ;;  %v14358_v58 = vld [vmem:[%s19530_s3 + $0x128] ss:$16 sps:$4 sm:$0xff]  }
 0x3d9   : > { %9486 = vmatpush1.bf16.msra.mxu1 %v14310_v48  ;;  %v14361_v48 = vld [vmem:[%s19530_s3 + $0x2e8] ss:$16 sps:$4 sm:$0xff]  }
 0x3da   : > { %9427 = vmatpush2.bf16.msra.mxu0 %v14313_v39  ;;  %9487 = vmatprep.subr.bf16.mxu1 %v14318_v14  ;;  %v14366_v39 = vld [vmem:[%s19530_s3 + $0x10c] ss:$16 sps:$4 sm:$0xff]  }
 0x3db   : > { %9428 = vmatprep.subr.bf16.mxu0 %v14321_v53  ;;  %v14369_v14 = vld [vmem:[%s19530_s3 + $0x2cc] ss:$16 sps:$4 sm:$0xff]   ;;  %v14364_v53 = vld [vmem:[%s19530_s3 + $0x108] ss:$16 sps:$4 sm:$0xff]  }
 0x3dd   : > { %9488 = vmatpush1.bf16.msra.mxu1 %v14316_v8  ;;  %v14367_v8 = vld [vmem:[%s19530_s3 + $0x2c8] ss:$16 sps:$4 sm:$0xff]  }
 0x3de   : > { %9429 = vmatpush2.bf16.msra.mxu0 %v14319_v27  ;;  %9489 = vmatprep.subr.bf16.mxu1 %v14324_v13  ;;  %v14372_v27 = vld [vmem:[%s19530_s3 + $0x4ec] ss:$16 sps:$4 sm:$0xff]  }
 0x3df   : > { %9430 = vmatprep.subr.bf16.mxu0 %v14327_v15  ;;  %v14375_v13 = vld [vmem:[%s19530_s3 + $0x2ac] ss:$16 sps:$4 sm:$0xff]   ;;  %v14370_v15 = vld [vmem:[%s19530_s3 + $0x4e8] ss:$16 sps:$4 sm:$0xff]  }
 0x3e1   : > { %9490 = vmatpush2.bf16.msra.mxu1 %v14322_v7  ;;  %v14378_v7 = vld [vmem:[%s19530_s3 + $0x4cc] ss:$16 sps:$4 sm:$0xff]  }
 0x3e2   : > { %9431 = vmatpush2.bf16.msra.mxu0 %v14325_v55  ;;  %9491 = vmatprep.subr.bf16.mxu1 %v14330_v0  ;;  %v14373_v55 = vld [vmem:[%s19530_s3 + $0x2a8] ss:$16 sps:$4 sm:$0xff]   ;;  %v14381_v0 = vld [vmem:[%s19530_s3 + $0x28c] ss:$16 sps:$4 sm:$0xff]  }
 0x3e3   : > { %9432 = vmatprep.subr.bf16.mxu0 %v14333_v26  ;;  %v14376_v26 = vld [vmem:[%s19530_s3 + $0x4c8] ss:$16 sps:$4 sm:$0xff]  }
 0x3e5   : > { %9492 = vmatpush2.bf16.msra.mxu1 %v14328_v44  ;;  %v14384_v44 = vld [vmem:[%s19530_s3 + $0x4ac] ss:$16 sps:$4 sm:$0xff]  }
 0x3e6   : > { %9433 = vmatpush2.bf16.msra.mxu0 %v14331_v59  ;;  %9493 = vmatprep.subr.bf16.mxu1 %v14336_v32  ;;  %v14382_v59 = vld [vmem:[%s19530_s3 + $0x4a8] ss:$16 sps:$4 sm:$0xff]   ;;  %v14390_v32 = vld [vmem:[%s19530_s3 + $0x48c] ss:$16 sps:$4 sm:$0xff]  }
 0x3e7   : > { %9434 = vmatprep.subr.bf16.mxu0 %v14339_v56  ;;  %v14385_v56 = vld [vmem:[%s19530_s3 + $0x268] ss:$16 sps:$4 sm:$0xff]  }
 0x3e9   : > { %9494 = vmatpush2.bf16.msra.mxu1 %v14334_v57  ;;  %v14393_v57 = vld [vmem:[%s19530_s3 + $0x24c] ss:$16 sps:$4 sm:$0xff]  }
 0x3ea   : > { %9435 = vmatpush2.bf16.msra.mxu0 %v14337_v10  ;;  %9495 = vmatprep.subr.bf16.mxu1 %v14342_v23  ;;  %v14388_v10 = vld [vmem:[%s19530_s3 + $0x488] ss:$16 sps:$4 sm:$0xff]   ;;  %v14396_v23 = vld [vmem:[%s19530_s3 + $0x46c] ss:$16 sps:$4 sm:$0xff]  }
 0x3eb   : > { %9436 = vmatprep.subr.bf16.mxu0 %v14345_v28  ;;  %v14394_v28 = vld [vmem:[%s19530_s3 + $0x468] ss:$16 sps:$4 sm:$0xff]  }
 0x3ed   : > { %9496 = vmatpush2.bf16.msra.mxu1 %v14340_v63  ;;  %v14402_v63 = vld [vmem:[%s19530_s3 + $0x44c] ss:$16 sps:$4 sm:$0xff]  }
 0x3ee   : > { %9437 = vmatpush2.bf16.msra.mxu0 %v14343_v2  ;;  %9497 = vmatprep.subr.bf16.mxu1 %v14348_v47  ;;  %v14405_v2 = vld [vmem:[%s19530_s3 + $0x20c] ss:$16 sps:$4 sm:$0xff]   ;;  %v14400_v47 = vld [vmem:[%s19530_s3 + $0x448] ss:$16 sps:$4 sm:$0xff]  }
 0x3ef   : > { %9438 = vmatprep.subr.bf16.mxu0 %v14351_v61  ;;  %v14408_v61 = vld [vmem:[%s19530_s3 + $0x42c] ss:$16 sps:$4 sm:$0xff]  }
 0x3f1   : > { %9498 = vmatpush2.bf16.msra.mxu1 %v14346_v20  ;;  %v14411_v20 = vld [vmem:[%s19530_s3 + $0x3ec] ss:$16 sps:$4 sm:$0xff]  }
 0x3f2   : > { %9439 = vmatpush2.bf16.msra.mxu0 %v14349_v24  ;;  %9499 = vmatprep.subr.bf16.mxu1 %v14354_v35  ;;  %v14414_v24 = vld [vmem:[%s19530_s3 + $0x40c] ss:$16 sps:$4 sm:$0xff]   ;;  %v14409_v35 = vld [vmem:[%s19530_s3 + $0x3e8] ss:$16 sps:$4 sm:$0xff]  }
 0x3f3   : > { %9440 = vmatprep.subr.bf16.mxu0 %v14357_v1  ;;  %v14417_v1 = vld [vmem:[%s19530_s3 + $0x3cc] ss:$16 sps:$4 sm:$0xff]  }
 0x3f5   : > { %9500 = vmatpush2.bf16.msra.mxu1 %v14352_v21  ;;  %v14412_v21 = vld [vmem:[%s19530_s3 + $0x408] ss:$16 sps:$4 sm:$0xff]  }
 0x3f6   : > { %9441 = vmatpush2.bf16.msra.mxu0 %v14355_v49  ;;  %9501 = vmatprep.subr.bf16.mxu1 %v14360_v18  ;;  %v14420_v49 = vld [vmem:[%s19530_s3 + $0x5ec] ss:$16 sps:$4 sm:$0xff]   ;;  %v14415_v18 = vld [vmem:[%s19530_s3 + $0x3c8] ss:$16 sps:$4 sm:$0xff]  }
 0x3f7   : > { %9536 = vmatprep.subr.bf16.mxu0 %v14363_v37  ;;  %v14423_v37 = vld [vmem:[%s19530_s3 + $0x3ac] ss:$16 sps:$4 sm:$0xff]  }
 0x3f9   : > { %9502 = vmatpush2.bf16.msra.mxu1 %v14358_v58  ;;  %9443 = vmatmul.mubr.bf16.vlgmr.msra.gmra.mxu0 %v17993_v36  ;;  %v14418_v58 = vld [vmem:[%s19530_s3 + $0x5e8] ss:$16 sps:$4 sm:$0xff]  }
 0x3fa   : > { %9452 = vmatprep.mubr.bf16.mxu0 %v18014_v34  ;;  %9537 = vmatpush1.bf16.msra.mxu0 %v14361_v48  ;;  %v14426_v48 = vld [vmem:[%s19530_s3 + $0x5cc] ss:$16 sps:$4 sm:$0xff]  }
 0x3fb   : > { %9503 = vmatprep.subr.bf16.mxu1 %v14366_v39  ;;  %9538 = vmatprep.subr.bf16.mxu0 %v14369_v14  ;;  %v14421_v39 = vld [vmem:[%s19530_s3 + $0x3a8] ss:$16 sps:$4 sm:$0xff]   ;;  %v14429_v14 = vld [vmem:[%s19530_s3 + $0x38c] ss:$16 sps:$4 sm:$0xff]  }
 0x3fd   : > { %9504 = vmatpush2.bf16.msra.mxu1 %v14364_v53  ;;  %v14424_v53 = vld [vmem:[%s19530_s3 + $0x5c8] ss:$16 sps:$4 sm:$0xff]  }
 0x3fe   : > { %9539 = vmatpush1.bf16.msra.mxu0 %v14367_v8  ;;  %9599 = vmatprep.subr.bf16.mxu1 %v14372_v27  ;;  %v14432_v8 = vld [vmem:[%s19530_s3 + $0x5ac] ss:$16 sps:$4 sm:$0xff]   ;;  %v14427_v27 = vld [vmem:[%s19530_s3 + $0x388] ss:$16 sps:$4 sm:$0xff]  }
 0x3ff   : > { %9540 = vmatprep.subr.bf16.mxu0 %v14375_v13  ;;  %v14435_v13 = vld [vmem:[%s19530_s3 + $0x36c] ss:$16 sps:$4 sm:$0xff]  }
 0x400   : > { %9506 = vmatmul.mubr.bf16.vlgmr.msra.gmra.mxu1 %v17610_v16  ;;  %v14379_v16 = vld [vmem:[%s19530_s3 + $0x288] ss:$16 sps:$4 sm:$0xff]  }
 0x401   : > { %9515 = vmatprep.mubr.bf16.mxu1 %v17694_v31  ;;  %9600 = vmatpush1.bf16.msra.mxu1 %v14370_v15  ;;  %v14387_v31 = vld [vmem:[%s19530_s3 + $0x26c] ss:$16 sps:$4 sm:$0xff]   ;;  %v14430_v15 = vld [vmem:[%s19530_s3 + $0x5a8] ss:$16 sps:$4 sm:$0xff]  }
 0x402   : > { %9453 = vmatmul.mubr.bf16.gmra.mxu0 %v18016_v45  ;;  %9601 = vmatprep.subr.bf16.mxu1 %v14378_v7  ;;  %v14438_v7 = vld [vmem:[%s19530_s3 + $0x58c] ss:$16 sps:$4 sm:$0xff]  }
 0x403   : > { %9462 = vmatprep.mubr.bf16.mxu0 %v18038_v6  ;;  %9541 = vmatpush1.bf16.msra.mxu0 %v14373_v55  ;;  %v14433_v55 = vld [vmem:[%s19530_s3 + $0x368] ss:$16 sps:$4 sm:$0xff]  }
 0x404   : > { %9542 = vmatprep.subr.bf16.mxu0 %v14381_v0  ;;  %v14441_v0 = vld [vmem:[%s19530_s3 + $0x34c] ss:$16 sps:$4 sm:$0xff]  }
 0x405   : > { %9602 = vmatpush1.bf16.msra.mxu1 %v14376_v26  ;;  %v14436_v26 = vld [vmem:[%s19530_s3 + $0x588] ss:$16 sps:$4 sm:$0xff]  }
 0x406   : > { %9603 = vmatprep.subr.bf16.mxu1 %v14384_v44  ;;  %v14444_v44 = vld [vmem:[%s19530_s3 + $0x56c] ss:$16 sps:$4 sm:$0xff]  }
 0x407   : > { %9543 = vmatpush1.bf16.msra.mxu0 %v14379_v16  ;;  %v14439_v16 = vld [vmem:[%s19530_s3 + $0x348] ss:$16 sps:$4 sm:$0xff]  }
 0x408   : > { %9516 = vmatmul.mubr.bf16.gmra.mxu1 %v17696_v43  ;;  %9544 = vmatprep.subr.bf16.mxu0 %v14387_v31  ;;  %v14391_v43 = vld [vmem:[%s19530_s3 + $0x248] ss:$16 sps:$4 sm:$0xff]   ;;  %v14447_v31 = vld [vmem:[%s19530_s3 + $0x32c] ss:$16 sps:$4 sm:$0xff]  }
 0x409   : > { %9525 = vmatprep.mubr.bf16.mxu1 %v17814_v29  ;;  %9604 = vmatpush1.bf16.msra.mxu1 %v14382_v59  ;;  %v14399_v29 = vld [vmem:[%s19530_s3 + $0x22c] ss:$16 sps:$4 sm:$0xff]   ;;  %v14442_v59 = vld [vmem:[%s19530_s3 + $0x568] ss:$16 sps:$4 sm:$0xff]  }
 0x40a   : > { %9463 = vmatmul.mubr.bf16.gmra.mxu0 %v18040_v5  ;;  %9605 = vmatprep.subr.bf16.mxu1 %v14390_v32  ;;  %v14450_v32 = vld [vmem:[%s19530_s3 + $0x54c] ss:$16 sps:$4 sm:$0xff]  }
 0x40b   : > { %9545 = vmatpush1.bf16.msra.mxu0 %v14385_v56  ;;  %9568 = vmatprep.mubr.bf16.mxu0 %v17676_v38  ;;  %v14397_v38 = vld [vmem:[%s19530_s3 + $0x228] ss:$16 sps:$4 sm:$0xff]  }
 0x40c   : > { %9546 = vmatprep.subr.bf16.mxu0 %v14393_v57  ;;  %v14445_v56 = vld [vmem:[%s19530_s3 + $0x328] ss:$16 sps:$4 sm:$0xff]   ;;  %v14453_v57 = vld [vmem:[%s19530_s3 + $0x30c] ss:$16 sps:$4 sm:$0xff]  }
 0x40d   : > { %9606 = vmatpush1.bf16.msra.mxu1 %v14388_v10  ;;  %v14448_v10 = vld [vmem:[%s19530_s3 + $0x548] ss:$16 sps:$4 sm:$0xff]  }
 0x40e   : > { %9607 = vmatprep.subr.bf16.mxu1 %v14396_v23  ;;  %v14456_v23 = vld [vmem:[%s19530_s3 + $0x52c] ss:$16 sps:$4 sm:$0xff]  }
 0x40f   : > { %9547 = vmatpush1.bf16.msra.mxu0 %v14391_v43  ;;  %v14451_v43 = vld [vmem:[%s19530_s3 + $0x308] ss:$16 sps:$4 sm:$0xff]  }
 0x410   : > { %9526 = vmatmul.mubr.bf16.gmra.mxu1 %v17818_v50  ;;  %9548 = vmatprep.subr.bf16.mxu0 %v14399_v29  ;;  %v14403_v50 = vld [vmem:[%s19530_s3 + $0x208] ss:$16 sps:$4 sm:$0xff]   ;;  %v14459_v29 = vld [vmem:[%s19530_s3 + $0x6ec] ss:$16 sps:$4 sm:$0xff]  }
 0x411   : > { %9608 = vmatpush1.bf16.msra.mxu1 %v14394_v28  ;;  %9631 = vmatprep.mubr.bf16.mxu1 %v17808_v40  ;;  %v14406_v40 = vld [vmem:[%s19530_s3 + $0x428] ss:$16 sps:$4 sm:$0xff]  }
 0x412   : > { %9609 = vmatprep.subr.bf16.mxu1 %v14402_v63  ;;  %v14454_v28 = vld [vmem:[%s19530_s3 + $0x528] ss:$16 sps:$4 sm:$0xff]   ;;  %v14462_v63 = vld [vmem:[%s19530_s3 + $0x50c] ss:$16 sps:$4 sm:$0xff]  }
 0x413   : > { %9549 = vmatpush1.bf16.msra.mxu0 %v14397_v38  ;;  %v14457_v38 = vld [vmem:[%s19530_s3 + $0x6e8] ss:$16 sps:$4 sm:$0xff]  }
 0x414   : > { %9550 = vmatprep.subr.bf16.mxu0 %v14405_v2 }
 0x415   : > { %9610 = vmatpush1.bf16.msra.mxu1 %v14400_v47  ;;  %v18465_v47 = vld [vmem:[%s19531_s4] sm:$0xf] }
 0x416   : > { %9611 = vmatprep.subr.bf16.mxu1 %v14408_v61  ;;  %v14465_v61 = vld [vmem:[%s19530_s3 + $0x6cc] ss:$16 sps:$4 sm:$0xff]  }
 0x417   : > { %9551 = vmatpush1.bf16.msra.mxu0 %v14403_v50  ;;  %v14460_v50 = vld [vmem:[%s19530_s3 + $0x508] ss:$16 sps:$4 sm:$0xff]  }
 0x418   : > { %9552 = vmatprep.subr.bf16.mxu0 %v14411_v20 }
 0x419   : > { %9612 = vmatpush1.bf16.msra.mxu1 %v14406_v40  ;;  %v14468_v40 = vld [vmem:[%s19530_s3 + $0x8ec] ss:$16 sps:$4 sm:$0xff]  }
 0x41a   : > { %9613 = vmatprep.subr.bf16.mxu1 %v14414_v24  ;;  %v19805_v24 = vld [vmem:[#allocation27_spill] sm:$0xff] }
 0x41b   : > { %9553 = vmatpush2.bf16.msra.mxu0 %v14409_v35  ;;  %v18479_v35 = vrot.slane %v18465_v47, %v19805_v24 }
 0x41c   : > { %9554 = vmatprep.subr.bf16.mxu0 %v14417_v1  ;;  %v14463_v1 = vld [vmem:[%s19530_s3 + $0x6c8] ss:$16 sps:$4 sm:$0xff]  }
 0x41d   : > { %9614 = vmatpush1.bf16.msra.mxu1 %v14412_v21  ;;  %v19806_v21 = vld [vmem:[#allocation13_spill] sm:$0xff] }
 0x41e   : > { %9615 = vmatprep.subr.bf16.mxu1 %v14420_v49  ;;  %v18490_v49 = vrot.slane %v18465_v47, %v19806_v21 }
 0x41f   : > { %9555 = vmatpush2.bf16.msra.mxu0 %v14415_v18 }
 0x420   : > { %9556 = vmatprep.subr.bf16.mxu0 %v14423_v37  ;;  %v14474_v37 = vld [vmem:[%s19530_s3 + $0x8cc] ss:$16 sps:$4 sm:$0xff]  }
 0x421   : > { %9616 = vmatpush2.bf16.msra.mxu1 %v14418_v58 }
 0x422   : > { %9617 = vmatprep.subr.bf16.mxu1 %v14426_v48  ;;  %v14469_v48 = vld [vmem:[%s19530_s3 + $0x6a8] ss:$16 sps:$4 sm:$0xff]  }
 0x423   : > { %9557 = vmatpush2.bf16.msra.mxu0 %v14421_v39 }
 0x424   : > { %9558 = vmatprep.subr.bf16.mxu0 %v14429_v14  ;;  %v14477_v14 = vld [vmem:[%s19530_s3 + $0x68c] ss:$16 sps:$4 sm:$0xff]  }
 0x425   : > { %9618 = vmatpush2.bf16.msra.mxu1 %v14424_v53 }
 0x426   : > { %9619 = vmatprep.subr.bf16.mxu1 %v14432_v8 }
 0x427   : > { %9559 = vmatpush2.bf16.msra.mxu0 %v14427_v27 }
 0x428   : > { %9560 = vmatprep.subr.bf16.mxu0 %v14435_v13  ;;  %v14472_v13 = vld [vmem:[%s19530_s3 + $0x8c8] ss:$16 sps:$4 sm:$0xff]  }
 0x429   : > { %9620 = vmatpush2.bf16.msra.mxu1 %v14430_v15  ;;  %v14480_v15 = vld [vmem:[%s19530_s3 + $0x8ac] ss:$16 sps:$4 sm:$0xff]  }
 0x42a   : > { %9621 = vmatprep.subr.bf16.mxu1 %v14438_v7 }
 0x42b   : > { %9561 = vmatpush2.bf16.msra.mxu0 %v14433_v55 }
 0x42c   : > { %9562 = vmatprep.subr.bf16.mxu0 %v14441_v0 }
 0x42d   : > { %9622 = vmatpush2.bf16.msra.mxu1 %v14436_v26 }
 0x42e   : > { %9623 = vmatprep.subr.bf16.mxu1 %v14444_v44 }
 0x42f   : > { %9563 = vmatpush2.bf16.msra.mxu0 %v14439_v16 }
 0x430   : > { %9564 = vmatprep.subr.bf16.mxu0 %v14447_v31 }
 0x431   : > { %9624 = vmatpush2.bf16.msra.mxu1 %v14442_v59 }
 0x432   : > { %9625 = vmatprep.subr.bf16.mxu1 %v14450_v32  ;;  %v14486_v32 = vld [vmem:[%s19530_s3 + $0x88c] ss:$16 sps:$4 sm:$0xff]  }
 0x433   : > { %9565 = vmatpush2.bf16.msra.mxu0 %v14445_v56 }
 0x434   : > { %9566 = vmatprep.subr.bf16.mxu0 %v14453_v57 }
 0x435   : > { %9626 = vmatpush2.bf16.msra.mxu1 %v14448_v10  ;;  %v14481_v10 = vld [vmem:[%s19530_s3 + $0x668] ss:$16 sps:$4 sm:$0xff]  }
 0x436   : > { %9627 = vmatprep.subr.bf16.mxu1 %v14456_v23 }
 0x437   : > { %9567 = vmatpush2.bf16.msra.mxu0 %v14451_v43  ;;  %v9192_v2 = vpop.f32.mrf.mxu0 }
 0x438   : > { %9662 = vmatprep.subr.bf16.mxu0 %v14459_v29  ;;  %v9193_v58 = vadd.f32 %v9192_v2, %v18479_v35  ;;  %v14489_v29 = vld [vmem:[%s19530_s3 + $0x64c] ss:$16 sps:$4 sm:$0xff]  }
 0x439   : > { %9628 = vmatpush2.bf16.msra.mxu1 %v14454_v28  ;;  %v9194_v20 = vpop.f32.mrf.mxu0 }
 0x43a   : > { %9569 = vmatmul.mubr.bf16.vlgmr.msra.gmra.mxu0 %v17674_v12  ;;  %9629 = vmatprep.subr.bf16.mxu1 %v14462_v63  ;;  %v14471_v12 = vld [vmem:[%s19530_s3 + $0x6ac] ss:$16 sps:$4 sm:$0xff]   ;;  %v9195_v53 = vadd.f32 %v9194_v20, %v18490_v49  ;;  %v14484_v63 = vld [vmem:[%s19530_s3 + $0x888] ss:$16 sps:$4 sm:$0xff]  }
 0x43b   : > { %9578 = vmatprep.mubr.bf16.mxu0 %v17725_v17  ;;  %9663 = vmatpush1.bf16.msra.mxu0 %v14457_v38  ;;  %v9196_v18 = vpop.f32.mrf.mxu0  ;;  %v14466_v17 = vld [vmem:[%s19530_s3 + $0x8e8] ss:$16 sps:$4 sm:$0xff]  }
 0x43c   : > { %9664 = vmatprep.subr.bf16.mxu0 %v14465_v61  ;;  %v9197_v7 = vadd.f32 %v9196_v18, %v18479_v35  ;;  %v14492_v61 = vld [vmem:[%s19530_s3 + $0x86c] ss:$16 sps:$4 sm:$0xff]  }
 0x43d   : > { %9630 = vmatpush2.bf16.msra.mxu1 %v14460_v50  ;;  %v9198_v8 = vpop.f32.mrf.mxu0  ;;  %v14487_v50 = vld [vmem:[%s19530_s3 + $0x648] ss:$16 sps:$4 sm:$0xff]  }
 0x43e   : > { %9725 = vmatprep.subr.bf16.mxu1 %v14468_v40  ;;  %v9199_v44 = vadd.f32 %v9198_v8, %v18490_v49  ;;  %v14495_v40 = vld [vmem:[%s19530_s3 + $0x62c] ss:$16 sps:$4 sm:$0xff]  }
 0x43f   : > { %9665 = vmatpush1.bf16.msra.mxu0 %v14463_v1 }
 0x440   : > { %9632 = vmatmul.mubr.bf16.vlgmr.msra.gmra.mxu1 %v17806_v30  ;;  %v9255_v39 = vpop.f32.mrf.mxu1  ;;  %9666 = vmatprep.subr.bf16.mxu0 %v14471_v12 }
 0x441   : > { %v18507_v27 = vadd.f32 %v9255_v39, %v9193_v58  ;;  %9641 = vmatprep.mubr.bf16.mxu1 %v17906_v46  ;;  %9726 = vmatpush1.bf16.msra.mxu1 %v14466_v17  ;;  %v14475_v46 = vld [vmem:[%s19530_s3 + $0x688] ss:$16 sps:$4 sm:$0xff]   ;;  %v14498_v17 = vld [vmem:[%s19530_s3 + $0x84c] ss:$16 sps:$4 sm:$0xff]  }
 0x442   : > { %9579 = vmatmul.mubr.bf16.gmra.mxu0 %v17727_v41  ;;  %v9257_v30 = vpop.f32.mrf.mxu1  ;;  %9727 = vmatprep.subr.bf16.mxu1 %v14474_v37  ;;  %v14483_v41 = vld [vmem:[%s19530_s3 + $0x66c] ss:$16 sps:$4 sm:$0xff]   ;;  %v14493_v37 = vld [vmem:[%s19530_s3 + $0x628] ss:$16 sps:$4 sm:$0xff]  }
 0x443   : > { %v18518_v55 = vadd.f32 %v9257_v30, %v9195_v53  ;;  %9588 = vmatprep.mubr.bf16.mxu0 %v17816_v62  ;;  %9667 = vmatpush1.bf16.msra.mxu0 %v14469_v48  ;;  %v9202_v0 = vpop.f32.mrf.mxu0  ;;  %v14478_v62 = vld [vmem:[%s19530_s3 + $0x8a8] ss:$16 sps:$4 sm:$0xff]   ;;  %v14501_v48 = vld [vmem:[%s19530_s3 + $0x60c] ss:$16 sps:$4 sm:$0xff]  }
 0x444   : > { %v9259_v26 = vpop.f32.mrf.mxu1  ;;  %9668 = vmatprep.subr.bf16.mxu0 %v14477_v14  ;;  %v9203_v57 = vadd.f32 %v9202_v0, %v18479_v35  ;;  %v14496_v39 = vld [vmem:[%s19530_s3 + $0x848] ss:$16 sps:$4 sm:$0xff]   ;;  %v14504_v14 = vld [vmem:[%s19530_s3 + $0x82c] ss:$16 sps:$4 sm:$0xff]  }
 0x445   : > { %v18528_v16 = vadd.f32 %v9259_v26, %v9197_v7  ;;  %9728 = vmatpush1.bf16.msra.mxu1 %v14472_v13  ;;  %v9204_v31 = vpop.f32.mrf.mxu0  ;;  %v14502_v30 = vld [vmem:[%s19530_s3 + $0x828] ss:$16 sps:$4 sm:$0xff]  }
 0x446   : > { %v9261_v59 = vpop.f32.mrf.mxu1  ;;  %9729 = vmatprep.subr.bf16.mxu1 %v14480_v15  ;;  %v9205_v28 = vadd.f32 %v9204_v31, %v18490_v49  ;;  %v14513_v31 = vld [vmem:[%s19530_s3 + $0x7cc] ss:$16 sps:$4 sm:$0xff]  }
 0x447   : > { %v18536_v56 = vadd.f32 %v9261_v59, %v9199_v44  ;;  %9669 = vmatpush1.bf16.msra.mxu0 %v14475_v46  ;;  %v9206_v23 = vpop.f32.mrf.mxu0  ;;  %v14510_v46 = vld [vmem:[%s19530_s3 + $0x80c] ss:$16 sps:$4 sm:$0xff]  }
 0x448   : > { %9642 = vmatmul.mubr.bf16.gmra.mxu1 %v17908_v52  ;;  %9670 = vmatprep.subr.bf16.mxu0 %v14483_v41  ;;  %v9265_v43 = vpop.f32.mrf.mxu1  ;;  %v14505_v41 = vld [vmem:[%s19530_s3 + $0x7e8] ss:$16 sps:$4 sm:$0xff]  }
 0x449   : > { %9651 = vmatprep.mubr.bf16.mxu1 %v17976_v54  ;;  %9730 = vmatpush1.bf16.msra.mxu1 %v14478_v62  ;;  %v18551_v38 = vadd.f32 %v9265_v43, %v9203_v57  ;;  %v9208_v52 = vpop.f32.mrf.mxu0  ;;  %v9207_v54 = vadd.f32 %v9206_v23, %v18479_v35  ;;  %v14508_v57 = vld [vmem:[%s19530_s3 + $0x808] ss:$16 sps:$4 sm:$0xff]   ;;  %v14516_v23 = vld [vmem:[%s19530_s3 + $0x9ec] ss:$16 sps:$4 sm:$0xff]  }
 0x44a   : > { %9589 = vmatmul.mubr.bf16.gmra.mxu0 %v17820_v33  ;;  %9731 = vmatprep.subr.bf16.mxu1 %v14486_v32  ;;  %v9267_v2 = vpop.f32.mrf.mxu1  ;;  %v9209_v1 = vadd.f32 %v9208_v52, %v18490_v49 }
 0x44b   : > { %9671 = vmatpush1.bf16.msra.mxu0 %v14481_v10  ;;  %9694 = vmatprep.mubr.bf16.mxu0 %v17891_v42  ;;  %v18562_v20 = vadd.f32 %v9267_v2, %v9205_v28  ;;  %v14490_v42 = vld [vmem:[%s19530_s3 + $0x868] ss:$16 sps:$4 sm:$0xff]  }
 0x44c   : > { %9672 = vmatprep.subr.bf16.mxu0 %v14489_v29  ;;  %v9269_v33 = vpop.f32.mrf.mxu1  ;;  %v14514_v2 = vld [vmem:[%s19530_s3 + $0x9e8] ss:$16 sps:$4 sm:$0xff]  }
 0x44d   : > { %9732 = vmatpush1.bf16.msra.mxu1 %v14484_v63  ;;  %v18571_v12 = vadd.f32 %v9269_v33, %v9207_v54  ;;  %v14519_v63 = vld [vmem:[%s19530_s3 + $0x7ac] ss:$16 sps:$4 sm:$0xff]  }
 0x44e   : > { %9733 = vmatprep.subr.bf16.mxu1 %v14492_v61  ;;  %v9271_v18 = vpop.f32.mrf.mxu1  ;;  %v14517_v61 = vld [vmem:[%s19530_s3 + $0x7a8] ss:$16 sps:$4 sm:$0xff]   ;;  %v14525_v54 = vld [vmem:[%s19530_s3 + $0x78c] ss:$16 sps:$4 sm:$0xff]  }
 0x44f   : > { %9673 = vmatpush1.bf16.msra.mxu0 %v14487_v50  ;;  %v18579_v58 = vadd.f32 %v9271_v18, %v9209_v1  ;;  %v14520_v50 = vld [vmem:[%s19530_s3 + $0x9c8] ss:$16 sps:$4 sm:$0xff]   ;;  %v14528_v33 = vld [vmem:[%s19530_s3 + $0x9ac] ss:$16 sps:$4 sm:$0xff]  }
 0x450   : > { %9652 = vmatmul.mubr.bf16.gmra.mxu1 %v17978_v11  ;;  %9674 = vmatprep.subr.bf16.mxu0 %v14495_v40  ;;  %v14499_v11 = vld [vmem:[%s19530_s3 + $0x608] ss:$16 sps:$4 sm:$0xff]   ;;  %v14531_v1 = vld [vmem:[%s19530_s3 + $0x76c] ss:$16 sps:$4 sm:$0xff]  }
 0x451   : > { %9734 = vmatpush1.bf16.msra.mxu1 %v14490_v42  ;;  %9757 = vmatprep.mubr.bf16.mxu1 %v17995_v51  ;;  %v14507_v51 = vld [vmem:[%s19530_s3 + $0x7ec] ss:$16 sps:$4 sm:$0xff]   ;;  %v14523_v40 = vld [vmem:[%s19530_s3 + $0x788] ss:$16 sps:$4 sm:$0xff]  }
 0x452   : > { %9735 = vmatprep.subr.bf16.mxu1 %v14498_v17  ;;  %v14526_v42 = vld [vmem:[%s19530_s3 + $0x9a8] ss:$16 sps:$4 sm:$0xff]   ;;  %v14534_v18 = vld [vmem:[%s19530_s3 + $0x98c] ss:$16 sps:$4 sm:$0xff]  }
 0x453   : > { %9675 = vmatpush1.bf16.msra.mxu0 %v14493_v37  ;;  %v9212_v53 = vpop.f32.mrf.mxu0  ;;  %v9275_v8 = vpop.f32.mrf.mxu1  ;;  %v14529_v17 = vld [vmem:[%s19530_s3 + $0x768] ss:$16 sps:$4 sm:$0xff]   ;;  %v14537_v37 = vld [vmem:[%s19530_s3 + $0x74c] ss:$16 sps:$4 sm:$0xff]  }
 0x454   : > { %9676 = vmatprep.subr.bf16.mxu0 %v14501_v48  ;;  %v9213_v13 = vadd.f32 %v9212_v53, %v18479_v35  ;;  %v14532_v48 = vld [vmem:[%s19530_s3 + $0x988] ss:$16 sps:$4 sm:$0xff]  }
 0x455   : > { %9736 = vmatpush1.bf16.msra.mxu1 %v14496_v39  ;;  %v9214_v15 = vpop.f32.mrf.mxu0  ;;  %v9277_v7 = vpop.f32.mrf.mxu1  ;;  %v14540_v39 = vld [vmem:[%s19530_s3 + $0x96c] ss:$16 sps:$4 sm:$0xff]   ;;  %v14538_v53 = vld [vmem:[%s19530_s3 + $0x968] ss:$16 sps:$4 sm:$0xff]  }
 0x456   : > { %9737 = vmatprep.subr.bf16.mxu1 %v14504_v14  ;;  %v18605_v0 = vadd.f32 %v9275_v8, %v9213_v13  ;;  %v9215_v26 = vadd.f32 %v9214_v15, %v18490_v49  ;;  %v14535_v14 = vld [vmem:[%s19530_s3 + $0x748] ss:$16 sps:$4 sm:$0xff]   ;;  %v14546_v8 = vld [vmem:[%s19530_s3 + $0x94c] ss:$16 sps:$4 sm:$0xff]  }
 0x457   : > { %9677 = vmatpush1.bf16.msra.mxu0 %v14499_v11  ;;  %v9216_v44 = vpop.f32.mrf.mxu0  ;;  %v9279_v62 = vpop.f32.mrf.mxu1  ;;  %v14543_v11 = vld [vmem:[%s19530_s3 + $0x72c] ss:$16 sps:$4 sm:$0xff]  }
 0x458   : > { %9678 = vmatprep.subr.bf16.mxu0 %v14507_v51  ;;  %v18614_v59 = vadd.f32 %v9277_v7, %v9215_v26  ;;  %v9217_v32 = vadd.f32 %v9216_v44, %v18479_v35  ;;  %v14511_v35 = vld [vmem:[%s19530_s3 + $0x7c8] ss:$16 sps:$4 sm:$0xff]   ;;  %v14549_v13 = vld [vmem:[%s19530_s3 + $0x70c] ss:$16 sps:$4 sm:$0xff]  }
 0x459   : > { %9738 = vmatpush1.bf16.msra.mxu1 %v14502_v30  ;;  %v9218_v10 = vpop.f32.mrf.mxu0  ;;  %v9281_v28 = vpop.f32.mrf.mxu1  ;;  %v14541_v51 = vld [vmem:[%s19530_s3 + $0x728] ss:$16 sps:$4 sm:$0xff]   ;;  %v14552_v15 = vld [vmem:[%s19530_s3 + $0x92c] ss:$16 sps:$4 sm:$0xff]  }
 0x45a   : > { %9739 = vmatprep.subr.bf16.mxu1 %v14510_v46  ;;  %v18623_v43 = vadd.f32 %v9279_v62, %v9217_v32  ;;  %v9219_v29 = vadd.f32 %v9218_v10, %v18490_v49  ;;  %v14522_v49 = vld [vmem:[%s19530_s3 + $0x9cc] ss:$16 sps:$4 sm:$0xff]   ;;  %v14544_v30 = vld [vmem:[%s19530_s3 + $0x948] ss:$16 sps:$4 sm:$0xff]  }
 0x45b   : > { %9679 = vmatpush2.bf16.msra.mxu0 %v14505_v41  ;;  %v14547_v7 = vld [vmem:[%s19530_s3 + $0x708] ss:$16 sps:$4 sm:$0xff]   ;;  %v14555_v26 = vld [vmem:[%s19530_s3 + $0x90c] ss:$16 sps:$4 sm:$0xff]  }
 0x45c   : > { %9680 = vmatprep.subr.bf16.mxu0 %v14513_v31  ;;  %v18632_v52 = vadd.f32 %v9281_v28, %v9219_v29  ;;  %v14550_v46 = vld [vmem:[%s19530_s3 + $0x928] ss:$16 sps:$4 sm:$0xff]  }
 0x45d   : > { %9740 = vmatpush1.bf16.msra.mxu1 %v14508_v57  ;;  %v14553_v31 = vld [vmem:[%s19530_s3 + $0x908] ss:$16 sps:$4 sm:$0xff]  }
 0x45e   : > { %9741 = vmatprep.subr.bf16.mxu1 %v14516_v23 }
 0x45f   : > { %9681 = vmatpush2.bf16.msra.mxu0 %v14511_v35 }
 0x460   : > { %9682 = vmatprep.subr.bf16.mxu0 %v14519_v63 }
 0x461   : > { %9742 = vmatpush2.bf16.msra.mxu1 %v14514_v2 }
 0x462   : > { %9743 = vmatprep.subr.bf16.mxu1 %v14522_v49 }
 0x463   : > { %9683 = vmatpush2.bf16.msra.mxu0 %v14517_v61 }
 0x464   : > { %9684 = vmatprep.subr.bf16.mxu0 %v14525_v54 }
 0x465   : > { %9744 = vmatpush2.bf16.msra.mxu1 %v14520_v50 }
 0x466   : > { %9745 = vmatprep.subr.bf16.mxu1 %v14528_v33 }
 0x467   : > { %9685 = vmatpush2.bf16.msra.mxu0 %v14523_v40 }
 0x468   : > { %9686 = vmatprep.subr.bf16.mxu0 %v14531_v1 }
 0x469   : > { %9746 = vmatpush2.bf16.msra.mxu1 %v14526_v42 }
 0x46a   : > { %9747 = vmatprep.subr.bf16.mxu1 %v14534_v18 }
 0x46b   : > { %9687 = vmatpush2.bf16.msra.mxu0 %v14529_v17 }
 0x46c   : > { %9688 = vmatprep.subr.bf16.mxu0 %v14537_v37 }
 0x46d   : > { %9748 = vmatpush2.bf16.msra.mxu1 %v14532_v48 }
 0x46e   : > { %9749 = vmatprep.subr.bf16.mxu1 %v14540_v39 }
 0x46f   : > { %9689 = vmatpush2.bf16.msra.mxu0 %v14535_v14 }
 0x470   : > { %9690 = vmatprep.subr.bf16.mxu0 %v14543_v11 }
 0x471   : > { %9750 = vmatpush2.bf16.msra.mxu1 %v14538_v53 }
 0x472   : > { %9751 = vmatprep.subr.bf16.mxu1 %v14546_v8 }
 0x473   : > { %9691 = vmatpush2.bf16.msra.mxu0 %v14541_v51 }
 0x474   : > { %9692 = vmatprep.subr.bf16.mxu0 %v14549_v13 }
 0x475   : > { %9752 = vmatpush2.bf16.msra.mxu1 %v14544_v30 }
 0x476   : > { %9753 = vmatprep.subr.bf16.mxu1 %v14552_v15 }
 0x477   : > { %9693 = vmatpush2.bf16.msra.mxu0 %v14547_v7  ;;  %v9318_v41 = vpop.f32.mrf.mxu0 }
 0x478   : > { %v9319_v44 = vadd.f32 %v9318_v41, %v18507_v27 }
 0x479   : > { %9754 = vmatpush2.bf16.msra.mxu1 %v14550_v46  ;;  %v9320_v62 = vpop.f32.mrf.mxu0 }
 0x47a   : > { %9695 = vmatmul.mubr.bf16.vlgmr.msra.gmra.mxu0 %v17889_v4  ;;  %v9321_v32 = vadd.f32 %v9320_v62, %v18518_v55  ;;  %9755 = vmatprep.subr.bf16.mxu1 %v14555_v26 }
 0x47b   : > { %9704 = vmatprep.mubr.bf16.mxu0 %v17924_v3  ;;  %v9322_v57 = vpop.f32.mrf.mxu0 }
 0x47c   : > { %v9323_v10 = vadd.f32 %v9322_v57, %v18528_v16 }
 0x47d   : > { %9756 = vmatpush2.bf16.msra.mxu1 %v14553_v31  ;;  %v9324_v23 = vpop.f32.mrf.mxu0 }
 0x47e   : > { %v9325_v27 = vadd.f32 %v9324_v23, %v18536_v56 }
 0x47f   : > { %v9328_v29 = vpop.f32.mrf.mxu0 }
 0x480   : > { %v9381_v35 = vpop.f32.mrf.mxu1  ;;  %9758 = vmatmul.mubr.bf16.vlgmr.msra.gmra.mxu1 %v17993_v36  ;;  %v9329_v28 = vadd.f32 %v9328_v29, %v18551_v38 }
 0x481   : > { %v9382_v63 = vadd.f32 %v9381_v35, %v9319_v44  ;;  %9767 = vmatprep.mubr.bf16.mxu1 %v18014_v34  ;;  %v9330_v4 = vpop.f32.mrf.mxu0  ;;  %v14556_v35 = vld [vmem:[#allocation4 + $0x70] ss:$8 sps:$4 sm:$0xff]  }
 0x482   : > { %v9383_v55 = vpop.f32.mrf.mxu1  ;;  %9705 = vmatmul.mubr.bf16.gmra.mxu0 %v17927_v22  ;;  %v9331_v3 = vadd.f32 %v9330_v4, %v18562_v20 }
 0x483   : > { %v9384_v16 = vadd.f32 %v9383_v55, %v9321_v32  ;;  %9714 = vmatprep.mubr.bf16.mxu0 %v17985_v9  ;;  %v9332_v2 = vpop.f32.mrf.mxu0 }
 0x484   : > { %v9385_v56 = vpop.f32.mrf.mxu1  ;;  %v9333_v49 = vadd.f32 %v9332_v2, %v18571_v12  ;;  %v14561_v2 = vld [vmem:[#allocation4 + $0x64] ss:$8 sps:$4 sm:$0xff]  }
 0x485   : > { %v9386_v61 = vadd.f32 %v9385_v56, %v9323_v10  ;;  %v9334_v36 = vpop.f32.mrf.mxu0  ;;  %v14559_v56 = vld [vmem:[#allocation4 + $0x60] ss:$8 sps:$4 sm:$0xff]  }
 0x486   : > { %v9387_v54 = vpop.f32.mrf.mxu1  ;;  %v9335_v38 = vadd.f32 %v9334_v36, %v18579_v58 }
 0x487   : > { %v9388_v50 = vadd.f32 %v9387_v54, %v9325_v27  ;;  %v9338_v34 = vpop.f32.mrf.mxu0 }
 0x488   : > { %v9391_v33 = vpop.f32.mrf.mxu1  ;;  %9768 = vmatmul.mubr.bf16.gmra.mxu1 %v18016_v45  ;;  %v9339_v22 = vadd.f32 %v9338_v34, %v18605_v0 }
 0x489   : > { %v9392_v20 = vadd.f32 %v9391_v33, %v9329_v28  ;;  %9777 = vmatprep.mubr.bf16.mxu1 %v18038_v6  ;;  %v9340_v9 = vpop.f32.mrf.mxu0  ;;  %v14558_v28 = vld [vmem:[#allocation4 + $0x74] ss:$8 sps:$4 sm:$0xff]  }
 0x48a   : > { %v9393_v40 = vpop.f32.mrf.mxu1  ;;  %9715 = vmatmul.mubr.bf16.gmra.mxu0 %v17988_v25  ;;  %v9341_v12 = vadd.f32 %v9340_v9, %v18614_v59  ;;  %12083 = vmatprep.subr.bf16.mxu0 %v14558_v28 }
 0x48b   : > { %v18731_v1 = vadd.f32 %v9393_v40, %v9331_v3  ;;  %v9342_v42 = vpop.f32.mrf.mxu0  ;;  %12084 = vmatpush1.bf16.msra.mxu0 %v14556_v35 }
 0x48c   : > { %v9395_v58 = vpop.f32.mrf.mxu1  ;;  %v9343_v18 = vadd.f32 %v9342_v42, %v18623_v43  ;;  %12085 = vmatprep.subr.bf16.mxu0 %v14561_v2  ;;  %v19807_v2 = vld [vmem:[#allocation8_spill] sm:$0xff] }
 0x48d   : > { %v18734_v17 = vadd.f32 %v9395_v58, %v9333_v49  ;;  %v9344_v45 = vpop.f32.mrf.mxu0 }
 0x48e   : > { %v9397_v37 = vpop.f32.mrf.mxu1  ;;  %v9345_v0 = vadd.f32 %v9344_v45, %v18632_v52 }
 0x48f   : > { %v18737_v48 = vadd.f32 %v9397_v37, %v9335_v38  ;;  %12086 = vmatpush1.bf16.msra.mxu0 %v14559_v56  ;;  %v14564_v38 = vld [vmem:[#allocation4 + $0x174] ss:$8 sps:$4 sm:$0xff]   ;;  %v19808_v56 = vsub.s32 2, %v19807_v2 }
 0x490   : > { %v9401_v6 = vpop.f32.mrf.mxu1  ;;  %9778 = vmatmul.mubr.bf16.gmra.mxu1 %v18040_v5  ;;  %12126 = vmatprep.subr.bf16.mxu1 %v14564_v38 }
 0x491   : > { %v18740_v25 = vadd.f32 %v9401_v6, %v9339_v22  ;;  %v14567_v22 = vld [vmem:[#allocation4 + $0x54] ss:$8 sps:$4 sm:$0xff]   ;;  %v14570_v6 = vld [vmem:[#allocation4 + $0x164] ss:$8 sps:$4 sm:$0xff]   ;;  %v7249_v38 = vrot.slane %v18465_v47, %v19808_v56 }
 0x492   : > { %v9403_v59 = vpop.f32.mrf.mxu1  ;;  %12087 = vmatprep.subr.bf16.mxu0 %v14567_v22  ;;  %v19809_v22 = vsub.s32 3, %v19807_v2 }
 0x493   : > { %v18742_v39 = vadd.f32 %v9403_v59, %v9341_v12 }
 0x494   : > { %v9405_v14 = vpop.f32.mrf.mxu1 }
 0x495   : > { %v18744_v11 = vadd.f32 %v9405_v14, %v9343_v18  ;;  %v14568_v14 = vld [vmem:[#allocation4 + $0x160] ss:$8 sps:$4 sm:$0xff]  }
 0x496   : > { %v9407_v43 = vpop.f32.mrf.mxu1 }
 0x497   : > { %v18746_v53 = vadd.f32 %v9407_v43, %v9345_v0 }
 0x4b9   : > { %v9444_v8 = vpop.f32.mrf.mxu0 }
 0x4ba   : > { %v18748_v51 = vadd.f32 %v9444_v8, %v9382_v63 }
 0x4bb   : > { %v9446_v52 = vpop.f32.mrf.mxu0 }
 0x4bc   : > { %v18750_v13 = vadd.f32 %v9446_v52, %v9384_v16 }
 0x4bd   : > { %v9448_v30 = vpop.f32.mrf.mxu0 }
 0x4be   : > { %v18752_v15 = vadd.f32 %v9448_v30, %v9386_v61 }
 0x4bf   : > { %v9450_v5 = vpop.f32.mrf.mxu0 }
 0x4c0   : > { %v18754_v7 = vadd.f32 %v9450_v5, %v9388_v50  ;;  %v18758_v41 = vpop.f32.mrf.mxu1  ;;  %v14562_v50 = vld [vmem:[#allocation4 + $0x170] ss:$8 sps:$4 sm:$0xff]  }
 0x4c1   : > { %12127 = vmatpush1.bf16.msra.mxu1 %v14562_v50  ;;  %v9508_v21 = vadd.f32 %v18758_v41, %v7249_v38 }
 0x4c2   : > { %v9454_v46 = vpop.f32.mrf.mxu0  ;;  %v18760_v44 = vpop.f32.mrf.mxu1  ;;  %12128 = vmatprep.subr.bf16.mxu1 %v14570_v6 }
 0x4c3   : > { %v18756_v26 = vadd.f32 %v9454_v46, %v9392_v20  ;;  %v14565_v20 = vld [vmem:[#allocation4 + $0x50] ss:$8 sps:$4 sm:$0xff]  }
 0x4c4   : > { %v18762_v62 = vpop.f32.mrf.mxu1  ;;  %v9456_v32 = vpop.f32.mrf.mxu0  ;;  %12088 = vmatpush1.bf16.msra.mxu0 %v14565_v20  ;;  %v7253_v20 = vrot.slane %v18465_v47, %v19809_v22 }
 0x4c5   : > { %12129 = vmatpush1.bf16.msra.mxu1 %v14568_v14  ;;  %v18829_v6 = vadd.f32 %v9456_v32, %v18731_v1  ;;  %v9512_v60 = vadd.f32 %v18762_v62, %v7249_v38  ;;  %v14571_v32 = vld [vmem:[#allocation4 + $0x40] ss:$8 sps:$4 sm:$0xff]  }
 0x4c6   : > { %v18764_v31 = vpop.f32.mrf.mxu1  ;;  %v9458_v10 = vpop.f32.mrf.mxu0  ;;  %v9510_v41 = vadd.f32 %v18760_v44, %v7253_v20 }
 0x4c7   : > { %v18835_v24 = vadd.f32 %v9458_v10, %v18734_v17  ;;  %v9514_v22 = vadd.f32 %v18764_v31, %v7253_v20 }
 0x4c8   : > { %v18766_v57 = vpop.f32.mrf.mxu1  ;;  %v9460_v27 = vpop.f32.mrf.mxu0 }
 0x4c9   : > { %v18841_v2 = vadd.f32 %v9460_v27, %v18737_v48  ;;  %v9518_v62 = vadd.f32 %v18766_v57, %v7249_v38 }
 0x4ca   : > { %v18768_v23 = vpop.f32.mrf.mxu1  ;;  %v18772_v63 = vpop.f32.mrf.mxu0 }
 0x4cb   : > { %v18852_v19 = vadd.f32 %v18772_v63, %v18740_v25  ;;  %v9520_v31 = vadd.f32 %v18768_v23, %v7253_v20 }
 0x4cc   : > { %v18770_v29 = vpop.f32.mrf.mxu1  ;;  %v18776_v55 = vpop.f32.mrf.mxu0 }
 0x4cd   : > { %v18856_v48 = vadd.f32 %v18776_v55, %v18742_v39  ;;  %v9804_v57 = vmax.f32 %v18852_v19, 0.0 }
 0x4ce   : > { %v18774_v4 = vpop.f32.mrf.mxu1  ;;  %v18780_v16 = vpop.f32.mrf.mxu0 }
 0x4cf   : > { %v18864_v25 = vadd.f32 %v18780_v16, %v18744_v11  ;;  %v9522_v11 = vadd.f32 %v18770_v29, %v7249_v38  ;;  %v9524_v16 = vadd.f32 %v18774_v4, %v7253_v20 }
 0x4d0   : > { %v18778_v3 = vpop.f32.mrf.mxu1  ;;  %v18784_v61 = vpop.f32.mrf.mxu0 }
 0x4d1   : > { %v18868_v39 = vadd.f32 %v18784_v61, %v18746_v53 }
 0x4d2   : > { %v18782_v49 = vpop.f32.mrf.mxu1 }
 0x4d4   : > { %v18786_v36 = vpop.f32.mrf.mxu1 }
 0x4d6   : > { %v18788_v34 = vpop.f32.mrf.mxu1 }
 0x4fa   : > { %v9570_v54 = vpop.f32.mrf.mxu0 }
 0x4fb   : > { %v9571_v17 = vadd.f32 %v9570_v54, %v9508_v21  ;;  %v14573_v21 = vld [vmem:[#allocation4 + $0x44] ss:$8 sps:$4 sm:$0xff]  }
 0x4fc   : > { %v9572_v33 = vpop.f32.mrf.mxu0  ;;  %12089 = vmatprep.subr.bf16.mxu0 %v14573_v21 }
 0x4fd   : > { %v9573_v56 = vadd.f32 %v9572_v33, %v9510_v41  ;;  %12090 = vmatpush1.bf16.msra.mxu0 %v14571_v32 }
 0x4fe   : > { %v9574_v40 = vpop.f32.mrf.mxu0 }
 0x4ff   : > { %v9575_v33 = vadd.f32 %v9574_v40, %v9512_v60  ;;  %v9808_v40 = vmax.f32 %v18864_v25, 0.0 }
 0x500   : > { %v9633_v9 = vpop.f32.mrf.mxu1  ;;  %v18790_v42 = vpop.f32.mrf.mxu0 }
 0x501   : > { %v9634_v44 = vadd.f32 %v9633_v9, %v9571_v17  ;;  %v9577_v54 = vadd.f32 %v18790_v42, %v9514_v22  ;;  %v14576_v42 = vld [vmem:[#allocation4 + $0x154] ss:$8 sps:$4 sm:$0xff]   ;;  %v9534_v22 = vadd.f32 %v18788_v34, %v7253_v20 }
 0x502   : > { %v9635_v12 = vpop.f32.mrf.mxu1  ;;  %v18794_v18 = vpop.f32.mrf.mxu0  ;;  %12130 = vmatprep.subr.bf16.mxu1 %v14576_v42  ;;  %v19813_v42 = vmax.f32 %v18754_v7, 0.0 }
 0x503   : > { %v9636_v9 = vadd.f32 %v9635_v12, %v9573_v56  ;;  %v9528_v56 = vadd.f32 %v18778_v3, %v7249_v38  ;;  %v14574_v3 = vld [vmem:[#allocation4 + $0x150] ss:$8 sps:$4 sm:$0xff]  }
 0x504   : > { %v18792_v58 = vpop.f32.mrf.mxu1  ;;  %v18798_v37 = vpop.f32.mrf.mxu0  ;;  %12131 = vmatpush1.bf16.msra.mxu1 %v14574_v3 }
 0x505   : > { %v9638_v10 = vadd.f32 %v18792_v58, %v9575_v33  ;;  %v9532_v58 = vadd.f32 %v18786_v36, %v7249_v38  ;;  %v9583_v33 = vadd.f32 %v18798_v37, %v9520_v31  ;;  %v14577_v37 = vld [vmem:[#allocation4 + $0x30] ss:$8 sps:$4 sm:$0xff]  }
 0x506   : > { %v18796_v45 = vpop.f32.mrf.mxu1  ;;  %v18802_v59 = vpop.f32.mrf.mxu0 }
 0x507   : > { %v9640_v4 = vadd.f32 %v18796_v45, %v9577_v54 }
 0x508   : > { %v18800_v0 = vpop.f32.mrf.mxu1  ;;  %v18806_v8 = vpop.f32.mrf.mxu0 }
 0x509   : > { %v9587_v54 = vadd.f32 %v18806_v8, %v9524_v16  ;;  %v14582_v8 = vld [vmem:[#allocation4 + $0x144] ss:$8 sps:$4 sm:$0xff]  }
 0x50a   : > { %v18804_v43 = vpop.f32.mrf.mxu1  ;;  %v18810_v30 = vpop.f32.mrf.mxu0  ;;  %12132 = vmatprep.subr.bf16.mxu1 %v14582_v8 }
 0x50b   : > { %v9591_v34 = vadd.f32 %v18810_v30, %v9528_v56  ;;  %v14585_v56 = vld [vmem:[#allocation4 + $0x24] ss:$8 sps:$4 sm:$0xff]  }
 0x50c   : > { %v18808_v52 = vpop.f32.mrf.mxu1  ;;  %v18814_v46 = vpop.f32.mrf.mxu0 }
 0x50e   : > { %v18812_v5 = vpop.f32.mrf.mxu1  ;;  %v18818_v28 = vpop.f32.mrf.mxu0 }
 0x50f   : > { %v9595_v30 = vadd.f32 %v18818_v28, %v9532_v58 }
 0x510   : > { %v18816_v35 = vpop.f32.mrf.mxu1  ;;  %v18831_v14 = vpop.f32.mrf.mxu0 }
 0x512   : > { %v18823_v50 = vpop.f32.mrf.mxu1 }
 0x514   : > { %v18843_v47 = vpop.f32.mrf.mxu1 }
 0x516   : > { %v18870_v63 = vpop.f32.mrf.mxu1 }
 0x53a   : > { %v9696_v1 = vpop.f32.mrf.mxu0 }
 0x53b   : > { %v9697_v41 = vadd.f32 %v9696_v1, %v9634_v44  ;;  %v9530_v1 = vadd.f32 %v18782_v49, %v7253_v20  ;;  %v9585_v49 = vadd.f32 %v18802_v59, %v9522_v11  ;;  %v19810_v59 = vmax.f32 %v18748_v51, 0.0 }
 0x53c   : > { %v9698_v27 = vpop.f32.mrf.mxu0 }
 0x53d   : > { %v9699_v23 = vadd.f32 %v9698_v27, %v9636_v9  ;;  %v9581_v27 = vadd.f32 %v18794_v18, %v9518_v62  ;;  %v9646_v18 = vadd.f32 %v18804_v43, %v9583_v33  ;;  %v9593_v20 = vadd.f32 %v18814_v46, %v9530_v1 }
 0x53e   : > { %v9700_v55 = vpop.f32.mrf.mxu0  ;;  %v18901_v46 = vadd.f32 %v18812_v5, %v9587_v54  ;;  %v9597_v1 = vadd.f32 %v18831_v14, %v9534_v22  ;;  %v18913_v5 = vadd.f32 %v18843_v47, %v9595_v30  ;;  %v14586_v47 = vld [vmem:[#allocation4 + $0x130] ss:$8 sps:$4 sm:$0xff]   ;;  %v14597_v30 = vld [vmem:[#allocation4 + $0x4] ss:$8 sps:$4 sm:$0xff]  }
 0x53f   : > { %v9701_v21 = vadd.f32 %v9700_v55, %v9638_v10  ;;  %v14579_v10 = vld [vmem:[#allocation4 + $0x34] ss:$8 sps:$4 sm:$0xff]   ;;  %v9644_v36 = vadd.f32 %v18800_v0, %v9581_v27  ;;  %v19811_v55 = vmax.f32 %v18750_v13, 0.0  ;;  %v9648_v0 = vadd.f32 %v18808_v52, %v9585_v49 }
 0x540   : > { %v9702_v53 = vpop.f32.mrf.mxu0  ;;  %v9759_v61 = vpop.f32.mrf.mxu1  ;;  %12091 = vmatprep.subr.bf16.mxu0 %v14579_v10  ;;  %v18905_v52 = vadd.f32 %v18816_v35, %v9591_v34  ;;  %v18908_v28 = vadd.f32 %v18823_v50, %v9593_v20  ;;  %v14588_v35 = vld [vmem:[#allocation4 + $0x134] ss:$8 sps:$4 sm:$0xff]   ;;  %v18920_v50 = vadd.f32 %v18870_v63, %v9597_v1  ;;  %v19814_v27 = vmax.f32 %v18752_v15, 0.0  ;;  %v14589_v15 = vld [vmem:[#allocation4 + $0x10] ss:$8 sps:$4 sm:$0xff]  }
 0x541   : > { %v9760_v60 = vadd.f32 %v9759_v61, %v9697_v41  ;;  %v9703_v41 = vadd.f32 %v9702_v53, %v9640_v4  ;;  %12092 = vmatpush1.bf16.msra.mxu0 %v14577_v37  ;;  %v14580_v53 = vld [vmem:[#allocation4 + $0x140] ss:$8 sps:$4 sm:$0xff]   ;;  %v19812_v4 = vld [vmem:[#allocation39_spill] sm:$0xff] }
 0x542   : > { %v9706_v29 = vpop.f32.mrf.mxu0  ;;  %v9761_v44 = vpop.f32.mrf.mxu1  ;;  %12133 = vmatpush1.bf16.msra.mxu1 %v14580_v53  ;;  %12093 = vmatprep.subr.bf16.mxu0 %v14585_v56  ;;  %v14600_v1 = vld [vmem:[#allocation4 + $0x114] ss:$8 sps:$4 sm:$0xff]  }
 0x543   : > { %v9790_v32 = vmax.f32 %v9760_v60, 0.0  ;;  %v9762_v17 = vadd.f32 %v9761_v44, %v9699_v23  ;;  %v9707_v11 = vadd.f32 %v9706_v29, %v9644_v36  ;;  %v14583_v44 = vld [vmem:[#allocation4 + $0x20] ss:$8 sps:$4 sm:$0xff]   ;;  %12134 = vmatprep.subr.bf16.mxu1 %v14588_v35 }
 0x544   : > { %v9763_v9 = vpop.f32.mrf.mxu1  ;;  %v9708_v12 = vpop.f32.mrf.mxu0 }
 0x545   : > { %v9791_v61 = vmax.f32 %v9762_v17, 0.0  ;;  %v9764_v45 = vadd.f32 %v9763_v9, %v9701_v21  ;;  %v9812_v62 = vmax.f32 %v19810_v59, %v9790_v32  ;;  %v9709_v22 = vadd.f32 %v9708_v12, %v9646_v18  ;;  %12094 = vmatpush1.bf16.msra.mxu0 %v14583_v44 }
 0x546   : > { %v9765_v38 = vpop.f32.mrf.mxu1  ;;  %v9710_v60 = vpop.f32.mrf.mxu0  ;;  %12135 = vmatpush1.bf16.msra.mxu1 %v14586_v47 }
 0x547   : > { %v9813_v31 = vmax.f32 %v19811_v55, %v9791_v61  ;;  %v9766_v17 = vadd.f32 %v9765_v38, %v9703_v41  ;;  %v9794_v43 = vmax.f32 %v9764_v45, 0.0  ;;  %v18924_v9 = vadd.f32 %v9710_v60, %v9648_v0  ;;  %v14591_v61 = vld [vmem:[#allocation4 + $0x14] ss:$8 sps:$4 sm:$0xff]   ;;  %v14594_v38 = vld [vmem:[#allocation4 + $0x124] ss:$8 sps:$4 sm:$0xff]  }
 0x548   : > { %v9769_v16 = vpop.f32.mrf.mxu1  ;;  %12095 = vmatprep.subr.bf16.mxu0 %v14591_v61  ;;  %v14592_v55 = vld [vmem:[#allocation4 + $0x120] ss:$8 sps:$4 sm:$0xff]   ;;  %12136 = vmatprep.subr.bf16.mxu1 %v14594_v38 }
 0x549   : > { %v9836_v51 = vcombine.low %v9812_v62, %v9813_v31  ;;  %v9837_v23 = vcombine.high %v9812_v62, %v9813_v31  ;;  %v9795_v13 = vmax.f32 %v9766_v17, 0.0  ;;  %v18910_v29 = vadd.f32 %v9769_v16, %v9707_v11  ;;  %12096 = vmatpush1.bf16.msra.mxu0 %v14589_v15 }
 0x54a   : > { %v9771_v58 = vpop.f32.mrf.mxu1  ;;  %v9814_v33 = vmax.f32 %v19814_v27, %v9794_v43  ;;  %12137 = vmatpush1.bf16.msra.mxu1 %v14592_v55  ;;  %12097 = vmatprep.subr.bf16.mxu0 %v14597_v30 }
 0x54b   : > { %v9844_v21 = vrot.slane %v9836_v51, %v19812_v4  ;;  %v9851_v32 = vrot.slane %v9837_v23, %v19812_v4  ;;  %v9815_v14 = vmax.f32 %v19813_v42, %v9795_v13  ;;  %v9798_v63 = vmax.f32 %v18910_v29, 0.0  ;;  %v14595_v51 = vld [vmem:[#allocation4] ss:$8 sps:$4 sm:$0xff]   ;;  %12138 = vmatprep.subr.bf16.mxu1 %v14600_v1  ;;  %v14654_v29 = vld [vmem:[#allocation4 + $0x184] ss:$8 sps:$4 sm:$0xff]  }
 0x54c   : > { %v18929_v12 = vadd.f32 %v9771_v58, %v9709_v22 }
 0x54d   : > { %v9852_v3 = vcombine.high %v9844_v21, %v9844_v21  ;;  %v9853_v49 = vcombine.high %v9851_v32, %v9851_v32  ;;  %v9950_v41 = vrot.slane %v9844_v21, %v19812_v4  ;;  %v9966_v7 = vrot.slane %v9851_v32, %v19812_v4  ;;  %12098 = vmatpush1.bf16.msra.mxu0 %v14595_v51 }
 0x54e   : > { %v9854_v45 = vcombine.low %v9814_v33, %v9815_v14  ;;  %v9855_v10 = vcombine.high %v9814_v33, %v9815_v14  ;;  %v14598_v14 = vld [vmem:[#allocation4 + $0x110] ss:$8 sps:$4 sm:$0xff]   ;;  %v14603_v33 = vld [vmem:[#allocation4 + $0xf4] ss:$8 sps:$4 sm:$0xff]  }
 0x54f   : > { %v9951_v54 = vcombine.high %v9950_v41, %v9950_v41  ;;  %v9958_v36 = vrot.slane %v9852_v3, %v19812_v4  ;;  %v9967_v34 = vcombine.high %v9966_v7, %v9966_v7  ;;  %v9974_v18 = vrot.slane %v9853_v49, %v19812_v4  ;;  %12139 = vmatpush1.bf16.msra.mxu1 %v14598_v14 }
 0x550   : > { %v10184_v37 = vsel %vm5125_vm4, %v9950_v41, -inf  ;;  %v10212_v20 = vsel %vm5125_vm4, %v9966_v7, -inf  ;;  %v18936_v59 = vrot.slane %v9854_v45, %v19812_v4  ;;  %v18939_v62 = vrot.slane %v9855_v10, %v19812_v4  ;;  %v14601_v7 = vld [vmem:[#allocation4 + $0xf0] ss:$8 sps:$4 sm:$0xff]   ;;  %12099 = vmatprep.subr.bf16.mxu0 %v14603_v33 }
 0x551   : > { %v9959_v31 = vcombine.high %v9958_v36, %v9958_v36  ;;  %v9975_v17 = vcombine.high %v9974_v18, %v9974_v18  ;;  %v10185_v8 = vrot.slane %v10184_v37, 4  ;;  %v10191_v0 = vsel %vm5125_vm4, %v9951_v54, -inf  ;;  %v14606_v54 = vld [vmem:[#allocation4 + $0x104] ss:$8 sps:$4 sm:$0xff]   ;;  %12100 = vmatpush2.bf16.msra.mxu0 %v14601_v7 }
 0x552   : > { %v10192_v11 = vrot.slane %v10191_v0, 4  ;;  %v10198_v43 = vsel %vm5125_vm4, %v9958_v36, -inf  ;;  %v10213_v16 = vrot.slane %v10212_v20, 4  ;;  %v10219_v53 = vsel %vm5125_vm4, %v9967_v34, -inf  ;;  %12140 = vmatprep.subr.bf16.mxu1 %v14606_v54 }
 0x553   : > { %v10186_v23 = vmax.f32 %v10184_v37, %v10185_v8  ;;  %v10199_v60 = vrot.slane %v10198_v43, 4  ;;  %v10205_v13 = vsel %vm5125_vm4, %v9959_v31, -inf  ;;  %v10220_v56 = vrot.slane %v10219_v53, 4  ;;  %v14604_v37 = vld [vmem:[#allocation4 + $0x100] ss:$8 sps:$4 sm:$0xff]  }
 0x554   : > { %v10193_v44 = vmax.f32 %v10191_v0, %v10192_v11  ;;  %v10206_v21 = vrot.slane %v10205_v13, 4  ;;  %v10214_v32 = vmax.f32 %v10212_v20, %v10213_v16  ;;  %v10226_v42 = vsel %vm5125_vm4, %v9974_v18, -inf  ;;  %12141 = vmatpush1.bf16.msra.mxu1 %v14604_v37  ;;  %v14607_v16 = vld [vmem:[#allocation4 + $0xe0] ss:$8 sps:$4 sm:$0xff]  }
 0x555   : > { %v10187_v58 = vrot.slane %v10186_v23, 2  ;;  %v10200_v35 = vmax.f32 %v10198_v43, %v10199_v60  ;;  %v10221_v22 = vmax.f32 %v10219_v53, %v10220_v56  ;;  %v10227_v27 = vrot.slane %v10226_v42, 4 }
 0x556   : > { %v10194_v47 = vrot.slane %v10193_v44, 2  ;;  %v10207_v3 = vmax.f32 %v10205_v13, %v10206_v21  ;;  %v10215_v49 = vrot.slane %v10214_v32, 2  ;;  %v10233_v41 = vsel %vm5125_vm4, %v9975_v17, -inf  ;;  %v14609_v17 = vld [vmem:[#allocation4 + $0xe4] ss:$8 sps:$4 sm:$0xff]  }
 0x557   : > { %v10188_v61 = vmax.f32 %v10186_v23, %v10187_v58  ;;  %v10201_v45 = vrot.slane %v10200_v35, 2  ;;  %v10222_v10 = vrot.slane %v10221_v22, 2  ;;  %v10228_v15 = vmax.f32 %v10226_v42, %v10227_v27  ;;  %12101 = vmatprep.subr.bf16.mxu0 %v14609_v17  ;;  %v14612_v13 = vld [vmem:[#allocation4 + $0x1f4] ss:$8 sps:$4 sm:$0xff]  }
 0x558   : > { %v10195_v36 = vmax.f32 %v10193_v44, %v10194_v47  ;;  %v10208_v34 = vrot.slane %v10207_v3, 2  ;;  %v10216_v18 = vmax.f32 %v10214_v32, %v10215_v49  ;;  %v10234_v38 = vrot.slane %v10233_v41, 4  ;;  %12102 = vmatpush2.bf16.msra.mxu0 %v14607_v16  ;;  %v14610_v32 = vld [vmem:[#allocation4 + $0x1f0] ss:$8 sps:$4 sm:$0xff]   ;;  %12142 = vmatprep.subr.bf16.mxu1 %v14612_v13 }
 0x559   : > { %v10189_v20 = vrot.slane %v10188_v61, 1  ;;  %v10202_v55 = vmax.f32 %v10200_v35, %v10201_v45  ;;  %v10223_v31 = vmax.f32 %v10221_v22, %v10222_v10  ;;  %v10229_v8 = vrot.slane %v10228_v15, 2  ;;  %v14615_v22 = vld [vmem:[#allocation4 + $0xd4] ss:$8 sps:$4 sm:$0xff]   ;;  %12143 = vmatpush2.bf16.msra.mxu1 %v14610_v32  ;;  %v14613_v49 = vld [vmem:[#allocation4 + $0xd0] ss:$8 sps:$4 sm:$0xff]  }
 0x55a   : > { %v10196_v0 = vrot.slane %v10195_v36, 1  ;;  %v10209_v30 = vmax.f32 %v10207_v3, %v10208_v34  ;;  %v10217_v11 = vrot.slane %v10216_v18, 1  ;;  %v10235_v43 = vmax.f32 %v10233_v41, %v10234_v38  ;;  %12103 = vmatprep.subr.bf16.mxu0 %v14615_v22  ;;  %v14618_v10 = vld [vmem:[#allocation4 + $0x1e4] ss:$8 sps:$4 sm:$0xff]  }
 0x55b   : > { %v10190_v53 = vmax.f32 %v10188_v61, %v10189_v20  ;;  %v10203_v51 = vrot.slane %v10202_v55, 1  ;;  %v10224_v23 = vrot.slane %v10223_v31, 1  ;;  %v10230_v60 = vmax.f32 %v10228_v15, %v10229_v8  ;;  %12144 = vmatprep.subr.bf16.mxu1 %v14618_v10 }
 0x55c   : > { %v10197_v56 = vmax.f32 %v10195_v36, %v10196_v0  ;;  %v10210_v1 = vrot.slane %v10209_v30, 1  ;;  %v10218_v44 = vmax.f32 %v10216_v18, %v10217_v11  ;;  %v10236_v21 = vrot.slane %v10235_v43, 2  ;;  %12104 = vmatpush2.bf16.msra.mxu0 %v14613_v49  ;;  %v14616_v18 = vld [vmem:[#allocation4 + $0x1e0] ss:$8 sps:$4 sm:$0xff]  }
 0x55d   : > { %v10204_v42 = vmax.f32 %v10202_v55, %v10203_v51  ;;  %v10225_v14 = vmax.f32 %v10223_v31, %v10224_v23  ;;  %v10231_v58 = vrot.slane %v10230_v60, 1  ;;  %v10520_v35 = vpack.c.bf16 %v10190_v53, %v10190_v53  ;;  %v14621_v31 = vld [vmem:[#allocation4 + $0xc4] ss:$8 sps:$4 sm:$0xff]   ;;  %12145 = vmatpush2.bf16.msra.mxu1 %v14616_v18  ;;  %v14619_v11 = vld [vmem:[#allocation4 + $0xc0] ss:$8 sps:$4 sm:$0xff]  }
 0x55e   : > { %v10211_v27 = vmax.f32 %v10209_v30, %v10210_v1  ;;  %v10237_v33 = vmax.f32 %v10235_v43, %v10236_v21  ;;  %v10521_v47 = vpack.c.bf16 %v10197_v56, %v10197_v56  ;;  %v10524_v3 = vpack.c.bf16 %v10218_v44, %v10218_v44  ;;  %12105 = vmatprep.subr.bf16.mxu0 %v14621_v31  ;;  %v14624_v23 = vld [vmem:[#allocation4 + $0x1d4] ss:$8 sps:$4 sm:$0xff]   ;;  %v14625_v44 = vld [vmem:[#allocation4 + $0xb0] ss:$8 sps:$4 sm:$0xff]  }
 0x55f   : > { %v10232_v41 = vmax.f32 %v10230_v60, %v10231_v58  ;;  %v10522_v7 = vpack.c.bf16 %v10204_v42, %v10204_v42  ;;  %v10525_v61 = vpack.c.bf16 %v10225_v14, %v10225_v14  ;;  %v10616_v45 = vunpack.c.l.b16 %v10520_v35  ;;  %v14627_v21 = vld [vmem:[#allocation4 + $0xb4] ss:$8 sps:$4 sm:$0xff]   ;;  %12146 = vmatprep.subr.bf16.mxu1 %v14624_v23  ;;  %v14642_v23 = vld [vmem:[#allocation4 + $0x1a4] ss:$8 sps:$4 sm:$0xff]  }
 0x560   : > { %v10238_v15 = vrot.slane %v10237_v33, 1  ;;  %v10523_v54 = vpack.c.bf16 %v10211_v27, %v10211_v27  ;;  %v10617_v36 = vunpack.c.l.b16 %v10521_v47  ;;  %v10620_v34 = vunpack.c.l.b16 %v10524_v3  ;;  %12106 = vmatpush2.bf16.msra.mxu0 %v14619_v11  ;;  %v14628_v47 = vld [vmem:[#allocation4 + $0x1c0] ss:$8 sps:$4 sm:$0xff]   ;;  %v14633_v3 = vld [vmem:[#allocation4 + $0xa4] ss:$8 sps:$4 sm:$0xff]  }
 0x561   : > { %v10526_v38 = vpack.c.bf16 %v10232_v41, %v10232_v41  ;;  %v10618_v37 = vunpack.c.l.b16 %v10522_v7  ;;  %v10621_v20 = vunpack.c.l.b16 %v10525_v61  ;;  %v9870_v55 = vcombine.high %v18936_v59, %v18936_v59  ;;  %12107 = vmatprep.subr.bf16.mxu0 %v14627_v21 }
 0x562   : > { %v10239_v8 = vmax.f32 %v10237_v33, %v10238_v15  ;;  %v10619_v17 = vunpack.c.l.b16 %v10523_v54  ;;  %v9871_v0 = vcombine.high %v18939_v62, %v18939_v62  ;;  %v9982_v30 = vrot.slane %v18936_v59, %v19812_v4  ;;  %v14622_v59 = vld [vmem:[#allocation4 + $0x1d0] ss:$8 sps:$4 sm:$0xff]  }
 0x563   : > { %v10622_v43 = vunpack.c.l.b16 %v10526_v38  ;;  %v10664_v16 = vsel %vm6326_vm5, %v10618_v37, %v10616_v45  ;;  %v9990_v53 = vrot.slane %v9870_v55, %v19812_v4  ;;  %v9998_v51 = vrot.slane %v18939_v62, %v19812_v4  ;;  %v14630_v62 = vld [vmem:[#allocation4 + $0x1c4] ss:$8 sps:$4 sm:$0xff]   ;;  %12147 = vmatpush2.bf16.msra.mxu1 %v14622_v59  ;;  %v14636_v45 = vld [vmem:[#allocation4 + $0x1b4] ss:$8 sps:$4 sm:$0xff]  }
 0x564   : > { %v10527_v60 = vpack.c.bf16 %v10239_v8, %v10239_v8  ;;  %v10665_v13 = vsel %vm6328_vm6, %v10620_v34, %v10664_v16  ;;  %v10669_v56 = vsel %vm6326_vm5, %v10619_v17, %v10617_v36  ;;  %v9983_v1 = vcombine.high %v9982_v30, %v9982_v30  ;;  %12148 = vmatprep.subr.bf16.mxu1 %v14630_v62  ;;  %v14631_v34 = vld [vmem:[#allocation4 + $0xa0] ss:$8 sps:$4 sm:$0xff]   ;;  %v14639_v55 = vld [vmem:[#allocation4 + $0x94] ss:$8 sps:$4 sm:$0xff]  }
 0x565   : > { %v18960_v32 = vsel %vm6330_vm7, %v10622_v43, %v10665_v13  ;;  %v10670_v42 = vsel %vm6328_vm6, %v10621_v20, %v10669_v56  ;;  %v9991_v14 = vcombine.high %v9990_v53, %v9990_v53  ;;  %v9999_v58 = vcombine.high %v9998_v51, %v9998_v51  ;;  %12108 = vmatpush2.bf16.msra.mxu0 %v14625_v44 }
 0x566   : > { %v10623_v35 = vunpack.c.l.b16 %v10527_v60  ;;  %v10006_v22 = vrot.slane %v9871_v0, %v19812_v4  ;;  %v10240_v27 = vsel %vm5125_vm4, %v9982_v30, -inf  ;;  %v10247_v33 = vsel %vm5125_vm4, %v9983_v1, -inf  ;;  %12109 = vmatprep.subr.bf16.mxu0 %v14633_v3  ;;  %v14634_v30 = vld [vmem:[#allocation4 + $0x1b0] ss:$8 sps:$4 sm:$0xff]  }
 0x567   : > { %v10241_v49 = vrot.slane %v10240_v27, 4  ;;  %v10248_v41 = vrot.slane %v10247_v33, 4  ;;  %v10254_v7 = vsel %vm5125_vm4, %v9990_v53, -inf  ;;  %v10261_v61 = vsel %vm5125_vm4, %v9991_v14, -inf  ;;  %12149 = vmatpush2.bf16.msra.mxu1 %v14628_v47  ;;  %v14637_v1 = vld [vmem:[#allocation4 + $0x90] ss:$8 sps:$4 sm:$0xff]  }
 0x568   : > { %v18969_v10 = vsel %vm6330_vm7, %v10623_v35, %v10670_v42  ;;  %v10007_v15 = vcombine.high %v10006_v22, %v10006_v22  ;;  %v10255_v54 = vrot.slane %v10254_v7, 4  ;;  %v10262_v36 = vrot.slane %v10261_v61, 4  ;;  %12150 = vmatprep.subr.bf16.mxu1 %v14636_v45  ;;  %v14645_v14 = vld [vmem:[#allocation4 + $0x84] ss:$8 sps:$4 sm:$0xff]   ;;  %v14640_v47 = vld [vmem:[#allocation4 + $0x1a0] ss:$8 sps:$4 sm:$0xff]  }
 0x569   : > { %v10242_v18 = vmax.f32 %v10240_v27, %v10241_v49  ;;  %v10249_v38 = vmax.f32 %v10247_v33, %v10248_v41  ;;  %v10268_v37 = vsel %vm5125_vm4, %v9998_v51, -inf  ;;  %v10275_v20 = vsel %vm5125_vm4, %v9999_v58, -inf  ;;  %12110 = vmatpush2.bf16.msra.mxu0 %v14631_v34  ;;  %v9712_v27 = vpop.f32.mrf.mxu0  ;;  %v18975_v33 = vpop.f32.mrf.mxu1  ;;  %v14643_v34 = vld [vmem:[#allocation4 + $0x80] ss:$8 sps:$4 sm:$0xff]  }
 0x56a   : > { %v10256_v31 = vmax.f32 %v10254_v7, %v10255_v54  ;;  %v10263_v8 = vmax.f32 %v10261_v61, %v10262_v36  ;;  %v10269_v17 = vrot.slane %v10268_v37, 4  ;;  %v10276_v0 = vrot.slane %v10275_v20, 4  ;;  %12111 = vmatprep.subr.bf16.mxu0 %v14639_v55  ;;  %v14648_v61 = vld [vmem:[#allocation4 + $0x194] ss:$8 sps:$4 sm:$0xff]  }
 0x56b   : > { %v10243_v11 = vrot.slane %v10242_v18, 2  ;;  %v10250_v43 = vrot.slane %v10249_v38, 2  ;;  %v10282_v16 = vsel %vm5125_vm4, %v10006_v22, -inf  ;;  %v10289_v53 = vsel %vm5125_vm4, %v10007_v15, -inf  ;;  %12151 = vmatpush2.bf16.msra.mxu1 %v14634_v30  ;;  %v9775_v30 = vpop.f32.mrf.mxu1 }
 0x56c   : > { %v10257_v60 = vrot.slane %v10256_v31, 2  ;;  %v10264_v51 = vrot.slane %v10263_v8, 2  ;;  %v10270_v13 = vmax.f32 %v10268_v37, %v10269_v17  ;;  %v10277_v56 = vmax.f32 %v10275_v20, %v10276_v0  ;;  %12152 = vmatprep.subr.bf16.mxu1 %v14642_v23  ;;  %v9716_v17 = vpop.f32.mrf.mxu0 }
 0x56d   : > { %v10244_v59 = vmax.f32 %v10242_v18, %v10243_v11  ;;  %v10251_v44 = vmax.f32 %v10249_v38, %v10250_v43  ;;  %v10283_v21 = vrot.slane %v10282_v16, 4  ;;  %v10290_v42 = vrot.slane %v10289_v53, 4  ;;  %12112 = vmatpush2.bf16.msra.mxu0 %v14637_v1  ;;  %v14646_v11 = vld [vmem:[#allocation4 + $0x190] ss:$8 sps:$4 sm:$0xff]  }
 0x56e   : > { %v10258_v58 = vmax.f32 %v10256_v31, %v10257_v60  ;;  %v10265_v62 = vmax.f32 %v10263_v8, %v10264_v51  ;;  %v10271_v35 = vrot.slane %v10270_v13, 2  ;;  %v10278_v22 = vrot.slane %v10277_v56, 2  ;;  %12113 = vmatprep.subr.bf16.mxu0 %v14645_v14 }
 0x56f   : > { %v10245_v3 = vrot.slane %v10244_v59, 1  ;;  %v10252_v49 = vrot.slane %v10251_v44, 1  ;;  %v10284_v41 = vmax.f32 %v10282_v16, %v10283_v21  ;;  %v10291_v7 = vmax.f32 %v10289_v53, %v10290_v42  ;;  %12153 = vmatpush2.bf16.msra.mxu1 %v14640_v47  ;;  %v14651_v42 = vld [vmem:[#allocation4 + $0x274] ss:$8 sps:$4 sm:$0xff]   ;;  %v9779_v47 = vpop.f32.mrf.mxu1 }
 0x570   : > { %v10259_v45 = vrot.slane %v10258_v58, 1  ;;  %v10266_v15 = vrot.slane %v10265_v62, 1  ;;  %v10272_v54 = vmax.f32 %v10270_v13, %v10271_v35  ;;  %v10279_v36 = vmax.f32 %v10277_v56, %v10278_v22  ;;  %12154 = vmatprep.subr.bf16.mxu1 %v14648_v61 }
 0x571   : > { %v10246_v18 = vmax.f32 %v10244_v59, %v10245_v3  ;;  %v10253_v38 = vmax.f32 %v10251_v44, %v10252_v49  ;;  %v10285_v37 = vrot.slane %v10284_v41, 2  ;;  %v10292_v20 = vrot.slane %v10291_v7, 2  ;;  %12114 = vmatpush2.bf16.msra.mxu0 %v14643_v34 }
 0x572   : > { %v10260_v55 = vmax.f32 %v10258_v58, %v10259_v45  ;;  %v10273_v31 = vrot.slane %v10272_v54, 1  ;;  %v10280_v8 = vrot.slane %v10279_v36, 1  ;;  %v9799_v0 = vmax.f32 %v18929_v12, 0.0  ;;  %12169 = vmatprep.subr.bf16.mxu0 %v14651_v42 }
 0x573   : > { %v10286_v43 = vmax.f32 %v10284_v41, %v10285_v37  ;;  %v10293_v16 = vmax.f32 %v10291_v7, %v10292_v20  ;;  %v10528_v53 = vpack.c.bf16 %v10246_v18, %v10246_v18  ;;  %v10529_v23 = vpack.c.bf16 %v10253_v38, %v10253_v38  ;;  %12155 = vmatpush2.bf16.msra.mxu1 %v14646_v11  ;;  %v9781_v37 = vpop.f32.mrf.mxu1 }
 0x574   : > { %v10267_v60 = vmax.f32 %v10265_v62, %v10266_v15  ;;  %v10274_v51 = vmax.f32 %v10272_v54, %v10273_v31  ;;  %v10281_v13 = vmax.f32 %v10279_v36, %v10280_v8  ;;  %v10530_v56 = vpack.c.bf16 %v10260_v55, %v10260_v55  ;;  %v9718_v62 = vpop.f32.mrf.mxu0  ;;  %12156 = vmatprep.subr.bf16.mxu1 %v14654_v29 }
 0x575   : > { %v10287_v1 = vrot.slane %v10286_v43, 1  ;;  %v10294_v59 = vrot.slane %v10293_v16, 1  ;;  %v10624_v44 = vunpack.c.l.b16 %v10528_v53  ;;  %v10625_v21 = vunpack.c.l.b16 %v10529_v23 }
 0x576   : > { %v10532_v14 = vpack.c.bf16 %v10274_v51, %v10274_v51  ;;  %v9713_v12 = vadd.f32 %v9712_v27, %v18901_v46  ;;  %v19815_v58 = vmax.f32 %v18756_v26, 0.0  ;;  %v9717_v22 = vadd.f32 %v9716_v17, %v18905_v52  ;;  %v14652_v46 = vld [vmem:[#allocation4 + $0x180] ss:$8 sps:$4 sm:$0xff]   ;;  %v9720_v18 = vpop.f32.mrf.mxu0 }
 0x577   : > { %v10288_v3 = vmax.f32 %v10286_v43, %v10287_v1  ;;  %v10295_v49 = vmax.f32 %v10293_v16, %v10294_v59  ;;  %v18986_v41 = vsel %vm6332_vm8, %v10624_v44, %v18960_v32  ;;  %v18990_v7 = vsel %vm6332_vm8, %v10625_v21, %v18969_v10  ;;  %12157 = vmatpush2.bf16.msra.mxu1 %v14652_v46 }
 0x578   : > { %v9816_v35 = vmax.f32 %v19815_v58, %v9798_v63  ;;  %v10531_v26 = vpack.c.bf16 %v10267_v60, %v10267_v60  ;;  %v10533_v63 = vpack.c.bf16 %v10281_v13, %v10281_v13  ;;  %v18992_v27 = vunpack.c.l.b16 %v10530_v56 }
 0x579   : > { %v19816_v52 = vmax.f32 %v18829_v6, 0.0  ;;  %v10534_v45 = vpack.c.bf16 %v10288_v3, %v10288_v3  ;;  %v10535_v15 = vpack.c.bf16 %v10295_v49, %v10295_v49  ;;  %v10628_v54 = vunpack.c.l.b16 %v10532_v14 }
 0x57a   : > { %v9774_v32 = vadd.f32 %v18975_v33, %v18924_v9  ;;  %v9719_v34 = vadd.f32 %v9718_v62, %v18908_v28  ;;  %v9776_v38 = vadd.f32 %v9775_v30, %v9713_v12  ;;  %v18999_v6 = vadd.f32 %v9779_v47, %v9717_v22  ;;  %v14660_v47 = vld [vmem:[#allocation4 + $0x374] ss:$8 sps:$4 sm:$0xff]  }
 0x57b   : > { %v9817_v61 = vmax.f32 %v19816_v52, %v9799_v0  ;;  %v10630_v20 = vunpack.c.l.b16 %v10534_v45  ;;  %v10631_v55 = vunpack.c.l.b16 %v10535_v15  ;;  %v19001_v8 = vunpack.c.l.b16 %v10531_v26  ;;  %12212 = vmatprep.subr.bf16.mxu1 %v14660_v47 }
 0x57c   : > { %v9802_v31 = vmax.f32 %v9774_v32, 0.0  ;;  %v9803_v33 = vmax.f32 %v9776_v38, 0.0  ;;  %v10629_v0 = vunpack.c.l.b16 %v10533_v63  ;;  %v19009_v28 = vadd.f32 %v9720_v18, %v18913_v5 }
 0x57d   : > { %v9872_v36 = vcombine.low %v9816_v35, %v9817_v61  ;;  %v9873_v10 = vcombine.high %v9816_v35, %v9817_v61  ;;  %v19006_v11 = vsel %vm6326_vm5, %v10630_v20, %v10628_v54  ;;  %v19011_v30 = vadd.f32 %v9781_v37, %v9719_v34 }
 0x57e   : > { %v19016_v60 = vsel %vm6326_vm5, %v10631_v55, %v10629_v0  ;;  %v19817_v51 = vmax.f32 %v18835_v24, 0.0  ;;  %v19818_v56 = vmax.f32 %v18841_v2, 0.0  ;;  %v9806_v5 = vmax.f32 %v18999_v6, 0.0 }
 0x57f   : > { %v9880_v17 = vrot.slane %v9872_v36, %v19812_v4  ;;  %v9887_v9 = vrot.slane %v9873_v10, %v19812_v4 }
 0x580   : > { %v19020_v13 = vmax.f32 %v19817_v51, %v9802_v31  ;;  %v19024_v1 = vmax.f32 %v19818_v56, %v9803_v33 }
 0x581   : > { %v9888_v43 = vcombine.high %v9880_v17, %v9880_v17  ;;  %v9889_v16 = vcombine.high %v9887_v9, %v9887_v9  ;;  %v10014_v53 = vrot.slane %v9880_v17, %v19812_v4  ;;  %v10030_v23 = vrot.slane %v9887_v9, %v19812_v4 }
 0x582   : > { %v9890_v24 = vcombine.low %v19020_v13, %v19024_v1  ;;  %v9891_v2 = vcombine.high %v19020_v13, %v19024_v1 }
 0x583   : > { %v10015_v59 = vcombine.high %v10014_v53, %v10014_v53  ;;  %v10022_v44 = vrot.slane %v9888_v43, %v19812_v4  ;;  %v10031_v21 = vcombine.high %v10030_v23, %v10030_v23  ;;  %v10038_v42 = vrot.slane %v9889_v16, %v19812_v4 }
 0x584   : > { %v10296_v14 = vsel %vm5125_vm4, %v10014_v53, -inf  ;;  %v10324_v12 = vsel %vm5125_vm4, %v10030_v23, -inf  ;;  %v9905_v19 = vrot.slane %v9891_v2, %v19812_v4 }
 0x585   : > { %v10023_v58 = vcombine.high %v10022_v44, %v10022_v44  ;;  %v10039_v35 = vcombine.high %v10038_v42, %v10038_v42  ;;  %v10297_v22 = vrot.slane %v10296_v14, 4  ;;  %v10303_v62 = vsel %vm5125_vm4, %v10015_v59, -inf }
 0x586   : > { %v10304_v3 = vrot.slane %v10303_v62, 4  ;;  %v10310_v49 = vsel %vm5125_vm4, %v10022_v44, -inf  ;;  %v10325_v46 = vrot.slane %v10324_v12, 4  ;;  %v10331_v29 = vsel %vm5125_vm4, %v10031_v21, -inf }
 0x587   : > { %v10298_v26 = vmax.f32 %v10296_v14, %v10297_v22  ;;  %v10311_v63 = vrot.slane %v10310_v49, 4  ;;  %v10317_v52 = vsel %vm5125_vm4, %v10023_v58, -inf  ;;  %v10332_v61 = vrot.slane %v10331_v29, 4 }
 0x588   : > { %v10305_v45 = vmax.f32 %v10303_v62, %v10304_v3  ;;  %v10318_v15 = vrot.slane %v10317_v52, 4  ;;  %v10326_v54 = vmax.f32 %v10324_v12, %v10325_v46  ;;  %v10338_v32 = vsel %vm5125_vm4, %v10038_v42, -inf }
 0x589   : > { %v10299_v36 = vrot.slane %v10298_v26, 2  ;;  %v10312_v10 = vmax.f32 %v10310_v49, %v10311_v63  ;;  %v10333_v34 = vmax.f32 %v10331_v29, %v10332_v61  ;;  %v10339_v18 = vrot.slane %v10338_v32, 4 }
 0x58a   : > { %v10306_v38 = vrot.slane %v10305_v45, 2  ;;  %v10319_v37 = vmax.f32 %v10317_v52, %v10318_v15  ;;  %v10327_v20 = vrot.slane %v10326_v54, 2  ;;  %v10345_v55 = vsel %vm5125_vm4, %v10039_v35, -inf  ;;  %v9722_v52 = vpop.f32.mrf.mxu0 }
 0x58b   : > { %v10300_v31 = vmax.f32 %v10298_v26, %v10299_v36  ;;  %v10313_v17 = vrot.slane %v10312_v10, 2  ;;  %v10334_v9 = vrot.slane %v10333_v34, 2  ;;  %v10340_v33 = vmax.f32 %v10338_v32, %v10339_v18 }
 0x58c   : > { %v10307_v0 = vmax.f32 %v10305_v45, %v10306_v38  ;;  %v10320_v43 = vrot.slane %v10319_v37, 2  ;;  %v10328_v16 = vmax.f32 %v10326_v54, %v10327_v20  ;;  %v10346_v53 = vrot.slane %v10345_v55, 4 }
 0x58d   : > { %v10301_v23 = vrot.slane %v10300_v31, 1  ;;  %v10314_v51 = vmax.f32 %v10312_v10, %v10313_v17  ;;  %v10335_v56 = vmax.f32 %v10333_v34, %v10334_v9  ;;  %v10341_v59 = vrot.slane %v10340_v33, 2 }
 0x58e   : > { %v10308_v44 = vrot.slane %v10307_v0, 1  ;;  %v10321_v21 = vmax.f32 %v10319_v37, %v10320_v43  ;;  %v10329_v42 = vrot.slane %v10328_v16, 1  ;;  %v10347_v14 = vmax.f32 %v10345_v55, %v10346_v53 }
 0x58f   : > { %v10302_v12 = vmax.f32 %v10300_v31, %v10301_v23  ;;  %v10315_v58 = vrot.slane %v10314_v51, 1  ;;  %v10336_v22 = vrot.slane %v10335_v56, 1  ;;  %v10342_v35 = vmax.f32 %v10340_v33, %v10341_v59 }
 0x590   : > { %v10309_v62 = vmax.f32 %v10307_v0, %v10308_v44  ;;  %v10322_v47 = vrot.slane %v10321_v21, 1  ;;  %v10330_v3 = vmax.f32 %v10328_v16, %v10329_v42  ;;  %v10348_v49 = vrot.slane %v10347_v14, 2 }
 0x591   : > { %v10316_v46 = vmax.f32 %v10314_v51, %v10315_v58  ;;  %v10337_v29 = vmax.f32 %v10335_v56, %v10336_v22  ;;  %v10343_v26 = vrot.slane %v10342_v35, 1  ;;  %v10536_v63 = vpack.c.bf16 %v10302_v12, %v10302_v12 }
 0x592   : > { %v10323_v61 = vmax.f32 %v10321_v21, %v10322_v47  ;;  %v10349_v45 = vmax.f32 %v10347_v14, %v10348_v49  ;;  %v10537_v15 = vpack.c.bf16 %v10309_v62, %v10309_v62  ;;  %v10540_v54 = vpack.c.bf16 %v10330_v3, %v10330_v3 }
 0x593   : > { %v10538_v32 = vpack.c.bf16 %v10316_v46, %v10316_v46  ;;  %v10541_v36 = vpack.c.bf16 %v10337_v29, %v10337_v29  ;;  %v10632_v10 = vunpack.c.l.b16 %v10536_v63  ;;  %v9807_v34 = vmax.f32 %v19011_v30, 0.0 }
 0x594   : > { %v19042_v18 = vmax.f32 %v10342_v35, %v10343_v26  ;;  %v10539_v38 = vpack.c.bf16 %v10323_v61, %v10323_v61  ;;  %v10633_v37 = vunpack.c.l.b16 %v10537_v15  ;;  %v19045_v20 = vadd.f32 %v9722_v52, %v18920_v50 }
 0x595   : > { %v10350_v55 = vrot.slane %v10349_v45, 1  ;;  %v10634_v31 = vunpack.c.l.b16 %v10538_v32  ;;  %v10675_v17 = vsel %vm6328_vm6, %v10632_v10, %v19006_v11  ;;  %v19053_v9 = vmax.f32 %v9804_v57, %v9806_v5 }
 0x596   : > { %v10635_v33 = vunpack.c.l.b16 %v10539_v38  ;;  %v10636_v30 = vunpack.c.l.b16 %v10540_v54  ;;  %v10680_v0 = vsel %vm6328_vm6, %v10633_v37, %v19016_v60  ;;  %v9898_v50 = vrot.slane %v9890_v24, %v19812_v4 }
 0x597   : > { %v10637_v43 = vunpack.c.l.b16 %v10541_v36  ;;  %v10676_v16 = vsel %vm6330_vm7, %v10634_v31, %v10675_v17  ;;  %v19819_v57 = vmax.f32 %v18856_v48, 0.0  ;;  %v10542_v11 = vpack.c.bf16 %v19042_v18, %v19042_v18 }
 0x598   : > { %v19073_v60 = vsel %vm6332_vm8, %v10636_v30, %v10676_v16  ;;  %v10681_v5 = vsel %vm6330_vm7, %v10635_v33, %v10680_v0  ;;  %v9906_v24 = vcombine.high %v9898_v50, %v9898_v50  ;;  %v9907_v23 = vcombine.high %v9905_v19, %v9905_v19 }
 0x599   : > { %v19068_v6 = vmax.f32 %v19819_v57, %v9807_v34  ;;  %v19077_v53 = vsel %vm6332_vm8, %v10637_v43, %v10681_v5  ;;  %v10046_v13 = vrot.slane %v9898_v50, %v19812_v4  ;;  %v10062_v1 = vrot.slane %v9905_v19, %v19812_v4 }
 0x59a   : > { %v19081_v48 = vmax.f32 %v10349_v45, %v10350_v55  ;;  %v10054_v2 = vrot.slane %v9906_v24, %v19812_v4  ;;  %v10070_v21 = vrot.slane %v9907_v23, %v19812_v4  ;;  %v10668_v18 = vsel %vm6334_vm9, %v18992_v27, %v18986_v41 }
 0x59b   : > { %v9908_v51 = vcombine.low %v19053_v9, %v19068_v6  ;;  %v9909_v56 = vcombine.high %v19053_v9, %v19068_v6  ;;  %v10047_v59 = vcombine.high %v10046_v13, %v10046_v13  ;;  %v10063_v44 = vcombine.high %v10062_v1, %v10062_v1 }
 0x59c   : > { %v10352_v42 = vsel %vm5125_vm4, %v10046_v13, -inf  ;;  %v10055_v14 = vcombine.high %v10054_v2, %v10054_v2  ;;  %v10366_v58 = vsel %vm5125_vm4, %v10054_v2, -inf  ;;  %v10380_v22 = vsel %vm5125_vm4, %v10062_v1, -inf }
 0x59d   : > { %v10353_v12 = vrot.slane %v10352_v42, 4  ;;  %v10071_v35 = vcombine.high %v10070_v21, %v10070_v21  ;;  %v10359_v62 = vsel %vm5125_vm4, %v10047_v59, -inf  ;;  %v10367_v47 = vrot.slane %v10366_v58, 4 }
 0x59e   : > { %v10381_v3 = vrot.slane %v10380_v22, 4  ;;  %v10360_v46 = vrot.slane %v10359_v62, 4  ;;  %v10373_v29 = vsel %vm5125_vm4, %v10055_v14, -inf  ;;  %v10387_v26 = vsel %vm5125_vm4, %v10063_v44, -inf }
 0x59f   : > { %v10354_v49 = vmax.f32 %v10352_v42, %v10353_v12  ;;  %v10368_v63 = vmax.f32 %v10366_v58, %v10367_v47  ;;  %v10374_v52 = vrot.slane %v10373_v29, 4  ;;  %v10388_v45 = vrot.slane %v10387_v26, 4 }
 0x5a0   : > { %v10382_v61 = vmax.f32 %v10380_v22, %v10381_v3  ;;  %v10361_v54 = vmax.f32 %v10359_v62, %v10360_v46  ;;  %v10394_v32 = vsel %vm5125_vm4, %v10070_v21, -inf  ;;  %v10401_v36 = vsel %vm5125_vm4, %v10071_v35, -inf }
 0x5a1   : > { %v10355_v15 = vrot.slane %v10354_v49, 2  ;;  %v10369_v10 = vrot.slane %v10368_v63, 2  ;;  %v10375_v34 = vmax.f32 %v10373_v29, %v10374_v52  ;;  %v10389_v37 = vmax.f32 %v10387_v26, %v10388_v45 }
 0x5a2   : > { %v10383_v38 = vrot.slane %v10382_v61, 2  ;;  %v10362_v31 = vrot.slane %v10361_v54, 2  ;;  %v10395_v17 = vrot.slane %v10394_v32, 4  ;;  %v10402_v33 = vrot.slane %v10401_v36, 4 }
 0x5a3   : > { %v10356_v55 = vmax.f32 %v10354_v49, %v10355_v15  ;;  %v10370_v30 = vmax.f32 %v10368_v63, %v10369_v10  ;;  %v10376_v0 = vrot.slane %v10375_v34, 2  ;;  %v10390_v43 = vrot.slane %v10389_v37, 2 }
 0x5a4   : > { %v10384_v50 = vmax.f32 %v10382_v61, %v10383_v38  ;;  %v10363_v19 = vmax.f32 %v10361_v54, %v10362_v31  ;;  %v10396_v57 = vmax.f32 %v10394_v32, %v10395_v17  ;;  %v10403_v5 = vmax.f32 %v10401_v36, %v10402_v33 }
 0x5a5   : > { %v10357_v16 = vrot.slane %v10356_v55, 1  ;;  %v10371_v24 = vrot.slane %v10370_v30, 1  ;;  %v10377_v23 = vmax.f32 %v10375_v34, %v10376_v0  ;;  %v10391_v1 = vmax.f32 %v10389_v37, %v10390_v43 }
 0x5a6   : > { %v10385_v13 = vrot.slane %v10384_v50, 1  ;;  %v10364_v59 = vrot.slane %v10363_v19, 1  ;;  %v10397_v44 = vrot.slane %v10396_v57, 2  ;;  %v10404_v21 = vrot.slane %v10403_v5, 2 }
 0x5a7   : > { %v10358_v2 = vmax.f32 %v10356_v55, %v10357_v16  ;;  %v10372_v42 = vmax.f32 %v10370_v30, %v10371_v24  ;;  %v10378_v14 = vrot.slane %v10377_v23, 1  ;;  %v10392_v58 = vrot.slane %v10391_v1, 1 }
 0x5a8   : > { %v10386_v12 = vmax.f32 %v10384_v50, %v10385_v13  ;;  %v10365_v22 = vmax.f32 %v10363_v19, %v10364_v59  ;;  %v10398_v35 = vmax.f32 %v10396_v57, %v10397_v44  ;;  %v10405_v62 = vmax.f32 %v10403_v5, %v10404_v21 }
 0x5a9   : > { %v10544_v47 = vpack.c.bf16 %v10358_v2, %v10358_v2  ;;  %v10379_v3 = vmax.f32 %v10377_v23, %v10378_v14  ;;  %v10393_v49 = vmax.f32 %v10391_v1, %v10392_v58  ;;  %v10546_v46 = vpack.c.bf16 %v10372_v42, %v10372_v42 }
 0x5aa   : > { %v10548_v29 = vpack.c.bf16 %v10386_v12, %v10386_v12  ;;  %v10399_v26 = vrot.slane %v10398_v35, 1  ;;  %v10406_v63 = vrot.slane %v10405_v62, 1  ;;  %v10545_v52 = vpack.c.bf16 %v10365_v22, %v10365_v22 }
 0x5ab   : > { %v10640_v61 = vunpack.c.l.b16 %v10544_v47  ;;  %v10547_v45 = vpack.c.bf16 %v10379_v3, %v10379_v3  ;;  %v10549_v15 = vpack.c.bf16 %v10393_v49, %v10393_v49  ;;  %v10642_v54 = vunpack.c.l.b16 %v10546_v46 }
 0x5ac   : > { %v10644_v32 = vunpack.c.l.b16 %v10548_v29  ;;  %v10400_v36 = vmax.f32 %v10398_v35, %v10399_v26  ;;  %v10407_v10 = vmax.f32 %v10405_v62, %v10406_v63  ;;  %v10641_v34 = vunpack.c.l.b16 %v10545_v52 }
 0x5ad   : > { %v9916_v38 = vrot.slane %v9908_v51, %v19812_v4  ;;  %v10643_v37 = vunpack.c.l.b16 %v10547_v45  ;;  %v10645_v55 = vunpack.c.l.b16 %v10549_v15  ;;  %v10684_v31 = vsel %vm6326_vm5, %v10642_v54, %v10640_v61 }
 0x5ae   : > { %v9923_v17 = vrot.slane %v9909_v56, %v19812_v4  ;;  %v10550_v33 = vpack.c.bf16 %v10400_v36, %v10400_v36  ;;  %v10551_v30 = vpack.c.bf16 %v10407_v10, %v10407_v10  ;;  %v10685_v0 = vsel %vm6328_vm6, %v10644_v32, %v10684_v31 }
 0x5af   : > { %v9924_v50 = vcombine.high %v9916_v38, %v9916_v38  ;;  %v10689_v43 = vsel %vm6326_vm5, %v10643_v37, %v10641_v34  ;;  %v10078_v19 = vrot.slane %v9916_v38, %v19812_v4  ;;  %v19820_v27 = vmax.f32 %v18868_v39, 0.0 }
 0x5b0   : > { %v9925_v16 = vcombine.high %v9923_v17, %v9923_v17  ;;  %v10094_v51 = vrot.slane %v9923_v17, %v19812_v4  ;;  %v10646_v57 = vunpack.c.l.b16 %v10550_v33  ;;  %v10647_v5 = vunpack.c.l.b16 %v10551_v30 }
 0x5b1   : > { %v10690_v24 = vsel %vm6328_vm6, %v10645_v55, %v10689_v43  ;;  %v10086_v23 = vrot.slane %v9924_v50, %v19812_v4  ;;  %v10079_v9 = vcombine.high %v10078_v19, %v10078_v19  ;;  %v10408_v13 = vsel %vm5125_vm4, %v10078_v19, -inf }
 0x5b2   : > { %v10095_v6 = vcombine.high %v10094_v51, %v10094_v51  ;;  %v10102_v56 = vrot.slane %v9925_v16, %v19812_v4  ;;  %v19115_v1 = vsel %vm6330_vm7, %v10646_v57, %v10685_v0  ;;  %v19118_v2 = vsel %vm6330_vm7, %v10647_v5, %v10690_v24 }
 0x5b3   : > { %v10087_v59 = vcombine.high %v10086_v23, %v10086_v23  ;;  %v10409_v44 = vrot.slane %v10408_v13, 4  ;;  %v10415_v42 = vsel %vm5125_vm4, %v10079_v9, -inf  ;;  %v10422_v14 = vsel %vm5125_vm4, %v10086_v23, -inf  ;;  %v9783_v23 = vpop.f32.mrf.mxu1 }
 0x5b4   : > { %v10103_v21 = vcombine.high %v10102_v56, %v10102_v56  ;;  %v10436_v12 = vsel %vm5125_vm4, %v10094_v51, -inf  ;;  %v10416_v22 = vrot.slane %v10415_v42, 4  ;;  %v10423_v35 = vrot.slane %v10422_v14, 4 }
 0x5b5   : > { %v10410_v58 = vmax.f32 %v10408_v13, %v10409_v44  ;;  %v10429_v62 = vsel %vm5125_vm4, %v10087_v59, -inf  ;;  %v10437_v3 = vrot.slane %v10436_v12, 4  ;;  %v10443_v49 = vsel %vm5125_vm4, %v10095_v6, -inf }
 0x5b6   : > { %v10430_v47 = vrot.slane %v10429_v62, 4  ;;  %v10450_v46 = vsel %vm5125_vm4, %v10102_v56, -inf  ;;  %v10417_v26 = vmax.f32 %v10415_v42, %v10416_v22  ;;  %v10424_v63 = vmax.f32 %v10422_v14, %v10423_v35 }
 0x5b7   : > { %v10411_v29 = vrot.slane %v10410_v58, 2  ;;  %v10444_v52 = vrot.slane %v10443_v49, 4  ;;  %v10438_v45 = vmax.f32 %v10436_v12, %v10437_v3  ;;  %v10451_v15 = vrot.slane %v10450_v46, 4 }
 0x5b8   : > { %v10431_v61 = vmax.f32 %v10429_v62, %v10430_v47  ;;  %v10457_v54 = vsel %vm5125_vm4, %v10103_v21, -inf  ;;  %v10418_v36 = vrot.slane %v10417_v26, 2  ;;  %v10425_v10 = vrot.slane %v10424_v63, 2 }
 0x5b9   : > { %v10412_v32 = vmax.f32 %v10410_v58, %v10411_v29  ;;  %v10445_v34 = vmax.f32 %v10443_v49, %v10444_v52  ;;  %v10439_v37 = vrot.slane %v10438_v45, 2  ;;  %v10452_v55 = vmax.f32 %v10450_v46, %v10451_v15 }
 0x5ba   : > { %v10432_v38 = vrot.slane %v10431_v61, 2  ;;  %v10458_v31 = vrot.slane %v10457_v54, 4  ;;  %v10419_v33 = vmax.f32 %v10417_v26, %v10418_v36  ;;  %v10426_v30 = vmax.f32 %v10424_v63, %v10425_v10  ;;  %v9785_v63 = vpop.f32.mrf.mxu1 }
 0x5bb   : > { %v10413_v17 = vrot.slane %v10412_v32, 1  ;;  %v10446_v0 = vrot.slane %v10445_v34, 2  ;;  %v10440_v43 = vmax.f32 %v10438_v45, %v10439_v37  ;;  %v10453_v16 = vrot.slane %v10452_v55, 2 }
 0x5bc   : > { %v10433_v50 = vmax.f32 %v10431_v61, %v10432_v38  ;;  %v10459_v19 = vmax.f32 %v10457_v54, %v10458_v31  ;;  %v10420_v57 = vrot.slane %v10419_v33, 1  ;;  %v10427_v5 = vrot.slane %v10426_v30, 1 }
 0x5bd   : > { %v10414_v51 = vmax.f32 %v10412_v32, %v10413_v17  ;;  %v10447_v24 = vmax.f32 %v10445_v34, %v10446_v0  ;;  %v10441_v6 = vrot.slane %v10440_v43, 1  ;;  %v10454_v56 = vmax.f32 %v10452_v55, %v10453_v16 }
 0x5be   : > { %v10434_v9 = vrot.slane %v10433_v50, 1  ;;  %v10460_v13 = vrot.slane %v10459_v19, 2  ;;  %v10421_v59 = vmax.f32 %v10419_v33, %v10420_v57  ;;  %v10428_v44 = vmax.f32 %v10426_v30, %v10427_v5 }
 0x5bf   : > { %v10448_v21 = vrot.slane %v10447_v24, 1  ;;  %v10552_v42 = vpack.c.bf16 %v10414_v51, %v10414_v51  ;;  %v10455_v12 = vrot.slane %v10454_v56, 1  ;;  %v9784_v22 = vadd.f32 %v9783_v23, %v19009_v28 }
 0x5c0   : > { %v10435_v14 = vmax.f32 %v10433_v50, %v10434_v9  ;;  %v10461_v58 = vmax.f32 %v10459_v19, %v10460_v13  ;;  %v10543_v35 = vpack.c.bf16 %v19081_v48, %v19081_v48  ;;  %v10553_v62 = vpack.c.bf16 %v10421_v59, %v10421_v59 }
 0x5c1   : > { %v10554_v47 = vpack.c.bf16 %v10428_v44, %v10428_v44  ;;  %v10648_v3 = vunpack.c.l.b16 %v10552_v42  ;;  %v10442_v49 = vmax.f32 %v10440_v43, %v10441_v6  ;;  %v10456_v46 = vmax.f32 %v10454_v56, %v10455_v12 }
 0x5c2   : > { %v10462_v29 = vrot.slane %v10461_v58, 1  ;;  %v10555_v26 = vpack.c.bf16 %v10435_v14, %v10435_v14  ;;  %v10638_v52 = vunpack.c.l.b16 %v10542_v11  ;;  %v10449_v61 = vmax.f32 %v10447_v24, %v10448_v21 }
 0x5c3   : > { %v10649_v45 = vunpack.c.l.b16 %v10553_v62  ;;  %v10687_v28 = vsel %vm6332_vm8, %v10648_v3, %v19115_v1  ;;  %v10558_v54 = vpack.c.bf16 %v10456_v46, %v10456_v46  ;;  %v10650_v48 = vunpack.c.l.b16 %v10554_v47 }
 0x5c4   : > { %v10463_v15 = vmax.f32 %v10461_v58, %v10462_v29  ;;  %v10651_v32 = vunpack.c.l.b16 %v10555_v26  ;;  %v10639_v36 = vunpack.c.l.b16 %v10543_v35  ;;  %v9810_v34 = vmax.f32 %v9784_v22, 0.0 }
 0x5c5   : > { %v10692_v10 = vsel %vm6332_vm8, %v10649_v45, %v19118_v2  ;;  %v9786_v38 = vadd.f32 %v9785_v63, %v19045_v20  ;;  %v10556_v37 = vpack.c.bf16 %v10442_v49, %v10442_v49  ;;  %v10673_v11 = vsel %vm6334_vm9, %v19001_v8, %v18990_v7 }
 0x5c6   : > { %v10559_v55 = vpack.c.bf16 %v10463_v15, %v10463_v15  ;;  %v10557_v1 = vpack.c.bf16 %v10449_v61, %v10449_v61  ;;  %v10678_v17 = vsel %vm6334_vm9, %v10638_v52, %v19073_v60  ;;  %v10683_v2 = vsel %vm6334_vm9, %v10639_v36, %v19077_v53 }
 0x5c7   : > { %v9811_v31 = vmax.f32 %v9786_v38, 0.0  ;;  %v10654_v33 = vunpack.c.l.b16 %v10558_v54  ;;  %v9822_v20 = vmax.f32 %v9808_v40, %v9810_v34  ;;  %v10688_v30 = vsel %vm6334_vm9, %v10650_v48, %v10687_v28 }
 0x5c8   : > { %v10693_v41 = vsel %vm6334_vm9, %v10651_v32, %v10692_v10  ;;  %v10704_v7 = vpack.c.b16 %v10668_v18, %v10668_v18  ;;  %v10705_v8 = vpack.c.b16 %v10673_v11, %v10673_v11  ;;  %v10706_v50 = vpack.c.b16 %v10678_v17, %v10678_v17 }
 0x5c9   : > { %v9823_v0 = vmax.f32 %v19820_v27, %v9811_v31  ;;  %v10655_v43 = vunpack.c.l.b16 %v10559_v55  ;;  %v10707_v16 = vpack.c.b16 %v10683_v2, %v10683_v2  ;;  %v10708_v60 = vpack.c.b16 %v10688_v30, %v10688_v30 }
 0x5ca   : > { %v10709_v19 = vpack.c.b16 %v10693_v41, %v10693_v41  ;;  %v10652_v51 = vunpack.c.l.b16 %v10556_v37  ;;  %v10653_v53 = vunpack.c.l.b16 %v10557_v1  ;;  %v10720_v40 = vsel %vm17514_vm14, 0, %v10704_v7 }
 0x5cb   : > { %v9926_v57 = vcombine.low %v9822_v20, %v9823_v0  ;;  %v9927_v5 = vcombine.high %v9822_v20, %v9823_v0  ;;  %v10721_v24 = vsel %vm17514_vm14, 0, %v10705_v8  ;;  %v10722_v39 = vsel %vm17514_vm14, 0, %v10706_v50 }
 0x5cc   : > { %v10723_v23 = vsel %vm17514_vm14, 0, %v10707_v16  ;;  %v19165_v56 = vsel %vm6326_vm5, %v10654_v33, %v10652_v51  ;;  %v19168_v13 = vsel %vm6326_vm5, %v10655_v43, %v10653_v53  ;;  %v10724_v59 = vsel %vm17514_vm14, 0, %v10708_v60 }
 0x5cd   : > { %v9934_v9 = vrot.slane %v9926_v57, %v19812_v4  ;;  %v9941_v6 = vrot.slane %v9927_v5, %v19812_v4  ;;  %v10725_v44 = vsel %vm17514_vm14, 0, %v10709_v19  ;;  %v19182_v22 = vsel %vm19174_vm1, %v10720_v40, 0 }
 0x5ce   : > { %v19186_v35 = vsel %vm19174_vm1, %v10721_v24, 0  ;;  %v19190_v62 = vsel %vm19174_vm1, %v10722_v39, 0  ;;  %v19194_v47 = vsel %vm19174_vm1, %v10723_v23, 0  ;;  %v19202_v52 = vsel %vm19174_vm1, %v10724_v59, 0 }
 0x5cf   : > { %v9942_v42 = vcombine.high %v9934_v9, %v9934_v9  ;;  %v9943_v14 = vcombine.high %v9941_v6, %v9941_v6  ;;  %v10110_v12 = vrot.slane %v9934_v9, %v19812_v4  ;;  %v10126_v58 = vrot.slane %v9941_v6, %v19812_v4 }
 0x5d0   : > { %v19206_v61 = vsel %vm19174_vm1, %v10725_v44, 0  ;;  %v10761_v21 = vshrl.u32 %v19194_v47, 16 }
 0x5d1   : > { %v10111_v3 = vcombine.high %v10110_v12, %v10110_v12  ;;  %v10118_v49 = vrot.slane %v9942_v42, %v19812_v4  ;;  %v10127_v46 = vcombine.high %v10126_v58, %v10126_v58  ;;  %v10134_v29 = vrot.slane %v9943_v14, %v19812_v4 }
 0x5d2   : > { %v10464_v26 = vsel %vm5125_vm4, %v10110_v12, -inf  ;;  %v10492_v63 = vsel %vm5125_vm4, %v10126_v58, -inf }
 0x5d3   : > { %v10119_v45 = vcombine.high %v10118_v49, %v10118_v49  ;;  %v10135_v28 = vcombine.high %v10134_v29, %v10134_v29  ;;  %v10465_v15 = vrot.slane %v10464_v26, 4  ;;  %v10471_v54 = vsel %vm5125_vm4, %v10111_v3, -inf }
 0x5d4   : > { %v10472_v48 = vrot.slane %v10471_v54, 4  ;;  %v10478_v32 = vsel %vm5125_vm4, %v10118_v49, -inf  ;;  %v10493_v36 = vrot.slane %v10492_v63, 4  ;;  %v10499_v10 = vsel %vm5125_vm4, %v10127_v46, -inf }
 0x5d5   : > { %v10466_v34 = vmax.f32 %v10464_v26, %v10465_v15  ;;  %v10479_v38 = vrot.slane %v10478_v32, 4  ;;  %v10485_v37 = vsel %vm5125_vm4, %v10119_v45, -inf  ;;  %v10500_v55 = vrot.slane %v10499_v10, 4 }
 0x5d6   : > { %v10473_v18 = vmax.f32 %v10471_v54, %v10472_v48  ;;  %v10486_v11 = vrot.slane %v10485_v37, 4  ;;  %v10494_v1 = vmax.f32 %v10492_v63, %v10493_v36  ;;  %v10506_v31 = vsel %vm5125_vm4, %v10134_v29, -inf }
 0x5d7   : > { %v10467_v17 = vrot.slane %v10466_v34, 2  ;;  %v10480_v2 = vmax.f32 %v10478_v32, %v10479_v38  ;;  %v10501_v33 = vmax.f32 %v10499_v10, %v10500_v55  ;;  %v10507_v20 = vrot.slane %v10506_v31, 4 }
 0x5d8   : > { %v10474_v30 = vrot.slane %v10473_v18, 2  ;;  %v10487_v41 = vmax.f32 %v10485_v37, %v10486_v11  ;;  %v10495_v27 = vrot.slane %v10494_v1, 2  ;;  %v10513_v0 = vsel %vm5125_vm4, %v10135_v28, -inf }
 0x5d9   : > { %v10468_v7 = vmax.f32 %v10466_v34, %v10467_v17  ;;  %v10481_v8 = vrot.slane %v10480_v2, 2  ;;  %v10502_v50 = vrot.slane %v10501_v33, 2  ;;  %v10508_v43 = vmax.f32 %v10506_v31, %v10507_v20 }
 0x5da   : > { %v10475_v16 = vmax.f32 %v10473_v18, %v10474_v30  ;;  %v10488_v60 = vrot.slane %v10487_v41, 2  ;;  %v10496_v19 = vmax.f32 %v10494_v1, %v10495_v27  ;;  %v10514_v51 = vrot.slane %v10513_v0, 4 }
 0x5db   : > { %v10469_v53 = vrot.slane %v10468_v7, 1  ;;  %v10482_v57 = vmax.f32 %v10480_v2, %v10481_v8  ;;  %v10503_v5 = vmax.f32 %v10501_v33, %v10502_v50  ;;  %v10509_v40 = vrot.slane %v10508_v43, 2 }
 0x5dc   : > { %v10476_v24 = vrot.slane %v10475_v16, 1  ;;  %v10489_v39 = vmax.f32 %v10487_v41, %v10488_v60  ;;  %v10497_v23 = vrot.slane %v10496_v19, 1  ;;  %v10515_v9 = vmax.f32 %v10513_v0, %v10514_v51 }
 0x5dd   : > { %v10470_v6 = vmax.f32 %v10468_v7, %v10469_v53  ;;  %v10483_v59 = vrot.slane %v10482_v57, 1  ;;  %v10504_v44 = vrot.slane %v10503_v5, 1  ;;  %v10510_v42 = vmax.f32 %v10508_v43, %v10509_v40 }
 0x5de   : > { %v10477_v14 = vmax.f32 %v10475_v16, %v10476_v24  ;;  %v10490_v12 = vrot.slane %v10489_v39, 1  ;;  %v10498_v58 = vmax.f32 %v10496_v19, %v10497_v23  ;;  %v10516_v3 = vrot.slane %v10515_v9, 2 }
 0x5df   : > { %v10484_v49 = vmax.f32 %v10482_v57, %v10483_v59  ;;  %v10505_v46 = vmax.f32 %v10503_v5, %v10504_v44  ;;  %v10511_v29 = vrot.slane %v10510_v42, 1  ;;  %v10560_v26 = vpack.c.bf16 %v10470_v6, %v10470_v6 }
 0x5e0   : > { %v10491_v63 = vmax.f32 %v10489_v39, %v10490_v12  ;;  %v10517_v45 = vmax.f32 %v10515_v9, %v10516_v3  ;;  %v10561_v28 = vpack.c.bf16 %v10477_v14, %v10477_v14  ;;  %v10564_v15 = vpack.c.bf16 %v10498_v58, %v10498_v58 }
 0x5e1   : > { %v10512_v54 = vmax.f32 %v10510_v42, %v10511_v29  ;;  %v10562_v48 = vpack.c.bf16 %v10484_v49, %v10484_v49  ;;  %v10565_v32 = vpack.c.bf16 %v10505_v46, %v10505_v46  ;;  %v10656_v36 = vunpack.c.l.b16 %v10560_v26 }
 0x5e2   : > { %v10518_v10 = vrot.slane %v10517_v45, 1  ;;  %v10563_v34 = vpack.c.bf16 %v10491_v63, %v10491_v63  ;;  %v10657_v38 = vunpack.c.l.b16 %v10561_v28  ;;  %v10660_v37 = vunpack.c.l.b16 %v10564_v15 }
 0x5e3   : > { %v10566_v55 = vpack.c.bf16 %v10512_v54, %v10512_v54  ;;  %v10658_v18 = vunpack.c.l.b16 %v10562_v48  ;;  %v10661_v11 = vunpack.c.l.b16 %v10565_v32  ;;  %v10695_v1 = vsel %vm6328_vm6, %v10656_v36, %v19165_v56 }
 0x5e4   : > { %v10519_v31 = vmax.f32 %v10517_v45, %v10518_v10  ;;  %v10659_v17 = vunpack.c.l.b16 %v10563_v34  ;;  %v10700_v2 = vsel %vm6328_vm6, %v10657_v38, %v19168_v13  ;;  %v10843_v33 = vcombine.low %v19182_v22, %v19186_v35 }
 0x5e5   : > { %v10662_v20 = vunpack.c.l.b16 %v10566_v55  ;;  %v10696_v30 = vsel %vm6330_vm7, %v10658_v18, %v10695_v1  ;;  %v10885_v41 = vcombine.low %v19190_v62, %v19194_v47  ;;  %v10927_v27 = vcombine.low %v19202_v52, %v19206_v61 }
 0x5e6   : > { %v10567_v0 = vpack.c.bf16 %v10519_v31, %v10519_v31  ;;  %v10697_v56 = vsel %vm6332_vm8, %v10660_v37, %v10696_v30  ;;  %v10701_v7 = vsel %vm6330_vm7, %v10659_v17, %v10700_v2  ;;  %v10851_v8 = vrot.slane %v10843_v33, %v19812_v4 }
 0x5e7   : > { %v10702_v13 = vsel %vm6332_vm8, %v10661_v11, %v10701_v7  ;;  %v10698_v50 = vsel %vm6334_vm9, %v10662_v20, %v10697_v56  ;;  %v10893_v43 = vrot.slane %v10885_v41, %v19812_v4  ;;  %v10935_v16 = vrot.slane %v10927_v27, %v19812_v4 }
 0x5e8   : > { %v10663_v60 = vunpack.c.l.b16 %v10567_v0  ;;  %v10710_v19 = vpack.c.b16 %v10698_v50, %v10698_v50  ;;  %v10803_v51 = vrot.slane %v19182_v22, 1  ;;  %v10804_v53 = vrot.slane %v19186_v35, 1 }
 0x5e9   : > { %v13546_v57 = vcombine.low %v10851_v8, %v10893_v43  ;;  %v10805_v5 = vrot.slane %v19190_v62, 1  ;;  %v10806_v40 = vrot.slane %v19194_v47, 1  ;;  %v10807_v24 = vrot.slane %v19202_v52, 1 }
 0x5ea   : > { %v10703_v39 = vsel %vm6334_vm9, %v10663_v60, %v10702_v13  ;;  %v10726_v23 = vsel %vm17514_vm14, 0, %v10710_v19  ;;  %v10808_v9 = vrot.slane %v19206_v61, 1  ;;  %v10860_v6 = vcombine.low %v10803_v51, %v10804_v53 }
 0x5eb   : > { %v10711_v59 = vpack.c.b16 %v10703_v39, %v10703_v39  ;;  %v19243_v44 = vsel %vm19174_vm1, %v10726_v23, 0  ;;  %v11193_v42 = vrot.slane %v13546_v57, %v19812_v4  ;;  %v10902_v14 = vcombine.low %v10805_v5, %v10806_v40  ;;  %v14649_v5 = vld [vmem:[#allocation4 + $0x270] ss:$8 sps:$4 sm:$0xff]   ;;  %v14657_v39 = vld [vmem:[#allocation4 + $0x264] ss:$8 sps:$4 sm:$0xff]  }
 0x5ec   : > { %v10809_v12 = vrot.slane %v19243_v44, 1  ;;  %v10868_v58 = vrot.slane %v10860_v6, %v19812_v4  ;;  %v10944_v3 = vcombine.low %v10807_v24, %v10808_v9  ;;  %v10740_v49 = vshrl.u32 %v19182_v22, 16 }
 0x5ed   : > { %v10727_v46 = vsel %vm17514_vm14, 0, %v10711_v59  ;;  %v10910_v29 = vrot.slane %v10902_v14, %v19812_v4  ;;  %v10742_v26 = vshll.u32 %v19182_v22, 16  ;;  %v10747_v63 = vshrl.u32 %v19186_v35, 16 }
 0x5ee   : > { %v19256_v45 = vsel %vm19174_vm1, %v10727_v46, 0  ;;  %v10952_v28 = vrot.slane %v10944_v3, %v19812_v4  ;;  %v10749_v15 = vshll.u32 %v19186_v35, 16  ;;  %v10754_v54 = vshrl.u32 %v19190_v62, 16 }
 0x5ef   : > { %v10969_v25 = vcombine.low %v19243_v44, %v19256_v45  ;;  %v10810_v48 = vrot.slane %v19256_v45, 1  ;;  %v13550_v32 = vcombine.low %v10868_v58, %v10910_v29  ;;  %v10744_v36 = vrot.slane %v10742_v26, 1 }
 0x5f0   : > { %v10751_v10 = vrot.slane %v10749_v15, 1  ;;  %v10756_v34 = vshll.u32 %v19190_v62, 16  ;;  %v10763_v38 = vshll.u32 %v19194_v47, 16  ;;  %v10768_v2 = vshrl.u32 %v19202_v52, 16 }
 0x5f1   : > { %v10977_v37 = vrot.slane %v10969_v25, %v19812_v4  ;;  %v10986_v55 = vcombine.low %v10809_v12, %v10810_v48  ;;  %v19269_v18 = vrot.slane %v13550_v32, %v19812_v4  ;;  %v10745_v11 = vor.u32 %v10744_v36, %v10740_v49  ;;  %v14655_v25 = vld [vmem:[#allocation4 + $0x260] ss:$8 sps:$4 sm:$0xff]  }
 0x5f2   : > { %v10752_v1 = vor.u32 %v10751_v10, %v10747_v63  ;;  %v10758_v31 = vrot.slane %v10756_v34, 1  ;;  %v10765_v17 = vrot.slane %v10763_v38, 1  ;;  %v10770_v30 = vshll.u32 %v19202_v52, 16 }
 0x5f3   : > { %v13548_v33 = vcombine.low %v10935_v16, %v10977_v37  ;;  %v10994_v20 = vrot.slane %v10986_v55, %v19812_v4  ;;  %v10775_v41 = vshrl.u32 %v19206_v61, 16  ;;  %v10777_v56 = vshll.u32 %v19206_v61, 16 }
 0x5f4   : > { %v10759_v27 = vor.u32 %v10758_v31, %v10754_v54  ;;  %v10766_v0 = vor.u32 %v10765_v17, %v10761_v21  ;;  %v10782_v7 = vshrl.u32 %v19243_v44, 16  ;;  %v10772_v50 = vrot.slane %v10770_v30, 1 }
 0x5f5   : > { %v11207_v8 = vrot.slane %v13548_v33, %v19812_v4  ;;  %v13552_v13 = vcombine.low %v10952_v28, %v10994_v20  ;;  %v10784_v43 = vshll.u32 %v19243_v44, 16  ;;  %v10779_v60 = vrot.slane %v10777_v56, 1 }
 0x5f6   : > { %v10789_v16 = vshrl.u32 %v19256_v45, 16  ;;  %v10791_v19 = vshll.u32 %v19256_v45, 16  ;;  %v10844_v51 = vcombine.low %v10745_v11, %v10752_v1  ;;  %v10773_v24 = vor.u32 %v10772_v50, %v10768_v2  ;;  %v14663_v11 = vld [vmem:[#allocation4 + $0x254] ss:$8 sps:$4 sm:$0xff]  }
 0x5f7   : > { %v11215_v53 = vcombine.low %v11193_v42, %v11207_v8  ;;  %v11216_v57 = vcombine.high %v11193_v42, %v11207_v8  ;;  %v19282_v40 = vrot.slane %v13552_v13, %v19812_v4  ;;  %v10780_v23 = vor.u32 %v10779_v60, %v10775_v41 }
 0x5f8   : > { %v10786_v9 = vrot.slane %v10784_v43, 1  ;;  %v10793_v6 = vrot.slane %v10791_v19, 1  ;;  %v10858_v59 = vrot.slane %v10844_v51, %v19812_v4  ;;  %v10886_v58 = vcombine.low %v10759_v27, %v10766_v0 }
 0x5f9   : > { %12115 = vmatprep.mubr.bf16.mxu0 %v11216_v57  ;;  %v11251_v14 = vcombine.low %v19269_v18, %v19282_v40  ;;  %v11252_v12 = vcombine.high %v19269_v18, %v19282_v40  ;;  %v10811_v42 = vrot.slane %v10740_v49, 1  ;;  %v10928_v29 = vcombine.low %v10773_v24, %v10780_v23  ;;  %v14669_v57 = vld [vmem:[#allocation4 + $0x244] ss:$8 sps:$4 sm:$0xff]   ;;  %v14757_v18 = vld [vmem:[#allocation4 + $0x440] ss:$8 sps:$4 sm:$0xff]  }
 0x5fa   : > { %12116 = vmatmul.mubr.bf16.vlgmr.msra.gmra.mxu0 %v11215_v53  ;;  %v10787_v3 = vor.u32 %v10786_v9, %v10782_v7  ;;  %v10794_v46 = vor.u32 %v10793_v6, %v10789_v16  ;;  %v10812_v28 = vrot.slane %v10742_v26, 2  ;;  %v10900_v48 = vrot.slane %v10886_v58, %v19812_v4  ;;  %v14667_v6 = vld [vmem:[#allocation4 + $0x240] ss:$8 sps:$4 sm:$0xff]   ;;  %v14762_v40 = vld [vmem:[#allocation4 + $0x434] ss:$8 sps:$4 sm:$0xff]  }
 0x5fb   : > { %12170 = vmatpush1.bf16.msra.mxu0 %v14649_v5  ;;  %12201 = vmatprep.mubr.bf16.mxu0 %v11252_v12  ;;  %v10814_v32 = vrot.slane %v10747_v63, 1  ;;  %v10815_v36 = vrot.slane %v10749_v15, 2  ;;  %v10817_v10 = vrot.slane %v10754_v54, 1  ;;  %v10942_v37 = vrot.slane %v10928_v29, %v19812_v4  ;;  %v14661_v15 = vld [vmem:[#allocation4 + $0x250] ss:$8 sps:$4 sm:$0xff]  }
 0x5fc   : > { %12171 = vmatprep.subr.bf16.mxu0 %v14657_v39  ;;  %v10970_v55 = vcombine.low %v10787_v3, %v10794_v46  ;;  %v10813_v1 = vor.u32 %v10812_v28, %v10811_v42  ;;  %v10818_v49 = vrot.slane %v10756_v34, 2  ;;  %v13547_v31 = vcombine.low %v10858_v59, %v10900_v48  ;;  %v14658_v12 = vld [vmem:[#allocation4 + $0x370] ss:$8 sps:$4 sm:$0xff]   ;;  %v14666_v3 = vld [vmem:[#allocation4 + $0x364] ss:$8 sps:$4 sm:$0xff]  }
 0x5fd   : > { %v10816_v17 = vor.u32 %v10815_v36, %v10814_v32  ;;  %v10820_v33 = vrot.slane %v10761_v21, 1  ;;  %v10821_v20 = vrot.slane %v10763_v38, 2  ;;  %v10823_v0 = vrot.slane %v10768_v2, 1 }
 0x5fe   : > { %v10984_v26 = vrot.slane %v10970_v55, %v19812_v4  ;;  %v10819_v27 = vor.u32 %v10818_v49, %v10817_v10  ;;  %v10824_v8 = vrot.slane %v10770_v30, 2  ;;  %v11200_v63 = vrot.slane %v13547_v31, %v19812_v4 }
 0x5ff   : > { %12172 = vmatpush1.bf16.msra.mxu0 %v14655_v25  ;;  %v10822_v54 = vor.u32 %v10821_v20, %v10820_v33  ;;  %v10826_v13 = vrot.slane %v10775_v41, 1  ;;  %v10827_v50 = vrot.slane %v10777_v56, 2  ;;  %v10829_v34 = vrot.slane %v10782_v7, 1  ;;  %v14679_v33 = vld [vmem:[#allocation4 + $0x220] ss:$8 sps:$4 sm:$0xff]  }
 0x600   : > { %v13549_v60 = vcombine.low %v10942_v37, %v10984_v26  ;;  %12173 = vmatprep.subr.bf16.mxu0 %v14663_v11  ;;  %v10825_v51 = vor.u32 %v10824_v8, %v10823_v0  ;;  %v10830_v53 = vrot.slane %v10784_v43, 2  ;;  %v10832_v38 = vrot.slane %v10789_v16, 1  ;;  %v14664_v37 = vld [vmem:[#allocation4 + $0x360] ss:$8 sps:$4 sm:$0xff]   ;;  %v14670_v26 = vld [vmem:[#allocation4 + $0x350] ss:$8 sps:$4 sm:$0xff]  }
 0x601   : > { %v10828_v21 = vor.u32 %v10827_v50, %v10826_v13  ;;  %v10833_v5 = vrot.slane %v10791_v19, 2  ;;  %v10861_v24 = vcombine.low %v10813_v1, %v10816_v17  ;;  %v10903_v39 = vcombine.low %v10819_v27, %v10822_v54  ;;  %v14675_v19 = vld [vmem:[#allocation4 + $0x234] ss:$8 sps:$4 sm:$0xff]   ;;  %v14685_v50 = vld [vmem:[#allocation4 + $0x210] ss:$8 sps:$4 sm:$0xff]  }
 0x602   : > { %v11214_v2 = vrot.slane %v13549_v60, %v19812_v4  ;;  %v10831_v30 = vor.u32 %v10830_v53, %v10829_v34  ;;  %v10835_v23 = vrot.slane %v19182_v22, 2  ;;  %v10836_v7 = vrot.slane %v19186_v35, 2  ;;  %v14687_v27 = vld [vmem:[#allocation4 + $0x214] ss:$8 sps:$4 sm:$0xff]   ;;  %v14676_v60 = vld [vmem:[#allocation4 + $0x340] ss:$8 sps:$4 sm:$0xff]  }
 0x603   : > { %v10834_v9 = vor.u32 %v10833_v5, %v10832_v38  ;;  %v10875_v41 = vrot.slane %v10861_v24, %v19812_v4  ;;  %v10945_v56 = vcombine.low %v10825_v51, %v10828_v21  ;;  %12174 = vmatpush1.bf16.msra.mxu0 %v14661_v15  ;;  %v10917_v16 = vrot.slane %v10903_v39, %v19812_v4  ;;  %v14678_v15 = vld [vmem:[#allocation4 + $0x344] ss:$8 sps:$4 sm:$0xff]   ;;  %v14691_v21 = vld [vmem:[#allocation4 + $0x200] ss:$8 sps:$4 sm:$0xff]   ;;  %v14682_v38 = vld [vmem:[#allocation4 + $0x330] ss:$8 sps:$4 sm:$0xff]  }
 0x604   : > { %v11217_v43 = vcombine.low %v11200_v63, %v11214_v2  ;;  %v11218_v59 = vcombine.high %v11200_v63, %v11214_v2  ;;  %12175 = vmatprep.subr.bf16.mxu0 %v14669_v57  ;;  %v10837_v58 = vrot.slane %v19190_v62, 2  ;;  %v10838_v46 = vrot.slane %v19194_v47, 2  ;;  %v14673_v62 = vld [vmem:[#allocation4 + $0x230] ss:$8 sps:$4 sm:$0xff]   ;;  %v14681_v47 = vld [vmem:[#allocation4 + $0x224] ss:$8 sps:$4 sm:$0xff]  }
 0x605   : > { %v10959_v42 = vrot.slane %v10945_v56, %v19812_v4  ;;  %v10987_v22 = vcombine.low %v10831_v30, %v10834_v9  ;;  %v10839_v29 = vrot.slane %v19202_v52, 2  ;;  %v13551_v28 = vcombine.low %v10875_v41, %v10917_v16  ;;  %v14693_v51 = vld [vmem:[#allocation4 + $0x204] ss:$8 sps:$4 sm:$0xff]   ;;  %v14684_v57 = vld [vmem:[#allocation4 + $0x334] ss:$8 sps:$4 sm:$0xff]  }
 0x606   : > { %12158 = vmatprep.mubr.bf16.mxu1 %v11218_v59  ;;  %v10840_v35 = vrot.slane %v19206_v61, 2  ;;  %v10841_v25 = vrot.slane %v19243_v44, 2  ;;  %v10842_v48 = vrot.slane %v19256_v45, 2  ;;  %v10877_v36 = vcombine.low %v10835_v23, %v10836_v7  ;;  %v14672_v61 = vld [vmem:[#allocation4 + $0x354] ss:$8 sps:$4 sm:$0xff]  }
 0x607   : > { %12159 = vmatmul.mubr.bf16.vlgmr.msra.gmra.mxu1 %v11217_v43  ;;  %v11001_v32 = vrot.slane %v10987_v22, %v19812_v4  ;;  %12176 = vmatpush1.bf16.msra.mxu0 %v14667_v6  ;;  %v10919_v10 = vcombine.low %v10837_v58, %v10838_v46  ;;  %v19311_v31 = vrot.slane %v13551_v28, %v19812_v4  ;;  %v14699_v5 = vld [vmem:[#allocation4 + $0x2f4] ss:$8 sps:$4 sm:$0xff]   ;;  %v14690_v24 = vld [vmem:[#allocation4 + $0x324] ss:$8 sps:$4 sm:$0xff]   ;;  %v14697_v2 = vld [vmem:[#allocation4 + $0x2f0] ss:$8 sps:$4 sm:$0xff]  }
 0x608   : > { %12213 = vmatpush1.bf16.msra.mxu1 %v14658_v12  ;;  %12177 = vmatprep.subr.bf16.mxu0 %v14675_v19  ;;  %v10961_v52 = vcombine.low %v10839_v29, %v10840_v35  ;;  %v11003_v55 = vcombine.low %v10841_v25, %v10842_v48  ;;  %v10884_v44 = vrot.slane %v10877_v36, %v19812_v4  ;;  %v14688_v30 = vld [vmem:[#allocation4 + $0x320] ss:$8 sps:$4 sm:$0xff]   ;;  %v14705_v39 = vld [vmem:[#allocation4 + $0x2e4] ss:$8 sps:$4 sm:$0xff]   ;;  %v14696_v23 = vld [vmem:[#allocation4 + $0x314] ss:$8 sps:$4 sm:$0xff]  }
 0x609   : > { %v13553_v11 = vcombine.low %v10959_v42, %v11001_v32  ;;  %12214 = vmatprep.subr.bf16.mxu1 %v14666_v3  ;;  %v10926_v45 = vrot.slane %v10919_v10, %v19812_v4  ;;  %v14703_v9 = vld [vmem:[#allocation4 + $0x2e0] ss:$8 sps:$4 sm:$0xff]   ;;  %v14694_v41 = vld [vmem:[#allocation4 + $0x310] ss:$8 sps:$4 sm:$0xff]   ;;  %v14711_v56 = vld [vmem:[#allocation4 + $0x2d4] ss:$8 sps:$4 sm:$0xff]  }
 0x60a   : > { %v10968_v1 = vrot.slane %v10961_v52, %v19812_v4  ;;  %v11010_v49 = vrot.slane %v11003_v55, %v19812_v4  ;;  %v14702_v6 = vld [vmem:[#allocation4 + $0x304] ss:$8 sps:$4 sm:$0xff]   ;;  %v14709_v7 = vld [vmem:[#allocation4 + $0x2d0] ss:$8 sps:$4 sm:$0xff]   ;;  %v14700_v43 = vld [vmem:[#allocation4 + $0x300] ss:$8 sps:$4 sm:$0xff]  }
 0x60b   : > { %v19314_v17 = vrot.slane %v13553_v11, %v19812_v4  ;;  %12178 = vmatpush1.bf16.msra.mxu0 %v14673_v62  ;;  %v11255_v20 = vcombine.low %v10884_v44, %v10926_v45  ;;  %v14717_v59 = vld [vmem:[#allocation4 + $0x2c4] ss:$8 sps:$4 sm:$0xff]   ;;  %v14708_v12 = vld [vmem:[#allocation4 + $0x3f4] ss:$8 sps:$4 sm:$0xff]   ;;  %v14715_v16 = vld [vmem:[#allocation4 + $0x2c0] ss:$8 sps:$4 sm:$0xff]  }
 0x60c   : > { %12215 = vmatpush1.bf16.msra.mxu1 %v14664_v37  ;;  %12179 = vmatprep.subr.bf16.mxu0 %v14681_v47  ;;  %v11256_v0 = vcombine.low %v10968_v1, %v11010_v49  ;;  %v14706_v19 = vld [vmem:[#allocation4 + $0x3f0] ss:$8 sps:$4 sm:$0xff]   ;;  %v14723_v58 = vld [vmem:[#allocation4 + $0x2b4] ss:$8 sps:$4 sm:$0xff]   ;;  %v14714_v42 = vld [vmem:[#allocation4 + $0x3e4] ss:$8 sps:$4 sm:$0xff]  }
 0x60d   : > { %v11253_v8 = vcombine.low %v19311_v31, %v19314_v17  ;;  %v11254_v63 = vcombine.high %v19311_v31, %v19314_v17  ;;  %12216 = vmatprep.subr.bf16.mxu1 %v14672_v61  ;;  %v19321_v54 = vrot.slane %v11255_v20, %v19812_v4  ;;  %v14721_v22 = vld [vmem:[#allocation4 + $0x2b0] ss:$8 sps:$4 sm:$0xff]   ;;  %v14712_v3 = vld [vmem:[#allocation4 + $0x3e0] ss:$8 sps:$4 sm:$0xff]   ;;  %v14729_v46 = vld [vmem:[#allocation4 + $0x2a4] ss:$8 sps:$4 sm:$0xff]  }
 0x60e   : > { %v19324_v13 = vrot.slane %v11256_v0, %v19812_v4  ;;  %v14720_v29 = vld [vmem:[#allocation4 + $0x3d4] ss:$8 sps:$4 sm:$0xff]   ;;  %v14727_v28 = vld [vmem:[#allocation4 + $0x2a0] ss:$8 sps:$4 sm:$0xff]   ;;  %v14718_v35 = vld [vmem:[#allocation4 + $0x3d0] ss:$8 sps:$4 sm:$0xff]  }
 0x60f   : > { %12244 = vmatprep.mubr.bf16.mxu1 %v11254_v63  ;;  %12180 = vmatpush1.bf16.msra.mxu0 %v14679_v33  ;;  %v14735_v25 = vld [vmem:[#allocation4 + $0x294] ss:$8 sps:$4 sm:$0xff]   ;;  %v14726_v48 = vld [vmem:[#allocation4 + $0x3c4] ss:$8 sps:$4 sm:$0xff]   ;;  %v14733_v32 = vld [vmem:[#allocation4 + $0x290] ss:$8 sps:$4 sm:$0xff]  }
 0x610   : > { %12217 = vmatpush1.bf16.msra.mxu1 %v14670_v26  ;;  %12181 = vmatprep.subr.bf16.mxu0 %v14687_v27  ;;  %v11271_v34 = vcombine.low %v19321_v54, %v19324_v13  ;;  %v11272_v53 = vcombine.high %v19321_v54, %v19324_v13  ;;  %v14724_v62 = vld [vmem:[#allocation4 + $0x3c0] ss:$8 sps:$4 sm:$0xff]   ;;  %v14741_v36 = vld [vmem:[#allocation4 + $0x284] ss:$8 sps:$4 sm:$0xff]   ;;  %v14732_v10 = vld [vmem:[#allocation4 + $0x3b4] ss:$8 sps:$4 sm:$0xff]  }
 0x611   : > { %12218 = vmatprep.subr.bf16.mxu1 %v14678_v15  ;;  %v14739_v37 = vld [vmem:[#allocation4 + $0x280] ss:$8 sps:$4 sm:$0xff]   ;;  %v14730_v47 = vld [vmem:[#allocation4 + $0x3b0] ss:$8 sps:$4 sm:$0xff]   ;;  %v14747_v52 = vld [vmem:[#allocation4 + $0x474] ss:$8 sps:$4 sm:$0xff]  }
 0x612   : > { %v14738_v55 = vld [vmem:[#allocation4 + $0x3a4] ss:$8 sps:$4 sm:$0xff]   ;;  %v14745_v11 = vld [vmem:[#allocation4 + $0x470] ss:$8 sps:$4 sm:$0xff]   ;;  %v14736_v61 = vld [vmem:[#allocation4 + $0x3a0] ss:$8 sps:$4 sm:$0xff]  }
 0x613   : > { %12182 = vmatpush1.bf16.msra.mxu0 %v14685_v50  ;;  %v14753_v44 = vld [vmem:[#allocation4 + $0x464] ss:$8 sps:$4 sm:$0xff]   ;;  %v14744_v45 = vld [vmem:[#allocation4 + $0x394] ss:$8 sps:$4 sm:$0xff]   ;;  %v14751_v1 = vld [vmem:[#allocation4 + $0x460] ss:$8 sps:$4 sm:$0xff]  }
 0x614   : > { %12219 = vmatpush1.bf16.msra.mxu1 %v14676_v60  ;;  %12183 = vmatprep.subr.bf16.mxu0 %v14693_v51  ;;  %v14742_v49 = vld [vmem:[#allocation4 + $0x390] ss:$8 sps:$4 sm:$0xff]   ;;  %v14756_v33 = vld [vmem:[#allocation4 + $0x454] ss:$8 sps:$4 sm:$0xff]   ;;  %v14750_v20 = vld [vmem:[#allocation4 + $0x384] ss:$8 sps:$4 sm:$0xff]  }
 0x615   : > { %12220 = vmatprep.subr.bf16.mxu1 %v14684_v57  ;;  %v14754_v26 = vld [vmem:[#allocation4 + $0x450] ss:$8 sps:$4 sm:$0xff]   ;;  %v14748_v27 = vld [vmem:[#allocation4 + $0x380] ss:$8 sps:$4 sm:$0xff]   ;;  %v14759_v0 = vld [vmem:[#allocation4 + $0x444] ss:$8 sps:$4 sm:$0xff]  }
 0x616   : > { %v14765_v63 = vld [vmem:[#allocation4 + $0x424] ss:$8 sps:$4 sm:$0xff]   ;;  %v14763_v15 = vld [vmem:[#allocation4 + $0x420] ss:$8 sps:$4 sm:$0xff]   ;;  %v14768_v50 = vld [vmem:[#allocation4 + $0x414] ss:$8 sps:$4 sm:$0xff]  }
 0x617   : > { %12184 = vmatpush1.bf16.msra.mxu0 %v14691_v21  ;;  %v14766_v60 = vld [vmem:[#allocation4 + $0x410] ss:$8 sps:$4 sm:$0xff]   ;;  %v14771_v51 = vld [vmem:[#allocation4 + $0x404] ss:$8 sps:$4 sm:$0xff]   ;;  %v14774_v57 = vld [vmem:[#allocation4 + $0x4f4] ss:$8 sps:$4 sm:$0xff]  }
 0x618   : > { %12221 = vmatpush1.bf16.msra.mxu1 %v14682_v38  ;;  %12185 = vmatprep.subr.bf16.mxu0 %v14699_v5  ;;  %v14772_v21 = vld [vmem:[#allocation4 + $0x4f0] ss:$8 sps:$4 sm:$0xff]   ;;  %v14777_v31 = vld [vmem:[#allocation4 + $0x4e4] ss:$8 sps:$4 sm:$0xff]   ;;  %v14775_v17 = vld [vmem:[#allocation4 + $0x4e0] ss:$8 sps:$4 sm:$0xff]  }
 0x619   : > { %12222 = vmatprep.subr.bf16.mxu1 %v14690_v24  ;;  %v14778_v38 = vld [vmem:[#allocation4 + $0x4d0] ss:$8 sps:$4 sm:$0xff]   ;;  %v14783_v5 = vld [vmem:[#allocation4 + $0x4c4] ss:$8 sps:$4 sm:$0xff]   ;;  %v14781_v24 = vld [vmem:[#allocation4 + $0x4c0] ss:$8 sps:$4 sm:$0xff]  }
 0x61a   : > { %v14804_v54 = vld [vmem:[%s19534_s7 + $0x54] ss:$8 sps:$4 sm:$0xff]   ;;  %v14802_v13 = vld [vmem:[%s19534_s7 + $0x50] ss:$8 sps:$4 sm:$0xff]  }
 0x61b   : > { %12186 = vmatpush2.bf16.msra.mxu0 %v14697_v2  ;;  %v14786_v2 = vld [vmem:[#allocation4 + $0x4b4] ss:$8 sps:$4 sm:$0xff]  }
 0x61c   : > { %12223 = vmatpush1.bf16.msra.mxu1 %v14688_v30  ;;  %12187 = vmatprep.subr.bf16.mxu0 %v14705_v39  ;;  %v14784_v30 = vld [vmem:[#allocation4 + $0x4b0] ss:$8 sps:$4 sm:$0xff]   ;;  %v14789_v39 = vld [vmem:[#allocation4 + $0x4a4] ss:$8 sps:$4 sm:$0xff]  }
 0x61d   : > { %12224 = vmatprep.subr.bf16.mxu1 %v14696_v23  ;;  %v14787_v23 = vld [vmem:[#allocation4 + $0x4a0] ss:$8 sps:$4 sm:$0xff]  }
 0x61f   : > { %12188 = vmatpush2.bf16.msra.mxu0 %v14703_v9  ;;  %v14792_v9 = vld [vmem:[#allocation4 + $0x494] ss:$8 sps:$4 sm:$0xff]  }
 0x620   : > { %12225 = vmatpush1.bf16.msra.mxu1 %v14694_v41  ;;  %12189 = vmatprep.subr.bf16.mxu0 %v14711_v56  ;;  %v14790_v41 = vld [vmem:[#allocation4 + $0x490] ss:$8 sps:$4 sm:$0xff]   ;;  %v14795_v56 = vld [vmem:[#allocation4 + $0x484] ss:$8 sps:$4 sm:$0xff]  }
 0x621   : > { %12226 = vmatprep.subr.bf16.mxu1 %v14702_v6  ;;  %v14793_v6 = vld [vmem:[#allocation4 + $0x480] ss:$8 sps:$4 sm:$0xff]  }
 0x623   : > { %12190 = vmatpush2.bf16.msra.mxu0 %v14709_v7  ;;  %v14796_v7 = vld [vmem:[%s19534_s7 + $0x70] ss:$8 sps:$4 sm:$0xff]  }
 0x624   : > { %12227 = vmatpush1.bf16.msra.mxu1 %v14700_v43  ;;  %12191 = vmatprep.subr.bf16.mxu0 %v14717_v59  ;;  %v14798_v43 = vld [vmem:[%s19534_s7 + $0x74] ss:$8 sps:$4 sm:$0xff]   ;;  %v14801_v59 = vld [vmem:[%s19534_s7 + $0x64] ss:$8 sps:$4 sm:$0xff]  }
 0x625   : > { %12228 = vmatprep.subr.bf16.mxu1 %v14708_v12  ;;  %v14799_v12 = vld [vmem:[%s19534_s7 + $0x60] ss:$8 sps:$4 sm:$0xff]  }
 0x627   : > { %12192 = vmatpush2.bf16.msra.mxu0 %v14715_v16  ;;  %v14805_v16 = vld [vmem:[%s19534_s7 + $0x40] ss:$8 sps:$4 sm:$0xff]  }
 0x628   : > { %12229 = vmatpush2.bf16.msra.mxu1 %v14706_v19  ;;  %12193 = vmatprep.subr.bf16.mxu0 %v14723_v58  ;;  %v14810_v19 = vld [vmem:[%s19534_s7 + $0x34] ss:$8 sps:$4 sm:$0xff]   ;;  %v14808_v58 = vld [vmem:[%s19534_s7 + $0x30] ss:$8 sps:$4 sm:$0xff]  }
 0x629   : > { %12230 = vmatprep.subr.bf16.mxu1 %v14714_v42  ;;  %v14813_v42 = vld [vmem:[%s19534_s7 + $0x24] ss:$8 sps:$4 sm:$0xff]  }
 0x62b   : > { %12194 = vmatpush2.bf16.msra.mxu0 %v14721_v22  ;;  %v14811_v22 = vld [vmem:[%s19534_s7 + $0x20] ss:$8 sps:$4 sm:$0xff]  }
 0x62c   : > { %12231 = vmatpush2.bf16.msra.mxu1 %v14712_v3  ;;  %12195 = vmatprep.subr.bf16.mxu0 %v14729_v46  ;;  %v14816_v3 = vld [vmem:[%s19534_s7 + $0x14] ss:$8 sps:$4 sm:$0xff]   ;;  %v14814_v46 = vld [vmem:[%s19534_s7 + $0x10] ss:$8 sps:$4 sm:$0xff]  }
 0x62d   : > { %12232 = vmatprep.subr.bf16.mxu1 %v14720_v29  ;;  %v14817_v29 = vld [vmem:[%s19534_s7] ss:$8 sps:$4 sm:$0xff]  }
 0x62f   : > { %12196 = vmatpush2.bf16.msra.mxu0 %v14727_v28  ;;  %v14819_v28 = vld [vmem:[%s19534_s7 + $0x4] ss:$8 sps:$4 sm:$0xff]  }
 0x630   : > { %12233 = vmatpush2.bf16.msra.mxu1 %v14718_v35  ;;  %12197 = vmatprep.subr.bf16.mxu0 %v14735_v25  ;;  %v14820_v35 = vld [vmem:[%s19534_s7 + $0xf0] ss:$8 sps:$4 sm:$0xff]   ;;  %v14822_v25 = vld [vmem:[%s19534_s7 + $0xf4] ss:$8 sps:$4 sm:$0xff]  }
 0x631   : > { %12234 = vmatprep.subr.bf16.mxu1 %v14726_v48  ;;  %v14823_v48 = vld [vmem:[%s19534_s7 + $0xe0] ss:$8 sps:$4 sm:$0xff]  }
 0x633   : > { %12198 = vmatpush2.bf16.msra.mxu0 %v14733_v32  ;;  %v14825_v32 = vld [vmem:[%s19534_s7 + $0xe4] ss:$8 sps:$4 sm:$0xff]  }
 0x634   : > { %12235 = vmatpush2.bf16.msra.mxu1 %v14724_v62  ;;  %12199 = vmatprep.subr.bf16.mxu0 %v14741_v36  ;;  %v14828_v62 = vld [vmem:[%s19534_s7 + $0xd4] ss:$8 sps:$4 sm:$0xff]   ;;  %v14826_v36 = vld [vmem:[%s19534_s7 + $0xd0] ss:$8 sps:$4 sm:$0xff]  }
 0x635   : > { %12236 = vmatprep.subr.bf16.mxu1 %v14732_v10  ;;  %v14831_v10 = vld [vmem:[%s19534_s7 + $0xc4] ss:$8 sps:$4 sm:$0xff]  }
 0x637   : > { %12200 = vmatpush2.bf16.msra.mxu0 %v14739_v37  ;;  %v14829_v37 = vld [vmem:[%s19534_s7 + $0xc0] ss:$8 sps:$4 sm:$0xff]  }
 0x638   : > { %12237 = vmatpush2.bf16.msra.mxu1 %v14730_v47  ;;  %12255 = vmatprep.subr.bf16.mxu0 %v14747_v52  ;;  %v14834_v47 = vld [vmem:[%s19534_s7 + $0xb4] ss:$8 sps:$4 sm:$0xff]  }
 0x639   : > { %12238 = vmatprep.subr.bf16.mxu1 %v14738_v55  ;;  %v14844_v52 = vld [vmem:[%s19536_s9 + $0x78] sm:$0xff]  }
 0x63a   : > { %12202 = vmatmul.mubr.bf16.vlgmr.msra.gmra.mxu0 %v11251_v14  ;;  %v14760_v14 = vld [vmem:[#allocation4 + $0x430] ss:$8 sps:$4 sm:$0xff]  }
 0x63b   : > { %12256 = vmatpush1.bf16.msra.mxu0 %v14745_v11  ;;  %12287 = vmatprep.mubr.bf16.mxu0 %v11272_v53  ;;  %v14769_v53 = vld [vmem:[#allocation4 + $0x400] ss:$8 sps:$4 sm:$0xff]   ;;  %v14845_v55 = vld [vmem:[%s19536_s9 + $0x38] sm:$0xff]   ;;  %v14846_v11 = vld [vmem:[%s19536_s9 + $0x70] sm:$0xff]  }
 0x63c   : > { %12239 = vmatpush2.bf16.msra.mxu1 %v14736_v61  ;;  %12257 = vmatprep.subr.bf16.mxu0 %v14753_v44  ;;  %v14832_v61 = vld [vmem:[%s19534_s7 + $0xb0] ss:$8 sps:$4 sm:$0xff]  }
 0x63d   : > { %12240 = vmatprep.subr.bf16.mxu1 %v14744_v45  ;;  %v14847_v44 = vld [vmem:[%s19536_s9 + $0x30] sm:$0xff]   ;;  %v14837_v45 = vld [vmem:[%s19534_s7 + $0xa4] ss:$8 sps:$4 sm:$0xff]  }
 0x63f   : > { %12258 = vmatpush1.bf16.msra.mxu0 %v14751_v1  ;;  %v14848_v1 = vld [vmem:[%s19536_s9 + $0x68] sm:$0xff]  }
 0x640   : > { %12241 = vmatpush2.bf16.msra.mxu1 %v14742_v49  ;;  %12259 = vmatprep.subr.bf16.mxu0 %v14756_v33  ;;  %v14835_v49 = vld [vmem:[%s19534_s7 + $0xa0] ss:$8 sps:$4 sm:$0xff]  }
 0x641   : > { %12242 = vmatprep.subr.bf16.mxu1 %v14750_v20  ;;  %v14849_v33 = vld [vmem:[%s19536_s9 + $0x28] sm:$0xff]   ;;  %v14840_v20 = vld [vmem:[%s19534_s7 + $0x94] ss:$8 sps:$4 sm:$0xff]  }
 0x643   : > { %12260 = vmatpush1.bf16.msra.mxu0 %v14754_v26  ;;  %v14850_v26 = vld [vmem:[%s19536_s9 + $0x60] sm:$0xff]  }
 0x644   : > { %12243 = vmatpush2.bf16.msra.mxu1 %v14748_v27  ;;  %12261 = vmatprep.subr.bf16.mxu0 %v14759_v0  ;;  %v14838_v27 = vld [vmem:[%s19534_s7 + $0x90] ss:$8 sps:$4 sm:$0xff]   ;;  %v14851_v0 = vld [vmem:[%s19536_s9 + $0x20] sm:$0xff]  }
 0x645   : > { %12626 = vmatprep.subr.bf16.mxu1 %v14798_v43 }
 0x647   : > { %12245 = vmatmul.mubr.bf16.vlgmr.msra.gmra.mxu1 %v11253_v8  ;;  %12262 = vmatpush1.bf16.msra.mxu0 %v14757_v18  ;;  %v14780_v8 = vld [vmem:[#allocation4 + $0x4d4] ss:$8 sps:$4 sm:$0xff]   ;;  %v14843_v18 = vld [vmem:[%s19534_s7 + $0x84] ss:$8 sps:$4 sm:$0xff]  }
 0x648   : > { %12263 = vmatprep.subr.bf16.mxu0 %v14762_v40  ;;  %12627 = vmatpush1.bf16.msra.mxu1 %v14796_v7  ;;  %v14852_v40 = vld [vmem:[%s19536_s9 + $0x58] sm:$0xff]  }
 0x649   : > { %12628 = vmatprep.subr.bf16.mxu1 %v14801_v59 }
 0x64b   : > { %12264 = vmatpush1.bf16.msra.mxu0 %v14760_v14  ;;  %v14841_v14 = vld [vmem:[%s19534_s7 + $0x80] ss:$8 sps:$4 sm:$0xff]  }
 0x64c   : > { %12265 = vmatprep.subr.bf16.mxu0 %v14765_v63  ;;  %12629 = vmatpush1.bf16.msra.mxu1 %v14799_v12  ;;  %v14853_v63 = vld [vmem:[%s19536_s9 + $0x18] sm:$0xff]  }
 0x64d   : > { %12630 = vmatprep.subr.bf16.mxu1 %v14804_v54 }
 0x64f   : > { %12266 = vmatpush1.bf16.msra.mxu0 %v14763_v15  ;;  %v14854_v15 = vld [vmem:[%s19536_s9 + $0x50] sm:$0xff]  }
 0x650   : > { %12267 = vmatprep.subr.bf16.mxu0 %v14768_v50  ;;  %12631 = vmatpush1.bf16.msra.mxu1 %v14802_v13  ;;  %v14855_v50 = vld [vmem:[%s19536_s9 + $0x10] sm:$0xff]  }
 0x653   : > { %12268 = vmatpush1.bf16.msra.mxu0 %v14766_v60 }
 0x654   : > { %12269 = vmatprep.subr.bf16.mxu0 %v14771_v51 }
 0x657   : > { %12270 = vmatpush1.bf16.msra.mxu0 %v14769_v53 }
 0x658   : > { %12271 = vmatprep.subr.bf16.mxu0 %v14774_v57 }
 0x65b   : > { %12272 = vmatpush2.bf16.msra.mxu0 %v14772_v21 }
 0x65c   : > { %12273 = vmatprep.subr.bf16.mxu0 %v14777_v31 }
 0x65f   : > { %12274 = vmatpush2.bf16.msra.mxu0 %v14775_v17 }
 0x660   : > { %12275 = vmatprep.subr.bf16.mxu0 %v14780_v8  ;;  %v11171_v8 = vld [vmem:[%s19533_s6] sm:$0x3] }
 0x663   : > { %12276 = vmatpush2.bf16.msra.mxu0 %v14778_v38 }
 0x664   : > { %12277 = vmatprep.subr.bf16.mxu0 %v14783_v5 }
 0x667   : > { %12278 = vmatpush2.bf16.msra.mxu0 %v14781_v24  ;;  %v19824_v24 = vld [vmem:[#allocation27_spill] sm:$0xff] }
 0x668   : > { %12279 = vmatprep.subr.bf16.mxu0 %v14786_v2  ;;  %v11176_v2 = vrot.slane %v11171_v8, %v19824_v24 }
 0x66b   : > { %12280 = vmatpush2.bf16.msra.mxu0 %v14784_v30 }
 0x66c   : > { %12281 = vmatprep.subr.bf16.mxu0 %v14789_v39 }
 0x66f   : > { %12282 = vmatpush2.bf16.msra.mxu0 %v14787_v23  ;;  %v19825_v23 = vld [vmem:[#allocation13_spill] sm:$0xff] }
 0x670   : > { %12283 = vmatprep.subr.bf16.mxu0 %v14792_v9  ;;  %v11180_v9 = vrot.slane %v11171_v8, %v19825_v23 }
 0x673   : > { %12284 = vmatpush2.bf16.msra.mxu0 %v14790_v41 }
 0x674   : > { %12285 = vmatprep.subr.bf16.mxu0 %v14795_v56 }
 0x677   : > { %12286 = vmatpush2.bf16.msra.mxu0 %v14793_v6 }
 0x678   : > { %13765 = vmatprep.subr.bf16.mxu0 %v14844_v52 }
 0x67a   : > { %12288 = vmatmul.mubr.bf16.vlgmr.msra.gmra.mxu0 %v11271_v34  ;;  %v14807_v34 = vld [vmem:[%s19534_s7 + $0x44] ss:$8 sps:$4 sm:$0xff]  }
 0x67b   : > { %12632 = vmatprep.subr.bf16.mxu1 %v14807_v34  ;;  %13766 = vmatpush3.bf16.msra.mxu0 %v14845_v55 }
 0x67c   : > { %12633 = vmatpush1.bf16.msra.mxu1 %v14805_v16  ;;  %13767 = vmatprep.subr.bf16.mxu0 %v14846_v11 }
 0x67d   : > { %12634 = vmatprep.subr.bf16.mxu1 %v14810_v19 }
 0x67f   : > { %13768 = vmatpush3.bf16.msra.mxu0 %v14847_v44 }
 0x680   : > { %12635 = vmatpush1.bf16.msra.mxu1 %v14808_v58  ;;  %13769 = vmatprep.subr.bf16.mxu0 %v14848_v1 }
 0x681   : > { %12636 = vmatprep.subr.bf16.mxu1 %v14813_v42 }
 0x683   : > { %13770 = vmatpush3.bf16.msra.mxu0 %v14849_v33 }
 0x684   : > { %12637 = vmatpush1.bf16.msra.mxu1 %v14811_v22  ;;  %13771 = vmatprep.subr.bf16.mxu0 %v14850_v26 }
 0x685   : > { %12638 = vmatprep.subr.bf16.mxu1 %v14816_v3 }
 0x687   : > { %13772 = vmatpush3.bf16.msra.mxu0 %v14851_v0 }
 0x688   : > { %12639 = vmatpush1.bf16.msra.mxu1 %v14814_v46  ;;  %13773 = vmatprep.subr.bf16.mxu0 %v14852_v40 }
 0x689   : > { %12640 = vmatprep.subr.bf16.mxu1 %v14819_v28 }
 0x68b   : > { %13774 = vmatpush3.bf16.msra.mxu0 %v14853_v63 }
 0x68c   : > { %12641 = vmatpush1.bf16.msra.mxu1 %v14817_v29  ;;  %13775 = vmatprep.subr.bf16.mxu0 %v14854_v15 }
 0x68d   : > { %12642 = vmatprep.subr.bf16.mxu1 %v14822_v25 }
 0x68f   : > { %13776 = vmatpush3.bf16.msra.mxu0 %v14855_v50 }
 0x690   : > { %12643 = vmatpush2.bf16.msra.mxu1 %v14820_v35 }
 0x691   : > { %12644 = vmatprep.subr.bf16.mxu1 %v14825_v32 }
 0x694   : > { %12645 = vmatpush2.bf16.msra.mxu1 %v14823_v48 }
 0x695   : > { %12646 = vmatprep.subr.bf16.mxu1 %v14828_v62 }
 0x698   : > { %12647 = vmatpush2.bf16.msra.mxu1 %v14826_v36 }
 0x699   : > { %12648 = vmatprep.subr.bf16.mxu1 %v14831_v10 }
 0x69c   : > { %12649 = vmatpush2.bf16.msra.mxu1 %v14829_v37 }
 0x69d   : > { %12650 = vmatprep.subr.bf16.mxu1 %v14834_v47 }
 0x6a0   : > { %12651 = vmatpush2.bf16.msra.mxu1 %v14832_v61 }
 0x6a1   : > { %12652 = vmatprep.subr.bf16.mxu1 %v14837_v45 }
 0x6a4   : > { %12653 = vmatpush2.bf16.msra.mxu1 %v14835_v49 }
 0x6a5   : > { %12654 = vmatprep.subr.bf16.mxu1 %v14840_v20 }
 0x6a8   : > { %12655 = vmatpush2.bf16.msra.mxu1 %v14838_v27 }
 0x6a9   : > { %12656 = vmatprep.subr.bf16.mxu1 %v14843_v18 }
 0x6ac   : > { %12657 = vmatpush2.bf16.msra.mxu1 %v14841_v14 }
 0x6ba   : > { %v12117_v60 = vpop.f32.mrf.mxu0 }
 0x6bb   : > { %v12118_v41 = vadd.f32 %v12117_v60, %v11176_v2 }
 0x6bc   : > { %v12119_v51 = vpop.f32.mrf.mxu0 }
 0x6bd   : > { %v12120_v7 = vadd.f32 %v12119_v51, %v11180_v9 }
 0x6be   : > { %v12121_v57 = vpop.f32.mrf.mxu0 }
 0x6bf   : > { %v12122_v59 = vadd.f32 %v12121_v57, %v11176_v2 }
 0x6c0   : > { %v12123_v31 = vpop.f32.mrf.mxu0 }
 0x6c1   : > { %v12124_v16 = vadd.f32 %v12123_v31, %v11180_v9 }
 0x6c7   : > { %v12160_v53 = vpop.f32.mrf.mxu1 }
 0x6c8   : > { %v12161_v43 = vadd.f32 %v12160_v53, %v12118_v41 }
 0x6c9   : > { %v12162_v21 = vpop.f32.mrf.mxu1 }
 0x6ca   : > { %v12163_v12 = vadd.f32 %v12162_v21, %v12120_v7 }
 0x6cb   : > { %v12164_v17 = vpop.f32.mrf.mxu1 }
 0x6cc   : > { %v12165_v19 = vadd.f32 %v12164_v17, %v12122_v59 }
 0x6cd   : > { %v12166_v5 = vpop.f32.mrf.mxu1 }
 0x6ce   : > { %v12167_v3 = vadd.f32 %v12166_v5, %v12124_v16 }
 0x6fa   : > { %v12203_v38 = vpop.f32.mrf.mxu0 }
 0x6fb   : > { %v12204_v54 = vadd.f32 %v12203_v38, %v12161_v43 }
 0x6fc   : > { %v12205_v30 = vpop.f32.mrf.mxu0 }
 0x6fd   : > { %v12206_v58 = vadd.f32 %v12205_v30, %v12163_v12 }
 0x6fe   : > { %v12207_v56 = vpop.f32.mrf.mxu0 }
 0x6ff   : > { %v12208_v46 = vadd.f32 %v12207_v56, %v12165_v19 }
 0x700   : > { %v12209_v13 = vpop.f32.mrf.mxu0 }
 0x701   : > { %v12210_v48 = vadd.f32 %v12209_v13, %v12167_v3 }
 0x707   : > { %v12246_v39 = vpop.f32.mrf.mxu1 }
 0x708   : > { %v12247_v42 = vadd.f32 %v12246_v39, %v12204_v54 }
 0x709   : > { %v12248_v6 = vpop.f32.mrf.mxu1 }
 0x70a   : > { %v12249_v29 = vadd.f32 %v12248_v6, %v12206_v58 }
 0x70b   : > { %v12250_v34 = vpop.f32.mrf.mxu1 }
 0x70c   : > { %v12251_v32 = vadd.f32 %v12250_v34, %v12208_v46 }
 0x70d   : > { %v12252_v35 = vpop.f32.mrf.mxu1 }
 0x70e   : > { %v12253_v10 = vadd.f32 %v12252_v35, %v12210_v48 }
 0x73a   : > { %v12289_v22 = vpop.f32.mrf.mxu0 }
 0x73b   : > { %v12290_v28 = vadd.f32 %v12289_v22, %v12247_v42 }
 0x73c   : > { %v12291_v25 = vpop.f32.mrf.mxu0 }
 0x73d   : > { %v12292_v62 = vadd.f32 %v12291_v25, %v12249_v29  ;;  %v12298_v37 = vmax.f32 %v12290_v28, 0.0 }
 0x73e   : > { %v12293_v36 = vpop.f32.mrf.mxu0 }
 0x73f   : > { %v12299_v47 = vmax.f32 %v12292_v62, 0.0  ;;  %v12294_v52 = vadd.f32 %v12293_v36, %v12251_v32 }
 0x740   : > { %v12295_v55 = vpop.f32.mrf.mxu0 }
 0x741   : > { %v12302_v11 = vmax.f32 %v12298_v37, %v12299_v47  ;;  %v12296_v61 = vadd.f32 %v12295_v55, %v12253_v10  ;;  %v12300_v1 = vmax.f32 %v12294_v52, 0.0 }
 0x743   : > { %v12306_v44 = vcombine.high %v12302_v11, %v12302_v11  ;;  %v12313_v45 = vrot.slane %v12302_v11, %v19812_v4  ;;  %v12301_v49 = vmax.f32 %v12296_v61, 0.0 }
 0x745   : > { %v12320_v33 = vrot.slane %v12306_v44, %v19812_v4  ;;  %v12321_v20 = vcombine.high %v12313_v45, %v12313_v45  ;;  %v12348_v26 = vsel %vm5125_vm4, %v12313_v45, -inf  ;;  %v12303_v27 = vmax.f32 %v12300_v1, %v12301_v49 }
 0x746   : > { %v12349_v0 = vrot.slane %v12348_v26, 4 }
 0x747   : > { %v12322_v18 = vcombine.high %v12320_v33, %v12320_v33  ;;  %v12355_v40 = vsel %vm5125_vm4, %v12321_v20, -inf  ;;  %v12362_v14 = vsel %vm5125_vm4, %v12320_v33, -inf  ;;  %v12323_v63 = vcombine.high %v12303_v27, %v12303_v27 }
 0x748   : > { %v12350_v15 = vmax.f32 %v12348_v26, %v12349_v0  ;;  %v12356_v50 = vrot.slane %v12355_v40, 4  ;;  %v12363_v60 = vrot.slane %v12362_v14, 4  ;;  %v12330_v51 = vrot.slane %v12303_v27, %v19812_v4 }
 0x749   : > { %v12369_v53 = vsel %vm5125_vm4, %v12322_v18, -inf  ;;  %v12337_v57 = vrot.slane %v12323_v63, %v19812_v4 }
 0x74a   : > { %v12351_v21 = vrot.slane %v12350_v15, 2  ;;  %v12357_v31 = vmax.f32 %v12355_v40, %v12356_v50  ;;  %v12364_v17 = vmax.f32 %v12362_v14, %v12363_v60  ;;  %v12370_v8 = vrot.slane %v12369_v53, 4  ;;  %v14856_v60 = vld [vmem:[%s19536_s9 + $0x48] sm:$0xff]  }
 0x74b   : > { %v12338_v38 = vcombine.high %v12330_v51, %v12330_v51  ;;  %v12339_v5 = vcombine.high %v12337_v57, %v12337_v57  ;;  %v12376_v2 = vsel %vm5125_vm4, %v12330_v51, -inf  ;;  %v12390_v30 = vsel %vm5125_vm4, %v12337_v57, -inf  ;;  %v14857_v51 = vld [vmem:[%s19536_s9 + $0x8] sm:$0xff]   ;;  %13777 = vmatprep.subr.bf16.mxu0 %v14856_v60  ;;  %v14859_v57 = vld [vmem:[%s19536_s9] sm:$0xff]  }
 0x74c   : > { %v12352_v39 = vmax.f32 %v12350_v15, %v12351_v21  ;;  %v12358_v9 = vrot.slane %v12357_v31, 2  ;;  %v12365_v41 = vrot.slane %v12364_v17, 2  ;;  %v12371_v56 = vmax.f32 %v12369_v53, %v12370_v8  ;;  %v14858_v53 = vld [vmem:[%s19536_s9 + $0x40] sm:$0xff]   ;;  %13778 = vmatpush3.bf16.msra.mxu0 %v14857_v51 }
 0x74d   : > { %v12377_v6 = vrot.slane %v12376_v2, 4  ;;  %v12383_v7 = vsel %vm5125_vm4, %v12338_v38, -inf  ;;  %v12391_v43 = vrot.slane %v12390_v30, 4  ;;  %v12397_v4 = vsel %vm5125_vm4, %v12339_v5, -inf  ;;  %13779 = vmatprep.subr.bf16.mxu0 %v14858_v53  ;;  %v12454_v21 = vld [vmem:[%s19535_s8] sm:$0x3] }
 0x74e   : > { %v12359_v59 = vmax.f32 %v12357_v31, %v12358_v9  ;;  %v12366_v12 = vmax.f32 %v12364_v17, %v12365_v41  ;;  %v12372_v54 = vrot.slane %v12371_v56, 2  ;;  %v12384_v34 = vrot.slane %v12383_v7, 4 }
 0x74f   : > { %v12378_v13 = vmax.f32 %v12376_v2, %v12377_v6  ;;  %v12392_v16 = vmax.f32 %v12390_v30, %v12391_v43  ;;  %v12398_v19 = vrot.slane %v12397_v4, 4  ;;  %v12353_v58 = vrot.slane %v12352_v39, 1 }
 0x750   : > { %v12367_v42 = vrot.slane %v12366_v12, 1  ;;  %v12373_v22 = vmax.f32 %v12371_v56, %v12372_v54  ;;  %v12385_v46 = vmax.f32 %v12383_v7, %v12384_v34  ;;  %v12360_v35 = vrot.slane %v12359_v59, 1  ;;  %13780 = vmatpush3.bf16.msra.mxu0 %v14859_v57 }
 0x751   : > { %v12379_v3 = vrot.slane %v12378_v13, 2  ;;  %v12393_v29 = vrot.slane %v12392_v16, 2  ;;  %v12399_v28 = vmax.f32 %v12397_v4, %v12398_v19  ;;  %v12354_v37 = vmax.f32 %v12352_v39, %v12353_v58  ;;  %v19826_v58 = vld [vmem:[#allocation9_spill] sm:$0xff] }
 0x752   : > { %v12368_v25 = vmax.f32 %v12366_v12, %v12367_v42  ;;  %v12374_v48 = vrot.slane %v12373_v22, 1  ;;  %v12386_v62 = vrot.slane %v12385_v46, 2  ;;  %v12361_v45 = vmax.f32 %v12359_v59, %v12360_v35 }
 0x753   : > { %v12380_v32 = vmax.f32 %v12378_v13, %v12379_v3  ;;  %v12394_v36 = vmax.f32 %v12392_v16, %v12393_v29  ;;  %v12400_v10 = vrot.slane %v12399_v28, 2  ;;  %v12459_v31 = vrot.slane %v12454_v21, %v19824_v24  ;;  %v13746_v24 = vld [vmem:[%s19537_s10] ss:$0 sm:$0xff] }
 0x754   : > { %v12375_v47 = vmax.f32 %v12373_v22, %v12374_v48  ;;  %v12387_v55 = vmax.f32 %v12385_v46, %v12386_v62  ;;  %v12408_v44 = vsel %vm6344_vm11, %v12368_v25, %v12354_v37  ;;  %v12463_v17 = vrot.slane %v12454_v21, %v19825_v23 }
 0x755   : > { %v12381_v52 = vrot.slane %v12380_v32, 1  ;;  %v12395_v11 = vrot.slane %v12394_v36, 1  ;;  %v12401_v61 = vmax.f32 %v12399_v28, %v12400_v10 }
 0x756   : > { %v12388_v33 = vrot.slane %v12387_v55, 1  ;;  %v12416_v26 = vsel %vm6344_vm11, %v12375_v47, %v12361_v45 }
 0x757   : > { %v12382_v1 = vmax.f32 %v12380_v32, %v12381_v52  ;;  %v12396_v49 = vmax.f32 %v12394_v36, %v12395_v11  ;;  %v12402_v20 = vrot.slane %v12401_v61, 1 }
 0x758   : > { %v12389_v27 = vmax.f32 %v12387_v55, %v12388_v33 }
 0x759   : > { %v12403_v0 = vmax.f32 %v12401_v61, %v12402_v20  ;;  %v12409_v18 = vsel %vm6326_vm5, %v12382_v1, %v12408_v44 }
 0x75a   : > { %v12417_v40 = vsel %vm6326_vm5, %v12389_v27, %v12416_v26  ;;  %v12410_v14 = vsel %vm6328_vm6, %v12396_v49, %v12409_v18 }
 0x75b   : > { %v12418_v63 = vsel %vm6328_vm6, %v12403_v0, %v12417_v40  ;;  %v12420_v50 = vpack.c.bf16 %v12410_v14, %v12410_v14 }
 0x75c   : > { %v12421_v15 = vpack.c.bf16 %v12418_v63, %v12418_v63 }
 0x75e   : > { %12658 = vmatprep.mubr.bf16.mxu1 %v12421_v15 }
 0x75f   : > { %12659 = vmatmul.mubr.bf16.vlgmr.msra.gmra.mxu1 %v12420_v50 }
 0x81f   : > { %v12660_v8 = vpop.f32.mrf.mxu1 }
 0x820   : > { %v12661_v38 = vadd.f32 %v12660_v8, %v12459_v31 }
 0x821   : > { %v12662_v5 = vpop.f32.mrf.mxu1 }
 0x822   : > { %v12663_v2 = vadd.f32 %v12662_v5, %v12463_v17  ;;  %v12667_v30 = vmax.f32 %v12661_v38, 0.0 }
 0x823   : > { %v12664_v39 = vpop.f32.mrf.mxu1 }
 0x824   : > { %v12668_v9 = vmax.f32 %v12663_v2, 0.0  ;;  %v12669_v6 = vpack.c.bf16 %v12667_v30, %v12667_v30 }
 0x825   : > { %v12665_v41 = vpop.f32.mrf.mxu1 }
 0x826   : > { %v12670_v56 = vpack.c.bf16 %v12668_v9, %v12668_v9 }
 0x828   : > { %12838 = vmatprep.mubr.bf16.mxu0 %v12670_v56 }
 0x829   : > { %12839 = vmatmul.mubr.bf16.vlgmr.msra.gmra.mxu0 %v12669_v6 }
 0x8e9   : > { %v13781_v7 = vpop.f32.mrf.mxu0 }
 0x8eb   : > { %v13782_v43 = vpop.f32.mrf.mxu0 }
 0x8ec   : > { %v13783_v23 = vadd.f32 %v13782_v43, %v13781_v7 }
 0x8ed   : > { %v13784_v4 = vpop.f32.mrf.mxu0 }
 0x8ee   : > { %v12841_v59 = vadd.f32 %v13783_v23, %v13746_v24 }
 0x8ef   : > { %v13785_v12 = vpop.f32.mrf.mxu0 }
 0x8f0   : > { %v12846_v54 = vsub.f32 0.0, %v12841_v59 }
 0x8f2   : > { %v12847_v13 = vmul.f32 1.442695, %v12846_v54 }
 0x8f4   : > { %14860 = vpow2.f32 %v12847_v13 }
 0x901   : > { %v14861_v34 = vpop.eup %14860 }
 0x902   : > { %v12849_v16 = vadd.f32 1.0, %v14861_v34 }
 0x904   : > { %14862 = vrcp.f32 %v12849_v16 }
 0x911   : > { %v14863_v19 = vpop.eup %14862 }
 0x912   : > { %v12859_v42 = vrot.slane %v14863_v19, %v19826_v58 }
 0x914   : > { %v12860_v22 = vcombine.high %v12859_v42, %v12859_v42  ;;  %v12867_v3 = vrot.slane %v12859_v42, %v19826_v58 }
 0x916   : > { %v12874_v46 = vrot.slane %v12860_v22, %v19826_v58  ;;  %v12875_v29 = vcombine.high %v12867_v3, %v12867_v3  ;;  %12882 = vst.msk [vmem:[%s419_s23] sm:$0x1] %vm12881_vm2, %v12867_v3 }
 0x918   : > { %v12876_v28 = vcombine.high %v12874_v46, %v12874_v46  ;;  %12883 = vst.msk [vmem:[%s419_s23 + $0x1] sm:$0x1] %vm12881_vm2, %v12874_v46  ;;  %12884 = vst.msk [vmem:[%s419_s23 + $0x2] sm:$0x1] %vm12881_vm2, %v12875_v29 }
 0x91a   : > { %12885 = vst.msk [vmem:[%s419_s23 + $0x3] sm:$0x1] %vm12881_vm2, %v12876_v28 }
 0x91b PF: > { %s23_s17 = sadd.s32 1, %s14930_s17  }
 0x91c   : > { %p20_p3 = scmp.ge.s32.totalorder %s23_s17, 4  }
 0x91e   :  { %22 = sbr.rel (!%p20_p3) target bundleno = 2 (0x2), region = 103 }
 0x923   :  { %12906 = vsyncpa [#allocation3], 1 }
 0x924   :  { %12908 = vsyncpa [#allocation3 + $0x1], 1 }
 0x925   :  { %12909 = vsyncpa [#allocation5], 1 }

</bundles_post_ra>
